<compile_context>
chip_gen: v5e
topology: v5e:2x2
jax: 0.10.0
libtpu: 0.0.40
codegen_flags: <defaults>
</compile_context>

<pallas_src>
import functools

import jax
import jax.numpy as jnp
from jax.experimental import pallas as pl
from jax.experimental.pallas import tpu as pltpu

EPS = 1e-5      # BatchNorm2d default eps
LANE = 128      # TPU lane width; channels padded to a multiple of this
TM_MAX = 256    # output-pixel rows per grid step (v7x-safe VMEM footprint)


def _round_up(x, m):
    return ((x + m - 1) // m) * m


# ----------------------------------------------------------------------------
# Pallas kernels: fused (patches @ W) + bias [+ relu] [+ skip] [+ relu]
# ----------------------------------------------------------------------------
def _mm_kernel(p_ref, w_ref, b_ref, o_ref, *, pre_relu, post_relu):
    acc = jnp.dot(p_ref[...], w_ref[...], preferred_element_type=jnp.float32)
    acc = acc + b_ref[...]
    if pre_relu:
        acc = jnp.maximum(acc, 0.0)
    if post_relu:
        acc = jnp.maximum(acc, 0.0)
    o_ref[...] = acc.astype(o_ref.dtype)


def _mm_skip_kernel(p_ref, w_ref, b_ref, s_ref, o_ref, *, pre_relu, post_relu):
    acc = jnp.dot(p_ref[...], w_ref[...], preferred_element_type=jnp.float32)
    acc = acc + b_ref[...]
    if pre_relu:                      # ReLU of the conv branch BEFORE the skip add
        acc = jnp.maximum(acc, 0.0)
    acc = acc + s_ref[...].astype(jnp.float32)
    if post_relu:                     # ReLU AFTER the skip add (decoder path)
        acc = jnp.maximum(acc, 0.0)
    o_ref[...] = acc.astype(o_ref.dtype)


def fused_matmul(patches, w, b, skip=None, pre_relu=False, post_relu=False):
    """patches: (M, K) bf16, w: (K, N) bf16, b: (N,) f32, skip: (M, N) bf16 or None.

    K and N are multiples of 128 (guaranteed by channel padding).  Returns (M, N) bf16.
    """
    M, K = patches.shape
    N = w.shape[1]

    if M <= TM_MAX:                       # single block, padded to a sublane multiple
        M_pad = _round_up(M, 8)
        TM = M_pad
    else:                                 # fixed tile, cdiv grid
        M_pad = _round_up(M, TM_MAX)
        TM = TM_MAX
    if M_pad != M:
        patches = jnp.pad(patches, ((0, M_pad - M), (0, 0)))
        if skip is not None:
            skip = jnp.pad(skip, ((0, M_pad - M), (0, 0)))

    grid = (M_pad // TM,)
    b2 = b.reshape(1, N).astype(jnp.float32)

    in_specs = [
        pl.BlockSpec((TM, K), lambda i: (i, 0)),
        pl.BlockSpec((K, N), lambda i: (0, 0)),
        pl.BlockSpec((1, N), lambda i: (0, 0)),
    ]
    args = [patches, w, b2]
    if skip is not None:
        in_specs.append(pl.BlockSpec((TM, N), lambda i: (i, 0)))
        args.append(skip)
        kern = functools.partial(_mm_skip_kernel, pre_relu=pre_relu, post_relu=post_relu)
    else:
        kern = functools.partial(_mm_kernel, pre_relu=pre_relu, post_relu=post_relu)

    out = pl.pallas_call(
        kern,
        out_shape=jax.ShapeDtypeStruct((M_pad, N), jnp.bfloat16),
        grid=grid,
        in_specs=in_specs,
        out_specs=pl.BlockSpec((TM, N), lambda i: (i, 0)),
        compiler_params=pltpu.CompilerParams(
            dimension_semantics=("parallel",)),   # disjoint row tiles -> megacore-safe
    )(*args)
    return out[:M]


# ----------------------------------------------------------------------------
# JAX glue: im2col (fused by XLA under jit)
# ----------------------------------------------------------------------------
def im2col(x, k, stride, pad):
    """x: (B,H,W,C) -> (B*OH*OW, k*k*C), (B,OH,OW).  K ordering = (kh, kw, c)."""
    if pad:
        x = jnp.pad(x, ((0, 0), (pad, pad), (pad, pad), (0, 0)))
    B, Hp, Wp, C = x.shape
    OH = (Hp - k) // stride + 1
    OW = (Wp - k) // stride + 1
    cols = []
    for kh in range(k):
        for kw in range(k):
            cols.append(x[:, kh:kh + stride * (OH - 1) + 1:stride,
                          kw:kw + stride * (OW - 1) + 1:stride, :])
    patches = jnp.concatenate(cols, axis=-1)          # (B, OH, OW, k*k*C)
    # TODO(synk): keep x in HBM (memory_space=pl.ANY) and build the k*k taps with
    # overlapping-window DMAs inside the kernel to avoid materializing the
    # duplicated patch matrix in HBM.
    return patches.reshape(B * OH * OW, k * k * C), (B, OH, OW)


# ----------------------------------------------------------------------------
# Conv / phase-decomposed ConvTranspose wrappers (compute runs in the Pallas kernel)
# ----------------------------------------------------------------------------
def conv2d(x, w, b, k, stride, pad, pre_relu=False, skip=None, post_relu=False):
    """x: NHWC bf16 (channel-padded); w: (k*k*Cin_p, Cout_p) bf16; b: (Cout_p,) f32."""
    cout_p = w.shape[1]
    patches, (B, OH, OW) = im2col(x, k, stride, pad)
    skip_flat = None if skip is None else skip.reshape(B * OH * OW, cout_p)
    out = fused_matmul(patches, w, b, skip=skip_flat,
                       pre_relu=pre_relu, post_relu=post_relu)
    return out.reshape(B, OH, OW, cout_p)


def conv_transpose2d_x2(x, w_big, b_big, skip=None, post_relu=True):
    """ConvTranspose2d(3, stride=2, pad=1, output_padding=1), phase-decomposed.

    x: (B,H,W,Cin_p) bf16; w_big: (4*Cin_p, 4*Cout_p) bf16 (phase-major columns);
    skip: (B,2H,2W,Cout_p) bf16 or None.  Returns (B,2H,2W,Cout_p) bf16.
    """
    B, H, W, Cp = x.shape
    cout_p = w_big.shape[1] // 4
    xp = jnp.pad(x, ((0, 0), (0, 1), (0, 1), (0, 0)))           # high-side pad
    win = [xp[:, dp:dp + H, dq:dq + W, :] for dp in (0, 1) for dq in (0, 1)]
    patches = jnp.concatenate(win, axis=-1).reshape(B * H * W, 4 * Cp)
    if skip is not None:
        sk = skip.reshape(B, H, 2, W, 2, cout_p).transpose(0, 1, 3, 2, 4, 5)
        skip_flat = sk.reshape(B * H * W, 4 * cout_p)
    else:
        skip_flat = None
    out = fused_matmul(patches, w_big, b_big, skip=skip_flat,
                       pre_relu=False, post_relu=post_relu)
    out = out.reshape(B, H, W, 2, 2, cout_p).transpose(0, 1, 3, 2, 4, 5)
    return out.reshape(B, 2 * H, 2 * W, cout_p)


# ----------------------------------------------------------------------------
# Module structure
# ----------------------------------------------------------------------------
def residual_block(x, prm, depth):
    # torch: x1 = relu(bn(conv_s2(x))); x2 = (relu(bn(conv_s1(.))))^(depth-1)(x1); out = x1+x2
    x1 = conv2d(x, prm["w1"], prm["b1"], k=3, stride=2, pad=1, pre_relu=True)
    x2 = x1
    for i in range(depth - 1):             # conv_list reuses the SAME conv2 weights
        last = (i == depth - 2)
        x2 = conv2d(x2, prm["w2"], prm["b2"], k=3, stride=1, pad=1,
                    pre_relu=True, skip=x1 if last else None)
    return x2


def l1block_forward_nhwc(x, p):
    f2 = residual_block(x, p["conv1"], 3)
    f3 = residual_block(f2, p["conv2"], 4)
    f4 = residual_block(f3, p["conv3"], 4)
    f5 = residual_block(f4, p["conv4"], 3)
    # pool1/pool2/pool3 in the torch forward never feed the returned output;
    # under jit XLA would DCE them, so they are omitted.
    u1 = conv_transpose2d_x2(f5, *p["up1"], skip=f4, post_relu=True)
    u2 = conv_transpose2d_x2(u1, *p["up2"], skip=f3, post_relu=True)
    u3 = conv_transpose2d_x2(u2, *p["up3"], skip=f2, post_relu=True)
    return conv_transpose2d_x2(u3, *p["up4"], skip=None, post_relu=True)


@jax.jit
def l1block_forward(x_nchw, packed_params):
    cin = x_nchw.shape[1]
    cin_p = _round_up(cin, LANE)
    x = jnp.transpose(x_nchw, (0, 2, 3, 1))                        # NCHW -> NHWC
    x = jnp.pad(x, ((0, 0), (0, 0), (0, 0), (0, cin_p - cin))).astype(jnp.bfloat16)
    out = l1block_forward_nhwc(x, packed_params)
    out = out[..., :cin].astype(jnp.float32)
    return jnp.transpose(out, (0, 3, 1, 2))                        # NHWC -> NCHW


# ----------------------------------------------------------------------------
# Deterministic parameter initialization (BN folded, eval mode) and packing
# ----------------------------------------------------------------------------
def conv_bn_params(key, cin, cout, k):
    kw, kb, kg, kbe, km, kv = jax.random.split(key, 6)
    w = 0.1 * jax.random.normal(kw, (k, k, cin, cout), jnp.float32)
    b = 0.05 * jax.random.normal(kb, (cout,), jnp.float32)
    gamma = 1.0 + 0.1 * jax.random.normal(kg, (cout,), jnp.float32)
    beta = 0.05 * jax.random.normal(kbe, (cout,), jnp.float32)
    mean = 0.05 * jax.random.normal(km, (cout,), jnp.float32)
    var = 1.0 + 0.1 * jax.random.uniform(kv, (cout,), jnp.float32)
    scale = gamma / jnp.sqrt(var + EPS)
    return w * scale, (b - mean) * scale + beta


def convt_params(key, cin, cout, k):
    # NOTE: real PyTorch ConvTranspose2d weights are (Cin, Cout, kH, kW);
    # transpose to (kH, kW, Cin, Cout) before packing if loading real weights.
    kw, kb = jax.random.split(key)
    w = 0.1 * jax.random.normal(kw, (k, k, cin, cout), jnp.float32)
    b = 0.05 * jax.random.normal(kb, (cout,), jnp.float32)
    return w, b


def init_params(key, cin, oc):
    ks = jax.random.split(key, 16)
    it = iter(ks)

    def res_params(c_in, c_out):
        w1, b1 = conv_bn_params(next(it), c_in, c_out, 3)
        w2, b2 = conv_bn_params(next(it), c_out, c_out, 3)
        return dict(w1=w1, b1=b1, w2=w2, b2=b2)

    p = {}
    p["conv1"] = res_params(cin, oc)
    p["conv2"] = res_params(oc, oc * 2)
    p["conv3"] = res_params(oc * 2, oc * 4)
    p["conv4"] = res_params(oc * 4, oc * 8)
    p["up1"] = convt_params(next(it), oc * 8, oc * 4, 3)
    p["up2"] = convt_params(next(it), oc * 4, oc * 2, 3)
    p["up3"] = convt_params(next(it), oc * 2, oc, 3)
    p["up4"] = convt_params(next(it), oc, cin, 3)
    return p


def _pack_conv(w, b, cin_p, cout_p):
    k, _, cin, cout = w.shape
    wp = jnp.zeros((k, k, cin_p, cout_p), jnp.float32).at[:, :, :cin, :cout].set(w)
    bp = jnp.zeros((cout_p,), jnp.float32).at[:cout].set(b)
    return wp.reshape(k * k * cin_p, cout_p).astype(jnp.bfloat16), bp


def _pack_convt(w, b, cin_p, cout_p):
    # Phase decomposition of ConvTranspose2d(3, stride=2, pad=1, output_padding=1):
    #   out[2p+r, 2q+s] = sum_{dp,dq in {0,1}} x[p+dp, q+dq] . wt[1+r-2*dp, 1+s-2*dq]
    # taps with kernel index outside [0, 2] (or x OOB, handled by high-side pad) are zero.
    cin, cout = w.shape[2], w.shape[3]
    wp = jnp.zeros((3, 3, cin_p, cout_p), jnp.float32).at[:, :, :cin, :cout].set(w)
    phase_cols = []
    for r in (0, 1):
        for s in (0, 1):
            taps = []
            for dp in (0, 1):
                for dq in (0, 1):
                    kh = 1 + r - 2 * dp
                    kw = 1 + s - 2 * dq
                    if 0 <= kh <= 2 and 0 <= kw <= 2:
                        taps.append(wp[kh, kw])
                    else:
                        taps.append(jnp.zeros((cin_p, cout_p), jnp.float32))
            phase_cols.append(jnp.concatenate(taps, axis=0))       # (4*cin_p, cout_p)
    w_big = jnp.concatenate(phase_cols, axis=1).astype(jnp.bfloat16)   # (4*cin_p, 4*cout_p)
    b_pad = jnp.zeros((cout_p,), jnp.float32).at[:cout].set(b)
    return w_big, jnp.tile(b_pad, 4)


def pack_params(raw, cin, oc):
    cp = lambda c: _round_up(c, LANE)

    def pack_res(prm, cin_p, cout_p):
        w1, b1 = _pack_conv(prm["w1"], prm["b1"], cin_p, cout_p)
        w2, b2 = _pack_conv(prm["w2"], prm["b2"], cout_p, cout_p)
        return dict(w1=w1, b1=b1, w2=w2, b2=b2)

    return {
        "conv1": pack_res(raw["conv1"], cp(cin), cp(oc)),
        "conv2": pack_res(raw["conv2"], cp(oc), cp(oc * 2)),
        "conv3": pack_res(raw["conv3"], cp(oc * 2), cp(oc * 4)),
        "conv4": pack_res(raw["conv4"], cp(oc * 4), cp(oc * 8)),
        "up1": _pack_convt(*raw["up1"], cp(oc * 8), cp(oc * 4)),
        "up2": _pack_convt(*raw["up2"], cp(oc * 4), cp(oc * 2)),
        "up3": _pack_convt(*raw["up3"], cp(oc * 2), cp(oc)),
        "up4": _pack_convt(*raw["up4"], cp(oc), cp(cin)),
    }


# ----------------------------------------------------------------------------
if __name__ == "__main__":
    key = jax.random.PRNGKey(0)
    kx, kp = jax.random.split(key)

    B, Cin, H, W = 2, 4, 16, 16        # small shapes; spatial divisible by 16
    oc = 8                             # L1Block(out_channel=8) -> channels 8/16/32/64

    x = jax.random.normal(kx, (B, Cin, H, W), jnp.float32)   # NCHW input, like torch
    raw = init_params(kp, Cin, oc)
    params = pack_params(raw, Cin, oc)     # fold/pad/bf16-cast weights once, outside jit

    out = l1block_forward(x, params)
    out = jax.block_until_ready(out)

    assert out.shape == (B, Cin, H, W), out.shape
    assert bool(jnp.all(jnp.isfinite(out)))
    assert bool(jnp.all(out >= 0.0))   # final ReLU
    print("KERNEL_OK")
</pallas_src>

<mosaic_0001>
module attributes {stable_mosaic.version = 11 : i64} {
  func.func @_mm_kernel(%arg0: i32, %arg1: memref<128x1152xbf16, #tpu.memory_space<vmem>>, %arg2: memref<1152x128xbf16, #tpu.memory_space<vmem>>, %arg3: memref<1x128xf32, #tpu.memory_space<vmem>>, %arg4: memref<128x128xbf16, #tpu.memory_space<vmem>>) attributes {dimension_semantics = [#tpu.dimension_semantics<parallel>], iteration_bounds = array<i64: 1>, scalar_prefetch = 0 : i64, scratch_operands = 0 : i64, tpu.core_type = #tpu.core_type<tc>, window_params = [{transform_indices = @transform_0, window_bounds = array<i64: 128, 1152>}, {pipeline_mode = #tpu.pipeline_mode<synchronous>, transform_indices = @transform_1, window_bounds = array<i64: 1152, 128>}, {pipeline_mode = #tpu.pipeline_mode<synchronous>, transform_indices = @transform_2, window_bounds = array<i64: 1, 128>}, {transform_indices = @transform_3, window_bounds = array<i64: 128, 128>}]} {
    %c0 = arith.constant 0 : index
    %c0_0 = arith.constant 0 : index
    %0 = vector.load %arg1[%c0, %c0_0] : memref<128x1152xbf16, #tpu.memory_space<vmem>>, vector<128x1152xbf16>
    %c0_1 = arith.constant 0 : index
    %c0_2 = arith.constant 0 : index
    %1 = vector.load %arg2[%c0_1, %c0_2] : memref<1152x128xbf16, #tpu.memory_space<vmem>>, vector<1152x128xbf16>
    %cst = arith.constant dense<0.000000e+00> : vector<128x128xf32>
    %2 = tpu.matmul %0, %1, %cst {dimension_numbers = #tpu.dot_dimension_numbers<[1], [0], [0], [1], [0, 0, 1, 1], [], []>} : vector<128x1152xbf16>, vector<1152x128xbf16>, vector<128x128xf32> -> vector<128x128xf32>
    %c0_3 = arith.constant 0 : index
    %c0_4 = arith.constant 0 : index
    %3 = vector.load %arg3[%c0_3, %c0_4] : memref<1x128xf32, #tpu.memory_space<vmem>>, vector<1x128xf32>
    %4 = vector.broadcast %3 : vector<1x128xf32> to vector<128x128xf32>
    %5 = arith.addf %2, %4 : vector<128x128xf32>
    %cst_5 = arith.constant 0.000000e+00 : f32
    %6 = vector.broadcast %cst_5 : f32 to vector<128x128xf32>
    %7 = arith.maximumf %5, %6 : vector<128x128xf32>
    %8 = arith.truncf %7 : vector<128x128xf32> to vector<128x128xbf16>
    %c0_6 = arith.constant 0 : index
    %c0_7 = arith.constant 0 : index
    %9 = vector.load %arg4[%c0_6, %c0_7] : memref<128x128xbf16, #tpu.memory_space<vmem>>, vector<128x128xbf16>
    tpu.vector_store %arg4[%c0_6, %c0_7], %8 {strides = array<i32>} : memref<128x128xbf16, #tpu.memory_space<vmem>>, vector<128x128xbf16>,
    return
  }
  func.func @transform_0(%arg0: i32) -> (i32, i32) {
    %c0_i32 = arith.constant 0 : i32
    %c0_i32_0 = arith.constant 0 : i32
    return %arg0, %c0_i32 : i32, i32
  }
  func.func @transform_1(%arg0: i32) -> (i32, i32) {
    %c0_i32 = arith.constant 0 : i32
    %c0_i32_0 = arith.constant 0 : i32
    %c0_i32_1 = arith.constant 0 : i32
    return %c0_i32, %c0_i32_0 : i32, i32
  }
  func.func @transform_2(%arg0: i32) -> (i32, i32) {
    %c0_i32 = arith.constant 0 : i32
    %c0_i32_0 = arith.constant 0 : i32
    %c0_i32_1 = arith.constant 0 : i32
    return %c0_i32, %c0_i32_0 : i32, i32
  }
  func.func @transform_3(%arg0: i32) -> (i32, i32) {
    %c0_i32 = arith.constant 0 : i32
    %c0_i32_0 = arith.constant 0 : i32
    return %arg0, %c0_i32 : i32, i32
  }
}

module attributes {stable_mosaic.version = 11 : i64} {
  func.func @_mm_skip_kernel(%arg0: i32, %arg1: memref<128x1152xbf16, #tpu.memory_space<vmem>>, %arg2: memref<1152x128xbf16, #tpu.memory_space<vmem>>, %arg3: memref<1x128xf32, #tpu.memory_space<vmem>>, %arg4: memref<128x128xbf16, #tpu.memory_space<vmem>>, %arg5: memref<128x128xbf16, #tpu.memory_space<vmem>>) attributes {dimension_semantics = [#tpu.dimension_semantics<parallel>], iteration_bounds = array<i64: 1>, scalar_prefetch = 0 : i64, scratch_operands = 0 : i64, tpu.core_type = #tpu.core_type<tc>, window_params = [{transform_indices = @transform_0, window_bounds = array<i64: 128, 1152>}, {pipeline_mode = #tpu.pipeline_mode<synchronous>, transform_indices = @transform_1, window_bounds = array<i64: 1152, 128>}, {pipeline_mode = #tpu.pipeline_mode<synchronous>, transform_indices = @transform_2, window_bounds = array<i64: 1, 128>}, {transform_indices = @transform_3, window_bounds = array<i64: 128, 128>}, {transform_indices = @transform_4, window_bounds = array<i64: 128, 128>}]} {
    %c0 = arith.constant 0 : index
    %c0_0 = arith.constant 0 : index
    %0 = vector.load %arg1[%c0, %c0_0] : memref<128x1152xbf16, #tpu.memory_space<vmem>>, vector<128x1152xbf16>
    %c0_1 = arith.constant 0 : index
    %c0_2 = arith.constant 0 : index
    %1 = vector.load %arg2[%c0_1, %c0_2] : memref<1152x128xbf16, #tpu.memory_space<vmem>>, vector<1152x128xbf16>
    %cst = arith.constant dense<0.000000e+00> : vector<128x128xf32>
    %2 = tpu.matmul %0, %1, %cst {dimension_numbers = #tpu.dot_dimension_numbers<[1], [0], [0], [1], [0, 0, 1, 1], [], []>} : vector<128x1152xbf16>, vector<1152x128xbf16>, vector<128x128xf32> -> vector<128x128xf32>
    %c0_3 = arith.constant 0 : index
    %c0_4 = arith.constant 0 : index
    %3 = vector.load %arg3[%c0_3, %c0_4] : memref<1x128xf32, #tpu.memory_space<vmem>>, vector<1x128xf32>
    %4 = vector.broadcast %3 : vector<1x128xf32> to vector<128x128xf32>
    %5 = arith.addf %2, %4 : vector<128x128xf32>
    %cst_5 = arith.constant 0.000000e+00 : f32
    %6 = vector.broadcast %cst_5 : f32 to vector<128x128xf32>
    %7 = arith.maximumf %5, %6 : vector<128x128xf32>
    %c0_6 = arith.constant 0 : index
    %c0_7 = arith.constant 0 : index
    %8 = vector.load %arg4[%c0_6, %c0_7] : memref<128x128xbf16, #tpu.memory_space<vmem>>, vector<128x128xbf16>
    %9 = arith.extf %8 : vector<128x128xbf16> to vector<128x128xf32>
    %10 = arith.addf %7, %9 : vector<128x128xf32>
    %11 = arith.truncf %10 : vector<128x128xf32> to vector<128x128xbf16>
    %c0_8 = arith.constant 0 : index
    %c0_9 = arith.constant 0 : index
    %12 = vector.load %arg5[%c0_8, %c0_9] : memref<128x128xbf16, #tpu.memory_space<vmem>>, vector<128x128xbf16>
    tpu.vector_store %arg5[%c0_8, %c0_9], %11 {strides = array<i32>} : memref<128x128xbf16, #tpu.memory_space<vmem>>, vector<128x128xbf16>,
    return
  }
  func.func @transform_0(%arg0: i32) -> (i32, i32) {
    %c0_i32 = arith.constant 0 : i32
    %c0_i32_0 = arith.constant 0 : i32
    return %arg0, %c0_i32 : i32, i32
  }
  func.func @transform_1(%arg0: i32) -> (i32, i32) {
    %c0_i32 = arith.constant 0 : i32
    %c0_i32_0 = arith.constant 0 : i32
    %c0_i32_1 = arith.constant 0 : i32
    return %c0_i32, %c0_i32_0 : i32, i32
  }
  func.func @transform_2(%arg0: i32) -> (i32, i32) {
    %c0_i32 = arith.constant 0 : i32
    %c0_i32_0 = arith.constant 0 : i32
    %c0_i32_1 = arith.constant 0 : i32
    return %c0_i32, %c0_i32_0 : i32, i32
  }
  func.func @transform_3(%arg0: i32) -> (i32, i32) {
    %c0_i32 = arith.constant 0 : i32
    %c0_i32_0 = arith.constant 0 : i32
    return %arg0, %c0_i32 : i32, i32
  }
  func.func @transform_4(%arg0: i32) -> (i32, i32) {
    %c0_i32 = arith.constant 0 : i32
    %c0_i32_0 = arith.constant 0 : i32
    return %arg0, %c0_i32 : i32, i32
  }
}

module attributes {stable_mosaic.version = 11 : i64} {
  func.func @_mm_kernel(%arg0: i32, %arg1: memref<32x1152xbf16, #tpu.memory_space<vmem>>, %arg2: memref<1152x128xbf16, #tpu.memory_space<vmem>>, %arg3: memref<1x128xf32, #tpu.memory_space<vmem>>, %arg4: memref<32x128xbf16, #tpu.memory_space<vmem>>) attributes {dimension_semantics = [#tpu.dimension_semantics<parallel>], iteration_bounds = array<i64: 1>, scalar_prefetch = 0 : i64, scratch_operands = 0 : i64, tpu.core_type = #tpu.core_type<tc>, window_params = [{transform_indices = @transform_0, window_bounds = array<i64: 32, 1152>}, {pipeline_mode = #tpu.pipeline_mode<synchronous>, transform_indices = @transform_1, window_bounds = array<i64: 1152, 128>}, {pipeline_mode = #tpu.pipeline_mode<synchronous>, transform_indices = @transform_2, window_bounds = array<i64: 1, 128>}, {transform_indices = @transform_3, window_bounds = array<i64: 32, 128>}]} {
    %c0 = arith.constant 0 : index
    %c0_0 = arith.constant 0 : index
    %0 = vector.load %arg1[%c0, %c0_0] : memref<32x1152xbf16, #tpu.memory_space<vmem>>, vector<32x1152xbf16>
    %c0_1 = arith.constant 0 : index
    %c0_2 = arith.constant 0 : index
    %1 = vector.load %arg2[%c0_1, %c0_2] : memref<1152x128xbf16, #tpu.memory_space<vmem>>, vector<1152x128xbf16>
    %cst = arith.constant dense<0.000000e+00> : vector<32x128xf32>
    %2 = tpu.matmul %0, %1, %cst {dimension_numbers = #tpu.dot_dimension_numbers<[1], [0], [0], [1], [0, 0, 1, 1], [], []>} : vector<32x1152xbf16>, vector<1152x128xbf16>, vector<32x128xf32> -> vector<32x128xf32>
    %c0_3 = arith.constant 0 : index
    %c0_4 = arith.constant 0 : index
    %3 = vector.load %arg3[%c0_3, %c0_4] : memref<1x128xf32, #tpu.memory_space<vmem>>, vector<1x128xf32>
    %4 = vector.broadcast %3 : vector<1x128xf32> to vector<32x128xf32>
    %5 = arith.addf %2, %4 : vector<32x128xf32>
    %cst_5 = arith.constant 0.000000e+00 : f32
    %6 = vector.broadcast %cst_5 : f32 to vector<32x128xf32>
    %7 = arith.maximumf %5, %6 : vector<32x128xf32>
    %8 = arith.truncf %7 : vector<32x128xf32> to vector<32x128xbf16>
    %c0_6 = arith.constant 0 : index
    %c0_7 = arith.constant 0 : index
    %9 = vector.load %arg4[%c0_6, %c0_7] : memref<32x128xbf16, #tpu.memory_space<vmem>>, vector<32x128xbf16>
    tpu.vector_store %arg4[%c0_6, %c0_7], %8 {strides = array<i32>} : memref<32x128xbf16, #tpu.memory_space<vmem>>, vector<32x128xbf16>,
    return
  }
  func.func @transform_0(%arg0: i32) -> (i32, i32) {
    %c0_i32 = arith.constant 0 : i32
    %c0_i32_0 = arith.constant 0 : i32
    return %arg0, %c0_i32 : i32, i32
  }
  func.func @transform_1(%arg0: i32) -> (i32, i32) {
    %c0_i32 = arith.constant 0 : i32
    %c0_i32_0 = arith.constant 0 : i32
    %c0_i32_1 = arith.constant 0 : i32
    return %c0_i32, %c0_i32_0 : i32, i32
  }
  func.func @transform_2(%arg0: i32) -> (i32, i32) {
    %c0_i32 = arith.constant 0 : i32
    %c0_i32_0 = arith.constant 0 : i32
    %c0_i32_1 = arith.constant 0 : i32
    return %c0_i32, %c0_i32_0 : i32, i32
  }
  func.func @transform_3(%arg0: i32) -> (i32, i32) {
    %c0_i32 = arith.constant 0 : i32
    %c0_i32_0 = arith.constant 0 : i32
    return %arg0, %c0_i32 : i32, i32
  }
}

module attributes {stable_mosaic.version = 11 : i64} {
  func.func @_mm_skip_kernel(%arg0: i32, %arg1: memref<32x1152xbf16, #tpu.memory_space<vmem>>, %arg2: memref<1152x128xbf16, #tpu.memory_space<vmem>>, %arg3: memref<1x128xf32, #tpu.memory_space<vmem>>, %arg4: memref<32x128xbf16, #tpu.memory_space<vmem>>, %arg5: memref<32x128xbf16, #tpu.memory_space<vmem>>) attributes {dimension_semantics = [#tpu.dimension_semantics<parallel>], iteration_bounds = array<i64: 1>, scalar_prefetch = 0 : i64, scratch_operands = 0 : i64, tpu.core_type = #tpu.core_type<tc>, window_params = [{transform_indices = @transform_0, window_bounds = array<i64: 32, 1152>}, {pipeline_mode = #tpu.pipeline_mode<synchronous>, transform_indices = @transform_1, window_bounds = array<i64: 1152, 128>}, {pipeline_mode = #tpu.pipeline_mode<synchronous>, transform_indices = @transform_2, window_bounds = array<i64: 1, 128>}, {transform_indices = @transform_3, window_bounds = array<i64: 32, 128>}, {transform_indices = @transform_4, window_bounds = array<i64: 32, 128>}]} {
    %c0 = arith.constant 0 : index
    %c0_0 = arith.constant 0 : index
    %0 = vector.load %arg1[%c0, %c0_0] : memref<32x1152xbf16, #tpu.memory_space<vmem>>, vector<32x1152xbf16>
    %c0_1 = arith.constant 0 : index
    %c0_2 = arith.constant 0 : index
    %1 = vector.load %arg2[%c0_1, %c0_2] : memref<1152x128xbf16, #tpu.memory_space<vmem>>, vector<1152x128xbf16>
    %cst = arith.constant dense<0.000000e+00> : vector<32x128xf32>
    %2 = tpu.matmul %0, %1, %cst {dimension_numbers = #tpu.dot_dimension_numbers<[1], [0], [0], [1], [0, 0, 1, 1], [], []>} : vector<32x1152xbf16>, vector<1152x128xbf16>, vector<32x128xf32> -> vector<32x128xf32>
    %c0_3 = arith.constant 0 : index
    %c0_4 = arith.constant 0 : index
    %3 = vector.load %arg3[%c0_3, %c0_4] : memref<1x128xf32, #tpu.memory_space<vmem>>, vector<1x128xf32>
    %4 = vector.broadcast %3 : vector<1x128xf32> to vector<32x128xf32>
    %5 = arith.addf %2, %4 : vector<32x128xf32>
    %cst_5 = arith.constant 0.000000e+00 : f32
    %6 = vector.broadcast %cst_5 : f32 to vector<32x128xf32>
    %7 = arith.maximumf %5, %6 : vector<32x128xf32>
    %c0_6 = arith.constant 0 : index
    %c0_7 = arith.constant 0 : index
    %8 = vector.load %arg4[%c0_6, %c0_7] : memref<32x128xbf16, #tpu.memory_space<vmem>>, vector<32x128xbf16>
    %9 = arith.extf %8 : vector<32x128xbf16> to vector<32x128xf32>
    %10 = arith.addf %7, %9 : vector<32x128xf32>
    %11 = arith.truncf %10 : vector<32x128xf32> to vector<32x128xbf16>
    %c0_8 = arith.constant 0 : index
    %c0_9 = arith.constant 0 : index
    %12 = vector.load %arg5[%c0_8, %c0_9] : memref<32x128xbf16, #tpu.memory_space<vmem>>, vector<32x128xbf16>
    tpu.vector_store %arg5[%c0_8, %c0_9], %11 {strides = array<i32>} : memref<32x128xbf16, #tpu.memory_space<vmem>>, vector<32x128xbf16>,
    return
  }
  func.func @transform_0(%arg0: i32) -> (i32, i32) {
    %c0_i32 = arith.constant 0 : i32
    %c0_i32_0 = arith.constant 0 : i32
    return %arg0, %c0_i32 : i32, i32
  }
  func.func @transform_1(%arg0: i32) -> (i32, i32) {
    %c0_i32 = arith.constant 0 : i32
    %c0_i32_0 = arith.constant 0 : i32
    %c0_i32_1 = arith.constant 0 : i32
    return %c0_i32, %c0_i32_0 : i32, i32
  }
  func.func @transform_2(%arg0: i32) -> (i32, i32) {
    %c0_i32 = arith.constant 0 : i32
    %c0_i32_0 = arith.constant 0 : i32
    %c0_i32_1 = arith.constant 0 : i32
    return %c0_i32, %c0_i32_0 : i32, i32
  }
  func.func @transform_3(%arg0: i32) -> (i32, i32) {
    %c0_i32 = arith.constant 0 : i32
    %c0_i32_0 = arith.constant 0 : i32
    return %arg0, %c0_i32 : i32, i32
  }
  func.func @transform_4(%arg0: i32) -> (i32, i32) {
    %c0_i32 = arith.constant 0 : i32
    %c0_i32_0 = arith.constant 0 : i32
    return %arg0, %c0_i32 : i32, i32
  }
}

module attributes {stable_mosaic.version = 11 : i64} {
  func.func @_mm_kernel(%arg0: i32, %arg1: memref<8x1152xbf16, #tpu.memory_space<vmem>>, %arg2: memref<1152x128xbf16, #tpu.memory_space<vmem>>, %arg3: memref<1x128xf32, #tpu.memory_space<vmem>>, %arg4: memref<8x128xbf16, #tpu.memory_space<vmem>>) attributes {dimension_semantics = [#tpu.dimension_semantics<parallel>], iteration_bounds = array<i64: 1>, scalar_prefetch = 0 : i64, scratch_operands = 0 : i64, tpu.core_type = #tpu.core_type<tc>, window_params = [{transform_indices = @transform_0, window_bounds = array<i64: 8, 1152>}, {pipeline_mode = #tpu.pipeline_mode<synchronous>, transform_indices = @transform_1, window_bounds = array<i64: 1152, 128>}, {pipeline_mode = #tpu.pipeline_mode<synchronous>, transform_indices = @transform_2, window_bounds = array<i64: 1, 128>}, {transform_indices = @transform_3, window_bounds = array<i64: 8, 128>}]} {
    %c0 = arith.constant 0 : index
    %c0_0 = arith.constant 0 : index
    %0 = vector.load %arg1[%c0, %c0_0] : memref<8x1152xbf16, #tpu.memory_space<vmem>>, vector<8x1152xbf16>
    %c0_1 = arith.constant 0 : index
    %c0_2 = arith.constant 0 : index
    %1 = vector.load %arg2[%c0_1, %c0_2] : memref<1152x128xbf16, #tpu.memory_space<vmem>>, vector<1152x128xbf16>
    %cst = arith.constant dense<0.000000e+00> : vector<8x128xf32>
    %2 = tpu.matmul %0, %1, %cst {dimension_numbers = #tpu.dot_dimension_numbers<[1], [0], [0], [1], [0, 0, 1, 1], [], []>} : vector<8x1152xbf16>, vector<1152x128xbf16>, vector<8x128xf32> -> vector<8x128xf32>
    %c0_3 = arith.constant 0 : index
    %c0_4 = arith.constant 0 : index
    %3 = vector.load %arg3[%c0_3, %c0_4] : memref<1x128xf32, #tpu.memory_space<vmem>>, vector<1x128xf32>
    %4 = vector.broadcast %3 : vector<1x128xf32> to vector<8x128xf32>
    %5 = arith.addf %2, %4 : vector<8x128xf32>
    %cst_5 = arith.constant 0.000000e+00 : f32
    %6 = vector.broadcast %cst_5 : f32 to vector<8x128xf32>
    %7 = arith.maximumf %5, %6 : vector<8x128xf32>
    %8 = arith.truncf %7 : vector<8x128xf32> to vector<8x128xbf16>
    %c0_6 = arith.constant 0 : index
    %c0_7 = arith.constant 0 : index
    %9 = vector.load %arg4[%c0_6, %c0_7] : memref<8x128xbf16, #tpu.memory_space<vmem>>, vector<8x128xbf16>
    tpu.vector_store %arg4[%c0_6, %c0_7], %8 {strides = array<i32>} : memref<8x128xbf16, #tpu.memory_space<vmem>>, vector<8x128xbf16>,
    return
  }
  func.func @transform_0(%arg0: i32) -> (i32, i32) {
    %c0_i32 = arith.constant 0 : i32
    %c0_i32_0 = arith.constant 0 : i32
    return %arg0, %c0_i32 : i32, i32
  }
  func.func @transform_1(%arg0: i32) -> (i32, i32) {
    %c0_i32 = arith.constant 0 : i32
    %c0_i32_0 = arith.constant 0 : i32
    %c0_i32_1 = arith.constant 0 : i32
    return %c0_i32, %c0_i32_0 : i32, i32
  }
  func.func @transform_2(%arg0: i32) -> (i32, i32) {
    %c0_i32 = arith.constant 0 : i32
    %c0_i32_0 = arith.constant 0 : i32
    %c0_i32_1 = arith.constant 0 : i32
    return %c0_i32, %c0_i32_0 : i32, i32
  }
  func.func @transform_3(%arg0: i32) -> (i32, i32) {
    %c0_i32 = arith.constant 0 : i32
    %c0_i32_0 = arith.constant 0 : i32
    return %arg0, %c0_i32 : i32, i32
  }
}

module attributes {stable_mosaic.version = 11 : i64} {
  func.func @_mm_skip_kernel(%arg0: i32, %arg1: memref<8x1152xbf16, #tpu.memory_space<vmem>>, %arg2: memref<1152x128xbf16, #tpu.memory_space<vmem>>, %arg3: memref<1x128xf32, #tpu.memory_space<vmem>>, %arg4: memref<8x128xbf16, #tpu.memory_space<vmem>>, %arg5: memref<8x128xbf16, #tpu.memory_space<vmem>>) attributes {dimension_semantics = [#tpu.dimension_semantics<parallel>], iteration_bounds = array<i64: 1>, scalar_prefetch = 0 : i64, scratch_operands = 0 : i64, tpu.core_type = #tpu.core_type<tc>, window_params = [{transform_indices = @transform_0, window_bounds = array<i64: 8, 1152>}, {pipeline_mode = #tpu.pipeline_mode<synchronous>, transform_indices = @transform_1, window_bounds = array<i64: 1152, 128>}, {pipeline_mode = #tpu.pipeline_mode<synchronous>, transform_indices = @transform_2, window_bounds = array<i64: 1, 128>}, {transform_indices = @transform_3, window_bounds = array<i64: 8, 128>}, {transform_indices = @transform_4, window_bounds = array<i64: 8, 128>}]} {
    %c0 = arith.constant 0 : index
    %c0_0 = arith.constant 0 : index
    %0 = vector.load %arg1[%c0, %c0_0] : memref<8x1152xbf16, #tpu.memory_space<vmem>>, vector<8x1152xbf16>
    %c0_1 = arith.constant 0 : index
    %c0_2 = arith.constant 0 : index
    %1 = vector.load %arg2[%c0_1, %c0_2] : memref<1152x128xbf16, #tpu.memory_space<vmem>>, vector<1152x128xbf16>
    %cst = arith.constant dense<0.000000e+00> : vector<8x128xf32>
    %2 = tpu.matmul %0, %1, %cst {dimension_numbers = #tpu.dot_dimension_numbers<[1], [0], [0], [1], [0, 0, 1, 1], [], []>} : vector<8x1152xbf16>, vector<1152x128xbf16>, vector<8x128xf32> -> vector<8x128xf32>
    %c0_3 = arith.constant 0 : index
    %c0_4 = arith.constant 0 : index
    %3 = vector.load %arg3[%c0_3, %c0_4] : memref<1x128xf32, #tpu.memory_space<vmem>>, vector<1x128xf32>
    %4 = vector.broadcast %3 : vector<1x128xf32> to vector<8x128xf32>
    %5 = arith.addf %2, %4 : vector<8x128xf32>
    %cst_5 = arith.constant 0.000000e+00 : f32
    %6 = vector.broadcast %cst_5 : f32 to vector<8x128xf32>
    %7 = arith.maximumf %5, %6 : vector<8x128xf32>
    %c0_6 = arith.constant 0 : index
    %c0_7 = arith.constant 0 : index
    %8 = vector.load %arg4[%c0_6, %c0_7] : memref<8x128xbf16, #tpu.memory_space<vmem>>, vector<8x128xbf16>
    %9 = arith.extf %8 : vector<8x128xbf16> to vector<8x128xf32>
    %10 = arith.addf %7, %9 : vector<8x128xf32>
    %11 = arith.truncf %10 : vector<8x128xf32> to vector<8x128xbf16>
    %c0_8 = arith.constant 0 : index
    %c0_9 = arith.constant 0 : index
    %12 = vector.load %arg5[%c0_8, %c0_9] : memref<8x128xbf16, #tpu.memory_space<vmem>>, vector<8x128xbf16>
    tpu.vector_store %arg5[%c0_8, %c0_9], %11 {strides = array<i32>} : memref<8x128xbf16, #tpu.memory_space<vmem>>, vector<8x128xbf16>,
    return
  }
  func.func @transform_0(%arg0: i32) -> (i32, i32) {
    %c0_i32 = arith.constant 0 : i32
    %c0_i32_0 = arith.constant 0 : i32
    return %arg0, %c0_i32 : i32, i32
  }
  func.func @transform_1(%arg0: i32) -> (i32, i32) {
    %c0_i32 = arith.constant 0 : i32
    %c0_i32_0 = arith.constant 0 : i32
    %c0_i32_1 = arith.constant 0 : i32
    return %c0_i32, %c0_i32_0 : i32, i32
  }
  func.func @transform_2(%arg0: i32) -> (i32, i32) {
    %c0_i32 = arith.constant 0 : i32
    %c0_i32_0 = arith.constant 0 : i32
    %c0_i32_1 = arith.constant 0 : i32
    return %c0_i32, %c0_i32_0 : i32, i32
  }
  func.func @transform_3(%arg0: i32) -> (i32, i32) {
    %c0_i32 = arith.constant 0 : i32
    %c0_i32_0 = arith.constant 0 : i32
    return %arg0, %c0_i32 : i32, i32
  }
  func.func @transform_4(%arg0: i32) -> (i32, i32) {
    %c0_i32 = arith.constant 0 : i32
    %c0_i32_0 = arith.constant 0 : i32
    return %arg0, %c0_i32 : i32, i32
  }
}

module attributes {stable_mosaic.version = 11 : i64} {
  func.func @_mm_skip_kernel(%arg0: i32, %arg1: memref<8x512xbf16, #tpu.memory_space<vmem>>, %arg2: memref<512x512xbf16, #tpu.memory_space<vmem>>, %arg3: memref<1x512xf32, #tpu.memory_space<vmem>>, %arg4: memref<8x512xbf16, #tpu.memory_space<vmem>>, %arg5: memref<8x512xbf16, #tpu.memory_space<vmem>>) attributes {dimension_semantics = [#tpu.dimension_semantics<parallel>], iteration_bounds = array<i64: 1>, scalar_prefetch = 0 : i64, scratch_operands = 0 : i64, tpu.core_type = #tpu.core_type<tc>, window_params = [{transform_indices = @transform_0, window_bounds = array<i64: 8, 512>}, {pipeline_mode = #tpu.pipeline_mode<synchronous>, transform_indices = @transform_1, window_bounds = array<i64: 512, 512>}, {pipeline_mode = #tpu.pipeline_mode<synchronous>, transform_indices = @transform_2, window_bounds = array<i64: 1, 512>}, {transform_indices = @transform_3, window_bounds = array<i64: 8, 512>}, {transform_indices = @transform_4, window_bounds = array<i64: 8, 512>}]} {
    %c0 = arith.constant 0 : index
    %c0_0 = arith.constant 0 : index
    %0 = vector.load %arg1[%c0, %c0_0] : memref<8x512xbf16, #tpu.memory_space<vmem>>, vector<8x512xbf16>
    %c0_1 = arith.constant 0 : index
    %c0_2 = arith.constant 0 : index
    %1 = vector.load %arg2[%c0_1, %c0_2] : memref<512x512xbf16, #tpu.memory_space<vmem>>, vector<512x512xbf16>
    %cst = arith.constant dense<0.000000e+00> : vector<8x512xf32>
    %2 = tpu.matmul %0, %1, %cst {dimension_numbers = #tpu.dot_dimension_numbers<[1], [0], [0], [1], [0, 0, 1, 1], [], []>} : vector<8x512xbf16>, vector<512x512xbf16>, vector<8x512xf32> -> vector<8x512xf32>
    %c0_3 = arith.constant 0 : index
    %c0_4 = arith.constant 0 : index
    %3 = vector.load %arg3[%c0_3, %c0_4] : memref<1x512xf32, #tpu.memory_space<vmem>>, vector<1x512xf32>
    %4 = vector.broadcast %3 : vector<1x512xf32> to vector<8x512xf32>
    %5 = arith.addf %2, %4 : vector<8x512xf32>
    %c0_5 = arith.constant 0 : index
    %c0_6 = arith.constant 0 : index
    %6 = vector.load %arg4[%c0_5, %c0_6] : memref<8x512xbf16, #tpu.memory_space<vmem>>, vector<8x512xbf16>
    %7 = arith.extf %6 : vector<8x512xbf16> to vector<8x512xf32>
    %8 = arith.addf %5, %7 : vector<8x512xf32>
    %cst_7 = arith.constant 0.000000e+00 : f32
    %9 = vector.broadcast %cst_7 : f32 to vector<8x512xf32>
    %10 = arith.maximumf %8, %9 : vector<8x512xf32>
    %11 = arith.truncf %10 : vector<8x512xf32> to vector<8x512xbf16>
    %c0_8 = arith.constant 0 : index
    %c0_9 = arith.constant 0 : index
    %12 = vector.load %arg5[%c0_8, %c0_9] : memref<8x512xbf16, #tpu.memory_space<vmem>>, vector<8x512xbf16>
    tpu.vector_store %arg5[%c0_8, %c0_9], %11 {strides = array<i32>} : memref<8x512xbf16, #tpu.memory_space<vmem>>, vector<8x512xbf16>,
    return
  }
  func.func @transform_0(%arg0: i32) -> (i32, i32) {
    %c0_i32 = arith.constant 0 : i32
    %c0_i32_0 = arith.constant 0 : i32
    return %arg0, %c0_i32 : i32, i32
  }
  func.func @transform_1(%arg0: i32) -> (i32, i32) {
    %c0_i32 = arith.constant 0 : i32
    %c0_i32_0 = arith.constant 0 : i32
    %c0_i32_1 = arith.constant 0 : i32
    return %c0_i32, %c0_i32_0 : i32, i32
  }
  func.func @transform_2(%arg0: i32) -> (i32, i32) {
    %c0_i32 = arith.constant 0 : i32
    %c0_i32_0 = arith.constant 0 : i32
    %c0_i32_1 = arith.constant 0 : i32
    return %c0_i32, %c0_i32_0 : i32, i32
  }
  func.func @transform_3(%arg0: i32) -> (i32, i32) {
    %c0_i32 = arith.constant 0 : i32
    %c0_i32_0 = arith.constant 0 : i32
    return %arg0, %c0_i32 : i32, i32
  }
  func.func @transform_4(%arg0: i32) -> (i32, i32) {
    %c0_i32 = arith.constant 0 : i32
    %c0_i32_0 = arith.constant 0 : i32
    return %arg0, %c0_i32 : i32, i32
  }
}

module attributes {stable_mosaic.version = 11 : i64} {
  func.func @_mm_skip_kernel(%arg0: i32, %arg1: memref<32x512xbf16, #tpu.memory_space<vmem>>, %arg2: memref<512x512xbf16, #tpu.memory_space<vmem>>, %arg3: memref<1x512xf32, #tpu.memory_space<vmem>>, %arg4: memref<32x512xbf16, #tpu.memory_space<vmem>>, %arg5: memref<32x512xbf16, #tpu.memory_space<vmem>>) attributes {dimension_semantics = [#tpu.dimension_semantics<parallel>], iteration_bounds = array<i64: 1>, scalar_prefetch = 0 : i64, scratch_operands = 0 : i64, tpu.core_type = #tpu.core_type<tc>, window_params = [{transform_indices = @transform_0, window_bounds = array<i64: 32, 512>}, {pipeline_mode = #tpu.pipeline_mode<synchronous>, transform_indices = @transform_1, window_bounds = array<i64: 512, 512>}, {pipeline_mode = #tpu.pipeline_mode<synchronous>, transform_indices = @transform_2, window_bounds = array<i64: 1, 512>}, {transform_indices = @transform_3, window_bounds = array<i64: 32, 512>}, {transform_indices = @transform_4, window_bounds = array<i64: 32, 512>}]} {
    %c0 = arith.constant 0 : index
    %c0_0 = arith.constant 0 : index
    %0 = vector.load %arg1[%c0, %c0_0] : memref<32x512xbf16, #tpu.memory_space<vmem>>, vector<32x512xbf16>
    %c0_1 = arith.constant 0 : index
    %c0_2 = arith.constant 0 : index
    %1 = vector.load %arg2[%c0_1, %c0_2] : memref<512x512xbf16, #tpu.memory_space<vmem>>, vector<512x512xbf16>
    %cst = arith.constant dense<0.000000e+00> : vector<32x512xf32>
    %2 = tpu.matmul %0, %1, %cst {dimension_numbers = #tpu.dot_dimension_numbers<[1], [0], [0], [1], [0, 0, 1, 1], [], []>} : vector<32x512xbf16>, vector<512x512xbf16>, vector<32x512xf32> -> vector<32x512xf32>
    %c0_3 = arith.constant 0 : index
    %c0_4 = arith.constant 0 : index
    %3 = vector.load %arg3[%c0_3, %c0_4] : memref<1x512xf32, #tpu.memory_space<vmem>>, vector<1x512xf32>
    %4 = vector.broadcast %3 : vector<1x512xf32> to vector<32x512xf32>
    %5 = arith.addf %2, %4 : vector<32x512xf32>
    %c0_5 = arith.constant 0 : index
    %c0_6 = arith.constant 0 : index
    %6 = vector.load %arg4[%c0_5, %c0_6] : memref<32x512xbf16, #tpu.memory_space<vmem>>, vector<32x512xbf16>
    %7 = arith.extf %6 : vector<32x512xbf16> to vector<32x512xf32>
    %8 = arith.addf %5, %7 : vector<32x512xf32>
    %cst_7 = arith.constant 0.000000e+00 : f32
    %9 = vector.broadcast %cst_7 : f32 to vector<32x512xf32>
    %10 = arith.maximumf %8, %9 : vector<32x512xf32>
    %11 = arith.truncf %10 : vector<32x512xf32> to vector<32x512xbf16>
    %c0_8 = arith.constant 0 : index
    %c0_9 = arith.constant 0 : index
    %12 = vector.load %arg5[%c0_8, %c0_9] : memref<32x512xbf16, #tpu.memory_space<vmem>>, vector<32x512xbf16>
    tpu.vector_store %arg5[%c0_8, %c0_9], %11 {strides = array<i32>} : memref<32x512xbf16, #tpu.memory_space<vmem>>, vector<32x512xbf16>,
    return
  }
  func.func @transform_0(%arg0: i32) -> (i32, i32) {
    %c0_i32 = arith.constant 0 : i32
    %c0_i32_0 = arith.constant 0 : i32
    return %arg0, %c0_i32 : i32, i32
  }
  func.func @transform_1(%arg0: i32) -> (i32, i32) {
    %c0_i32 = arith.constant 0 : i32
    %c0_i32_0 = arith.constant 0 : i32
    %c0_i32_1 = arith.constant 0 : i32
    return %c0_i32, %c0_i32_0 : i32, i32
  }
  func.func @transform_2(%arg0: i32) -> (i32, i32) {
    %c0_i32 = arith.constant 0 : i32
    %c0_i32_0 = arith.constant 0 : i32
    %c0_i32_1 = arith.constant 0 : i32
    return %c0_i32, %c0_i32_0 : i32, i32
  }
  func.func @transform_3(%arg0: i32) -> (i32, i32) {
    %c0_i32 = arith.constant 0 : i32
    %c0_i32_0 = arith.constant 0 : i32
    return %arg0, %c0_i32 : i32, i32
  }
  func.func @transform_4(%arg0: i32) -> (i32, i32) {
    %c0_i32 = arith.constant 0 : i32
    %c0_i32_0 = arith.constant 0 : i32
    return %arg0, %c0_i32 : i32, i32
  }
}

module attributes {stable_mosaic.version = 11 : i64} {
  func.func @_mm_kernel(%arg0: i32, %arg1: memref<128x512xbf16, #tpu.memory_space<vmem>>, %arg2: memref<512x512xbf16, #tpu.memory_space<vmem>>, %arg3: memref<1x512xf32, #tpu.memory_space<vmem>>, %arg4: memref<128x512xbf16, #tpu.memory_space<vmem>>) attributes {dimension_semantics = [#tpu.dimension_semantics<parallel>], iteration_bounds = array<i64: 1>, scalar_prefetch = 0 : i64, scratch_operands = 0 : i64, tpu.core_type = #tpu.core_type<tc>, window_params = [{transform_indices = @transform_0, window_bounds = array<i64: 128, 512>}, {pipeline_mode = #tpu.pipeline_mode<synchronous>, transform_indices = @transform_1, window_bounds = array<i64: 512, 512>}, {pipeline_mode = #tpu.pipeline_mode<synchronous>, transform_indices = @transform_2, window_bounds = array<i64: 1, 512>}, {transform_indices = @transform_3, window_bounds = array<i64: 128, 512>}]} {
    %c0 = arith.constant 0 : index
    %c0_0 = arith.constant 0 : index
    %0 = vector.load %arg1[%c0, %c0_0] : memref<128x512xbf16, #tpu.memory_space<vmem>>, vector<128x512xbf16>
    %c0_1 = arith.constant 0 : index
    %c0_2 = arith.constant 0 : index
    %1 = vector.load %arg2[%c0_1, %c0_2] : memref<512x512xbf16, #tpu.memory_space<vmem>>, vector<512x512xbf16>
    %cst = arith.constant dense<0.000000e+00> : vector<128x512xf32>
    %2 = tpu.matmul %0, %1, %cst {dimension_numbers = #tpu.dot_dimension_numbers<[1], [0], [0], [1], [0, 0, 1, 1], [], []>} : vector<128x512xbf16>, vector<512x512xbf16>, vector<128x512xf32> -> vector<128x512xf32>
    %c0_3 = arith.constant 0 : index
    %c0_4 = arith.constant 0 : index
    %3 = vector.load %arg3[%c0_3, %c0_4] : memref<1x512xf32, #tpu.memory_space<vmem>>, vector<1x512xf32>
    %4 = vector.broadcast %3 : vector<1x512xf32> to vector<128x512xf32>
    %5 = arith.addf %2, %4 : vector<128x512xf32>
    %cst_5 = arith.constant 0.000000e+00 : f32
    %6 = vector.broadcast %cst_5 : f32 to vector<128x512xf32>
    %7 = arith.maximumf %5, %6 : vector<128x512xf32>
    %8 = arith.truncf %7 : vector<128x512xf32> to vector<128x512xbf16>
    %c0_6 = arith.constant 0 : index
    %c0_7 = arith.constant 0 : index
    %9 = vector.load %arg4[%c0_6, %c0_7] : memref<128x512xbf16, #tpu.memory_space<vmem>>, vector<128x512xbf16>
    tpu.vector_store %arg4[%c0_6, %c0_7], %8 {strides = array<i32>} : memref<128x512xbf16, #tpu.memory_space<vmem>>, vector<128x512xbf16>,
    return
  }
  func.func @transform_0(%arg0: i32) -> (i32, i32) {
    %c0_i32 = arith.constant 0 : i32
    %c0_i32_0 = arith.constant 0 : i32
    return %arg0, %c0_i32 : i32, i32
  }
  func.func @transform_1(%arg0: i32) -> (i32, i32) {
    %c0_i32 = arith.constant 0 : i32
    %c0_i32_0 = arith.constant 0 : i32
    %c0_i32_1 = arith.constant 0 : i32
    return %c0_i32, %c0_i32_0 : i32, i32
  }
  func.func @transform_2(%arg0: i32) -> (i32, i32) {
    %c0_i32 = arith.constant 0 : i32
    %c0_i32_0 = arith.constant 0 : i32
    %c0_i32_1 = arith.constant 0 : i32
    return %c0_i32, %c0_i32_0 : i32, i32
  }
  func.func @transform_3(%arg0: i32) -> (i32, i32) {
    %c0_i32 = arith.constant 0 : i32
    %c0_i32_0 = arith.constant 0 : i32
    return %arg0, %c0_i32 : i32, i32
  }
}

</mosaic_0001>

<bundles_post_ra>
// kernel: l1block_forward.18
= control target key start
LH: loop header
LB: loop body
LE: loop exit
PB: predicated region body
PF: predicated region fallthrough
CT: control target
= control target key end

     0   :  { %s3124_s1 = inlined_call_operand.vmem [shape: bf16[1152,128], index: 1, kind: input, shape index: {}]   ;;  %s3125_s2 = inlined_call_operand.vmem [shape: f32[1,128], index: 2, kind: input, shape index: {}]   ;;  %s3126_s0 = inlined_call_operand.vmem [shape: bf16[128,1152], index: 0, kind: input, shape index: {}]   ;;  %s3127_s3 = inlined_call_operand.vmem [shape: bf16[128,128], index: 3, kind: output, shape index: {}]  }
   0x1   :  { %v2190_v0 = vld [vmem:[%s3124_s1 + $0x38] sm:$0xff]  ;;  %v2189_v1 = vld [vmem:[%s3124_s1 + $0x30] sm:$0xff]  ;;  %v2188_v2 = vld [vmem:[%s3124_s1 + $0x28] sm:$0xff] }
   0x2   :  { %2302 = vmatpush.bf16.msra.mxu1 %v2190_v0  ;;  %2303 = vmatpush.bf16.msra.mxu2 %v2190_v0  ;;  %v2187_v3 = vld [vmem:[%s3124_s1 + $0x20] sm:$0xff]  ;;  %v2186_v4 = vld [vmem:[%s3124_s1 + $0x18] sm:$0xff]  ;;  %v2185_v5 = vld [vmem:[%s3124_s1 + $0x10] sm:$0xff] }
   0x3   :  { %2304 = vmatpush.bf16.msra.mxu3 %v2190_v0  ;;  %1042 = vmatpush.bf16.msra.mxu0 %v2190_v0  ;;  %v2184_v6 = vld [vmem:[%s3124_s1 + $0x8] sm:$0xff]  ;;  %v2183_v7 = vld [vmem:[%s3124_s1] sm:$0xff]  ;;  %v1609_v8 = vld [vmem:[%s3126_s0 + $0x90] sm:$0xf] }
   0x4   :  { %v2133_v9 = vld [vmem:[%s3126_s0 + $0xb0] sm:$0xf0]  ;;  %v1681_v10 = vld [vmem:[%s3126_s0 + $0x120] sm:$0xf]  ;;  %v2151_v11 = vld [vmem:[%s3126_s0 + $0x140] sm:$0xf0] }
   0x5   :  { %v1753_v12 = vld [vmem:[%s3126_s0 + $0x1b0] sm:$0xf]  ;;  %v2169_v13 = vld [vmem:[%s3126_s0 + $0x1d0] sm:$0xf0]  ;;  %v1537_v14 = vld [vmem:[%s3126_s0] sm:$0xf]  ;;  %v1610_v18 = vor.u32 %v2133_v9, %v1609_v8  ;;  %v1682_v19 = vor.u32 %v2151_v11, %v1681_v10 }
   0x6   :  { %2305 = vmatpush.bf16.msra.mxu1 %v2189_v1  ;;  %2306 = vmatpush.bf16.msra.mxu2 %v2189_v1  ;;  %v2115_v15 = vld [vmem:[%s3126_s0 + $0x20] sm:$0xf0]  ;;  %v2206_v16 = vld [vmem:[%s3124_s1 + $0xb8] sm:$0xff]  ;;  %v1754_v20 = vor.u32 %v2169_v13, %v1753_v12  ;;  %v2205_v24 = vld [vmem:[%s3124_s1 + $0xb0] sm:$0xff] }
   0x7   :  { %2307 = vmatpush.bf16.msra.mxu3 %v2189_v1  ;;  %1043 = vmatpush.bf16.msra.mxu0 %v2189_v1  ;;  %v2198_v17 = vld [vmem:[%s3124_s1 + $0x78] sm:$0xff]  ;;  %v1538_v21 = vor.u32 %v2115_v15, %v1537_v14  ;;  %v2197_v25 = vld [vmem:[%s3124_s1 + $0x70] sm:$0xff]  ;;  %v2204_v28 = vld [vmem:[%s3124_s1 + $0xa8] sm:$0xff] }
   0x8   :  { %v2214_v22 = vld [vmem:[%s3124_s1 + $0xf8] sm:$0xff]  ;;  %v2213_v26 = vld [vmem:[%s3124_s1 + $0xf0] sm:$0xff]  ;;  %v2196_v29 = vld [vmem:[%s3124_s1 + $0x68] sm:$0xff] }
   0x9   :  { %v2222_v23 = vld [vmem:[%s3124_s1 + $0x138] sm:$0xff]  ;;  %v2221_v27 = vld [vmem:[%s3124_s1 + $0x130] sm:$0xff]  ;;  %v2212_v30 = vld [vmem:[%s3124_s1 + $0xe8] sm:$0xff] }
   0xa   :  { %2308 = vmatpush.bf16.msra.mxu1 %v2188_v2  ;;  %2309 = vmatpush.bf16.msra.mxu2 %v2188_v2  ;;  %v2220_v31 = vld [vmem:[%s3124_s1 + $0x128] sm:$0xff]  ;;  %v2203_v32 = vld [vmem:[%s3124_s1 + $0xa0] sm:$0xff]  ;;  %v1645_v36 = vld [vmem:[%s3126_s0 + $0xd8] sm:$0xf] }
   0xb   :  { %2310 = vmatpush.bf16.msra.mxu3 %v2188_v2  ;;  %1044 = vmatpush.bf16.msra.mxu0 %v2188_v2  ;;  %v2195_v33 = vld [vmem:[%s3124_s1 + $0x60] sm:$0xff]  ;;  %v2142_v37 = vld [vmem:[%s3126_s0 + $0xf8] sm:$0xf0]  ;;  %v1717_v38 = vld [vmem:[%s3126_s0 + $0x168] sm:$0xf] }
   0xc   :  { %v2211_v34 = vld [vmem:[%s3124_s1 + $0xe0] sm:$0xff]  ;;  %v2160_v39 = vld [vmem:[%s3126_s0 + $0x188] sm:$0xf0]  ;;  %v1789_v40 = vld [vmem:[%s3126_s0 + $0x1f8] sm:$0xf]  ;;  %v1646_v46 = vor.u32 %v2142_v37, %v1645_v36 }
   0xd   :  { %v2219_v35 = vld [vmem:[%s3124_s1 + $0x120] sm:$0xff]  ;;  %v2178_v41 = vld [vmem:[%s3126_s0 + $0x218] sm:$0xf0]  ;;  %v1573_v42 = vld [vmem:[%s3126_s0 + $0x48] sm:$0xf]  ;;  %v1718_v47 = vor.u32 %v2160_v39, %v1717_v38 }
   0xe   :  { %2311 = vmatpush.bf16.msra.mxu1 %v2187_v3  ;;  %2312 = vmatpush.bf16.msra.mxu2 %v2187_v3  ;;  %v2124_v43 = vld [vmem:[%s3126_s0 + $0x68] sm:$0xf0]  ;;  %v2202_v44 = vld [vmem:[%s3124_s1 + $0x98] sm:$0xff]  ;;  %v1790_v48 = vor.u32 %v2178_v41, %v1789_v40  ;;  %v2201_v52 = vld [vmem:[%s3124_s1 + $0x90] sm:$0xff] }
   0xf   :  { %2313 = vmatpush.bf16.msra.mxu3 %v2187_v3  ;;  %1045 = vmatpush.bf16.msra.mxu0 %v2187_v3  ;;  %v2194_v45 = vld [vmem:[%s3124_s1 + $0x58] sm:$0xff]  ;;  %v1574_v49 = vor.u32 %v2124_v43, %v1573_v42  ;;  %v2193_v53 = vld [vmem:[%s3124_s1 + $0x50] sm:$0xff]  ;;  %v2200_v56 = vld [vmem:[%s3124_s1 + $0x88] sm:$0xff] }
  0x10   :  { %v2210_v50 = vld [vmem:[%s3124_s1 + $0xd8] sm:$0xff]  ;;  %v2209_v54 = vld [vmem:[%s3124_s1 + $0xd0] sm:$0xff]  ;;  %v2192_v57 = vld [vmem:[%s3124_s1 + $0x48] sm:$0xff] }
  0x11   :  { %v2218_v51 = vld [vmem:[%s3124_s1 + $0x118] sm:$0xff]  ;;  %v2217_v55 = vld [vmem:[%s3124_s1 + $0x110] sm:$0xff]  ;;  %v2208_v58 = vld [vmem:[%s3124_s1 + $0xc8] sm:$0xff] }
  0x12   :  { %2314 = vmatpush.bf16.msra.mxu1 %v2186_v4  ;;  %2315 = vmatpush.bf16.msra.mxu2 %v2186_v4  ;;  %v2216_v59 = vld [vmem:[%s3124_s1 + $0x108] sm:$0xff]  ;;  %v2199_v60 = vld [vmem:[%s3124_s1 + $0x80] sm:$0xff]  ;;  %v2238_v2 = vld [vmem:[%s3124_s1 + $0x1b8] sm:$0xff] }
  0x13   :  { %2316 = vmatpush.bf16.msra.mxu3 %v2186_v4  ;;  %1046 = vmatpush.bf16.msra.mxu0 %v2186_v4  ;;  %v2191_v61 = vld [vmem:[%s3124_s1 + $0x40] sm:$0xff]  ;;  %v1539_v1 = vld [vmem:[%s3126_s0 + $0x24] sm:$0xf0]  ;;  %v2230_v3 = vld [vmem:[%s3124_s1 + $0x178] sm:$0xff] }
  0x14   :  { %v2111_v62 = vld [vmem:[%s3126_s0 + $0x4] sm:$0xf]  ;;  %v1545_v4 = vld [vmem:[%s3126_s0 + $0x8] sm:$0xf]  ;;  %v1553_v8 = vld [vmem:[%s3126_s0 + $0x10] sm:$0xf] }
  0x15   :  { %v2207_v63 = vld [vmem:[%s3124_s1 + $0xc0] sm:$0xff]  ;;  %v2117_v9 = vld [vmem:[%s3126_s0 + $0x30] sm:$0xf0]  ;;  %v2246_v10 = vld [vmem:[%s3124_s1 + $0x1f8] sm:$0xff]  ;;  %v1542_v12 = vor.u32 %v2111_v62, %v1539_v1 }
  0x16   :  { %2317 = vmatpush.bf16.msra.mxu1 %v2185_v5  ;;  %2318 = vmatpush.bf16.msra.mxu2 %v2185_v5  ;;  %v2215_v0 = vld [vmem:[%s3124_s1 + $0x100] sm:$0xff]  ;;  %v2254_v11 = vld [vmem:[%s3124_s1 + $0x238] sm:$0xff]  ;;  %v1554_v15 = vor.u32 %v2117_v9, %v1553_v8  ;;  %v2129_v40 = vld [vmem:[%s3126_s0 + $0x94] sm:$0xf] }
  0x17   :  { %2319 = vmatpush.bf16.msra.mxu3 %v2185_v5  ;;  %1047 = vmatpush.bf16.msra.mxu0 %v2185_v5  ;;  %v2116_v5 = vld [vmem:[%s3126_s0 + $0x28] sm:$0xf0]  ;;  %v2235_v36 = vld [vmem:[%s3124_s1 + $0x1a0] sm:$0xff]  ;;  %v1611_v41 = vld [vmem:[%s3126_s0 + $0xb4] sm:$0xf0] }
  0x18   :  { %v1546_v13 = vor.u32 %v2116_v5, %v1545_v4  ;;  %v2243_v37 = vld [vmem:[%s3124_s1 + $0x1e0] sm:$0xff]  ;;  %v1617_v42 = vld [vmem:[%s3126_s0 + $0x98] sm:$0xf]  ;;  %v2134_v43 = vld [vmem:[%s3126_s0 + $0xb8] sm:$0xf0] }
  0x19   :  { %v2227_v38 = vld [vmem:[%s3124_s1 + $0x160] sm:$0xff]  ;;  %v1661_v62 = vld [vmem:[%s3126_s0 + $0xe8] sm:$0xf]  ;;  %v2233_v4 = vld [vmem:[%s3124_s1 + $0x190] sm:$0xff] }
  0x1a   :  { %2320 = vmatpush.bf16.msra.mxu1 %v2184_v6  ;;  %2321 = vmatpush.bf16.msra.mxu2 %v2184_v6  ;;  %v2251_v39 = vld [vmem:[%s3124_s1 + $0x220] sm:$0xff]  ;;  %v2241_v5 = vld [vmem:[%s3124_s1 + $0x1d0] sm:$0xff]  ;;  %v1683_v9 = vld [vmem:[%s3126_s0 + $0x144] sm:$0xf0] }
  0x1b   :  { %2322 = vmatpush.bf16.msra.mxu3 %v2184_v6  ;;  %1048 = vmatpush.bf16.msra.mxu0 %v2184_v6  ;;  %v2112_v6 = vld [vmem:[%s3126_s0 + $0xc] sm:$0xf]  ;;  %v2147_v8 = vld [vmem:[%s3126_s0 + $0x124] sm:$0xf] }
  0x1e   :  { %2323 = vmatpush.bf16.msra.mxu1 %v2183_v7  ;;  %2324 = vmatpush.bf16.msra.mxu2 %v2183_v7 }
  0x1f   :  { %2325 = vmatpush.bf16.msra.mxu3 %v2183_v7  ;;  %1049 = vmatpush.bf16.msra.mxu0 %v2183_v7  ;;  %v1547_v7 = vld [vmem:[%s3126_s0 + $0x2c] sm:$0xf0] }
  0x20   :  { %v1550_v14 = vor.u32 %v2112_v6, %v1547_v7  ;;  %v2225_v6 = vld [vmem:[%s3124_s1 + $0x150] sm:$0xff] }
  0x21   :  { %1060 = vmatmul.bf16.vlgmr.msra.gmra.mxu1 %v1610_v18  ;;  %1070 = vmatmul.bf16.vlgmr.msra.gmra.mxu2 %v1682_v19  ;;  %v2245_v18 = vld [vmem:[%s3124_s1 + $0x1f0] sm:$0xff] }
  0x22   :  { %1140 = vmatpush.bf16.msrb.mxu2 %v2206_v16  ;;  %1091 = vmatpush.bf16.msrb.mxu1 %v2198_v17  ;;  %v2237_v16 = vld [vmem:[%s3124_s1 + $0x1b0] sm:$0xff] }
  0x23   :  { %1080 = vmatmul.bf16.vlgmr.msra.gmra.mxu3 %v1754_v20  ;;  %1050 = vmatmul.bf16.vlgmr.msra.gmra.mxu0 %v1538_v21  ;;  %v2229_v17 = vld [vmem:[%s3124_s1 + $0x170] sm:$0xff]  ;;  %v2236_v20 = vld [vmem:[%s3124_s1 + $0x1a8] sm:$0xff] }
  0x24   :  { %1189 = vmatpush.bf16.msrb.mxu3 %v2214_v22  ;;  %1238 = vmatpush.bf16.msrb.mxu0 %v2222_v23  ;;  %v2253_v19 = vld [vmem:[%s3124_s1 + $0x230] sm:$0xff]  ;;  %v2228_v21 = vld [vmem:[%s3124_s1 + $0x168] sm:$0xff] }
  0x25   :  { %v2244_v22 = vld [vmem:[%s3124_s1 + $0x1e8] sm:$0xff]  ;;  %v2249_v7 = vld [vmem:[%s3124_s1 + $0x210] sm:$0xff] }
  0x26   :  { %1141 = vmatpush.bf16.msrb.mxu2 %v2205_v24  ;;  %1092 = vmatpush.bf16.msrb.mxu1 %v2197_v25  ;;  %v2252_v23 = vld [vmem:[%s3124_s1 + $0x228] sm:$0xff]  ;;  %v1575_v25 = vld [vmem:[%s3126_s0 + $0x6c] sm:$0xf0] }
  0x27   :  { %v2120_v24 = vld [vmem:[%s3126_s0 + $0x4c] sm:$0xf] }
  0x28   :  { %1190 = vmatpush.bf16.msrb.mxu3 %v2213_v26  ;;  %1239 = vmatpush.bf16.msrb.mxu0 %v2221_v27  ;;  %v1581_v26 = vld [vmem:[%s3126_s0 + $0x50] sm:$0xf]  ;;  %v2125_v27 = vld [vmem:[%s3126_s0 + $0x70] sm:$0xf0] }
  0x2a   :  { %1142 = vmatpush.bf16.msrb.mxu2 %v2204_v28  ;;  %1093 = vmatpush.bf16.msrb.mxu1 %v2196_v29  ;;  %v2121_v28 = vld [vmem:[%s3126_s0 + $0x54] sm:$0xf]  ;;  %v1583_v29 = vld [vmem:[%s3126_s0 + $0x74] sm:$0xf0] }
  0x2c   :  { %1191 = vmatpush.bf16.msrb.mxu3 %v2212_v30  ;;  %1240 = vmatpush.bf16.msrb.mxu0 %v2220_v31  ;;  %v1589_v30 = vld [vmem:[%s3126_s0 + $0x58] sm:$0xf]  ;;  %v2126_v31 = vld [vmem:[%s3126_s0 + $0x78] sm:$0xf0] }
  0x2e   :  { %1143 = vmatpush.bf16.msrb.mxu2 %v2203_v32  ;;  %1094 = vmatpush.bf16.msrb.mxu1 %v2195_v33  ;;  %v1578_v32 = vor.u32 %v2120_v24, %v1575_v25  ;;  %v1582_v33 = vor.u32 %v2125_v27, %v1581_v26  ;;  %v2156_v24 = vld [vmem:[%s3126_s0 + $0x16c] sm:$0xf]  ;;  %v1719_v25 = vld [vmem:[%s3126_s0 + $0x18c] sm:$0xf0]  ;;  %v2161_v27 = vld [vmem:[%s3126_s0 + $0x190] sm:$0xf0] }
  0x2f   :  { %v1725_v26 = vld [vmem:[%s3126_s0 + $0x170] sm:$0xf] }
  0x30   :  { %1192 = vmatpush.bf16.msrb.mxu3 %v2211_v34  ;;  %1241 = vmatpush.bf16.msrb.mxu0 %v2219_v35  ;;  %v1586_v34 = vor.u32 %v2121_v28, %v1583_v29  ;;  %v1590_v35 = vor.u32 %v2126_v31, %v1589_v30  ;;  %v2157_v28 = vld [vmem:[%s3126_s0 + $0x174] sm:$0xf]  ;;  %v1727_v29 = vld [vmem:[%s3126_s0 + $0x194] sm:$0xf0]  ;;  %v2162_v31 = vld [vmem:[%s3126_s0 + $0x198] sm:$0xf0] }
  0x31   :  { %1065 = vmatmul.bf16.gmra.mxu1 %v1646_v46  ;;  %1075 = vmatmul.bf16.gmra.mxu2 %v1718_v47  ;;  %v1625_v46 = vld [vmem:[%s3126_s0 + $0xa0] sm:$0xf]  ;;  %v2135_v47 = vld [vmem:[%s3126_s0 + $0xc0] sm:$0xf0]  ;;  %v1733_v30 = vld [vmem:[%s3126_s0 + $0x178] sm:$0xf] }
  0x32   :  { %1144 = vmatpush.bf16.msrb.mxu2 %v2202_v44  ;;  %1095 = vmatpush.bf16.msrb.mxu1 %v2194_v45  ;;  %v2130_v44 = vld [vmem:[%s3126_s0 + $0x9c] sm:$0xf]  ;;  %v1619_v45 = vld [vmem:[%s3126_s0 + $0xbc] sm:$0xf0] }
  0x33   :  { %1085 = vmatmul.bf16.gmra.mxu3 %v1790_v48  ;;  %1055 = vmatmul.bf16.gmra.mxu0 %v1574_v49  ;;  %v1614_v48 = vor.u32 %v2129_v40, %v1611_v41  ;;  %v1618_v49 = vor.u32 %v2134_v43, %v1617_v42  ;;  %v2165_v40 = vld [vmem:[%s3126_s0 + $0x1b4] sm:$0xf]  ;;  %v1755_v41 = vld [vmem:[%s3126_s0 + $0x1d4] sm:$0xf0]  ;;  %v2170_v43 = vld [vmem:[%s3126_s0 + $0x1d8] sm:$0xf0] }
  0x34   :  { %1193 = vmatpush.bf16.msrb.mxu3 %v2210_v50  ;;  %1242 = vmatpush.bf16.msrb.mxu0 %v2218_v51  ;;  %v1622_v50 = vor.u32 %v2130_v44, %v1619_v45  ;;  %v1626_v51 = vor.u32 %v2135_v47, %v1625_v46  ;;  %v1761_v42 = vld [vmem:[%s3126_s0 + $0x1b8] sm:$0xf]  ;;  %v2166_v44 = vld [vmem:[%s3126_s0 + $0x1bc] sm:$0xf]  ;;  %v1763_v45 = vld [vmem:[%s3126_s0 + $0x1dc] sm:$0xf0] }
  0x35   :  { %v1769_v46 = vld [vmem:[%s3126_s0 + $0x1c0] sm:$0xf]  ;;  %v2171_v47 = vld [vmem:[%s3126_s0 + $0x1e0] sm:$0xf0] }
  0x36   :  { %1145 = vmatpush.bf16.msrb.mxu2 %v2201_v52  ;;  %1096 = vmatpush.bf16.msrb.mxu1 %v2193_v53  ;;  %v2234_v52 = vld [vmem:[%s3124_s1 + $0x198] sm:$0xff] }
  0x37   :  { %v2242_v53 = vld [vmem:[%s3124_s1 + $0x1d8] sm:$0xff] }
  0x38   :  { %1194 = vmatpush.bf16.msrb.mxu3 %v2209_v54  ;;  %1243 = vmatpush.bf16.msrb.mxu0 %v2217_v55  ;;  %v2226_v54 = vld [vmem:[%s3124_s1 + $0x158] sm:$0xff] }
  0x39   :  { %v2250_v55 = vld [vmem:[%s3124_s1 + $0x218] sm:$0xff] }
  0x3a   :  { %1146 = vmatpush.bf16.msrb.mxu2 %v2200_v56  ;;  %1097 = vmatpush.bf16.msrb.mxu1 %v2192_v57  ;;  %v2138_v56 = vld [vmem:[%s3126_s0 + $0xdc] sm:$0xf]  ;;  %v1647_v57 = vld [vmem:[%s3126_s0 + $0xfc] sm:$0xf0] }
  0x3c   :  { %1195 = vmatpush.bf16.msrb.mxu3 %v2208_v58  ;;  %1244 = vmatpush.bf16.msrb.mxu0 %v2216_v59  ;;  %v1653_v58 = vld [vmem:[%s3126_s0 + $0xe0] sm:$0xf]  ;;  %v2143_v59 = vld [vmem:[%s3126_s0 + $0x100] sm:$0xf0] }
  0x3d   :  { %v1654_v1 = vor.u32 %v2143_v59, %v1653_v58 }
  0x3e   :  { %1147 = vmatpush.bf16.msrb.mxu2 %v2199_v60  ;;  %1098 = vmatpush.bf16.msrb.mxu1 %v2191_v61  ;;  %v2139_v60 = vld [vmem:[%s3126_s0 + $0xe4] sm:$0xf]  ;;  %v1655_v61 = vld [vmem:[%s3126_s0 + $0x104] sm:$0xf0] }
  0x40   :  { %1196 = vmatpush.bf16.msrb.mxu3 %v2207_v63  ;;  %1245 = vmatpush.bf16.msrb.mxu0 %v2215_v0  ;;  %v2144_v63 = vld [vmem:[%s3126_s0 + $0x108] sm:$0xf0]  ;;  %v1650_v0 = vor.u32 %v2138_v56, %v1647_v57 }
  0x41   :  { %1099 = vmatmul.bf16.vlgmr.msrb.gmra.mxu1 %v1542_v12  ;;  %1148 = vmatmul.bf16.vlgmr.msrb.gmra.mxu2 %v1546_v13  ;;  %v2148_v12 = vld [vmem:[%s3126_s0 + $0x12c] sm:$0xf]  ;;  %v1691_v13 = vld [vmem:[%s3126_s0 + $0x14c] sm:$0xf0] }
  0x42   :  { %1336 = vmatpush.bf16.msra.mxu2 %v2238_v2  ;;  %1287 = vmatpush.bf16.msra.mxu1 %v2230_v3  ;;  %v1658_v2 = vor.u32 %v2139_v60, %v1655_v61  ;;  %v1662_v3 = vor.u32 %v2144_v63, %v1661_v62  ;;  %v2174_v61 = vld [vmem:[%s3126_s0 + $0x1fc] sm:$0xf]  ;;  %v1791_v62 = vld [vmem:[%s3126_s0 + $0x21c] sm:$0xf0] }
  0x43   :  { %1197 = vmatmul.bf16.vlgmr.msrb.gmra.mxu3 %v1550_v14  ;;  %1246 = vmatmul.bf16.vlgmr.msrb.gmra.mxu0 %v1554_v15  ;;  %v1697_v14 = vld [vmem:[%s3126_s0 + $0x130] sm:$0xf]  ;;  %v2153_v15 = vld [vmem:[%s3126_s0 + $0x150] sm:$0xf0]  ;;  %v1797_v63 = vld [vmem:[%s3126_s0 + $0x200] sm:$0xf] }
  0x44   :  { %1385 = vmatpush.bf16.msra.mxu3 %v2246_v10  ;;  %1434 = vmatpush.bf16.msra.mxu0 %v2254_v11  ;;  %v1689_v10 = vld [vmem:[%s3126_s0 + $0x128] sm:$0xf]  ;;  %v2152_v11 = vld [vmem:[%s3126_s0 + $0x148] sm:$0xf0] }
  0x46   :  { %1337 = vmatpush.bf16.msra.mxu2 %v2237_v16  ;;  %1288 = vmatpush.bf16.msra.mxu1 %v2229_v17  ;;  %v1686_v16 = vor.u32 %v2147_v8, %v1683_v9  ;;  %v1690_v17 = vor.u32 %v2152_v11, %v1689_v10  ;;  %v1794_v8 = vor.u32 %v2174_v61, %v1791_v62  ;;  %v1605_v61 = vld [vmem:[%s3126_s0 + $0x68] sm:$0xf]  ;;  %v2128_v62 = vld [vmem:[%s3126_s0 + $0x88] sm:$0xf0] }
  0x48   :  { %1386 = vmatpush.bf16.msra.mxu3 %v2245_v18  ;;  %1435 = vmatpush.bf16.msra.mxu0 %v2253_v19  ;;  %v1694_v18 = vor.u32 %v2148_v12, %v1691_v13  ;;  %v1698_v19 = vor.u32 %v2153_v15, %v1697_v14 }
  0x4a   :  { %1338 = vmatpush.bf16.msra.mxu2 %v2236_v20  ;;  %1289 = vmatpush.bf16.msra.mxu1 %v2228_v21  ;;  %v2232_v20 = vld [vmem:[%s3124_s1 + $0x188] sm:$0xff] }
  0x4b   :  { %v2240_v21 = vld [vmem:[%s3124_s1 + $0x1c8] sm:$0xff] }
  0x4c   :  { %1387 = vmatpush.bf16.msra.mxu3 %v2244_v22  ;;  %1436 = vmatpush.bf16.msra.mxu0 %v2252_v23  ;;  %v2224_v22 = vld [vmem:[%s3124_s1 + $0x148] sm:$0xff] }
  0x4d   :  { %v2248_v23 = vld [vmem:[%s3124_s1 + $0x208] sm:$0xff] }
  0x4e   :  { %1339 = vmatpush.bf16.msra.mxu2 %v2235_v36  ;;  %1290 = vmatpush.bf16.msra.mxu1 %v2227_v38  ;;  %v2231_v36 = vld [vmem:[%s3124_s1 + $0x180] sm:$0xff] }
  0x4f   :  { %v2223_v38 = vld [vmem:[%s3124_s1 + $0x140] sm:$0xff] }
  0x50   :  { %1388 = vmatpush.bf16.msra.mxu3 %v2243_v37  ;;  %1437 = vmatpush.bf16.msra.mxu0 %v2251_v39  ;;  %v2239_v37 = vld [vmem:[%s3124_s1 + $0x1c0] sm:$0xff] }
  0x51   :  { %1104 = vmatmul.bf16.gmra.mxu1 %v1578_v32  ;;  %1153 = vmatmul.bf16.gmra.mxu2 %v1582_v33  ;;  %v1722_v32 = vor.u32 %v2156_v24, %v1719_v25  ;;  %v1726_v33 = vor.u32 %v2161_v27, %v1725_v26  ;;  %v2247_v39 = vld [vmem:[%s3124_s1 + $0x200] sm:$0xff]  ;;  %v2118_v24 = vld [vmem:[%s3126_s0 + $0x38] sm:$0xf0] }
  0x52   :  { %1340 = vmatpush.bf16.msra.mxu2 %v2234_v52  ;;  %1291 = vmatpush.bf16.msra.mxu1 %v2226_v54  ;;  %v1770_v52 = vor.u32 %v2171_v47, %v1769_v46  ;;  %v2784_v54 = vld [vmem:[%s3125_s2] ss:$0 sm:$0xff]  ;;  %v2114_v25 = vld [vmem:[%s3126_s0 + $0x1c] sm:$0xf] }
  0x53   :  { %1202 = vmatmul.bf16.gmra.mxu3 %v1586_v34  ;;  %1251 = vmatmul.bf16.gmra.mxu0 %v1590_v35  ;;  %v1730_v34 = vor.u32 %v2157_v28, %v1727_v29  ;;  %v1734_v35 = vor.u32 %v2162_v31, %v1733_v30  ;;  %v1563_v26 = vld [vmem:[%s3126_s0 + $0x3c] sm:$0xf0]  ;;  %v2119_v28 = vld [vmem:[%s3126_s0 + $0x40] sm:$0xf0] }
  0x54   :  { %1389 = vmatpush.bf16.msra.mxu3 %v2242_v53  ;;  %1438 = vmatpush.bf16.msra.mxu0 %v2250_v55  ;;  %v1569_v27 = vld [vmem:[%s3126_s0 + $0x20] sm:$0xf] }
  0x56   :  { %1341 = vmatpush.bf16.msra.mxu2 %v2233_v4  ;;  %1292 = vmatpush.bf16.msra.mxu1 %v2225_v6  ;;  %v2180_v4 = vld [vmem:[%s3126_s0 + $0x228] sm:$0xf0] }
  0x58   :  { %1390 = vmatpush.bf16.msra.mxu3 %v2241_v5  ;;  %1439 = vmatpush.bf16.msra.mxu0 %v2249_v7 }
  0x5a   :  { %1342 = vmatpush.bf16.msra.mxu2 %v2232_v20  ;;  %1293 = vmatpush.bf16.msra.mxu1 %v2224_v22  ;;  %v1555_v22 = vld [vmem:[%s3126_s0 + $0x34] sm:$0xf0] }
  0x5c   :  { %1391 = vmatpush.bf16.msra.mxu3 %v2240_v21  ;;  %1440 = vmatpush.bf16.msra.mxu0 %v2248_v23  ;;  %v2113_v21 = vld [vmem:[%s3126_s0 + $0x14] sm:$0xf]  ;;  %v1561_v23 = vld [vmem:[%s3126_s0 + $0x18] sm:$0xf] }
  0x5e   :  { %1343 = vmatpush.bf16.msra.mxu2 %v2231_v36  ;;  %1294 = vmatpush.bf16.msra.mxu1 %v2223_v38  ;;  %v1570_v38 = vor.u32 %v2119_v28, %v1569_v27  ;;  %v2131_v27 = vld [vmem:[%s3126_s0 + $0xa4] sm:$0xf]  ;;  %v1627_v28 = vld [vmem:[%s3126_s0 + $0xc4] sm:$0xf0] }
  0x60   :  { %1392 = vmatpush.bf16.msra.mxu3 %v2239_v37  ;;  %1441 = vmatpush.bf16.msra.mxu0 %v2247_v39  ;;  %v1566_v37 = vor.u32 %v2114_v25, %v1563_v26 }
  0x61   :  { %1109 = vmatmul.bf16.gmra.mxu1 %v1614_v48  ;;  %1158 = vmatmul.bf16.gmra.mxu2 %v1618_v49  ;;  %v1758_v48 = vor.u32 %v2165_v40, %v1755_v41  ;;  %v1762_v49 = vor.u32 %v2170_v43, %v1761_v42 }
  0x63   :  { %1207 = vmatmul.bf16.gmra.mxu3 %v1622_v50  ;;  %1256 = vmatmul.bf16.gmra.mxu0 %v1626_v51  ;;  %v1766_v51 = vor.u32 %v2166_v44, %v1763_v45 }
  0x71   :  { %1114 = vmatmul.bf16.gmra.mxu1 %v1650_v0  ;;  %1163 = vmatmul.bf16.gmra.mxu2 %v1654_v1  ;;  %v2179_v0 = vld [vmem:[%s3126_s0 + $0x220] sm:$0xf0] }
  0x72   :  { %v2175_v1 = vld [vmem:[%s3126_s0 + $0x204] sm:$0xf]  ;;  %v1798_v9 = vor.u32 %v2179_v0, %v1797_v63 }
  0x73   :  { %1212 = vmatmul.bf16.gmra.mxu3 %v1658_v2  ;;  %1261 = vmatmul.bf16.gmra.mxu0 %v1662_v3  ;;  %v1799_v2 = vld [vmem:[%s3126_s0 + $0x224] sm:$0xf0] }
  0x74   :  { %v1805_v3 = vld [vmem:[%s3126_s0 + $0x208] sm:$0xf]  ;;  %v1802_v12 = vor.u32 %v2175_v1, %v1799_v2 }
  0x75   :  { %v1806_v13 = vor.u32 %v2180_v4, %v1805_v3 }
  0x81   :  { %1119 = vmatmul.bf16.gmra.mxu1 %v1686_v16  ;;  %1168 = vmatmul.bf16.gmra.mxu2 %v1690_v17 }
  0x83   :  { %1217 = vmatmul.bf16.gmra.mxu3 %v1694_v18  ;;  %1266 = vmatmul.bf16.gmra.mxu0 %v1698_v19 }
  0x91   :  { %1124 = vmatmul.bf16.gmra.mxu1 %v1722_v32  ;;  %1173 = vmatmul.bf16.gmra.mxu2 %v1726_v33  ;;  %v1558_v33 = vor.u32 %v2113_v21, %v1555_v22 }
  0x93   :  { %1222 = vmatmul.bf16.gmra.mxu3 %v1730_v34  ;;  %1271 = vmatmul.bf16.gmra.mxu0 %v1734_v35  ;;  %v1562_v34 = vor.u32 %v2118_v24, %v1561_v23 }
  0x9e   :  { %v2779_v50 = vpop.f32.mrf.mxu1 }
  0xa0   :  { %v1051_v53 = vpop.f32.mrf.mxu0 }
  0xa1   :  { %1129 = vmatmul.bf16.gmra.mxu1 %v1758_v48  ;;  %1178 = vmatmul.bf16.gmra.mxu2 %v1762_v49  ;;  %v1052_v30 = vadd.f32 %v2784_v54, %v1051_v53  ;;  %v2122_v49 = vld [vmem:[%s3126_s0 + $0x5c] sm:$0xf]  ;;  %v1597_v53 = vld [vmem:[%s3126_s0 + $0x60] sm:$0xf] }
  0xa3   :  { %1227 = vmatmul.bf16.gmra.mxu3 %v1766_v51  ;;  %1276 = vmatmul.bf16.gmra.mxu0 %v1770_v52  ;;  %v1591_v51 = vld [vmem:[%s3126_s0 + $0x7c] sm:$0xf0] }
  0xa4   :  { %v1071_v55 = vpop.f32.mrf.mxu2  ;;  %v1594_v3 = vor.u32 %v2122_v49, %v1591_v51 }
  0xa5   :  { %v2787_v56 = vadd.f32 %v2784_v54, %v1071_v55  ;;  %v2127_v55 = vld [vmem:[%s3126_s0 + $0x80] sm:$0xf0] }
  0xa6   :  { %v1081_v57 = vpop.f32.mrf.mxu3  ;;  %v2792_v59 = vpop.f32.mrf.mxu1  ;;  %v1598_v4 = vor.u32 %v2127_v55, %v1597_v53 }
  0xa7   :  { %v2790_v58 = vadd.f32 %v2784_v54, %v1081_v57  ;;  %v2123_v57 = vld [vmem:[%s3126_s0 + $0x64] sm:$0xf] }
  0xa8   :  { %v1053_v60 = vpop.f32.mrf.mxu0 }
  0xa9   :  { %v1054_v42 = vadd.f32 %v2784_v54, %v1053_v60  ;;  %v1599_v60 = vld [vmem:[%s3126_s0 + $0x84] sm:$0xf0] }
  0xac   :  { %v1073_v5 = vpop.f32.mrf.mxu2 }
  0xad   :  { %v2819_v6 = vadd.f32 %v2784_v54, %v1073_v5 }
  0xae   :  { %v1083_v7 = vpop.f32.mrf.mxu3  ;;  %v2824_v11 = vpop.f32.mrf.mxu1 }
  0xaf   :  { %v2822_v10 = vadd.f32 %v2784_v54, %v1083_v7  ;;  %v1602_v7 = vor.u32 %v2123_v57, %v1599_v60 }
  0xb0   :  { %v1056_v14 = vpop.f32.mrf.mxu0 }
  0xb1   :  { %1134 = vmatmul.bf16.gmra.mxu1 %v1794_v8  ;;  %1183 = vmatmul.bf16.gmra.mxu2 %v1798_v9  ;;  %v1057_v0 = vadd.f32 %v2784_v54, %v1056_v14  ;;  %v1606_v8 = vor.u32 %v2128_v62, %v1605_v61 }
  0xb3   :  { %1232 = vmatmul.bf16.gmra.mxu3 %v1802_v12  ;;  %1281 = vmatmul.bf16.gmra.mxu0 %v1806_v13 }
  0xb4   :  { %v1076_v15 = vpop.f32.mrf.mxu2 }
  0xb5   :  { %v2827_v16 = vadd.f32 %v2784_v54, %v1076_v15 }
  0xb6   :  { %v1086_v17 = vpop.f32.mrf.mxu3  ;;  %v2832_v19 = vpop.f32.mrf.mxu1 }
  0xb7   :  { %v2830_v18 = vadd.f32 %v2784_v54, %v1086_v17 }
  0xb8   :  { %v1058_v20 = vpop.f32.mrf.mxu0 }
  0xb9   :  { %v1059_v21 = vadd.f32 %v2784_v54, %v1058_v20  ;;  %v1633_v20 = vld [vmem:[%s3126_s0 + $0xa8] sm:$0xf] }
  0xbc   :  { %v1078_v29 = vpop.f32.mrf.mxu2 }
  0xbd   :  { %v2860_v31 = vadd.f32 %v2784_v54, %v1078_v29 }
  0xbe   :  { %v1088_v32 = vpop.f32.mrf.mxu3  ;;  %v1100_v36 = vpop.f32.mrf.mxu1 }
  0xbf   :  { %v2863_v35 = vadd.f32 %v2784_v54, %v1088_v32  ;;  %v1101_v39 = vadd.f32 %v1100_v36, %v1052_v30  ;;  %v2136_v30 = vld [vmem:[%s3126_s0 + $0xc8] sm:$0xf0]  ;;  %v2137_v36 = vld [vmem:[%s3126_s0 + $0xd0] sm:$0xf0] }
  0xc0   :  { %v1247_v40 = vpop.f32.mrf.mxu0  ;;  %v2132_v32 = vld [vmem:[%s3126_s0 + $0xac] sm:$0xf] }
  0xc1   :  { %1295 = vmatmul.bf16.vlgmr.msra.gmra.mxu1 %v1558_v33  ;;  %1344 = vmatmul.bf16.vlgmr.msra.gmra.mxu2 %v1562_v34  ;;  %v1635_v33 = vld [vmem:[%s3126_s0 + $0xcc] sm:$0xf0] }
  0xc2   :  { %v1641_v34 = vld [vmem:[%s3126_s0 + $0xb0] sm:$0xf] }
  0xc3   :  { %1393 = vmatmul.bf16.vlgmr.msra.gmra.mxu3 %v1566_v37  ;;  %1442 = vmatmul.bf16.vlgmr.msra.gmra.mxu0 %v1570_v38  ;;  %v1062_v38 = vadd.f32 %v2784_v54, %v2779_v50  ;;  %v1064_v50 = vadd.f32 %v2784_v54, %v2792_v59  ;;  %v1669_v59 = vld [vmem:[%s3126_s0 + $0xf0] sm:$0xf] }
  0xc4   :  { %v1149_v41 = vpop.f32.mrf.mxu2 }
  0xc5   :  { %v1150_v43 = vadd.f32 %v1149_v41, %v1101_v39  ;;  %v1630_v41 = vor.u32 %v2131_v27, %v1627_v28 }
  0xc6   :  { %v1198_v44 = vpop.f32.mrf.mxu3  ;;  %v1102_v45 = vpop.f32.mrf.mxu1 }
  0xc7   :  { %v1199_v46 = vadd.f32 %v1198_v44, %v1150_v43  ;;  %v1103_v47 = vadd.f32 %v1102_v45, %v1054_v42  ;;  %v1634_v42 = vor.u32 %v2136_v30, %v1633_v20  ;;  %v1638_v44 = vor.u32 %v2132_v32, %v1635_v33 }
  0xc8   :  { %v1249_v48 = vpop.f32.mrf.mxu0  ;;  %v1642_v45 = vor.u32 %v2137_v36, %v1641_v34 }
  0xc9   :  { %v2872_v52 = vadd.f32 %v1247_v40, %v1199_v46 }
  0xcc   :  { %v1151_v63 = vpop.f32.mrf.mxu2 }
  0xcd   :  { %v1152_v1 = vadd.f32 %v1151_v63, %v1103_v47  ;;  %v2140_v63 = vld [vmem:[%s3126_s0 + $0xec] sm:$0xf] }
  0xce   :  { %v1200_v2 = vpop.f32.mrf.mxu3  ;;  %v1105_v5 = vpop.f32.mrf.mxu1 }
  0xcf   :  { %v1201_v9 = vadd.f32 %v1200_v2, %v1152_v1  ;;  %v1106_v12 = vadd.f32 %v1105_v5, %v1057_v0  ;;  %v1663_v0 = vld [vmem:[%s3126_s0 + $0x10c] sm:$0xf0]  ;;  %v2145_v2 = vld [vmem:[%s3126_s0 + $0x110] sm:$0xf0]  ;;  %v1677_v5 = vld [vmem:[%s3126_s0 + $0xf8] sm:$0xf] }
  0xd0   :  { %v1252_v13 = vpop.f32.mrf.mxu0 }
  0xd1   :  { %1300 = vmatmul.bf16.gmra.mxu1 %v1594_v3  ;;  %1349 = vmatmul.bf16.gmra.mxu2 %v1598_v4  ;;  %v2893_v15 = vadd.f32 %v1249_v48, %v1201_v9  ;;  %v2141_v3 = vld [vmem:[%s3126_s0 + $0xf4] sm:$0xf]  ;;  %v1671_v4 = vld [vmem:[%s3126_s0 + $0x114] sm:$0xf0]  ;;  %v1067_v9 = vadd.f32 %v2784_v54, %v2824_v11  ;;  %v1069_v11 = vadd.f32 %v2784_v54, %v2832_v19  ;;  %v2154_v19 = vld [vmem:[%s3126_s0 + $0x158] sm:$0xf0] }
  0xd2   :  { %v1705_v54 = vld [vmem:[%s3126_s0 + $0x138] sm:$0xf] }
  0xd3   :  { %1398 = vmatmul.bf16.gmra.mxu3 %v1602_v7  ;;  %1447 = vmatmul.bf16.gmra.mxu0 %v1606_v8  ;;  %v2146_v7 = vld [vmem:[%s3126_s0 + $0x118] sm:$0xf0] }
  0xd4   :  { %v1154_v17 = vpop.f32.mrf.mxu2 }
  0xd5   :  { %v1155_v14 = vadd.f32 %v1154_v17, %v1106_v12  ;;  %v1666_v17 = vor.u32 %v2140_v63, %v1663_v0 }
  0xd6   :  { %v1203_v22 = vpop.f32.mrf.mxu3  ;;  %v1107_v23 = vpop.f32.mrf.mxu1 }
  0xd7   :  { %v1204_v24 = vadd.f32 %v1203_v22, %v1155_v14  ;;  %v1108_v25 = vadd.f32 %v1107_v23, %v1059_v21  ;;  %v1670_v21 = vor.u32 %v2145_v2, %v1669_v59  ;;  %v1674_v22 = vor.u32 %v2141_v3, %v1671_v4 }
  0xd8   :  { %v1254_v26 = vpop.f32.mrf.mxu0  ;;  %v1678_v23 = vor.u32 %v2146_v7, %v1677_v5  ;;  %v2158_v5 = vld [vmem:[%s3126_s0 + $0x17c] sm:$0xf] }
  0xd9   :  { %v2902_v29 = vadd.f32 %v1252_v13, %v1204_v24 }
  0xdc   :  { %v1156_v37 = vpop.f32.mrf.mxu2 }
  0xdd   :  { %v1157_v39 = vadd.f32 %v1156_v37, %v1108_v25  ;;  %v2149_v37 = vld [vmem:[%s3126_s0 + $0x134] sm:$0xf] }
  0xde   :  { %v1205_v40 = vpop.f32.mrf.mxu3  ;;  %v1110_v43 = vpop.f32.mrf.mxu1 }
  0xdf   :  { %v1206_v46 = vadd.f32 %v1205_v40, %v1157_v39  ;;  %v1111_v47 = vadd.f32 %v1110_v43, %v1062_v38  ;;  %v1699_v38 = vld [vmem:[%s3126_s0 + $0x154] sm:$0xf0]  ;;  %v2150_v40 = vld [vmem:[%s3126_s0 + $0x13c] sm:$0xf]  ;;  %v2155_v43 = vld [vmem:[%s3126_s0 + $0x160] sm:$0xf0] }
  0xe0   :  { %v1257_v48 = vpop.f32.mrf.mxu0 }
  0xe1   :  { %1305 = vmatmul.bf16.gmra.mxu1 %v1630_v41  ;;  %1354 = vmatmul.bf16.gmra.mxu2 %v1634_v42  ;;  %v2924_v49 = vadd.f32 %v1254_v26, %v1206_v46  ;;  %v1707_v41 = vld [vmem:[%s3126_s0 + $0x15c] sm:$0xf0] }
  0xe2   :  { %v1713_v42 = vld [vmem:[%s3126_s0 + $0x140] sm:$0xf] }
  0xe3   :  { %1403 = vmatmul.bf16.gmra.mxu3 %v1638_v44  ;;  %1452 = vmatmul.bf16.gmra.mxu0 %v1642_v45 }
  0xe4   :  { %v1159_v51 = vpop.f32.mrf.mxu2 }
  0xe5   :  { %v1160_v53 = vadd.f32 %v1159_v51, %v1111_v47  ;;  %v1702_v47 = vor.u32 %v2149_v37, %v1699_v38 }
  0xe6   :  { %v1208_v55 = vpop.f32.mrf.mxu3  ;;  %v1112_v57 = vpop.f32.mrf.mxu1 }
  0xe7   :  { %v1209_v60 = vadd.f32 %v1208_v55, %v1160_v53  ;;  %v1113_v61 = vadd.f32 %v1112_v57, %v1064_v50  ;;  %v1710_v50 = vor.u32 %v2150_v40, %v1707_v41  ;;  %v1714_v53 = vor.u32 %v2155_v43, %v1713_v42  ;;  %v2167_v40 = vld [vmem:[%s3126_s0 + $0x1c4] sm:$0xf]  ;;  %v1777_v42 = vld [vmem:[%s3126_s0 + $0x1c8] sm:$0xf]  ;;  %v2172_v43 = vld [vmem:[%s3126_s0 + $0x1e8] sm:$0xf0] }
  0xe8   :  { %v1259_v62 = vpop.f32.mrf.mxu0 }
  0xe9   :  { %v2934_v1 = vadd.f32 %v1257_v48, %v1209_v60  ;;  %v1706_v48 = vor.u32 %v2154_v19, %v1705_v54 }
  0xec   :  { %v1161_v8 = vpop.f32.mrf.mxu2 }
  0xed   :  { %v1162_v12 = vadd.f32 %v1161_v8, %v1113_v61  ;;  %v1741_v8 = vld [vmem:[%s3126_s0 + $0x180] sm:$0xf] }
  0xee   :  { %v1210_v13 = vpop.f32.mrf.mxu3  ;;  %v1115_v14 = vpop.f32.mrf.mxu1 }
  0xef   :  { %v1211_v24 = vadd.f32 %v1210_v13, %v1162_v12  ;;  %v1116_v25 = vadd.f32 %v1115_v14, %v1067_v9  ;;  %v2163_v9 = vld [vmem:[%s3126_s0 + $0x1a0] sm:$0xf0]  ;;  %v1743_v12 = vld [vmem:[%s3126_s0 + $0x1a4] sm:$0xf0] }
  0xf0   :  { %v1262_v26 = vpop.f32.mrf.mxu0  ;;  %v1749_v13 = vld [vmem:[%s3126_s0 + $0x188] sm:$0xf] }
  0xf1   :  { %1310 = vmatmul.bf16.gmra.mxu1 %v1666_v17  ;;  %1359 = vmatmul.bf16.gmra.mxu2 %v1670_v21  ;;  %v2956_v27 = vadd.f32 %v1259_v62, %v1211_v24  ;;  %v2164_v17 = vld [vmem:[%s3126_s0 + $0x1a8] sm:$0xf0]  ;;  %v1742_v24 = vor.u32 %v2163_v9, %v1741_v8 }
  0xf3   :  { %1408 = vmatmul.bf16.gmra.mxu3 %v1674_v22  ;;  %1457 = vmatmul.bf16.gmra.mxu0 %v1678_v23 }
  0xf4   :  { %v1164_v28 = vpop.f32.mrf.mxu2 }
  0xf5   :  { %v1165_v20 = vadd.f32 %v1164_v28, %v1116_v25  ;;  %v1750_v28 = vor.u32 %v2164_v17, %v1749_v13  ;;  %v1813_v13 = vld [vmem:[%s3126_s0 + $0x210] sm:$0xf]  ;;  %v2181_v17 = vld [vmem:[%s3126_s0 + $0x230] sm:$0xf0] }
  0xf6   :  { %v1213_v30 = vpop.f32.mrf.mxu3  ;;  %v1117_v32 = vpop.f32.mrf.mxu1 }
  0xf7   :  { %v1214_v33 = vadd.f32 %v1213_v30, %v1165_v20  ;;  %v1118_v34 = vadd.f32 %v1117_v32, %v1069_v11 }
  0xf8   :  { %v1264_v36 = vpop.f32.mrf.mxu0 }
  0xf9   :  { %v2966_v39 = vadd.f32 %v1262_v26, %v1214_v33 }
  0xfc   :  { %v1166_v44 = vpop.f32.mrf.mxu2 }
  0xfd   :  { %v1167_v45 = vadd.f32 %v1166_v44, %v1118_v34  ;;  %v1779_v44 = vld [vmem:[%s3126_s0 + $0x1ec] sm:$0xf0] }
  0xfe   :  { %v1215_v46 = vpop.f32.mrf.mxu3  ;;  %v1120_v51 = vpop.f32.mrf.mxu1 }
  0xff   :  { %v1216_v55 = vadd.f32 %v1215_v46, %v1167_v45  ;;  %v1121_v57 = vadd.f32 %v1120_v51, %v2787_v56  ;;  %v1735_v56 = vld [vmem:[%s3126_s0 + $0x19c] sm:$0xf0]  ;;  %v1785_v45 = vld [vmem:[%s3126_s0 + $0x1d0] sm:$0xf]  ;;  %v2173_v46 = vld [vmem:[%s3126_s0 + $0x1f0] sm:$0xf0] }
 0x100   :  { %v1267_v60 = vpop.f32.mrf.mxu0  ;;  %v1738_v23 = vor.u32 %v2158_v5, %v1735_v56 }
 0x101   :  { %1315 = vmatmul.bf16.gmra.mxu1 %v1702_v47  ;;  %1364 = vmatmul.bf16.gmra.mxu2 %v1706_v48  ;;  %v2987_v61 = vadd.f32 %v1264_v36, %v1216_v55 }
 0x103   :  { %1413 = vmatmul.bf16.gmra.mxu3 %v1710_v50  ;;  %1462 = vmatmul.bf16.gmra.mxu0 %v1714_v53  ;;  %v1778_v53 = vor.u32 %v2172_v43, %v1777_v42 }
 0x104   :  { %v1169_v62 = vpop.f32.mrf.mxu2 }
 0x105   :  { %v1170_v63 = vadd.f32 %v1169_v62, %v1121_v57 }
 0x106   :  { %v1218_v0 = vpop.f32.mrf.mxu3  ;;  %v1122_v59 = vpop.f32.mrf.mxu1 }
 0x107   :  { %v1219_v2 = vadd.f32 %v1218_v0, %v1170_v63  ;;  %v1123_v3 = vadd.f32 %v1122_v59, %v2819_v6  ;;  %v2159_v6 = vld [vmem:[%s3126_s0 + $0x184] sm:$0xf] }
 0x108   :  { %v1269_v4 = vpop.f32.mrf.mxu0  ;;  %v1746_v26 = vor.u32 %v2159_v6, %v1743_v12  ;;  %v2176_v6 = vld [vmem:[%s3126_s0 + $0x20c] sm:$0xf] }
 0x109   :  { %v2996_v7 = vadd.f32 %v1267_v60, %v1219_v2  ;;  %v1786_v60 = vor.u32 %v2173_v46, %v1785_v45 }
 0x10c   :  { %v1171_v21 = vpop.f32.mrf.mxu2 }
 0x10d   :  { %v1172_v14 = vadd.f32 %v1171_v21, %v1123_v3  ;;  %v1815_v21 = vld [vmem:[%s3126_s0 + $0x234] sm:$0xf0] }
 0x10e   :  { %v1220_v22 = vpop.f32.mrf.mxu3  ;;  %v1125_v25 = vpop.f32.mrf.mxu1 }
 0x10f   :  { %v1221_v11 = vadd.f32 %v1220_v22, %v1172_v14  ;;  %v1126_v20 = vadd.f32 %v1125_v25, %v2827_v16  ;;  %v1771_v16 = vld [vmem:[%s3126_s0 + $0x1e4] sm:$0xf0]  ;;  %v1821_v14 = vld [vmem:[%s3126_s0 + $0x218] sm:$0xf]  ;;  %v2182_v22 = vld [vmem:[%s3126_s0 + $0x238] sm:$0xf0] }
 0x110   :  { %v1272_v30 = vpop.f32.mrf.mxu0  ;;  %v1774_v50 = vor.u32 %v2167_v40, %v1771_v16 }
 0x111   :  { %1320 = vmatmul.bf16.gmra.mxu1 %v1738_v23  ;;  %1369 = vmatmul.bf16.gmra.mxu2 %v1742_v24  ;;  %v3017_v32 = vadd.f32 %v1269_v4, %v1221_v11 }
 0x113   :  { %1418 = vmatmul.bf16.gmra.mxu3 %v1746_v26  ;;  %1467 = vmatmul.bf16.gmra.mxu0 %v1750_v28  ;;  %v1814_v28 = vor.u32 %v2181_v17, %v1813_v13 }
 0x114   :  { %v1174_v33 = vpop.f32.mrf.mxu2 }
 0x115   :  { %v1175_v34 = vadd.f32 %v1174_v33, %v1126_v20 }
 0x116   :  { %v1223_v36 = vpop.f32.mrf.mxu3  ;;  %v1127_v37 = vpop.f32.mrf.mxu1 }
 0x117   :  { %v1224_v38 = vadd.f32 %v1223_v36, %v1175_v34  ;;  %v1128_v54 = vadd.f32 %v1127_v37, %v2860_v31  ;;  %v2168_v31 = vld [vmem:[%s3126_s0 + $0x1cc] sm:$0xf] }
 0x118   :  { %v1274_v19 = vpop.f32.mrf.mxu0  ;;  %v1782_v57 = vor.u32 %v2168_v31, %v1779_v44 }
 0x119   :  { %v3026_v41 = vadd.f32 %v1272_v30, %v1224_v38  ;;  %v1822_v30 = vor.u32 %v2182_v22, %v1821_v14 }
 0x11c   :  { %v1176_v47 = vpop.f32.mrf.mxu2 }
 0x11d   :  { %v1177_v48 = vadd.f32 %v1176_v47, %v1128_v54 }
 0x11e   :  { %v1225_v51 = vpop.f32.mrf.mxu3  ;;  %v1130_v55 = vpop.f32.mrf.mxu1 }
 0x11f   :  { %v1226_v62 = vadd.f32 %v1225_v51, %v1177_v48  ;;  %v1131_v63 = vadd.f32 %v1130_v55, %v2790_v58  ;;  %v1807_v58 = vld [vmem:[%s3126_s0 + $0x22c] sm:$0xf0] }
 0x120   :  { %v1277_v0 = vpop.f32.mrf.mxu0  ;;  %v1810_v26 = vor.u32 %v2176_v6, %v1807_v58 }
 0x121   :  { %1325 = vmatmul.bf16.gmra.mxu1 %v1774_v50  ;;  %1374 = vmatmul.bf16.gmra.mxu2 %v1778_v53  ;;  %v3047_v59 = vadd.f32 %v1274_v19, %v1226_v62 }
 0x123   :  { %1423 = vmatmul.bf16.gmra.mxu3 %v1782_v57  ;;  %1472 = vmatmul.bf16.gmra.mxu0 %v1786_v60 }
 0x124   :  { %v1179_v2 = vpop.f32.mrf.mxu2 }
 0x125   :  { %v1180_v3 = vadd.f32 %v1179_v2, %v1131_v63 }
 0x126   :  { %v1228_v4 = vpop.f32.mrf.mxu3  ;;  %v1132_v5 = vpop.f32.mrf.mxu1 }
 0x127   :  { %v1229_v56 = vadd.f32 %v1228_v4, %v1180_v3  ;;  %v1133_v8 = vadd.f32 %v1132_v5, %v2822_v10  ;;  %v2177_v10 = vld [vmem:[%s3126_s0 + $0x214] sm:$0xf] }
 0x128   :  { %v1279_v9 = vpop.f32.mrf.mxu0  ;;  %v1818_v20 = vor.u32 %v2177_v10, %v1815_v21 }
 0x129   :  { %v3056_v12 = vadd.f32 %v1277_v0, %v1229_v56 }
 0x12c   :  { %v1181_v23 = vpop.f32.mrf.mxu2 }
 0x12d   :  { %v1182_v24 = vadd.f32 %v1181_v23, %v1133_v8 }
 0x12e   :  { %v1230_v25 = vpop.f32.mrf.mxu3  ;;  %v1135_v11 = vpop.f32.mrf.mxu1 }
 0x12f   :  { %v1231_v33 = vadd.f32 %v1230_v25, %v1182_v24  ;;  %v1136_v34 = vadd.f32 %v1135_v11, %v2830_v18 }
 0x130   :  { %v1282_v36 = vpop.f32.mrf.mxu0 }
 0x131   :  { %1330 = vmatmul.bf16.gmra.mxu1 %v1810_v26  ;;  %1379 = vmatmul.bf16.gmra.mxu2 %v1814_v28  ;;  %v3077_v37 = vadd.f32 %v1279_v9, %v1231_v33 }
 0x133   :  { %1428 = vmatmul.bf16.gmra.mxu3 %v1818_v20  ;;  %1477 = vmatmul.bf16.gmra.mxu0 %v1822_v30 }
 0x134   :  { %v1184_v38 = vpop.f32.mrf.mxu2 }
 0x135   :  { %v1185_v54 = vadd.f32 %v1184_v38, %v1136_v34 }
 0x136   :  { %v1233_v19 = vpop.f32.mrf.mxu3  ;;  %v1137_v40 = vpop.f32.mrf.mxu1 }
 0x137   :  { %v1234_v16 = vadd.f32 %v1233_v19, %v1185_v54  ;;  %v1138_v42 = vadd.f32 %v1137_v40, %v2863_v35 }
 0x138   :  { %v1284_v43 = vpop.f32.mrf.mxu0 }
 0x139   :  { %v3080_v31 = vadd.f32 %v1282_v36, %v1234_v16 }
 0x13c   :  { %v1186_v44 = vpop.f32.mrf.mxu2 }
 0x13d   :  { %v1187_v45 = vadd.f32 %v1186_v44, %v1138_v42 }
 0x13e   :  { %v1235_v18 = vpop.f32.mrf.mxu3  ;;  %v1296_v46 = vpop.f32.mrf.mxu1 }
 0x13f   :  { %v1236_v47 = vadd.f32 %v1235_v18, %v1187_v45  ;;  %v1297_v53 = vadd.f32 %v1296_v46, %v2872_v52 }
 0x140   :  { %v1443_v48 = vpop.f32.mrf.mxu0 }
 0x141   :  { %v3082_v51 = vadd.f32 %v1284_v43, %v1236_v47 }
 0x144   :  { %v1345_v50 = vpop.f32.mrf.mxu2 }
 0x145   :  { %v1346_v60 = vadd.f32 %v1345_v50, %v1297_v53 }
 0x146   :  { %v1394_v55 = vpop.f32.mrf.mxu3  ;;  %v1298_v57 = vpop.f32.mrf.mxu1 }
 0x147   :  { %v1395_v63 = vadd.f32 %v1394_v55, %v1346_v60  ;;  %v1299_v35 = vadd.f32 %v1298_v57, %v2893_v15 }
 0x148   :  { %v1445_v62 = vpop.f32.mrf.mxu0 }
 0x149   :  { %v1444_v5 = vadd.f32 %v1443_v48, %v1395_v63 }
 0x14b   :  { %v1483_v6 = vmax.f32 %v1444_v5, 0.0 }
 0x14c   :  { %v1347_v0 = vpop.f32.mrf.mxu2 }
 0x14d   :  { %v1348_v2 = vadd.f32 %v1347_v0, %v1299_v35 }
 0x14e   :  { %v1396_v3 = vpop.f32.mrf.mxu3  ;;  %v1301_v4 = vpop.f32.mrf.mxu1 }
 0x14f   :  { %v1397_v56 = vadd.f32 %v1396_v3, %v1348_v2  ;;  %v1302_v52 = vadd.f32 %v1301_v4, %v2902_v29 }
 0x150   :  { %v1448_v8 = vpop.f32.mrf.mxu0 }
 0x151   :  { %v1446_v9 = vadd.f32 %v1445_v62, %v1397_v56 }
 0x153   :  { %v1484_v58 = vmax.f32 %v1446_v9, 0.0 }
 0x154   :  { %v1350_v13 = vpop.f32.mrf.mxu2 }
 0x155   :  { %v2258_v17 = vpack.c.bf16 %v1484_v58, %v1483_v6  ;;  %v1351_v15 = vadd.f32 %v1350_v13, %v1302_v52 }
 0x156   :  { %v1399_v10 = vpop.f32.mrf.mxu3  ;;  %v1303_v21 = vpop.f32.mrf.mxu1 }
 0x157   :  { %2259 = vst [vmem:[%s3127_s3] sm:$0xff] %v2258_v17   ;;  %v1400_v22 = vadd.f32 %v1399_v10, %v1351_v15  ;;  %v1304_v23 = vadd.f32 %v1303_v21, %v2924_v49 }
 0x158   :  { %v1450_v14 = vpop.f32.mrf.mxu0 }
 0x159   :  { %v1449_v11 = vadd.f32 %v1448_v8, %v1400_v22 }
 0x15b   :  { %v1485_v29 = vmax.f32 %v1449_v11, 0.0 }
 0x15c   :  { %v1352_v24 = vpop.f32.mrf.mxu2 }
 0x15d   :  { %v1353_v25 = vadd.f32 %v1352_v24, %v1304_v23 }
 0x15e   :  { %v1401_v26 = vpop.f32.mrf.mxu3  ;;  %v1306_v28 = vpop.f32.mrf.mxu1 }
 0x15f   :  { %v1402_v20 = vadd.f32 %v1401_v26, %v1353_v25  ;;  %v1307_v54 = vadd.f32 %v1306_v28, %v2934_v1 }
 0x160   :  { %v1453_v30 = vpop.f32.mrf.mxu0 }
 0x161   :  { %v1451_v33 = vadd.f32 %v1450_v14, %v1402_v20 }
 0x163   :  { %v1486_v34 = vmax.f32 %v1451_v33, 0.0 }
 0x164   :  { %v1355_v36 = vpop.f32.mrf.mxu2 }
 0x165   :  { %v2263_v38 = vpack.c.bf16 %v1486_v34, %v1485_v29  ;;  %v1356_v49 = vadd.f32 %v1355_v36, %v1307_v54 }
 0x166   :  { %v1404_v19 = vpop.f32.mrf.mxu3  ;;  %v1308_v40 = vpop.f32.mrf.mxu1 }
 0x167   :  { %2295 = vst [vmem:[%s3127_s3 + $0x8] sm:$0xff] %v2263_v38   ;;  %v1405_v42 = vadd.f32 %v1404_v19, %v1356_v49  ;;  %v1309_v43 = vadd.f32 %v1308_v40, %v2956_v27 }
 0x168   :  { %v1455_v16 = vpop.f32.mrf.mxu0 }
 0x169   :  { %v1454_v47 = vadd.f32 %v1453_v30, %v1405_v42 }
 0x16b   :  { %v1487_v1 = vmax.f32 %v1454_v47, 0.0 }
 0x16c   :  { %v1357_v44 = vpop.f32.mrf.mxu2 }
 0x16d   :  { %v1358_v45 = vadd.f32 %v1357_v44, %v1309_v43 }
 0x16e   :  { %v1406_v18 = vpop.f32.mrf.mxu3  ;;  %v1311_v46 = vpop.f32.mrf.mxu1 }
 0x16f   :  { %v1407_v48 = vadd.f32 %v1406_v18, %v1358_v45  ;;  %v1312_v62 = vadd.f32 %v1311_v46, %v2966_v39 }
 0x170   :  { %v1458_v50 = vpop.f32.mrf.mxu0 }
 0x171   :  { %v1456_v53 = vadd.f32 %v1455_v16, %v1407_v48 }
 0x173   :  { %v1488_v55 = vmax.f32 %v1456_v53, 0.0 }
 0x174   :  { %v1360_v57 = vpop.f32.mrf.mxu2 }
 0x175   :  { %v2268_v60 = vpack.c.bf16 %v1488_v55, %v1487_v1  ;;  %v1361_v27 = vadd.f32 %v1360_v57, %v1312_v62 }
 0x176   :  { %v1409_v63 = vpop.f32.mrf.mxu3  ;;  %v1313_v35 = vpop.f32.mrf.mxu1 }
 0x177   :  { %2296 = vst [vmem:[%s3127_s3 + $0x10] sm:$0xff] %v2268_v60   ;;  %v1410_v2 = vadd.f32 %v1409_v63, %v1361_v27  ;;  %v1314_v3 = vadd.f32 %v1313_v35, %v2987_v61 }
 0x178   :  { %v1460_v0 = vpop.f32.mrf.mxu0 }
 0x179   :  { %v1459_v9 = vadd.f32 %v1458_v50, %v1410_v2 }
 0x17b   :  { %v1489_v39 = vmax.f32 %v1459_v9, 0.0 }
 0x17c   :  { %v1362_v4 = vpop.f32.mrf.mxu2 }
 0x17d   :  { %v1363_v5 = vadd.f32 %v1362_v4, %v1314_v3 }
 0x17e   :  { %v1411_v56 = vpop.f32.mrf.mxu3  ;;  %v1316_v8 = vpop.f32.mrf.mxu1 }
 0x17f   :  { %v1412_v6 = vadd.f32 %v1411_v56, %v1363_v5  ;;  %v1317_v21 = vadd.f32 %v1316_v8, %v2996_v7 }
 0x180   :  { %v1463_v58 = vpop.f32.mrf.mxu0 }
 0x181   :  { %v1461_v13 = vadd.f32 %v1460_v0, %v1412_v6 }
 0x183   :  { %v1490_v17 = vmax.f32 %v1461_v13, 0.0 }
 0x184   :  { %v1365_v52 = vpop.f32.mrf.mxu2 }
 0x185   :  { %v2273_v10 = vpack.c.bf16 %v1490_v17, %v1489_v39  ;;  %v1366_v61 = vadd.f32 %v1365_v52, %v1317_v21 }
 0x186   :  { %v1414_v15 = vpop.f32.mrf.mxu3  ;;  %v1318_v14 = vpop.f32.mrf.mxu1 }
 0x187   :  { %2297 = vst [vmem:[%s3127_s3 + $0x18] sm:$0xff] %v2273_v10   ;;  %v1415_v23 = vadd.f32 %v1414_v15, %v1366_v61  ;;  %v1319_v24 = vadd.f32 %v1318_v14, %v3017_v32 }
 0x188   :  { %v1465_v22 = vpop.f32.mrf.mxu0 }
 0x189   :  { %v1464_v20 = vadd.f32 %v1463_v58, %v1415_v23 }
 0x18b   :  { %v1491_v7 = vmax.f32 %v1464_v20, 0.0 }
 0x18c   :  { %v1367_v25 = vpop.f32.mrf.mxu2 }
 0x18d   :  { %v1368_v26 = vadd.f32 %v1367_v25, %v1319_v24 }
 0x18e   :  { %v1416_v28 = vpop.f32.mrf.mxu3  ;;  %v1321_v11 = vpop.f32.mrf.mxu1 }
 0x18f   :  { %v1417_v30 = vadd.f32 %v1416_v28, %v1368_v26  ;;  %v1322_v54 = vadd.f32 %v1321_v11, %v3026_v41 }
 0x190   :  { %v1468_v33 = vpop.f32.mrf.mxu0 }
 0x191   :  { %v1466_v29 = vadd.f32 %v1465_v22, %v1417_v30 }
 0x193   :  { %v1492_v34 = vmax.f32 %v1466_v29, 0.0 }
 0x194   :  { %v1370_v36 = vpop.f32.mrf.mxu2 }
 0x195   :  { %v2278_v38 = vpack.c.bf16 %v1492_v34, %v1491_v7  ;;  %v1371_v32 = vadd.f32 %v1370_v36, %v1322_v54 }
 0x196   :  { %v1419_v19 = vpop.f32.mrf.mxu3  ;;  %v1323_v40 = vpop.f32.mrf.mxu1 }
 0x197   :  { %2298 = vst [vmem:[%s3127_s3 + $0x20] sm:$0xff] %v2278_v38   ;;  %v1420_v16 = vadd.f32 %v1419_v19, %v1371_v32  ;;  %v1324_v42 = vadd.f32 %v1323_v40, %v3047_v59 }
 0x198   :  { %v1470_v49 = vpop.f32.mrf.mxu0 }
 0x199   :  { %v1469_v46 = vadd.f32 %v1468_v33, %v1420_v16 }
 0x19b   :  { %v1493_v41 = vmax.f32 %v1469_v46, 0.0 }
 0x19c   :  { %v1372_v43 = vpop.f32.mrf.mxu2 }
 0x19d   :  { %v1373_v44 = vadd.f32 %v1372_v43, %v1324_v42 }
 0x19e   :  { %v1421_v45 = vpop.f32.mrf.mxu3  ;;  %v1326_v18 = vpop.f32.mrf.mxu1 }
 0x19f   :  { %v1422_v47 = vadd.f32 %v1421_v45, %v1373_v44  ;;  %v1327_v57 = vadd.f32 %v1326_v18, %v3056_v12 }
 0x1a0   :  { %v1473_v50 = vpop.f32.mrf.mxu0 }
 0x1a1   :  { %v1471_v48 = vadd.f32 %v1470_v49, %v1422_v47 }
 0x1a3   :  { %v1494_v53 = vmax.f32 %v1471_v48, 0.0 }
 0x1a4   :  { %v1375_v1 = vpop.f32.mrf.mxu2 }
 0x1a5   :  { %v2283_v55 = vpack.c.bf16 %v1494_v53, %v1493_v41  ;;  %v1376_v59 = vadd.f32 %v1375_v1, %v1327_v57 }
 0x1a6   :  { %v1424_v60 = vpop.f32.mrf.mxu3  ;;  %v1328_v62 = vpop.f32.mrf.mxu1 }
 0x1a7   :  { %2299 = vst [vmem:[%s3127_s3 + $0x28] sm:$0xff] %v2283_v55   ;;  %v1425_v63 = vadd.f32 %v1424_v60, %v1376_v59  ;;  %v1329_v35 = vadd.f32 %v1328_v62, %v3077_v37 }
 0x1a8   :  { %v1475_v27 = vpop.f32.mrf.mxu0 }
 0x1a9   :  { %v1474_v5 = vadd.f32 %v1473_v50, %v1425_v63 }
 0x1ab   :  { %v1495_v9 = vmax.f32 %v1474_v5, 0.0 }
 0x1ac   :  { %v1377_v0 = vpop.f32.mrf.mxu2 }
 0x1ad   :  { %v1378_v2 = vadd.f32 %v1377_v0, %v1329_v35 }
 0x1ae   :  { %v1426_v3 = vpop.f32.mrf.mxu3  ;;  %v1331_v4 = vpop.f32.mrf.mxu1 }
 0x1af   :  { %v1427_v56 = vadd.f32 %v1426_v3, %v1378_v2  ;;  %v1332_v13 = vadd.f32 %v1331_v4, %v3080_v31 }
 0x1b0   :  { %v1478_v17 = vpop.f32.mrf.mxu0 }
 0x1b1   :  { %v1476_v8 = vadd.f32 %v1475_v27, %v1427_v56 }
 0x1b3   :  { %v1496_v12 = vmax.f32 %v1476_v8, 0.0 }
 0x1b4   :  { %v1380_v6 = vpop.f32.mrf.mxu2 }
 0x1b5   :  { %v2288_v58 = vpack.c.bf16 %v1496_v12, %v1495_v9  ;;  %v1381_v37 = vadd.f32 %v1380_v6, %v1332_v13 }
 0x1b6   :  { %v1429_v39 = vpop.f32.mrf.mxu3  ;;  %v1333_v52 = vpop.f32.mrf.mxu1 }
 0x1b7   :  { %2300 = vst [vmem:[%s3127_s3 + $0x30] sm:$0xff] %v2288_v58   ;;  %v1430_v10 = vadd.f32 %v1429_v39, %v1381_v37  ;;  %v1334_v21 = vadd.f32 %v1333_v52, %v3082_v51 }
 0x1b8   :  { %v1480_v24 = vpop.f32.mrf.mxu0 }
 0x1b9   :  { %v1479_v22 = vadd.f32 %v1478_v17, %v1430_v10 }
 0x1bb   :  { %v1497_v26 = vmax.f32 %v1479_v22, 0.0 }
 0x1bc   :  { %v1382_v15 = vpop.f32.mrf.mxu2 }
 0x1bd   :  { %v1383_v14 = vadd.f32 %v1382_v15, %v1334_v21 }
 0x1be   :  { %v1431_v61 = vpop.f32.mrf.mxu3 }
 0x1bf   :  { %v1432_v23 = vadd.f32 %v1431_v61, %v1383_v14 }
 0x1c1   :  { %v1481_v25 = vadd.f32 %v1480_v24, %v1432_v23 }
 0x1c3   :  { %v1498_v31 = vmax.f32 %v1481_v25, 0.0 }
 0x1c5   :  { %v2293_v28 = vpack.c.bf16 %v1498_v31, %v1497_v26 }
 0x1c7   :  { %2301 = vst [vmem:[%s3127_s3 + $0x38] sm:$0xff] %v2293_v28  }

// kernel: l1block_forward.20
= control target key start
LH: loop header
LB: loop body
LE: loop exit
PB: predicated region body
PF: predicated region fallthrough
CT: control target
= control target key end

     0   :  { %s3243_s1 = inlined_call_operand.vmem [shape: bf16[1152,128], index: 1, kind: input, shape index: {}]   ;;  %s3244_s2 = inlined_call_operand.vmem [shape: f32[1,128], index: 2, kind: input, shape index: {}]   ;;  %s3245_s0 = inlined_call_operand.vmem [shape: bf16[128,1152], index: 0, kind: input, shape index: {}]   ;;  %s3246_s3 = inlined_call_operand.vmem [shape: bf16[128,128], index: 3, kind: input, shape index: {}]   ;;  %s3247_s4 = inlined_call_operand.vmem [shape: bf16[128,128], index: 4, kind: output, shape index: {}]  }
   0x1   :  { %v2241_v0 = vld [vmem:[%s3243_s1 + $0x38] sm:$0xff]  ;;  %v2240_v1 = vld [vmem:[%s3243_s1 + $0x30] sm:$0xff]  ;;  %v2239_v2 = vld [vmem:[%s3243_s1 + $0x28] sm:$0xff] }
   0x2   :  { %2392 = vmatpush.bf16.msra.mxu1 %v2241_v0  ;;  %2393 = vmatpush.bf16.msra.mxu2 %v2241_v0  ;;  %v2238_v3 = vld [vmem:[%s3243_s1 + $0x20] sm:$0xff]  ;;  %v2237_v4 = vld [vmem:[%s3243_s1 + $0x18] sm:$0xff]  ;;  %v2236_v5 = vld [vmem:[%s3243_s1 + $0x10] sm:$0xff] }
   0x3   :  { %2394 = vmatpush.bf16.msra.mxu3 %v2241_v0  ;;  %1045 = vmatpush.bf16.msra.mxu0 %v2241_v0  ;;  %v2235_v6 = vld [vmem:[%s3243_s1 + $0x8] sm:$0xff]  ;;  %v2234_v7 = vld [vmem:[%s3243_s1] sm:$0xff]  ;;  %v1660_v8 = vld [vmem:[%s3245_s0 + $0x90] sm:$0xf] }
   0x4   :  { %v2184_v9 = vld [vmem:[%s3245_s0 + $0xb0] sm:$0xf0]  ;;  %v1732_v10 = vld [vmem:[%s3245_s0 + $0x120] sm:$0xf]  ;;  %v2202_v11 = vld [vmem:[%s3245_s0 + $0x140] sm:$0xf0] }
   0x5   :  { %v1804_v12 = vld [vmem:[%s3245_s0 + $0x1b0] sm:$0xf]  ;;  %v2220_v13 = vld [vmem:[%s3245_s0 + $0x1d0] sm:$0xf0]  ;;  %v1588_v14 = vld [vmem:[%s3245_s0] sm:$0xf]  ;;  %v1661_v18 = vor.u32 %v2184_v9, %v1660_v8  ;;  %v1733_v19 = vor.u32 %v2202_v11, %v1732_v10 }
   0x6   :  { %2395 = vmatpush.bf16.msra.mxu1 %v2240_v1  ;;  %2396 = vmatpush.bf16.msra.mxu2 %v2240_v1  ;;  %v2166_v15 = vld [vmem:[%s3245_s0 + $0x20] sm:$0xf0]  ;;  %v2257_v16 = vld [vmem:[%s3243_s1 + $0xb8] sm:$0xff]  ;;  %v1805_v20 = vor.u32 %v2220_v13, %v1804_v12  ;;  %v2256_v24 = vld [vmem:[%s3243_s1 + $0xb0] sm:$0xff] }
   0x7   :  { %2397 = vmatpush.bf16.msra.mxu3 %v2240_v1  ;;  %1046 = vmatpush.bf16.msra.mxu0 %v2240_v1  ;;  %v2249_v17 = vld [vmem:[%s3243_s1 + $0x78] sm:$0xff]  ;;  %v1589_v21 = vor.u32 %v2166_v15, %v1588_v14  ;;  %v2248_v25 = vld [vmem:[%s3243_s1 + $0x70] sm:$0xff]  ;;  %v2255_v28 = vld [vmem:[%s3243_s1 + $0xa8] sm:$0xff] }
   0x8   :  { %v2265_v22 = vld [vmem:[%s3243_s1 + $0xf8] sm:$0xff]  ;;  %v2264_v26 = vld [vmem:[%s3243_s1 + $0xf0] sm:$0xff]  ;;  %v2247_v29 = vld [vmem:[%s3243_s1 + $0x68] sm:$0xff] }
   0x9   :  { %v2273_v23 = vld [vmem:[%s3243_s1 + $0x138] sm:$0xff]  ;;  %v2272_v27 = vld [vmem:[%s3243_s1 + $0x130] sm:$0xff]  ;;  %v2263_v30 = vld [vmem:[%s3243_s1 + $0xe8] sm:$0xff] }
   0xa   :  { %2398 = vmatpush.bf16.msra.mxu1 %v2239_v2  ;;  %2399 = vmatpush.bf16.msra.mxu2 %v2239_v2  ;;  %v2271_v31 = vld [vmem:[%s3243_s1 + $0x128] sm:$0xff]  ;;  %v2254_v32 = vld [vmem:[%s3243_s1 + $0xa0] sm:$0xff]  ;;  %v1696_v36 = vld [vmem:[%s3245_s0 + $0xd8] sm:$0xf] }
   0xb   :  { %2400 = vmatpush.bf16.msra.mxu3 %v2239_v2  ;;  %1047 = vmatpush.bf16.msra.mxu0 %v2239_v2  ;;  %v2246_v33 = vld [vmem:[%s3243_s1 + $0x60] sm:$0xff]  ;;  %v2193_v37 = vld [vmem:[%s3245_s0 + $0xf8] sm:$0xf0]  ;;  %v1768_v38 = vld [vmem:[%s3245_s0 + $0x168] sm:$0xf] }
   0xc   :  { %v2262_v34 = vld [vmem:[%s3243_s1 + $0xe0] sm:$0xff]  ;;  %v2211_v39 = vld [vmem:[%s3245_s0 + $0x188] sm:$0xf0]  ;;  %v1840_v40 = vld [vmem:[%s3245_s0 + $0x1f8] sm:$0xf]  ;;  %v1697_v46 = vor.u32 %v2193_v37, %v1696_v36 }
   0xd   :  { %v2270_v35 = vld [vmem:[%s3243_s1 + $0x120] sm:$0xff]  ;;  %v2229_v41 = vld [vmem:[%s3245_s0 + $0x218] sm:$0xf0]  ;;  %v1624_v42 = vld [vmem:[%s3245_s0 + $0x48] sm:$0xf]  ;;  %v1769_v47 = vor.u32 %v2211_v39, %v1768_v38 }
   0xe   :  { %2401 = vmatpush.bf16.msra.mxu1 %v2238_v3  ;;  %2402 = vmatpush.bf16.msra.mxu2 %v2238_v3  ;;  %v2175_v43 = vld [vmem:[%s3245_s0 + $0x68] sm:$0xf0]  ;;  %v2253_v44 = vld [vmem:[%s3243_s1 + $0x98] sm:$0xff]  ;;  %v1841_v48 = vor.u32 %v2229_v41, %v1840_v40  ;;  %v2252_v52 = vld [vmem:[%s3243_s1 + $0x90] sm:$0xff] }
   0xf   :  { %2403 = vmatpush.bf16.msra.mxu3 %v2238_v3  ;;  %1048 = vmatpush.bf16.msra.mxu0 %v2238_v3  ;;  %v2245_v45 = vld [vmem:[%s3243_s1 + $0x58] sm:$0xff]  ;;  %v1625_v49 = vor.u32 %v2175_v43, %v1624_v42  ;;  %v2244_v53 = vld [vmem:[%s3243_s1 + $0x50] sm:$0xff]  ;;  %v2251_v56 = vld [vmem:[%s3243_s1 + $0x88] sm:$0xff] }
  0x10   :  { %v2261_v50 = vld [vmem:[%s3243_s1 + $0xd8] sm:$0xff]  ;;  %v2260_v54 = vld [vmem:[%s3243_s1 + $0xd0] sm:$0xff]  ;;  %v2243_v57 = vld [vmem:[%s3243_s1 + $0x48] sm:$0xff] }
  0x11   :  { %v2269_v51 = vld [vmem:[%s3243_s1 + $0x118] sm:$0xff]  ;;  %v2268_v55 = vld [vmem:[%s3243_s1 + $0x110] sm:$0xff]  ;;  %v2259_v58 = vld [vmem:[%s3243_s1 + $0xc8] sm:$0xff] }
  0x12   :  { %2404 = vmatpush.bf16.msra.mxu1 %v2237_v4  ;;  %2405 = vmatpush.bf16.msra.mxu2 %v2237_v4  ;;  %v2267_v59 = vld [vmem:[%s3243_s1 + $0x108] sm:$0xff]  ;;  %v2250_v60 = vld [vmem:[%s3243_s1 + $0x80] sm:$0xff]  ;;  %v2289_v2 = vld [vmem:[%s3243_s1 + $0x1b8] sm:$0xff] }
  0x13   :  { %2406 = vmatpush.bf16.msra.mxu3 %v2237_v4  ;;  %1049 = vmatpush.bf16.msra.mxu0 %v2237_v4  ;;  %v2242_v61 = vld [vmem:[%s3243_s1 + $0x40] sm:$0xff]  ;;  %v1590_v1 = vld [vmem:[%s3245_s0 + $0x24] sm:$0xf0]  ;;  %v2281_v3 = vld [vmem:[%s3243_s1 + $0x178] sm:$0xff] }
  0x14   :  { %v2162_v62 = vld [vmem:[%s3245_s0 + $0x4] sm:$0xf]  ;;  %v1596_v4 = vld [vmem:[%s3245_s0 + $0x8] sm:$0xf]  ;;  %v1604_v8 = vld [vmem:[%s3245_s0 + $0x10] sm:$0xf] }
  0x15   :  { %v2258_v63 = vld [vmem:[%s3243_s1 + $0xc0] sm:$0xff]  ;;  %v2168_v9 = vld [vmem:[%s3245_s0 + $0x30] sm:$0xf0]  ;;  %v2297_v10 = vld [vmem:[%s3243_s1 + $0x1f8] sm:$0xff]  ;;  %v1593_v12 = vor.u32 %v2162_v62, %v1590_v1 }
  0x16   :  { %2407 = vmatpush.bf16.msra.mxu1 %v2236_v5  ;;  %2408 = vmatpush.bf16.msra.mxu2 %v2236_v5  ;;  %v2266_v0 = vld [vmem:[%s3243_s1 + $0x100] sm:$0xff]  ;;  %v2305_v11 = vld [vmem:[%s3243_s1 + $0x238] sm:$0xff]  ;;  %v1605_v15 = vor.u32 %v2168_v9, %v1604_v8  ;;  %v2180_v40 = vld [vmem:[%s3245_s0 + $0x94] sm:$0xf] }
  0x17   :  { %2409 = vmatpush.bf16.msra.mxu3 %v2236_v5  ;;  %1050 = vmatpush.bf16.msra.mxu0 %v2236_v5  ;;  %v2167_v5 = vld [vmem:[%s3245_s0 + $0x28] sm:$0xf0]  ;;  %v2286_v36 = vld [vmem:[%s3243_s1 + $0x1a0] sm:$0xff]  ;;  %v1662_v41 = vld [vmem:[%s3245_s0 + $0xb4] sm:$0xf0] }
  0x18   :  { %v1597_v13 = vor.u32 %v2167_v5, %v1596_v4  ;;  %v2294_v37 = vld [vmem:[%s3243_s1 + $0x1e0] sm:$0xff]  ;;  %v1668_v42 = vld [vmem:[%s3245_s0 + $0x98] sm:$0xf]  ;;  %v2185_v43 = vld [vmem:[%s3245_s0 + $0xb8] sm:$0xf0] }
  0x19   :  { %v2278_v38 = vld [vmem:[%s3243_s1 + $0x160] sm:$0xff]  ;;  %v1712_v62 = vld [vmem:[%s3245_s0 + $0xe8] sm:$0xf]  ;;  %v2284_v4 = vld [vmem:[%s3243_s1 + $0x190] sm:$0xff] }
  0x1a   :  { %2410 = vmatpush.bf16.msra.mxu1 %v2235_v6  ;;  %2411 = vmatpush.bf16.msra.mxu2 %v2235_v6  ;;  %v2302_v39 = vld [vmem:[%s3243_s1 + $0x220] sm:$0xff]  ;;  %v2292_v5 = vld [vmem:[%s3243_s1 + $0x1d0] sm:$0xff]  ;;  %v1734_v9 = vld [vmem:[%s3245_s0 + $0x144] sm:$0xf0] }
  0x1b   :  { %2412 = vmatpush.bf16.msra.mxu3 %v2235_v6  ;;  %1051 = vmatpush.bf16.msra.mxu0 %v2235_v6  ;;  %v2163_v6 = vld [vmem:[%s3245_s0 + $0xc] sm:$0xf]  ;;  %v2198_v8 = vld [vmem:[%s3245_s0 + $0x124] sm:$0xf] }
  0x1e   :  { %2413 = vmatpush.bf16.msra.mxu1 %v2234_v7  ;;  %2414 = vmatpush.bf16.msra.mxu2 %v2234_v7 }
  0x1f   :  { %2415 = vmatpush.bf16.msra.mxu3 %v2234_v7  ;;  %1052 = vmatpush.bf16.msra.mxu0 %v2234_v7  ;;  %v1598_v7 = vld [vmem:[%s3245_s0 + $0x2c] sm:$0xf0] }
  0x20   :  { %v1601_v14 = vor.u32 %v2163_v6, %v1598_v7  ;;  %v2276_v6 = vld [vmem:[%s3243_s1 + $0x150] sm:$0xff] }
  0x21   :  { %1063 = vmatmul.bf16.vlgmr.msra.gmra.mxu1 %v1661_v18  ;;  %1073 = vmatmul.bf16.vlgmr.msra.gmra.mxu2 %v1733_v19  ;;  %v2296_v18 = vld [vmem:[%s3243_s1 + $0x1f0] sm:$0xff] }
  0x22   :  { %1143 = vmatpush.bf16.msrb.mxu2 %v2257_v16  ;;  %1094 = vmatpush.bf16.msrb.mxu1 %v2249_v17  ;;  %v2288_v16 = vld [vmem:[%s3243_s1 + $0x1b0] sm:$0xff] }
  0x23   :  { %1083 = vmatmul.bf16.vlgmr.msra.gmra.mxu3 %v1805_v20  ;;  %1053 = vmatmul.bf16.vlgmr.msra.gmra.mxu0 %v1589_v21  ;;  %v2280_v17 = vld [vmem:[%s3243_s1 + $0x170] sm:$0xff]  ;;  %v2287_v20 = vld [vmem:[%s3243_s1 + $0x1a8] sm:$0xff] }
  0x24   :  { %1192 = vmatpush.bf16.msrb.mxu3 %v2265_v22  ;;  %1241 = vmatpush.bf16.msrb.mxu0 %v2273_v23  ;;  %v2304_v19 = vld [vmem:[%s3243_s1 + $0x230] sm:$0xff]  ;;  %v2279_v21 = vld [vmem:[%s3243_s1 + $0x168] sm:$0xff] }
  0x25   :  { %v2295_v22 = vld [vmem:[%s3243_s1 + $0x1e8] sm:$0xff]  ;;  %v2300_v7 = vld [vmem:[%s3243_s1 + $0x210] sm:$0xff] }
  0x26   :  { %1144 = vmatpush.bf16.msrb.mxu2 %v2256_v24  ;;  %1095 = vmatpush.bf16.msrb.mxu1 %v2248_v25  ;;  %v2303_v23 = vld [vmem:[%s3243_s1 + $0x228] sm:$0xff]  ;;  %v1626_v25 = vld [vmem:[%s3245_s0 + $0x6c] sm:$0xf0] }
  0x27   :  { %v2171_v24 = vld [vmem:[%s3245_s0 + $0x4c] sm:$0xf] }
  0x28   :  { %1193 = vmatpush.bf16.msrb.mxu3 %v2264_v26  ;;  %1242 = vmatpush.bf16.msrb.mxu0 %v2272_v27  ;;  %v1632_v26 = vld [vmem:[%s3245_s0 + $0x50] sm:$0xf]  ;;  %v2176_v27 = vld [vmem:[%s3245_s0 + $0x70] sm:$0xf0] }
  0x2a   :  { %1145 = vmatpush.bf16.msrb.mxu2 %v2255_v28  ;;  %1096 = vmatpush.bf16.msrb.mxu1 %v2247_v29  ;;  %v2172_v28 = vld [vmem:[%s3245_s0 + $0x54] sm:$0xf]  ;;  %v1634_v29 = vld [vmem:[%s3245_s0 + $0x74] sm:$0xf0] }
  0x2c   :  { %1194 = vmatpush.bf16.msrb.mxu3 %v2263_v30  ;;  %1243 = vmatpush.bf16.msrb.mxu0 %v2271_v31  ;;  %v1640_v30 = vld [vmem:[%s3245_s0 + $0x58] sm:$0xf]  ;;  %v2177_v31 = vld [vmem:[%s3245_s0 + $0x78] sm:$0xf0] }
  0x2e   :  { %1146 = vmatpush.bf16.msrb.mxu2 %v2254_v32  ;;  %1097 = vmatpush.bf16.msrb.mxu1 %v2246_v33  ;;  %v1629_v32 = vor.u32 %v2171_v24, %v1626_v25  ;;  %v1633_v33 = vor.u32 %v2176_v27, %v1632_v26  ;;  %v2207_v24 = vld [vmem:[%s3245_s0 + $0x16c] sm:$0xf]  ;;  %v1770_v25 = vld [vmem:[%s3245_s0 + $0x18c] sm:$0xf0]  ;;  %v2212_v27 = vld [vmem:[%s3245_s0 + $0x190] sm:$0xf0] }
  0x2f   :  { %v1776_v26 = vld [vmem:[%s3245_s0 + $0x170] sm:$0xf] }
  0x30   :  { %1195 = vmatpush.bf16.msrb.mxu3 %v2262_v34  ;;  %1244 = vmatpush.bf16.msrb.mxu0 %v2270_v35  ;;  %v1637_v34 = vor.u32 %v2172_v28, %v1634_v29  ;;  %v1641_v35 = vor.u32 %v2177_v31, %v1640_v30  ;;  %v2208_v28 = vld [vmem:[%s3245_s0 + $0x174] sm:$0xf]  ;;  %v1778_v29 = vld [vmem:[%s3245_s0 + $0x194] sm:$0xf0]  ;;  %v2213_v31 = vld [vmem:[%s3245_s0 + $0x198] sm:$0xf0] }
  0x31   :  { %1068 = vmatmul.bf16.gmra.mxu1 %v1697_v46  ;;  %1078 = vmatmul.bf16.gmra.mxu2 %v1769_v47  ;;  %v1676_v46 = vld [vmem:[%s3245_s0 + $0xa0] sm:$0xf]  ;;  %v2186_v47 = vld [vmem:[%s3245_s0 + $0xc0] sm:$0xf0]  ;;  %v1784_v30 = vld [vmem:[%s3245_s0 + $0x178] sm:$0xf] }
  0x32   :  { %1147 = vmatpush.bf16.msrb.mxu2 %v2253_v44  ;;  %1098 = vmatpush.bf16.msrb.mxu1 %v2245_v45  ;;  %v2181_v44 = vld [vmem:[%s3245_s0 + $0x9c] sm:$0xf]  ;;  %v1670_v45 = vld [vmem:[%s3245_s0 + $0xbc] sm:$0xf0] }
  0x33   :  { %1088 = vmatmul.bf16.gmra.mxu3 %v1841_v48  ;;  %1058 = vmatmul.bf16.gmra.mxu0 %v1625_v49  ;;  %v1665_v48 = vor.u32 %v2180_v40, %v1662_v41  ;;  %v1669_v49 = vor.u32 %v2185_v43, %v1668_v42  ;;  %v2216_v40 = vld [vmem:[%s3245_s0 + $0x1b4] sm:$0xf]  ;;  %v1806_v41 = vld [vmem:[%s3245_s0 + $0x1d4] sm:$0xf0]  ;;  %v2221_v43 = vld [vmem:[%s3245_s0 + $0x1d8] sm:$0xf0] }
  0x34   :  { %1196 = vmatpush.bf16.msrb.mxu3 %v2261_v50  ;;  %1245 = vmatpush.bf16.msrb.mxu0 %v2269_v51  ;;  %v1673_v50 = vor.u32 %v2181_v44, %v1670_v45  ;;  %v1677_v51 = vor.u32 %v2186_v47, %v1676_v46  ;;  %v1812_v42 = vld [vmem:[%s3245_s0 + $0x1b8] sm:$0xf]  ;;  %v2217_v44 = vld [vmem:[%s3245_s0 + $0x1bc] sm:$0xf]  ;;  %v1814_v45 = vld [vmem:[%s3245_s0 + $0x1dc] sm:$0xf0] }
  0x35   :  { %v1820_v46 = vld [vmem:[%s3245_s0 + $0x1c0] sm:$0xf]  ;;  %v2222_v47 = vld [vmem:[%s3245_s0 + $0x1e0] sm:$0xf0] }
  0x36   :  { %1148 = vmatpush.bf16.msrb.mxu2 %v2252_v52  ;;  %1099 = vmatpush.bf16.msrb.mxu1 %v2244_v53  ;;  %v2285_v52 = vld [vmem:[%s3243_s1 + $0x198] sm:$0xff] }
  0x37   :  { %v2293_v53 = vld [vmem:[%s3243_s1 + $0x1d8] sm:$0xff] }
  0x38   :  { %1197 = vmatpush.bf16.msrb.mxu3 %v2260_v54  ;;  %1246 = vmatpush.bf16.msrb.mxu0 %v2268_v55  ;;  %v2277_v54 = vld [vmem:[%s3243_s1 + $0x158] sm:$0xff] }
  0x39   :  { %v2301_v55 = vld [vmem:[%s3243_s1 + $0x218] sm:$0xff] }
  0x3a   :  { %1149 = vmatpush.bf16.msrb.mxu2 %v2251_v56  ;;  %1100 = vmatpush.bf16.msrb.mxu1 %v2243_v57  ;;  %v2189_v56 = vld [vmem:[%s3245_s0 + $0xdc] sm:$0xf]  ;;  %v1698_v57 = vld [vmem:[%s3245_s0 + $0xfc] sm:$0xf0] }
  0x3c   :  { %1198 = vmatpush.bf16.msrb.mxu3 %v2259_v58  ;;  %1247 = vmatpush.bf16.msrb.mxu0 %v2267_v59  ;;  %v1704_v58 = vld [vmem:[%s3245_s0 + $0xe0] sm:$0xf]  ;;  %v2194_v59 = vld [vmem:[%s3245_s0 + $0x100] sm:$0xf0] }
  0x3d   :  { %v1705_v1 = vor.u32 %v2194_v59, %v1704_v58 }
  0x3e   :  { %1150 = vmatpush.bf16.msrb.mxu2 %v2250_v60  ;;  %1101 = vmatpush.bf16.msrb.mxu1 %v2242_v61  ;;  %v2190_v60 = vld [vmem:[%s3245_s0 + $0xe4] sm:$0xf]  ;;  %v1706_v61 = vld [vmem:[%s3245_s0 + $0x104] sm:$0xf0] }
  0x40   :  { %1199 = vmatpush.bf16.msrb.mxu3 %v2258_v63  ;;  %1248 = vmatpush.bf16.msrb.mxu0 %v2266_v0  ;;  %v2195_v63 = vld [vmem:[%s3245_s0 + $0x108] sm:$0xf0]  ;;  %v1701_v0 = vor.u32 %v2189_v56, %v1698_v57 }
  0x41   :  { %1102 = vmatmul.bf16.vlgmr.msrb.gmra.mxu1 %v1593_v12  ;;  %1151 = vmatmul.bf16.vlgmr.msrb.gmra.mxu2 %v1597_v13  ;;  %v2199_v12 = vld [vmem:[%s3245_s0 + $0x12c] sm:$0xf]  ;;  %v1742_v13 = vld [vmem:[%s3245_s0 + $0x14c] sm:$0xf0] }
  0x42   :  { %1339 = vmatpush.bf16.msra.mxu2 %v2289_v2  ;;  %1290 = vmatpush.bf16.msra.mxu1 %v2281_v3  ;;  %v1709_v2 = vor.u32 %v2190_v60, %v1706_v61  ;;  %v1713_v3 = vor.u32 %v2195_v63, %v1712_v62  ;;  %v2225_v61 = vld [vmem:[%s3245_s0 + $0x1fc] sm:$0xf]  ;;  %v1842_v62 = vld [vmem:[%s3245_s0 + $0x21c] sm:$0xf0] }
  0x43   :  { %1200 = vmatmul.bf16.vlgmr.msrb.gmra.mxu3 %v1601_v14  ;;  %1249 = vmatmul.bf16.vlgmr.msrb.gmra.mxu0 %v1605_v15  ;;  %v1748_v14 = vld [vmem:[%s3245_s0 + $0x130] sm:$0xf]  ;;  %v2204_v15 = vld [vmem:[%s3245_s0 + $0x150] sm:$0xf0]  ;;  %v1848_v63 = vld [vmem:[%s3245_s0 + $0x200] sm:$0xf] }
  0x44   :  { %1388 = vmatpush.bf16.msra.mxu3 %v2297_v10  ;;  %1437 = vmatpush.bf16.msra.mxu0 %v2305_v11  ;;  %v1740_v10 = vld [vmem:[%s3245_s0 + $0x128] sm:$0xf]  ;;  %v2203_v11 = vld [vmem:[%s3245_s0 + $0x148] sm:$0xf0] }
  0x46   :  { %1340 = vmatpush.bf16.msra.mxu2 %v2288_v16  ;;  %1291 = vmatpush.bf16.msra.mxu1 %v2280_v17  ;;  %v1737_v16 = vor.u32 %v2198_v8, %v1734_v9  ;;  %v1741_v17 = vor.u32 %v2203_v11, %v1740_v10  ;;  %v1845_v8 = vor.u32 %v2225_v61, %v1842_v62  ;;  %v1656_v61 = vld [vmem:[%s3245_s0 + $0x68] sm:$0xf]  ;;  %v2179_v62 = vld [vmem:[%s3245_s0 + $0x88] sm:$0xf0] }
  0x48   :  { %1389 = vmatpush.bf16.msra.mxu3 %v2296_v18  ;;  %1438 = vmatpush.bf16.msra.mxu0 %v2304_v19  ;;  %v1745_v18 = vor.u32 %v2199_v12, %v1742_v13  ;;  %v1749_v19 = vor.u32 %v2204_v15, %v1748_v14 }
  0x4a   :  { %1341 = vmatpush.bf16.msra.mxu2 %v2287_v20  ;;  %1292 = vmatpush.bf16.msra.mxu1 %v2279_v21  ;;  %v2283_v20 = vld [vmem:[%s3243_s1 + $0x188] sm:$0xff] }
  0x4b   :  { %v2291_v21 = vld [vmem:[%s3243_s1 + $0x1c8] sm:$0xff] }
  0x4c   :  { %1390 = vmatpush.bf16.msra.mxu3 %v2295_v22  ;;  %1439 = vmatpush.bf16.msra.mxu0 %v2303_v23  ;;  %v2275_v22 = vld [vmem:[%s3243_s1 + $0x148] sm:$0xff] }
  0x4d   :  { %v2299_v23 = vld [vmem:[%s3243_s1 + $0x208] sm:$0xff] }
  0x4e   :  { %1342 = vmatpush.bf16.msra.mxu2 %v2286_v36  ;;  %1293 = vmatpush.bf16.msra.mxu1 %v2278_v38  ;;  %v2282_v36 = vld [vmem:[%s3243_s1 + $0x180] sm:$0xff] }
  0x4f   :  { %v2274_v38 = vld [vmem:[%s3243_s1 + $0x140] sm:$0xff] }
  0x50   :  { %1391 = vmatpush.bf16.msra.mxu3 %v2294_v37  ;;  %1440 = vmatpush.bf16.msra.mxu0 %v2302_v39  ;;  %v2290_v37 = vld [vmem:[%s3243_s1 + $0x1c0] sm:$0xff] }
  0x51   :  { %1107 = vmatmul.bf16.gmra.mxu1 %v1629_v32  ;;  %1156 = vmatmul.bf16.gmra.mxu2 %v1633_v33  ;;  %v1773_v32 = vor.u32 %v2207_v24, %v1770_v25  ;;  %v1777_v33 = vor.u32 %v2212_v27, %v1776_v26  ;;  %v2298_v39 = vld [vmem:[%s3243_s1 + $0x200] sm:$0xff]  ;;  %v2169_v24 = vld [vmem:[%s3245_s0 + $0x38] sm:$0xf0] }
  0x52   :  { %1343 = vmatpush.bf16.msra.mxu2 %v2285_v52  ;;  %1294 = vmatpush.bf16.msra.mxu1 %v2277_v54  ;;  %v1821_v52 = vor.u32 %v2222_v47, %v1820_v46  ;;  %v2879_v54 = vld [vmem:[%s3244_s2] ss:$0 sm:$0xff]  ;;  %v2165_v25 = vld [vmem:[%s3245_s0 + $0x1c] sm:$0xf] }
  0x53   :  { %1205 = vmatmul.bf16.gmra.mxu3 %v1637_v34  ;;  %1254 = vmatmul.bf16.gmra.mxu0 %v1641_v35  ;;  %v1781_v34 = vor.u32 %v2208_v28, %v1778_v29  ;;  %v1785_v35 = vor.u32 %v2213_v31, %v1784_v30  ;;  %v1614_v26 = vld [vmem:[%s3245_s0 + $0x3c] sm:$0xf0]  ;;  %v2170_v28 = vld [vmem:[%s3245_s0 + $0x40] sm:$0xf0] }
  0x54   :  { %1392 = vmatpush.bf16.msra.mxu3 %v2293_v53  ;;  %1441 = vmatpush.bf16.msra.mxu0 %v2301_v55  ;;  %v1620_v27 = vld [vmem:[%s3245_s0 + $0x20] sm:$0xf] }
  0x56   :  { %1344 = vmatpush.bf16.msra.mxu2 %v2284_v4  ;;  %1295 = vmatpush.bf16.msra.mxu1 %v2276_v6  ;;  %v2231_v4 = vld [vmem:[%s3245_s0 + $0x228] sm:$0xf0] }
  0x58   :  { %1393 = vmatpush.bf16.msra.mxu3 %v2292_v5  ;;  %1442 = vmatpush.bf16.msra.mxu0 %v2300_v7 }
  0x5a   :  { %1345 = vmatpush.bf16.msra.mxu2 %v2283_v20  ;;  %1296 = vmatpush.bf16.msra.mxu1 %v2275_v22  ;;  %v1606_v22 = vld [vmem:[%s3245_s0 + $0x34] sm:$0xf0] }
  0x5c   :  { %1394 = vmatpush.bf16.msra.mxu3 %v2291_v21  ;;  %1443 = vmatpush.bf16.msra.mxu0 %v2299_v23  ;;  %v2164_v21 = vld [vmem:[%s3245_s0 + $0x14] sm:$0xf]  ;;  %v1612_v23 = vld [vmem:[%s3245_s0 + $0x18] sm:$0xf] }
  0x5e   :  { %1346 = vmatpush.bf16.msra.mxu2 %v2282_v36  ;;  %1297 = vmatpush.bf16.msra.mxu1 %v2274_v38  ;;  %v1621_v38 = vor.u32 %v2170_v28, %v1620_v27  ;;  %v2182_v27 = vld [vmem:[%s3245_s0 + $0xa4] sm:$0xf]  ;;  %v1678_v28 = vld [vmem:[%s3245_s0 + $0xc4] sm:$0xf0] }
  0x60   :  { %1395 = vmatpush.bf16.msra.mxu3 %v2290_v37  ;;  %1444 = vmatpush.bf16.msra.mxu0 %v2298_v39  ;;  %v1617_v37 = vor.u32 %v2165_v25, %v1614_v26 }
  0x61   :  { %1112 = vmatmul.bf16.gmra.mxu1 %v1665_v48  ;;  %1161 = vmatmul.bf16.gmra.mxu2 %v1669_v49  ;;  %v1809_v48 = vor.u32 %v2216_v40, %v1806_v41  ;;  %v1813_v49 = vor.u32 %v2221_v43, %v1812_v42 }
  0x63   :  { %1210 = vmatmul.bf16.gmra.mxu3 %v1673_v50  ;;  %1259 = vmatmul.bf16.gmra.mxu0 %v1677_v51  ;;  %v1817_v51 = vor.u32 %v2217_v44, %v1814_v45 }
  0x71   :  { %1117 = vmatmul.bf16.gmra.mxu1 %v1701_v0  ;;  %1166 = vmatmul.bf16.gmra.mxu2 %v1705_v1  ;;  %v2230_v0 = vld [vmem:[%s3245_s0 + $0x220] sm:$0xf0] }
  0x72   :  { %v2226_v1 = vld [vmem:[%s3245_s0 + $0x204] sm:$0xf]  ;;  %v1849_v9 = vor.u32 %v2230_v0, %v1848_v63 }
  0x73   :  { %1215 = vmatmul.bf16.gmra.mxu3 %v1709_v2  ;;  %1264 = vmatmul.bf16.gmra.mxu0 %v1713_v3  ;;  %v1850_v2 = vld [vmem:[%s3245_s0 + $0x224] sm:$0xf0] }
  0x74   :  { %v1856_v3 = vld [vmem:[%s3245_s0 + $0x208] sm:$0xf]  ;;  %v1853_v12 = vor.u32 %v2226_v1, %v1850_v2 }
  0x75   :  { %v1857_v13 = vor.u32 %v2231_v4, %v1856_v3 }
  0x81   :  { %1122 = vmatmul.bf16.gmra.mxu1 %v1737_v16  ;;  %1171 = vmatmul.bf16.gmra.mxu2 %v1741_v17 }
  0x83   :  { %1220 = vmatmul.bf16.gmra.mxu3 %v1745_v18  ;;  %1269 = vmatmul.bf16.gmra.mxu0 %v1749_v19 }
  0x91   :  { %1127 = vmatmul.bf16.gmra.mxu1 %v1773_v32  ;;  %1176 = vmatmul.bf16.gmra.mxu2 %v1777_v33  ;;  %v1609_v33 = vor.u32 %v2164_v21, %v1606_v22 }
  0x93   :  { %1225 = vmatmul.bf16.gmra.mxu3 %v1781_v34  ;;  %1274 = vmatmul.bf16.gmra.mxu0 %v1785_v35  ;;  %v1613_v34 = vor.u32 %v2169_v24, %v1612_v23 }
  0x9e   :  { %v2874_v50 = vpop.f32.mrf.mxu1 }
  0xa0   :  { %v1054_v53 = vpop.f32.mrf.mxu0 }
  0xa1   :  { %1132 = vmatmul.bf16.gmra.mxu1 %v1809_v48  ;;  %1181 = vmatmul.bf16.gmra.mxu2 %v1813_v49  ;;  %v1055_v30 = vadd.f32 %v2879_v54, %v1054_v53  ;;  %v2173_v49 = vld [vmem:[%s3245_s0 + $0x5c] sm:$0xf]  ;;  %v1648_v53 = vld [vmem:[%s3245_s0 + $0x60] sm:$0xf] }
  0xa3   :  { %1230 = vmatmul.bf16.gmra.mxu3 %v1817_v51  ;;  %1279 = vmatmul.bf16.gmra.mxu0 %v1821_v52  ;;  %v1642_v51 = vld [vmem:[%s3245_s0 + $0x7c] sm:$0xf0] }
  0xa4   :  { %v1074_v55 = vpop.f32.mrf.mxu2  ;;  %v1645_v3 = vor.u32 %v2173_v49, %v1642_v51 }
  0xa5   :  { %v2882_v56 = vadd.f32 %v2879_v54, %v1074_v55  ;;  %v2178_v55 = vld [vmem:[%s3245_s0 + $0x80] sm:$0xf0] }
  0xa6   :  { %v1084_v57 = vpop.f32.mrf.mxu3  ;;  %v2887_v59 = vpop.f32.mrf.mxu1  ;;  %v1649_v4 = vor.u32 %v2178_v55, %v1648_v53 }
  0xa7   :  { %v2885_v58 = vadd.f32 %v2879_v54, %v1084_v57  ;;  %v2174_v57 = vld [vmem:[%s3245_s0 + $0x64] sm:$0xf] }
  0xa8   :  { %v1056_v60 = vpop.f32.mrf.mxu0 }
  0xa9   :  { %v1057_v42 = vadd.f32 %v2879_v54, %v1056_v60  ;;  %v1650_v60 = vld [vmem:[%s3245_s0 + $0x84] sm:$0xf0] }
  0xac   :  { %v1076_v5 = vpop.f32.mrf.mxu2 }
  0xad   :  { %v2914_v6 = vadd.f32 %v2879_v54, %v1076_v5 }
  0xae   :  { %v1086_v7 = vpop.f32.mrf.mxu3  ;;  %v2919_v11 = vpop.f32.mrf.mxu1 }
  0xaf   :  { %v2917_v10 = vadd.f32 %v2879_v54, %v1086_v7  ;;  %v1653_v7 = vor.u32 %v2174_v57, %v1650_v60 }
  0xb0   :  { %v1059_v14 = vpop.f32.mrf.mxu0 }
  0xb1   :  { %1137 = vmatmul.bf16.gmra.mxu1 %v1845_v8  ;;  %1186 = vmatmul.bf16.gmra.mxu2 %v1849_v9  ;;  %v1060_v0 = vadd.f32 %v2879_v54, %v1059_v14  ;;  %v1657_v8 = vor.u32 %v2179_v62, %v1656_v61 }
  0xb3   :  { %1235 = vmatmul.bf16.gmra.mxu3 %v1853_v12  ;;  %1284 = vmatmul.bf16.gmra.mxu0 %v1857_v13 }
  0xb4   :  { %v1079_v15 = vpop.f32.mrf.mxu2 }
  0xb5   :  { %v2922_v16 = vadd.f32 %v2879_v54, %v1079_v15 }
  0xb6   :  { %v1089_v17 = vpop.f32.mrf.mxu3  ;;  %v2927_v19 = vpop.f32.mrf.mxu1 }
  0xb7   :  { %v2925_v18 = vadd.f32 %v2879_v54, %v1089_v17 }
  0xb8   :  { %v1061_v20 = vpop.f32.mrf.mxu0 }
  0xb9   :  { %v1062_v21 = vadd.f32 %v2879_v54, %v1061_v20  ;;  %v1684_v20 = vld [vmem:[%s3245_s0 + $0xa8] sm:$0xf] }
  0xbc   :  { %v1081_v29 = vpop.f32.mrf.mxu2 }
  0xbd   :  { %v2955_v31 = vadd.f32 %v2879_v54, %v1081_v29 }
  0xbe   :  { %v1091_v32 = vpop.f32.mrf.mxu3  ;;  %v1103_v36 = vpop.f32.mrf.mxu1 }
  0xbf   :  { %v2958_v35 = vadd.f32 %v2879_v54, %v1091_v32  ;;  %v1104_v39 = vadd.f32 %v1103_v36, %v1055_v30  ;;  %v2187_v30 = vld [vmem:[%s3245_s0 + $0xc8] sm:$0xf0]  ;;  %v2188_v36 = vld [vmem:[%s3245_s0 + $0xd0] sm:$0xf0] }
  0xc0   :  { %v1250_v40 = vpop.f32.mrf.mxu0  ;;  %v2183_v32 = vld [vmem:[%s3245_s0 + $0xac] sm:$0xf] }
  0xc1   :  { %1298 = vmatmul.bf16.vlgmr.msra.gmra.mxu1 %v1609_v33  ;;  %1347 = vmatmul.bf16.vlgmr.msra.gmra.mxu2 %v1613_v34  ;;  %v1686_v33 = vld [vmem:[%s3245_s0 + $0xcc] sm:$0xf0] }
  0xc2   :  { %v1692_v34 = vld [vmem:[%s3245_s0 + $0xb0] sm:$0xf] }
  0xc3   :  { %1396 = vmatmul.bf16.vlgmr.msra.gmra.mxu3 %v1617_v37  ;;  %1445 = vmatmul.bf16.vlgmr.msra.gmra.mxu0 %v1621_v38  ;;  %v1065_v38 = vadd.f32 %v2879_v54, %v2874_v50  ;;  %v1067_v50 = vadd.f32 %v2879_v54, %v2887_v59  ;;  %v1720_v59 = vld [vmem:[%s3245_s0 + $0xf0] sm:$0xf] }
  0xc4   :  { %v1152_v41 = vpop.f32.mrf.mxu2 }
  0xc5   :  { %v1153_v43 = vadd.f32 %v1152_v41, %v1104_v39  ;;  %v1681_v41 = vor.u32 %v2182_v27, %v1678_v28 }
  0xc6   :  { %v1201_v44 = vpop.f32.mrf.mxu3  ;;  %v1105_v45 = vpop.f32.mrf.mxu1 }
  0xc7   :  { %v1202_v46 = vadd.f32 %v1201_v44, %v1153_v43  ;;  %v1106_v47 = vadd.f32 %v1105_v45, %v1057_v42  ;;  %v1685_v42 = vor.u32 %v2187_v30, %v1684_v20  ;;  %v1689_v44 = vor.u32 %v2183_v32, %v1686_v33 }
  0xc8   :  { %v1252_v48 = vpop.f32.mrf.mxu0  ;;  %v1693_v45 = vor.u32 %v2188_v36, %v1692_v34 }
  0xc9   :  { %v2967_v52 = vadd.f32 %v1250_v40, %v1202_v46 }
  0xcc   :  { %v1154_v63 = vpop.f32.mrf.mxu2 }
  0xcd   :  { %v1155_v1 = vadd.f32 %v1154_v63, %v1106_v47  ;;  %v2191_v63 = vld [vmem:[%s3245_s0 + $0xec] sm:$0xf] }
  0xce   :  { %v1203_v2 = vpop.f32.mrf.mxu3  ;;  %v1108_v5 = vpop.f32.mrf.mxu1 }
  0xcf   :  { %v1204_v9 = vadd.f32 %v1203_v2, %v1155_v1  ;;  %v1109_v12 = vadd.f32 %v1108_v5, %v1060_v0  ;;  %v1714_v0 = vld [vmem:[%s3245_s0 + $0x10c] sm:$0xf0]  ;;  %v2196_v2 = vld [vmem:[%s3245_s0 + $0x110] sm:$0xf0]  ;;  %v1728_v5 = vld [vmem:[%s3245_s0 + $0xf8] sm:$0xf] }
  0xd0   :  { %v1255_v13 = vpop.f32.mrf.mxu0 }
  0xd1   :  { %1303 = vmatmul.bf16.gmra.mxu1 %v1645_v3  ;;  %1352 = vmatmul.bf16.gmra.mxu2 %v1649_v4  ;;  %v2988_v15 = vadd.f32 %v1252_v48, %v1204_v9  ;;  %v2192_v3 = vld [vmem:[%s3245_s0 + $0xf4] sm:$0xf]  ;;  %v1722_v4 = vld [vmem:[%s3245_s0 + $0x114] sm:$0xf0]  ;;  %v1070_v9 = vadd.f32 %v2879_v54, %v2919_v11  ;;  %v1072_v11 = vadd.f32 %v2879_v54, %v2927_v19  ;;  %v2205_v19 = vld [vmem:[%s3245_s0 + $0x158] sm:$0xf0] }
  0xd2   :  { %v1756_v54 = vld [vmem:[%s3245_s0 + $0x138] sm:$0xf] }
  0xd3   :  { %1401 = vmatmul.bf16.gmra.mxu3 %v1653_v7  ;;  %1450 = vmatmul.bf16.gmra.mxu0 %v1657_v8  ;;  %v2197_v7 = vld [vmem:[%s3245_s0 + $0x118] sm:$0xf0] }
  0xd4   :  { %v1157_v17 = vpop.f32.mrf.mxu2 }
  0xd5   :  { %v1158_v14 = vadd.f32 %v1157_v17, %v1109_v12  ;;  %v1717_v17 = vor.u32 %v2191_v63, %v1714_v0 }
  0xd6   :  { %v1206_v22 = vpop.f32.mrf.mxu3  ;;  %v1110_v23 = vpop.f32.mrf.mxu1 }
  0xd7   :  { %v1207_v24 = vadd.f32 %v1206_v22, %v1158_v14  ;;  %v1111_v25 = vadd.f32 %v1110_v23, %v1062_v21  ;;  %v1721_v21 = vor.u32 %v2196_v2, %v1720_v59  ;;  %v1725_v22 = vor.u32 %v2192_v3, %v1722_v4 }
  0xd8   :  { %v1257_v26 = vpop.f32.mrf.mxu0  ;;  %v1729_v23 = vor.u32 %v2197_v7, %v1728_v5  ;;  %v2209_v5 = vld [vmem:[%s3245_s0 + $0x17c] sm:$0xf] }
  0xd9   :  { %v2997_v29 = vadd.f32 %v1255_v13, %v1207_v24 }
  0xdc   :  { %v1159_v37 = vpop.f32.mrf.mxu2 }
  0xdd   :  { %v1160_v39 = vadd.f32 %v1159_v37, %v1111_v25  ;;  %v2200_v37 = vld [vmem:[%s3245_s0 + $0x134] sm:$0xf] }
  0xde   :  { %v1208_v40 = vpop.f32.mrf.mxu3  ;;  %v1113_v43 = vpop.f32.mrf.mxu1 }
  0xdf   :  { %v1209_v46 = vadd.f32 %v1208_v40, %v1160_v39  ;;  %v1114_v47 = vadd.f32 %v1113_v43, %v1065_v38  ;;  %v1750_v38 = vld [vmem:[%s3245_s0 + $0x154] sm:$0xf0]  ;;  %v2201_v40 = vld [vmem:[%s3245_s0 + $0x13c] sm:$0xf]  ;;  %v2206_v43 = vld [vmem:[%s3245_s0 + $0x160] sm:$0xf0] }
  0xe0   :  { %v1260_v48 = vpop.f32.mrf.mxu0 }
  0xe1   :  { %1308 = vmatmul.bf16.gmra.mxu1 %v1681_v41  ;;  %1357 = vmatmul.bf16.gmra.mxu2 %v1685_v42  ;;  %v3019_v49 = vadd.f32 %v1257_v26, %v1209_v46  ;;  %v1758_v41 = vld [vmem:[%s3245_s0 + $0x15c] sm:$0xf0] }
  0xe2   :  { %v1764_v42 = vld [vmem:[%s3245_s0 + $0x140] sm:$0xf] }
  0xe3   :  { %1406 = vmatmul.bf16.gmra.mxu3 %v1689_v44  ;;  %1455 = vmatmul.bf16.gmra.mxu0 %v1693_v45 }
  0xe4   :  { %v1162_v51 = vpop.f32.mrf.mxu2 }
  0xe5   :  { %v1163_v53 = vadd.f32 %v1162_v51, %v1114_v47  ;;  %v1753_v47 = vor.u32 %v2200_v37, %v1750_v38 }
  0xe6   :  { %v1211_v55 = vpop.f32.mrf.mxu3  ;;  %v1115_v57 = vpop.f32.mrf.mxu1 }
  0xe7   :  { %v1212_v60 = vadd.f32 %v1211_v55, %v1163_v53  ;;  %v1116_v61 = vadd.f32 %v1115_v57, %v1067_v50  ;;  %v1761_v50 = vor.u32 %v2201_v40, %v1758_v41  ;;  %v1765_v53 = vor.u32 %v2206_v43, %v1764_v42  ;;  %v2218_v40 = vld [vmem:[%s3245_s0 + $0x1c4] sm:$0xf]  ;;  %v1828_v42 = vld [vmem:[%s3245_s0 + $0x1c8] sm:$0xf]  ;;  %v2223_v43 = vld [vmem:[%s3245_s0 + $0x1e8] sm:$0xf0] }
  0xe8   :  { %v1262_v62 = vpop.f32.mrf.mxu0 }
  0xe9   :  { %v3029_v1 = vadd.f32 %v1260_v48, %v1212_v60  ;;  %v1757_v48 = vor.u32 %v2205_v19, %v1756_v54 }
  0xec   :  { %v1164_v8 = vpop.f32.mrf.mxu2 }
  0xed   :  { %v1165_v12 = vadd.f32 %v1164_v8, %v1116_v61  ;;  %v1792_v8 = vld [vmem:[%s3245_s0 + $0x180] sm:$0xf] }
  0xee   :  { %v1213_v13 = vpop.f32.mrf.mxu3  ;;  %v1118_v14 = vpop.f32.mrf.mxu1 }
  0xef   :  { %v1214_v24 = vadd.f32 %v1213_v13, %v1165_v12  ;;  %v1119_v25 = vadd.f32 %v1118_v14, %v1070_v9  ;;  %v2214_v9 = vld [vmem:[%s3245_s0 + $0x1a0] sm:$0xf0]  ;;  %v1794_v12 = vld [vmem:[%s3245_s0 + $0x1a4] sm:$0xf0] }
  0xf0   :  { %v1265_v26 = vpop.f32.mrf.mxu0  ;;  %v1800_v13 = vld [vmem:[%s3245_s0 + $0x188] sm:$0xf] }
  0xf1   :  { %1313 = vmatmul.bf16.gmra.mxu1 %v1717_v17  ;;  %1362 = vmatmul.bf16.gmra.mxu2 %v1721_v21  ;;  %v3051_v27 = vadd.f32 %v1262_v62, %v1214_v24  ;;  %v2215_v17 = vld [vmem:[%s3245_s0 + $0x1a8] sm:$0xf0]  ;;  %v1793_v24 = vor.u32 %v2214_v9, %v1792_v8 }
  0xf3   :  { %1411 = vmatmul.bf16.gmra.mxu3 %v1725_v22  ;;  %1460 = vmatmul.bf16.gmra.mxu0 %v1729_v23 }
  0xf4   :  { %v1167_v28 = vpop.f32.mrf.mxu2 }
  0xf5   :  { %v1168_v20 = vadd.f32 %v1167_v28, %v1119_v25  ;;  %v1801_v28 = vor.u32 %v2215_v17, %v1800_v13  ;;  %v1864_v13 = vld [vmem:[%s3245_s0 + $0x210] sm:$0xf]  ;;  %v2232_v17 = vld [vmem:[%s3245_s0 + $0x230] sm:$0xf0] }
  0xf6   :  { %v1216_v30 = vpop.f32.mrf.mxu3  ;;  %v1120_v32 = vpop.f32.mrf.mxu1 }
  0xf7   :  { %v1217_v33 = vadd.f32 %v1216_v30, %v1168_v20  ;;  %v1121_v34 = vadd.f32 %v1120_v32, %v1072_v11 }
  0xf8   :  { %v1267_v36 = vpop.f32.mrf.mxu0 }
  0xf9   :  { %v3061_v39 = vadd.f32 %v1265_v26, %v1217_v33 }
  0xfc   :  { %v1169_v44 = vpop.f32.mrf.mxu2 }
  0xfd   :  { %v1170_v45 = vadd.f32 %v1169_v44, %v1121_v34  ;;  %v1830_v44 = vld [vmem:[%s3245_s0 + $0x1ec] sm:$0xf0] }
  0xfe   :  { %v1218_v46 = vpop.f32.mrf.mxu3  ;;  %v1123_v51 = vpop.f32.mrf.mxu1 }
  0xff   :  { %v1219_v55 = vadd.f32 %v1218_v46, %v1170_v45  ;;  %v1124_v57 = vadd.f32 %v1123_v51, %v2882_v56  ;;  %v1786_v56 = vld [vmem:[%s3245_s0 + $0x19c] sm:$0xf0]  ;;  %v1836_v45 = vld [vmem:[%s3245_s0 + $0x1d0] sm:$0xf]  ;;  %v2224_v46 = vld [vmem:[%s3245_s0 + $0x1f0] sm:$0xf0] }
 0x100   :  { %v1270_v60 = vpop.f32.mrf.mxu0  ;;  %v1789_v23 = vor.u32 %v2209_v5, %v1786_v56 }
 0x101   :  { %1318 = vmatmul.bf16.gmra.mxu1 %v1753_v47  ;;  %1367 = vmatmul.bf16.gmra.mxu2 %v1757_v48  ;;  %v3082_v61 = vadd.f32 %v1267_v36, %v1219_v55 }
 0x103   :  { %1416 = vmatmul.bf16.gmra.mxu3 %v1761_v50  ;;  %1465 = vmatmul.bf16.gmra.mxu0 %v1765_v53  ;;  %v1829_v53 = vor.u32 %v2223_v43, %v1828_v42 }
 0x104   :  { %v1172_v62 = vpop.f32.mrf.mxu2 }
 0x105   :  { %v1173_v63 = vadd.f32 %v1172_v62, %v1124_v57 }
 0x106   :  { %v1221_v0 = vpop.f32.mrf.mxu3  ;;  %v1125_v59 = vpop.f32.mrf.mxu1 }
 0x107   :  { %v1222_v2 = vadd.f32 %v1221_v0, %v1173_v63  ;;  %v1126_v3 = vadd.f32 %v1125_v59, %v2914_v6  ;;  %v2210_v6 = vld [vmem:[%s3245_s0 + $0x184] sm:$0xf] }
 0x108   :  { %v1272_v4 = vpop.f32.mrf.mxu0  ;;  %v1797_v26 = vor.u32 %v2210_v6, %v1794_v12  ;;  %v2227_v6 = vld [vmem:[%s3245_s0 + $0x20c] sm:$0xf] }
 0x109   :  { %v3091_v7 = vadd.f32 %v1270_v60, %v1222_v2  ;;  %v1837_v60 = vor.u32 %v2224_v46, %v1836_v45 }
 0x10c   :  { %v1174_v21 = vpop.f32.mrf.mxu2 }
 0x10d   :  { %v1175_v14 = vadd.f32 %v1174_v21, %v1126_v3  ;;  %v1866_v21 = vld [vmem:[%s3245_s0 + $0x234] sm:$0xf0] }
 0x10e   :  { %v1223_v22 = vpop.f32.mrf.mxu3  ;;  %v1128_v25 = vpop.f32.mrf.mxu1 }
 0x10f   :  { %v1224_v11 = vadd.f32 %v1223_v22, %v1175_v14  ;;  %v1129_v20 = vadd.f32 %v1128_v25, %v2922_v16  ;;  %v1822_v16 = vld [vmem:[%s3245_s0 + $0x1e4] sm:$0xf0]  ;;  %v1872_v14 = vld [vmem:[%s3245_s0 + $0x218] sm:$0xf]  ;;  %v2233_v22 = vld [vmem:[%s3245_s0 + $0x238] sm:$0xf0] }
 0x110   :  { %v1275_v30 = vpop.f32.mrf.mxu0  ;;  %v1825_v50 = vor.u32 %v2218_v40, %v1822_v16 }
 0x111   :  { %1323 = vmatmul.bf16.gmra.mxu1 %v1789_v23  ;;  %1372 = vmatmul.bf16.gmra.mxu2 %v1793_v24  ;;  %v3112_v32 = vadd.f32 %v1272_v4, %v1224_v11 }
 0x113   :  { %1421 = vmatmul.bf16.gmra.mxu3 %v1797_v26  ;;  %1470 = vmatmul.bf16.gmra.mxu0 %v1801_v28  ;;  %v1865_v28 = vor.u32 %v2232_v17, %v1864_v13 }
 0x114   :  { %v1177_v33 = vpop.f32.mrf.mxu2 }
 0x115   :  { %v1178_v34 = vadd.f32 %v1177_v33, %v1129_v20 }
 0x116   :  { %v1226_v36 = vpop.f32.mrf.mxu3  ;;  %v1130_v37 = vpop.f32.mrf.mxu1 }
 0x117   :  { %v1227_v38 = vadd.f32 %v1226_v36, %v1178_v34  ;;  %v1131_v54 = vadd.f32 %v1130_v37, %v2955_v31  ;;  %v2219_v31 = vld [vmem:[%s3245_s0 + $0x1cc] sm:$0xf] }
 0x118   :  { %v1277_v19 = vpop.f32.mrf.mxu0  ;;  %v1833_v57 = vor.u32 %v2219_v31, %v1830_v44 }
 0x119   :  { %v3121_v41 = vadd.f32 %v1275_v30, %v1227_v38  ;;  %v1873_v30 = vor.u32 %v2233_v22, %v1872_v14 }
 0x11c   :  { %v1179_v47 = vpop.f32.mrf.mxu2 }
 0x11d   :  { %v1180_v48 = vadd.f32 %v1179_v47, %v1131_v54 }
 0x11e   :  { %v1228_v51 = vpop.f32.mrf.mxu3  ;;  %v1133_v55 = vpop.f32.mrf.mxu1 }
 0x11f   :  { %v1229_v62 = vadd.f32 %v1228_v51, %v1180_v48  ;;  %v1134_v63 = vadd.f32 %v1133_v55, %v2885_v58  ;;  %v1858_v58 = vld [vmem:[%s3245_s0 + $0x22c] sm:$0xf0] }
 0x120   :  { %v1280_v0 = vpop.f32.mrf.mxu0  ;;  %v1861_v26 = vor.u32 %v2227_v6, %v1858_v58 }
 0x121   :  { %1328 = vmatmul.bf16.gmra.mxu1 %v1825_v50  ;;  %1377 = vmatmul.bf16.gmra.mxu2 %v1829_v53  ;;  %v3142_v59 = vadd.f32 %v1277_v19, %v1229_v62 }
 0x123   :  { %1426 = vmatmul.bf16.gmra.mxu3 %v1833_v57  ;;  %1475 = vmatmul.bf16.gmra.mxu0 %v1837_v60 }
 0x124   :  { %v1182_v2 = vpop.f32.mrf.mxu2 }
 0x125   :  { %v1183_v3 = vadd.f32 %v1182_v2, %v1134_v63 }
 0x126   :  { %v1231_v4 = vpop.f32.mrf.mxu3  ;;  %v1135_v5 = vpop.f32.mrf.mxu1 }
 0x127   :  { %v1232_v56 = vadd.f32 %v1231_v4, %v1183_v3  ;;  %v1136_v8 = vadd.f32 %v1135_v5, %v2917_v10  ;;  %v2228_v10 = vld [vmem:[%s3245_s0 + $0x214] sm:$0xf]  ;;  %v2307_v5 = vld [vmem:[%s3246_s3] sm:$0xff]  }
 0x128   :  { %v1282_v9 = vpop.f32.mrf.mxu0  ;;  %v1869_v20 = vor.u32 %v2228_v10, %v1866_v21  ;;  %v2308_v6 = vunpack.c.l.bf16 %v2307_v5  ;;  %v2309_v13 = vunpack.c.h.bf16 %v2307_v5 }
 0x129   :  { %v3151_v12 = vadd.f32 %v1280_v0, %v1232_v56 }
 0x12c   :  { %v1184_v23 = vpop.f32.mrf.mxu2 }
 0x12d   :  { %v1185_v24 = vadd.f32 %v1184_v23, %v1136_v8 }
 0x12e   :  { %v1233_v25 = vpop.f32.mrf.mxu3  ;;  %v1138_v11 = vpop.f32.mrf.mxu1 }
 0x12f   :  { %v1234_v33 = vadd.f32 %v1233_v25, %v1185_v24  ;;  %v1139_v34 = vadd.f32 %v1138_v11, %v2925_v18 }
 0x130   :  { %v1285_v36 = vpop.f32.mrf.mxu0 }
 0x131   :  { %1333 = vmatmul.bf16.gmra.mxu1 %v1861_v26  ;;  %1382 = vmatmul.bf16.gmra.mxu2 %v1865_v28  ;;  %v3172_v37 = vadd.f32 %v1282_v9, %v1234_v33 }
 0x133   :  { %1431 = vmatmul.bf16.gmra.mxu3 %v1869_v20  ;;  %1480 = vmatmul.bf16.gmra.mxu0 %v1873_v30 }
 0x134   :  { %v1187_v38 = vpop.f32.mrf.mxu2 }
 0x135   :  { %v1188_v54 = vadd.f32 %v1187_v38, %v1139_v34 }
 0x136   :  { %v1236_v19 = vpop.f32.mrf.mxu3  ;;  %v1140_v40 = vpop.f32.mrf.mxu1 }
 0x137   :  { %v1237_v16 = vadd.f32 %v1236_v19, %v1188_v54  ;;  %v1141_v42 = vadd.f32 %v1140_v40, %v2958_v35 }
 0x138   :  { %v1287_v43 = vpop.f32.mrf.mxu0 }
 0x139   :  { %v3175_v31 = vadd.f32 %v1285_v36, %v1237_v16 }
 0x13c   :  { %v1189_v44 = vpop.f32.mrf.mxu2 }
 0x13d   :  { %v1190_v45 = vadd.f32 %v1189_v44, %v1141_v42 }
 0x13e   :  { %v1238_v18 = vpop.f32.mrf.mxu3  ;;  %v1299_v46 = vpop.f32.mrf.mxu1 }
 0x13f   :  { %v1239_v47 = vadd.f32 %v1238_v18, %v1190_v45  ;;  %v1300_v50 = vadd.f32 %v1299_v46, %v2967_v52 }
 0x140   :  { %v1446_v48 = vpop.f32.mrf.mxu0 }
 0x141   :  { %v3177_v51 = vadd.f32 %v1287_v43, %v1239_v47 }
 0x144   :  { %v1348_v53 = vpop.f32.mrf.mxu2 }
 0x145   :  { %v1349_v55 = vadd.f32 %v1348_v53, %v1300_v50 }
 0x146   :  { %v1397_v57 = vpop.f32.mrf.mxu3  ;;  %v1301_v60 = vpop.f32.mrf.mxu1 }
 0x147   :  { %v1398_v63 = vadd.f32 %v1397_v57, %v1349_v55  ;;  %v1302_v35 = vadd.f32 %v1301_v60, %v2988_v15 }
 0x148   :  { %v1448_v62 = vpop.f32.mrf.mxu0 }
 0x149   :  { %v1447_v2 = vadd.f32 %v1446_v48, %v1398_v63 }
 0x14b   :  { %v1486_v52 = vmax.f32 %v1447_v2, 0.0 }
 0x14c   :  { %v1350_v0 = vpop.f32.mrf.mxu2 }
 0x14d   :  { %v1351_v3 = vadd.f32 %v1350_v0, %v1302_v35  ;;  %v1534_v15 = vadd.f32 %v2308_v6, %v1486_v52 }
 0x14e   :  { %v1399_v4 = vpop.f32.mrf.mxu3  ;;  %v1304_v56 = vpop.f32.mrf.mxu1 }
 0x14f   :  { %v1400_v8 = vadd.f32 %v1399_v4, %v1351_v3  ;;  %v1305_v10 = vadd.f32 %v1304_v56, %v2997_v29  ;;  %v2378_v29 = vld [vmem:[%s3246_s3 + $0x8] sm:$0xff]  }
 0x150   :  { %v1451_v9 = vpop.f32.mrf.mxu0  ;;  %v2312_v40 = vunpack.c.l.bf16 %v2378_v29  ;;  %v2313_v42 = vunpack.c.h.bf16 %v2378_v29 }
 0x151   :  { %v1449_v58 = vadd.f32 %v1448_v62, %v1400_v8 }
 0x153   :  { %v1487_v17 = vmax.f32 %v1449_v58, 0.0 }
 0x154   :  { %v1353_v21 = vpop.f32.mrf.mxu2 }
 0x155   :  { %v1535_v14 = vadd.f32 %v2309_v13, %v1487_v17  ;;  %v1354_v22 = vadd.f32 %v1353_v21, %v1305_v10 }
 0x156   :  { %v1402_v23 = vpop.f32.mrf.mxu3  ;;  %v1306_v24 = vpop.f32.mrf.mxu1 }
 0x157   :  { %v2341_v25 = vpack.c.bf16 %v1535_v14, %v1534_v15  ;;  %v1403_v28 = vadd.f32 %v1402_v23, %v1354_v22  ;;  %v1307_v11 = vadd.f32 %v1306_v24, %v3019_v49 }
 0x158   :  { %v1453_v26 = vpop.f32.mrf.mxu0 }
 0x159   :  { %2342 = vst [vmem:[%s3247_s4] sm:$0xff] %v2341_v25   ;;  %v1452_v30 = vadd.f32 %v1451_v9, %v1403_v28 }
 0x15b   :  { %v1488_v19 = vmax.f32 %v1452_v30, 0.0 }
 0x15c   :  { %v1355_v20 = vpop.f32.mrf.mxu2 }
 0x15d   :  { %v1356_v33 = vadd.f32 %v1355_v20, %v1307_v11  ;;  %v1536_v49 = vadd.f32 %v2312_v40, %v1488_v19 }
 0x15e   :  { %v1404_v34 = vpop.f32.mrf.mxu3  ;;  %v1309_v36 = vpop.f32.mrf.mxu1 }
 0x15f   :  { %v1405_v38 = vadd.f32 %v1404_v34, %v1356_v33  ;;  %v1310_v44 = vadd.f32 %v1309_v36, %v3029_v1  ;;  %v2379_v1 = vld [vmem:[%s3246_s3 + $0x10] sm:$0xff]  }
 0x160   :  { %v1456_v54 = vpop.f32.mrf.mxu0  ;;  %v2316_v5 = vunpack.c.l.bf16 %v2379_v1  ;;  %v2317_v8 = vunpack.c.h.bf16 %v2379_v1 }
 0x161   :  { %v1454_v16 = vadd.f32 %v1453_v26, %v1405_v38 }
 0x163   :  { %v1489_v43 = vmax.f32 %v1454_v16, 0.0 }
 0x164   :  { %v1358_v45 = vpop.f32.mrf.mxu2 }
 0x165   :  { %v1537_v18 = vadd.f32 %v2313_v42, %v1489_v43  ;;  %v1359_v46 = vadd.f32 %v1358_v45, %v1310_v44 }
 0x166   :  { %v1407_v47 = vpop.f32.mrf.mxu3  ;;  %v1311_v48 = vpop.f32.mrf.mxu1 }
 0x167   :  { %v2346_v50 = vpack.c.bf16 %v1537_v18, %v1536_v49  ;;  %v1408_v55 = vadd.f32 %v1407_v47, %v1359_v46  ;;  %v1312_v57 = vadd.f32 %v1311_v48, %v3051_v27 }
 0x168   :  { %v1458_v53 = vpop.f32.mrf.mxu0 }
 0x169   :  { %2385 = vst [vmem:[%s3247_s4 + $0x8] sm:$0xff] %v2346_v50   ;;  %v1457_v62 = vadd.f32 %v1456_v54, %v1408_v55 }
 0x16b   :  { %v1490_v4 = vmax.f32 %v1457_v62, 0.0 }
 0x16c   :  { %v1360_v60 = vpop.f32.mrf.mxu2 }
 0x16d   :  { %v1361_v63 = vadd.f32 %v1360_v60, %v1312_v57  ;;  %v1538_v27 = vadd.f32 %v2316_v5, %v1490_v4 }
 0x16e   :  { %v1409_v35 = vpop.f32.mrf.mxu3  ;;  %v1314_v0 = vpop.f32.mrf.mxu1 }
 0x16f   :  { %v1410_v2 = vadd.f32 %v1409_v35, %v1361_v63  ;;  %v1315_v52 = vadd.f32 %v1314_v0, %v3061_v39  ;;  %v2380_v39 = vld [vmem:[%s3246_s3 + $0x18] sm:$0xff]  }
 0x170   :  { %v1461_v3 = vpop.f32.mrf.mxu0  ;;  %v2320_v33 = vunpack.c.l.bf16 %v2380_v39  ;;  %v2321_v29 = vunpack.c.h.bf16 %v2380_v39 }
 0x171   :  { %v1459_v56 = vadd.f32 %v1458_v53, %v1410_v2 }
 0x173   :  { %v1491_v9 = vmax.f32 %v1459_v56, 0.0 }
 0x174   :  { %v1363_v6 = vpop.f32.mrf.mxu2 }
 0x175   :  { %v1539_v58 = vadd.f32 %v2317_v8, %v1491_v9  ;;  %v1364_v13 = vadd.f32 %v1363_v6, %v1315_v52 }
 0x176   :  { %v1412_v17 = vpop.f32.mrf.mxu3  ;;  %v1316_v10 = vpop.f32.mrf.mxu1 }
 0x177   :  { %v2351_v21 = vpack.c.bf16 %v1539_v58, %v1538_v27  ;;  %v1413_v14 = vadd.f32 %v1412_v17, %v1364_v13  ;;  %v1317_v22 = vadd.f32 %v1316_v10, %v3082_v61 }
 0x178   :  { %v1463_v15 = vpop.f32.mrf.mxu0 }
 0x179   :  { %2386 = vst [vmem:[%s3247_s4 + $0x10] sm:$0xff] %v2351_v21   ;;  %v1462_v24 = vadd.f32 %v1461_v3, %v1413_v14 }
 0x17b   :  { %v1492_v30 = vmax.f32 %v1462_v24, 0.0 }
 0x17c   :  { %v1365_v23 = vpop.f32.mrf.mxu2 }
 0x17d   :  { %v1366_v25 = vadd.f32 %v1365_v23, %v1317_v22  ;;  %v1540_v61 = vadd.f32 %v2320_v33, %v1492_v30 }
 0x17e   :  { %v1414_v26 = vpop.f32.mrf.mxu3  ;;  %v1319_v28 = vpop.f32.mrf.mxu1 }
 0x17f   :  { %v1415_v11 = vadd.f32 %v1414_v26, %v1366_v25  ;;  %v1320_v38 = vadd.f32 %v1319_v28, %v3091_v7  ;;  %v2381_v7 = vld [vmem:[%s3246_s3 + $0x20] sm:$0xff]  }
 0x180   :  { %v1466_v20 = vpop.f32.mrf.mxu0  ;;  %v2324_v60 = vunpack.c.l.bf16 %v2381_v7  ;;  %v2325_v63 = vunpack.c.h.bf16 %v2381_v7 }
 0x181   :  { %v1464_v34 = vadd.f32 %v1463_v15, %v1415_v11 }
 0x183   :  { %v1493_v36 = vmax.f32 %v1464_v34, 0.0 }
 0x184   :  { %v1368_v54 = vpop.f32.mrf.mxu2 }
 0x185   :  { %v1541_v19 = vadd.f32 %v2321_v29, %v1493_v36  ;;  %v1369_v40 = vadd.f32 %v1368_v54, %v1320_v38 }
 0x186   :  { %v1417_v16 = vpop.f32.mrf.mxu3  ;;  %v1321_v42 = vpop.f32.mrf.mxu1 }
 0x187   :  { %v2356_v43 = vpack.c.bf16 %v1541_v19, %v1540_v61  ;;  %v1418_v45 = vadd.f32 %v1417_v16, %v1369_v40  ;;  %v1322_v49 = vadd.f32 %v1321_v42, %v3112_v32 }
 0x188   :  { %v1468_v44 = vpop.f32.mrf.mxu0 }
 0x189   :  { %2387 = vst [vmem:[%s3247_s4 + $0x18] sm:$0xff] %v2356_v43   ;;  %v1467_v46 = vadd.f32 %v1466_v20, %v1418_v45 }
 0x18b   :  { %v1494_v57 = vmax.f32 %v1467_v46, 0.0 }
 0x18c   :  { %v1370_v18 = vpop.f32.mrf.mxu2 }
 0x18d   :  { %v1371_v47 = vadd.f32 %v1370_v18, %v1322_v49  ;;  %v1542_v32 = vadd.f32 %v2324_v60, %v1494_v57 }
 0x18e   :  { %v1419_v48 = vpop.f32.mrf.mxu3  ;;  %v1324_v50 = vpop.f32.mrf.mxu1 }
 0x18f   :  { %v1420_v53 = vadd.f32 %v1419_v48, %v1371_v47  ;;  %v1325_v1 = vadd.f32 %v1324_v50, %v3121_v41  ;;  %v2382_v41 = vld [vmem:[%s3246_s3 + $0x28] sm:$0xff]  }
 0x190   :  { %v1471_v55 = vpop.f32.mrf.mxu0  ;;  %v2328_v15 = vunpack.c.l.bf16 %v2382_v41  ;;  %v2329_v22 = vunpack.c.h.bf16 %v2382_v41 }
 0x191   :  { %v1469_v62 = vadd.f32 %v1468_v44, %v1420_v53 }
 0x193   :  { %v1495_v35 = vmax.f32 %v1469_v62, 0.0 }
 0x194   :  { %v1373_v0 = vpop.f32.mrf.mxu2 }
 0x195   :  { %v1543_v2 = vadd.f32 %v2325_v63, %v1495_v35  ;;  %v1374_v3 = vadd.f32 %v1373_v0, %v1325_v1 }
 0x196   :  { %v1422_v4 = vpop.f32.mrf.mxu3  ;;  %v1326_v5 = vpop.f32.mrf.mxu1 }
 0x197   :  { %v2361_v56 = vpack.c.bf16 %v1543_v2, %v1542_v32  ;;  %v1423_v9 = vadd.f32 %v1422_v4, %v1374_v3  ;;  %v1327_v52 = vadd.f32 %v1326_v5, %v3142_v59 }
 0x198   :  { %v1473_v8 = vpop.f32.mrf.mxu0 }
 0x199   :  { %2388 = vst [vmem:[%s3247_s4 + $0x20] sm:$0xff] %v2361_v56   ;;  %v1472_v27 = vadd.f32 %v1471_v55, %v1423_v9 }
 0x19b   :  { %v1496_v21 = vmax.f32 %v1472_v27, 0.0 }
 0x19c   :  { %v1375_v6 = vpop.f32.mrf.mxu2 }
 0x19d   :  { %v1376_v58 = vadd.f32 %v1375_v6, %v1327_v52  ;;  %v1544_v59 = vadd.f32 %v2328_v15, %v1496_v21 }
 0x19e   :  { %v1424_v13 = vpop.f32.mrf.mxu3  ;;  %v1329_v17 = vpop.f32.mrf.mxu1 }
 0x19f   :  { %v1425_v10 = vadd.f32 %v1424_v13, %v1376_v58  ;;  %v1330_v25 = vadd.f32 %v1329_v17, %v3151_v12  ;;  %v2383_v12 = vld [vmem:[%s3246_s3 + $0x30] sm:$0xff]  }
 0x1a0   :  { %v1476_v23 = vpop.f32.mrf.mxu0  ;;  %v2332_v42 = vunpack.c.l.bf16 %v2383_v12  ;;  %v2333_v44 = vunpack.c.h.bf16 %v2383_v12 }
 0x1a1   :  { %v1474_v14 = vadd.f32 %v1473_v8, %v1425_v10 }
 0x1a3   :  { %v1497_v24 = vmax.f32 %v1474_v14, 0.0 }
 0x1a4   :  { %v1378_v26 = vpop.f32.mrf.mxu2 }
 0x1a5   :  { %v1545_v39 = vadd.f32 %v2329_v22, %v1497_v24  ;;  %v1379_v28 = vadd.f32 %v1378_v26, %v1330_v25 }
 0x1a6   :  { %v1427_v11 = vpop.f32.mrf.mxu3  ;;  %v1331_v20 = vpop.f32.mrf.mxu1 }
 0x1a7   :  { %v2366_v30 = vpack.c.bf16 %v1545_v39, %v1544_v59  ;;  %v1428_v33 = vadd.f32 %v1427_v11, %v1379_v28  ;;  %v1332_v34 = vadd.f32 %v1331_v20, %v3172_v37 }
 0x1a8   :  { %v1478_v29 = vpop.f32.mrf.mxu0 }
 0x1a9   :  { %2389 = vst [vmem:[%s3247_s4 + $0x28] sm:$0xff] %v2366_v30   ;;  %v1477_v38 = vadd.f32 %v1476_v23, %v1428_v33 }
 0x1ab   :  { %v1498_v16 = vmax.f32 %v1477_v38, 0.0 }
 0x1ac   :  { %v1380_v36 = vpop.f32.mrf.mxu2 }
 0x1ad   :  { %v1381_v54 = vadd.f32 %v1380_v36, %v1332_v34  ;;  %v1546_v37 = vadd.f32 %v2332_v42, %v1498_v16 }
 0x1ae   :  { %v1429_v61 = vpop.f32.mrf.mxu3  ;;  %v1334_v19 = vpop.f32.mrf.mxu1 }
 0x1af   :  { %v1430_v40 = vadd.f32 %v1429_v61, %v1381_v54  ;;  %v1335_v49 = vadd.f32 %v1334_v19, %v3175_v31  ;;  %v2384_v31 = vld [vmem:[%s3246_s3 + $0x38] sm:$0xff]  }
 0x1b0   :  { %v1481_v7 = vpop.f32.mrf.mxu0  ;;  %v2336_v2 = vunpack.c.l.bf16 %v2384_v31  ;;  %v2337_v4 = vunpack.c.h.bf16 %v2384_v31 }
 0x1b1   :  { %v1479_v43 = vadd.f32 %v1478_v29, %v1430_v40 }
 0x1b3   :  { %v1499_v45 = vmax.f32 %v1479_v43, 0.0 }
 0x1b4   :  { %v1383_v18 = vpop.f32.mrf.mxu2 }
 0x1b5   :  { %v1547_v46 = vadd.f32 %v2333_v44, %v1499_v45  ;;  %v1384_v47 = vadd.f32 %v1383_v18, %v1335_v49 }
 0x1b6   :  { %v1432_v48 = vpop.f32.mrf.mxu3  ;;  %v1336_v53 = vpop.f32.mrf.mxu1 }
 0x1b7   :  { %v2371_v50 = vpack.c.bf16 %v1547_v46, %v1546_v37  ;;  %v1433_v55 = vadd.f32 %v1432_v48, %v1384_v47  ;;  %v1337_v57 = vadd.f32 %v1336_v53, %v3177_v51 }
 0x1b8   :  { %v1483_v0 = vpop.f32.mrf.mxu0 }
 0x1b9   :  { %2390 = vst [vmem:[%s3247_s4 + $0x30] sm:$0xff] %v2371_v50   ;;  %v1482_v62 = vadd.f32 %v1481_v7, %v1433_v55 }
 0x1bb   :  { %v1500_v32 = vmax.f32 %v1482_v62, 0.0 }
 0x1bc   :  { %v1385_v60 = vpop.f32.mrf.mxu2 }
 0x1bd   :  { %v1386_v63 = vadd.f32 %v1385_v60, %v1337_v57  ;;  %v1548_v56 = vadd.f32 %v2336_v2, %v1500_v32 }
 0x1be   :  { %v1434_v35 = vpop.f32.mrf.mxu3 }
 0x1bf   :  { %v1435_v1 = vadd.f32 %v1434_v35, %v1386_v63 }
 0x1c1   :  { %v1484_v3 = vadd.f32 %v1483_v0, %v1435_v1 }
 0x1c3   :  { %v1501_v5 = vmax.f32 %v1484_v3, 0.0 }
 0x1c5   :  { %v1549_v8 = vadd.f32 %v2337_v4, %v1501_v5 }
 0x1c7   :  { %v2376_v9 = vpack.c.bf16 %v1549_v8, %v1548_v56 }
 0x1c9   :  { %2391 = vst [vmem:[%s3247_s4 + $0x38] sm:$0xff] %v2376_v9  }

// kernel: l1block_forward.21
= control target key start
LH: loop header
LB: loop body
LE: loop exit
PB: predicated region body
PF: predicated region fallthrough
CT: control target
= control target key end

     0   :  { %s1716_s1 = inlined_call_operand.vmem [shape: bf16[1152,128], index: 1, kind: input, shape index: {}]   ;;  %s1717_s0 = inlined_call_operand.vmem [shape: bf16[32,1152], index: 0, kind: input, shape index: {}]   ;;  %s1718_s2 = inlined_call_operand.vmem [shape: f32[1,128], index: 2, kind: input, shape index: {}]   ;;  %s1719_s3 = inlined_call_operand.vmem [shape: bf16[32,128], index: 3, kind: output, shape index: {}]  }
   0x1   :  { %v1278_v0 = vld [vmem:[%s1716_s1 + $0x38] sm:$0xff]  ;;  %v1277_v4 = vld [vmem:[%s1716_s1 + $0x30] sm:$0xff]  ;;  %v1276_v8 = vld [vmem:[%s1716_s1 + $0x28] sm:$0xff] }
   0x2   :  { %v1286_v1 = vld [vmem:[%s1716_s1 + $0x78] sm:$0xff]  ;;  %706 = vmatpush.bf16.msra.mxu0 %v1278_v0  ;;  %v1285_v5 = vld [vmem:[%s1716_s1 + $0x70] sm:$0xff]  ;;  %v1284_v9 = vld [vmem:[%s1716_s1 + $0x68] sm:$0xff] }
   0x3   :  { %v1294_v2 = vld [vmem:[%s1716_s1 + $0xb8] sm:$0xff]  ;;  %725 = vmatpush.bf16.msra.mxu1 %v1286_v1  ;;  %v1293_v6 = vld [vmem:[%s1716_s1 + $0xb0] sm:$0xff]  ;;  %v1292_v10 = vld [vmem:[%s1716_s1 + $0xa8] sm:$0xff] }
   0x4   :  { %v1302_v3 = vld [vmem:[%s1716_s1 + $0xf8] sm:$0xff]  ;;  %744 = vmatpush.bf16.msra.mxu2 %v1294_v2  ;;  %v1301_v7 = vld [vmem:[%s1716_s1 + $0xf0] sm:$0xff]  ;;  %v1300_v11 = vld [vmem:[%s1716_s1 + $0xe8] sm:$0xff] }
   0x5   :  { %763 = vmatpush.bf16.msra.mxu3 %v1302_v3  ;;  %v1275_v12 = vld [vmem:[%s1716_s1 + $0x20] sm:$0xff]  ;;  %v1274_v16 = vld [vmem:[%s1716_s1 + $0x18] sm:$0xff]  ;;  %v1273_v20 = vld [vmem:[%s1716_s1 + $0x10] sm:$0xff] }
   0x6   :  { %707 = vmatpush.bf16.msra.mxu0 %v1277_v4  ;;  %v1283_v13 = vld [vmem:[%s1716_s1 + $0x60] sm:$0xff]  ;;  %v1282_v17 = vld [vmem:[%s1716_s1 + $0x58] sm:$0xff]  ;;  %v1281_v21 = vld [vmem:[%s1716_s1 + $0x50] sm:$0xff] }
   0x7   :  { %726 = vmatpush.bf16.msra.mxu1 %v1285_v5  ;;  %v1291_v14 = vld [vmem:[%s1716_s1 + $0xa0] sm:$0xff]  ;;  %v1290_v18 = vld [vmem:[%s1716_s1 + $0x98] sm:$0xff]  ;;  %v1289_v22 = vld [vmem:[%s1716_s1 + $0x90] sm:$0xff] }
   0x8   :  { %745 = vmatpush.bf16.msra.mxu2 %v1293_v6  ;;  %v1299_v15 = vld [vmem:[%s1716_s1 + $0xe0] sm:$0xff]  ;;  %v1298_v19 = vld [vmem:[%s1716_s1 + $0xd8] sm:$0xff]  ;;  %v1297_v23 = vld [vmem:[%s1716_s1 + $0xd0] sm:$0xff] }
   0x9   :  { %764 = vmatpush.bf16.msra.mxu3 %v1301_v7  ;;  %v1272_v24 = vld [vmem:[%s1716_s1 + $0x8] sm:$0xff]  ;;  %v1271_v28 = vld [vmem:[%s1716_s1] sm:$0xff]  ;;  %v905_v39 = vld [vmem:[%s1717_s0 + $0x2c] sm:$0xf0] }
   0xa   :  { %708 = vmatpush.bf16.msra.mxu0 %v1276_v8  ;;  %v1280_v25 = vld [vmem:[%s1716_s1 + $0x48] sm:$0xff]  ;;  %v1279_v29 = vld [vmem:[%s1716_s1 + $0x40] sm:$0xff]  ;;  %v1310_v40 = vld [vmem:[%s1716_s1 + $0x138] sm:$0xff] }
   0xb   :  { %727 = vmatpush.bf16.msra.mxu1 %v1284_v9  ;;  %v1288_v26 = vld [vmem:[%s1716_s1 + $0x88] sm:$0xff]  ;;  %v1287_v30 = vld [vmem:[%s1716_s1 + $0x80] sm:$0xff]  ;;  %v1318_v41 = vld [vmem:[%s1716_s1 + $0x178] sm:$0xff] }
   0xc   :  { %746 = vmatpush.bf16.msra.mxu2 %v1292_v10  ;;  %v1296_v27 = vld [vmem:[%s1716_s1 + $0xc8] sm:$0xff]  ;;  %v1295_v31 = vld [vmem:[%s1716_s1 + $0xc0] sm:$0xff]  ;;  %v1326_v46 = vld [vmem:[%s1716_s1 + $0x1b8] sm:$0xff] }
   0xd   :  { %765 = vmatpush.bf16.msra.mxu3 %v1300_v11  ;;  %v895_v32 = vld [vmem:[%s1717_s0] sm:$0xf]  ;;  %v1257_v33 = vld [vmem:[%s1717_s0 + $0x20] sm:$0xf0]  ;;  %v897_v35 = vld [vmem:[%s1717_s0 + $0x24] sm:$0xf0] }
   0xe   :  { %709 = vmatpush.bf16.msra.mxu0 %v1275_v12  ;;  %v1253_v34 = vld [vmem:[%s1717_s0 + $0x4] sm:$0xf]  ;;  %v903_v36 = vld [vmem:[%s1717_s0 + $0x8] sm:$0xf]  ;;  %v1258_v37 = vld [vmem:[%s1717_s0 + $0x28] sm:$0xf0]  ;;  %v896_v42 = vor.u32 %v1257_v33, %v895_v32 }
   0xf   :  { %728 = vmatpush.bf16.msra.mxu1 %v1283_v13  ;;  %v1254_v38 = vld [vmem:[%s1717_s0 + $0xc] sm:$0xf]  ;;  %v900_v43 = vor.u32 %v1253_v34, %v897_v35  ;;  %v904_v44 = vor.u32 %v1258_v37, %v903_v36  ;;  %v1334_v47 = vld [vmem:[%s1716_s1 + $0x1f8] sm:$0xff]  ;;  %v1309_v48 = vld [vmem:[%s1716_s1 + $0x130] sm:$0xff] }
  0x10   :  { %747 = vmatpush.bf16.msra.mxu2 %v1291_v14  ;;  %v908_v45 = vor.u32 %v1254_v38, %v905_v39  ;;  %v1317_v49 = vld [vmem:[%s1716_s1 + $0x170] sm:$0xff]  ;;  %v1308_v52 = vld [vmem:[%s1716_s1 + $0x128] sm:$0xff]  ;;  %v1307_v56 = vld [vmem:[%s1716_s1 + $0x120] sm:$0xff] }
  0x11   :  { %766 = vmatpush.bf16.msra.mxu3 %v1299_v15  ;;  %v1325_v50 = vld [vmem:[%s1716_s1 + $0x1b0] sm:$0xff]  ;;  %v1316_v53 = vld [vmem:[%s1716_s1 + $0x168] sm:$0xff]  ;;  %v1315_v57 = vld [vmem:[%s1716_s1 + $0x160] sm:$0xff] }
  0x12   :  { %710 = vmatpush.bf16.msra.mxu0 %v1274_v16  ;;  %v1333_v51 = vld [vmem:[%s1716_s1 + $0x1f0] sm:$0xff]  ;;  %v1324_v54 = vld [vmem:[%s1716_s1 + $0x1a8] sm:$0xff]  ;;  %v1323_v58 = vld [vmem:[%s1716_s1 + $0x1a0] sm:$0xff] }
  0x13   :  { %729 = vmatpush.bf16.msra.mxu1 %v1282_v17  ;;  %v1332_v55 = vld [vmem:[%s1716_s1 + $0x1e8] sm:$0xff]  ;;  %v1331_v59 = vld [vmem:[%s1716_s1 + $0x1e0] sm:$0xff]  ;;  %v933_v63 = vld [vmem:[%s1717_s0 + $0x6c] sm:$0xf0] }
  0x14   :  { %748 = vmatpush.bf16.msra.mxu2 %v1290_v18  ;;  %v931_v60 = vld [vmem:[%s1717_s0 + $0x48] sm:$0xf]  ;;  %v1266_v61 = vld [vmem:[%s1717_s0 + $0x68] sm:$0xf0]  ;;  %v939_v0 = vld [vmem:[%s1717_s0 + $0x50] sm:$0xf] }
  0x15   :  { %767 = vmatpush.bf16.msra.mxu3 %v1298_v19  ;;  %v1262_v62 = vld [vmem:[%s1717_s0 + $0x4c] sm:$0xf]  ;;  %v1267_v1 = vld [vmem:[%s1717_s0 + $0x70] sm:$0xf0]  ;;  %v941_v3 = vld [vmem:[%s1717_s0 + $0x74] sm:$0xf0]  ;;  %v932_v6 = vor.u32 %v1266_v61, %v931_v60 }
  0x16   :  { %711 = vmatpush.bf16.msra.mxu0 %v1273_v20  ;;  %v1263_v2 = vld [vmem:[%s1717_s0 + $0x54] sm:$0xf]  ;;  %v1306_v4 = vld [vmem:[%s1716_s1 + $0x118] sm:$0xff]  ;;  %v936_v7 = vor.u32 %v1262_v62, %v933_v63  ;;  %v940_v8 = vor.u32 %v1267_v1, %v939_v0  ;;  %v1304_v16 = vld [vmem:[%s1716_s1 + $0x108] sm:$0xff] }
  0x17   :  { %730 = vmatpush.bf16.msra.mxu1 %v1281_v21  ;;  %v1314_v5 = vld [vmem:[%s1716_s1 + $0x158] sm:$0xff]  ;;  %v944_v9 = vor.u32 %v1263_v2, %v941_v3  ;;  %v1305_v12 = vld [vmem:[%s1716_s1 + $0x110] sm:$0xff]  ;;  %v1312_v17 = vld [vmem:[%s1716_s1 + $0x148] sm:$0xff] }
  0x18   :  { %749 = vmatpush.bf16.msra.mxu2 %v1289_v22  ;;  %v1322_v10 = vld [vmem:[%s1716_s1 + $0x198] sm:$0xff]  ;;  %v1313_v13 = vld [vmem:[%s1716_s1 + $0x150] sm:$0xff]  ;;  %v1320_v18 = vld [vmem:[%s1716_s1 + $0x188] sm:$0xff] }
  0x19   :  { %768 = vmatpush.bf16.msra.mxu3 %v1297_v23  ;;  %v1330_v11 = vld [vmem:[%s1716_s1 + $0x1d8] sm:$0xff]  ;;  %v1321_v14 = vld [vmem:[%s1716_s1 + $0x190] sm:$0xff]  ;;  %v1328_v19 = vld [vmem:[%s1716_s1 + $0x1c8] sm:$0xff] }
  0x1a   :  { %712 = vmatpush.bf16.msra.mxu0 %v1272_v24  ;;  %v1329_v15 = vld [vmem:[%s1716_s1 + $0x1d0] sm:$0xff]  ;;  %v1303_v20 = vld [vmem:[%s1716_s1 + $0x100] sm:$0xff]  ;;  %v1340_v38 = vld [vmem:[%s1716_s1 + $0x228] sm:$0xff] }
  0x1b   :  { %731 = vmatpush.bf16.msra.mxu1 %v1280_v25  ;;  %v1311_v21 = vld [vmem:[%s1716_s1 + $0x140] sm:$0xff]  ;;  %v911_v24 = vld [vmem:[%s1717_s0 + $0x10] sm:$0xf]  ;;  %v1259_v25 = vld [vmem:[%s1717_s0 + $0x30] sm:$0xf0] }
  0x1c   :  { %750 = vmatpush.bf16.msra.mxu2 %v1288_v26  ;;  %v1319_v22 = vld [vmem:[%s1716_s1 + $0x180] sm:$0xff]  ;;  %v1342_v26 = vld [vmem:[%s1716_s1 + $0x238] sm:$0xff]  ;;  %v912_v33 = vor.u32 %v1259_v25, %v911_v24  ;;  %v1341_v37 = vld [vmem:[%s1716_s1 + $0x230] sm:$0xff] }
  0x1d   :  { %769 = vmatpush.bf16.msra.mxu3 %v1296_v27  ;;  %v1327_v23 = vld [vmem:[%s1716_s1 + $0x1c0] sm:$0xff]  ;;  %v1255_v27 = vld [vmem:[%s1717_s0 + $0x14] sm:$0xf] }
  0x1e   :  { %713 = vmatpush.bf16.msra.mxu0 %v1271_v28  ;;  %v913_v28 = vld [vmem:[%s1717_s0 + $0x34] sm:$0xf0]  ;;  %v921_v32 = vld [vmem:[%s1717_s0 + $0x3c] sm:$0xf0] }
  0x1f   :  { %732 = vmatpush.bf16.msra.mxu1 %v1279_v29  ;;  %v919_v29 = vld [vmem:[%s1717_s0 + $0x18] sm:$0xf]  ;;  %v916_v34 = vor.u32 %v1255_v27, %v913_v28  ;;  %v1339_v39 = vld [vmem:[%s1716_s1 + $0x220] sm:$0xff] }
  0x20   :  { %751 = vmatpush.bf16.msra.mxu2 %v1287_v30  ;;  %v1260_v30 = vld [vmem:[%s1717_s0 + $0x38] sm:$0xf0] }
  0x21   :  { %770 = vmatpush.bf16.msra.mxu3 %v1295_v31  ;;  %714 = vmatmul.bf16.vlgmr.msra.gmra.mxu0 %v896_v42  ;;  %v1256_v31 = vld [vmem:[%s1717_s0 + $0x1c] sm:$0xf]  ;;  %v920_v35 = vor.u32 %v1260_v30, %v919_v29 }
  0x22   :  { %782 = vmatpush.bf16.msrb.mxu0 %v1310_v40  ;;  %733 = vmatmul.bf16.vlgmr.msra.gmra.mxu1 %v900_v43  ;;  %v924_v36 = vor.u32 %v1256_v31, %v921_v32  ;;  %v947_v40 = vld [vmem:[%s1717_s0 + $0x58] sm:$0xf]  ;;  %v1264_v42 = vld [vmem:[%s1717_s0 + $0x5c] sm:$0xf]  ;;  %v949_v43 = vld [vmem:[%s1717_s0 + $0x7c] sm:$0xf0] }
  0x23   :  { %801 = vmatpush.bf16.msrb.mxu1 %v1318_v41  ;;  %752 = vmatmul.bf16.vlgmr.msra.gmra.mxu2 %v904_v44  ;;  %v1268_v41 = vld [vmem:[%s1717_s0 + $0x78] sm:$0xf0]  ;;  %v955_v44 = vld [vmem:[%s1717_s0 + $0x60] sm:$0xf] }
  0x24   :  { %771 = vmatmul.bf16.vlgmr.msra.gmra.mxu3 %v908_v45  ;;  %820 = vmatpush.bf16.msrb.mxu2 %v1326_v46  ;;  %v1269_v45 = vld [vmem:[%s1717_s0 + $0x80] sm:$0xf0] }
  0x25   :  { %839 = vmatpush.bf16.msrb.mxu3 %v1334_v47  ;;  %v1265_v46 = vld [vmem:[%s1717_s0 + $0x64] sm:$0xf]  ;;  %v957_v47 = vld [vmem:[%s1717_s0 + $0x84] sm:$0xf0] }
  0x26   :  { %783 = vmatpush.bf16.msrb.mxu0 %v1309_v48  ;;  %v1338_v48 = vld [vmem:[%s1716_s1 + $0x218] sm:$0xff] }
  0x27   :  { %802 = vmatpush.bf16.msrb.mxu1 %v1317_v49  ;;  %v948_v49 = vor.u32 %v1268_v41, %v947_v40 }
  0x28   :  { %821 = vmatpush.bf16.msrb.mxu2 %v1325_v50  ;;  %v952_v50 = vor.u32 %v1264_v42, %v949_v43 }
  0x29   :  { %840 = vmatpush.bf16.msrb.mxu3 %v1333_v51  ;;  %v956_v51 = vor.u32 %v1269_v45, %v955_v44 }
  0x2a   :  { %784 = vmatpush.bf16.msrb.mxu0 %v1308_v52  ;;  %v960_v52 = vor.u32 %v1265_v46, %v957_v47 }
  0x2b   :  { %803 = vmatpush.bf16.msrb.mxu1 %v1316_v53  ;;  %v1337_v53 = vld [vmem:[%s1716_s1 + $0x210] sm:$0xff] }
  0x2c   :  { %822 = vmatpush.bf16.msrb.mxu2 %v1324_v54  ;;  %v1336_v54 = vld [vmem:[%s1716_s1 + $0x208] sm:$0xff] }
  0x2d   :  { %841 = vmatpush.bf16.msrb.mxu3 %v1332_v55  ;;  %v1335_v55 = vld [vmem:[%s1716_s1 + $0x200] sm:$0xff] }
  0x2e   :  { %785 = vmatpush.bf16.msrb.mxu0 %v1307_v56  ;;  %v927_v56 = vld [vmem:[%s1717_s0 + $0x20] sm:$0xf] }
  0x2f   :  { %804 = vmatpush.bf16.msrb.mxu1 %v1315_v57  ;;  %v1261_v57 = vld [vmem:[%s1717_s0 + $0x40] sm:$0xf0] }
  0x30   :  { %823 = vmatpush.bf16.msrb.mxu2 %v1323_v58  ;;  %v963_v58 = vld [vmem:[%s1717_s0 + $0x68] sm:$0xf]  ;;  %v928_v60 = vor.u32 %v1261_v57, %v927_v56 }
  0x31   :  { %842 = vmatpush.bf16.msrb.mxu3 %v1331_v59  ;;  %719 = vmatmul.bf16.gmra.mxu0 %v932_v6  ;;  %v1270_v59 = vld [vmem:[%s1717_s0 + $0x88] sm:$0xf0] }
  0x32   :  { %786 = vmatpush.bf16.msrb.mxu0 %v1306_v4  ;;  %738 = vmatmul.bf16.gmra.mxu1 %v936_v7  ;;  %v964_v61 = vor.u32 %v1270_v59, %v963_v58 }
  0x33   :  { %805 = vmatpush.bf16.msrb.mxu1 %v1314_v5  ;;  %757 = vmatmul.bf16.gmra.mxu2 %v940_v8 }
  0x34   :  { %776 = vmatmul.bf16.gmra.mxu3 %v944_v9  ;;  %824 = vmatpush.bf16.msrb.mxu2 %v1322_v10 }
  0x35   :  { %843 = vmatpush.bf16.msrb.mxu3 %v1330_v11 }
  0x36   :  { %787 = vmatpush.bf16.msrb.mxu0 %v1305_v12 }
  0x37   :  { %806 = vmatpush.bf16.msrb.mxu1 %v1313_v13 }
  0x38   :  { %825 = vmatpush.bf16.msrb.mxu2 %v1321_v14 }
  0x39   :  { %844 = vmatpush.bf16.msrb.mxu3 %v1329_v15 }
  0x3a   :  { %788 = vmatpush.bf16.msrb.mxu0 %v1304_v16 }
  0x3b   :  { %807 = vmatpush.bf16.msrb.mxu1 %v1312_v17 }
  0x3c   :  { %826 = vmatpush.bf16.msrb.mxu2 %v1320_v18 }
  0x3d   :  { %845 = vmatpush.bf16.msrb.mxu3 %v1328_v19 }
  0x3e   :  { %789 = vmatpush.bf16.msrb.mxu0 %v1303_v20  ;;  %v1362_v20 = vld [vmem:[%s1718_s2] ss:$0 sm:$0xff] }
  0x3f   :  { %808 = vmatpush.bf16.msrb.mxu1 %v1311_v21 }
  0x40   :  { %827 = vmatpush.bf16.msrb.mxu2 %v1319_v22 }
  0x41   :  { %846 = vmatpush.bf16.msrb.mxu3 %v1327_v23  ;;  %790 = vmatmul.bf16.vlgmr.msrb.gmra.mxu0 %v912_v33 }
  0x42   :  { %858 = vmatpush.bf16.msra.mxu0 %v1342_v26  ;;  %809 = vmatmul.bf16.vlgmr.msrb.gmra.mxu1 %v916_v34 }
  0x43   :  { %1354 = vmatpush.bf16.msra.mxu1 %v1342_v26  ;;  %828 = vmatmul.bf16.vlgmr.msrb.gmra.mxu2 %v920_v35 }
  0x44   :  { %847 = vmatmul.bf16.vlgmr.msrb.gmra.mxu3 %v924_v36 }
  0x46   :  { %859 = vmatpush.bf16.msra.mxu0 %v1341_v37 }
  0x47   :  { %1355 = vmatpush.bf16.msra.mxu1 %v1341_v37 }
  0x4a   :  { %860 = vmatpush.bf16.msra.mxu0 %v1340_v38 }
  0x4b   :  { %1356 = vmatpush.bf16.msra.mxu1 %v1340_v38 }
  0x4e   :  { %861 = vmatpush.bf16.msra.mxu0 %v1339_v39 }
  0x4f   :  { %1357 = vmatpush.bf16.msra.mxu1 %v1339_v39 }
  0x51   :  { %795 = vmatmul.bf16.gmra.mxu0 %v948_v49 }
  0x52   :  { %862 = vmatpush.bf16.msra.mxu0 %v1338_v48  ;;  %814 = vmatmul.bf16.gmra.mxu1 %v952_v50 }
  0x53   :  { %1358 = vmatpush.bf16.msra.mxu1 %v1338_v48  ;;  %833 = vmatmul.bf16.gmra.mxu2 %v956_v51 }
  0x54   :  { %852 = vmatmul.bf16.gmra.mxu3 %v960_v52 }
  0x56   :  { %863 = vmatpush.bf16.msra.mxu0 %v1337_v53 }
  0x57   :  { %1359 = vmatpush.bf16.msra.mxu1 %v1337_v53 }
  0x5a   :  { %864 = vmatpush.bf16.msra.mxu0 %v1336_v54 }
  0x5b   :  { %1360 = vmatpush.bf16.msra.mxu1 %v1336_v54 }
  0x5e   :  { %865 = vmatpush.bf16.msra.mxu0 %v1335_v55 }
  0x5f   :  { %1361 = vmatpush.bf16.msra.mxu1 %v1335_v55 }
  0x61   :  { %866 = vmatmul.bf16.vlgmr.msra.gmra.mxu0 %v928_v60 }
  0x62   :  { %871 = vmatmul.bf16.vlgmr.msra.gmra.mxu1 %v964_v61 }
  0x9e   :  { %v715_v62 = vpop.f32.mrf.mxu0 }
  0x9f   :  { %v734_v63 = vpop.f32.mrf.mxu1  ;;  %v716_v21 = vadd.f32 %v1362_v20, %v715_v62 }
  0xa1   :  { %v735_v29 = vadd.f32 %v734_v63, %v716_v21 }
  0xa6   :  { %v753_v0 = vpop.f32.mrf.mxu2  ;;  %v717_v2 = vpop.f32.mrf.mxu0 }
  0xa7   :  { %v772_v1 = vpop.f32.mrf.mxu3  ;;  %v736_v3 = vpop.f32.mrf.mxu1  ;;  %v718_v26 = vadd.f32 %v1362_v20, %v717_v2  ;;  %v754_v31 = vadd.f32 %v753_v0, %v735_v29 }
  0xa9   :  { %v737_v32 = vadd.f32 %v736_v3, %v718_v26  ;;  %v773_v40 = vadd.f32 %v772_v1, %v754_v31 }
  0xae   :  { %v755_v4 = vpop.f32.mrf.mxu2  ;;  %v720_v6 = vpop.f32.mrf.mxu0 }
  0xaf   :  { %v774_v5 = vpop.f32.mrf.mxu3  ;;  %v739_v7 = vpop.f32.mrf.mxu1  ;;  %v721_v22 = vadd.f32 %v1362_v20, %v720_v6  ;;  %v756_v35 = vadd.f32 %v755_v4, %v737_v32 }
  0xb1   :  { %v740_v30 = vadd.f32 %v739_v7, %v721_v22  ;;  %v775_v42 = vadd.f32 %v774_v5, %v756_v35 }
  0xb6   :  { %v758_v8 = vpop.f32.mrf.mxu2  ;;  %v722_v10 = vpop.f32.mrf.mxu0 }
  0xb7   :  { %v777_v9 = vpop.f32.mrf.mxu3  ;;  %v741_v11 = vpop.f32.mrf.mxu1  ;;  %v723_v27 = vadd.f32 %v1362_v20, %v722_v10  ;;  %v759_v33 = vadd.f32 %v758_v8, %v740_v30 }
  0xb9   :  { %v742_v34 = vadd.f32 %v741_v11, %v723_v27  ;;  %v778_v41 = vadd.f32 %v777_v9, %v759_v33 }
  0xbe   :  { %v760_v12 = vpop.f32.mrf.mxu2  ;;  %v791_v14 = vpop.f32.mrf.mxu0 }
  0xbf   :  { %v779_v13 = vpop.f32.mrf.mxu3  ;;  %v810_v15 = vpop.f32.mrf.mxu1  ;;  %v761_v36 = vadd.f32 %v760_v12, %v742_v34  ;;  %v792_v44 = vadd.f32 %v791_v14, %v773_v40 }
  0xc1   :  { %v780_v43 = vadd.f32 %v779_v13, %v761_v36  ;;  %v811_v49 = vadd.f32 %v810_v15, %v792_v44 }
  0xc6   :  { %v829_v16 = vpop.f32.mrf.mxu2  ;;  %v793_v18 = vpop.f32.mrf.mxu0 }
  0xc7   :  { %v848_v17 = vpop.f32.mrf.mxu3  ;;  %v812_v19 = vpop.f32.mrf.mxu1  ;;  %v794_v47 = vadd.f32 %v793_v18, %v775_v42  ;;  %v830_v54 = vadd.f32 %v829_v16, %v811_v49 }
  0xc9   :  { %v813_v55 = vadd.f32 %v812_v19, %v794_v47  ;;  %v849_v60 = vadd.f32 %v848_v17, %v830_v54 }
  0xce   :  { %v831_v23 = vpop.f32.mrf.mxu2  ;;  %v796_v24 = vpop.f32.mrf.mxu0 }
  0xcf   :  { %v815_v25 = vpop.f32.mrf.mxu1  ;;  %v850_v28 = vpop.f32.mrf.mxu3  ;;  %v797_v45 = vadd.f32 %v796_v24, %v778_v41  ;;  %v832_v58 = vadd.f32 %v831_v23, %v813_v55 }
  0xd1   :  { %v816_v50 = vadd.f32 %v815_v25, %v797_v45  ;;  %v851_v63 = vadd.f32 %v850_v28, %v832_v58 }
  0xd6   :  { %v834_v37 = vpop.f32.mrf.mxu2  ;;  %v798_v38 = vpop.f32.mrf.mxu0 }
  0xd7   :  { %v817_v39 = vpop.f32.mrf.mxu1  ;;  %v853_v46 = vpop.f32.mrf.mxu3  ;;  %v799_v48 = vadd.f32 %v798_v38, %v780_v43  ;;  %v835_v56 = vadd.f32 %v834_v37, %v816_v50 }
  0xd9   :  { %v818_v57 = vadd.f32 %v817_v39, %v799_v48  ;;  %v854_v61 = vadd.f32 %v853_v46, %v835_v56 }
  0xde   :  { %v836_v51 = vpop.f32.mrf.mxu2  ;;  %v867_v52 = vpop.f32.mrf.mxu0 }
  0xdf   :  { %v872_v53 = vpop.f32.mrf.mxu1  ;;  %v837_v59 = vadd.f32 %v836_v51, %v818_v57  ;;  %v855_v62 = vpop.f32.mrf.mxu3  ;;  %v868_v1 = vadd.f32 %v867_v52, %v849_v60 }
  0xe0   :  { %v873_v2 = vadd.f32 %v872_v53, %v854_v61 }
  0xe1   :  { %v856_v0 = vadd.f32 %v855_v62, %v837_v59  ;;  %v877_v7 = vmax.f32 %v868_v1, 0.0 }
  0xe2   :  { %v879_v8 = vmax.f32 %v873_v2, 0.0 }
  0xe6   :  { %v869_v3 = vpop.f32.mrf.mxu0 }
  0xe7   :  { %v874_v4 = vpop.f32.mrf.mxu1  ;;  %v870_v5 = vadd.f32 %v869_v3, %v851_v63 }
  0xe8   :  { %v875_v6 = vadd.f32 %v874_v4, %v856_v0 }
  0xe9   :  { %v878_v9 = vmax.f32 %v870_v5, 0.0 }
  0xea   :  { %v880_v10 = vmax.f32 %v875_v6, 0.0 }
  0xeb   :  { %v1346_v11 = vpack.c.bf16 %v878_v9, %v877_v7 }
  0xec   :  { %v1351_v12 = vpack.c.bf16 %v880_v10, %v879_v8 }
  0xed   :  { %1347 = vst [vmem:[%s1719_s3] sm:$0xff] %v1346_v11  }
  0xee   :  { %1353 = vst [vmem:[%s1719_s3 + $0x8] sm:$0xff] %v1351_v12  }

// kernel: l1block_forward.24
= control target key start
LH: loop header
LB: loop body
LE: loop exit
PB: predicated region body
PF: predicated region fallthrough
CT: control target
= control target key end

     0   :  { %s1751_s1 = inlined_call_operand.vmem [shape: bf16[1152,128], index: 1, kind: input, shape index: {}]   ;;  %s1752_s0 = inlined_call_operand.vmem [shape: bf16[32,1152], index: 0, kind: input, shape index: {}]   ;;  %s1753_s2 = inlined_call_operand.vmem [shape: f32[1,128], index: 2, kind: input, shape index: {}]   ;;  %s1754_s3 = inlined_call_operand.vmem [shape: bf16[32,128], index: 3, kind: input, shape index: {}]   ;;  %s1755_s4 = inlined_call_operand.vmem [shape: bf16[32,128], index: 4, kind: output, shape index: {}]  }
   0x1   :  { %v1293_v0 = vld [vmem:[%s1751_s1 + $0x38] sm:$0xff]  ;;  %v1292_v4 = vld [vmem:[%s1751_s1 + $0x30] sm:$0xff]  ;;  %v1291_v8 = vld [vmem:[%s1751_s1 + $0x28] sm:$0xff] }
   0x2   :  { %v1301_v1 = vld [vmem:[%s1751_s1 + $0x78] sm:$0xff]  ;;  %709 = vmatpush.bf16.msra.mxu0 %v1293_v0  ;;  %v1300_v5 = vld [vmem:[%s1751_s1 + $0x70] sm:$0xff]  ;;  %v1299_v9 = vld [vmem:[%s1751_s1 + $0x68] sm:$0xff] }
   0x3   :  { %v1309_v2 = vld [vmem:[%s1751_s1 + $0xb8] sm:$0xff]  ;;  %728 = vmatpush.bf16.msra.mxu1 %v1301_v1  ;;  %v1308_v6 = vld [vmem:[%s1751_s1 + $0xb0] sm:$0xff]  ;;  %v1307_v10 = vld [vmem:[%s1751_s1 + $0xa8] sm:$0xff] }
   0x4   :  { %v1317_v3 = vld [vmem:[%s1751_s1 + $0xf8] sm:$0xff]  ;;  %747 = vmatpush.bf16.msra.mxu2 %v1309_v2  ;;  %v1316_v7 = vld [vmem:[%s1751_s1 + $0xf0] sm:$0xff]  ;;  %v1315_v11 = vld [vmem:[%s1751_s1 + $0xe8] sm:$0xff] }
   0x5   :  { %766 = vmatpush.bf16.msra.mxu3 %v1317_v3  ;;  %v1290_v12 = vld [vmem:[%s1751_s1 + $0x20] sm:$0xff]  ;;  %v1289_v16 = vld [vmem:[%s1751_s1 + $0x18] sm:$0xff]  ;;  %v1288_v20 = vld [vmem:[%s1751_s1 + $0x10] sm:$0xff] }
   0x6   :  { %710 = vmatpush.bf16.msra.mxu0 %v1292_v4  ;;  %v1298_v13 = vld [vmem:[%s1751_s1 + $0x60] sm:$0xff]  ;;  %v1297_v17 = vld [vmem:[%s1751_s1 + $0x58] sm:$0xff]  ;;  %v1296_v21 = vld [vmem:[%s1751_s1 + $0x50] sm:$0xff] }
   0x7   :  { %729 = vmatpush.bf16.msra.mxu1 %v1300_v5  ;;  %v1306_v14 = vld [vmem:[%s1751_s1 + $0xa0] sm:$0xff]  ;;  %v1305_v18 = vld [vmem:[%s1751_s1 + $0x98] sm:$0xff]  ;;  %v1304_v22 = vld [vmem:[%s1751_s1 + $0x90] sm:$0xff] }
   0x8   :  { %748 = vmatpush.bf16.msra.mxu2 %v1308_v6  ;;  %v1314_v15 = vld [vmem:[%s1751_s1 + $0xe0] sm:$0xff]  ;;  %v1313_v19 = vld [vmem:[%s1751_s1 + $0xd8] sm:$0xff]  ;;  %v1312_v23 = vld [vmem:[%s1751_s1 + $0xd0] sm:$0xff] }
   0x9   :  { %767 = vmatpush.bf16.msra.mxu3 %v1316_v7  ;;  %v1287_v24 = vld [vmem:[%s1751_s1 + $0x8] sm:$0xff]  ;;  %v1286_v28 = vld [vmem:[%s1751_s1] sm:$0xff]  ;;  %v920_v39 = vld [vmem:[%s1752_s0 + $0x2c] sm:$0xf0] }
   0xa   :  { %711 = vmatpush.bf16.msra.mxu0 %v1291_v8  ;;  %v1295_v25 = vld [vmem:[%s1751_s1 + $0x48] sm:$0xff]  ;;  %v1294_v29 = vld [vmem:[%s1751_s1 + $0x40] sm:$0xff]  ;;  %v1325_v40 = vld [vmem:[%s1751_s1 + $0x138] sm:$0xff] }
   0xb   :  { %730 = vmatpush.bf16.msra.mxu1 %v1299_v9  ;;  %v1303_v26 = vld [vmem:[%s1751_s1 + $0x88] sm:$0xff]  ;;  %v1302_v30 = vld [vmem:[%s1751_s1 + $0x80] sm:$0xff]  ;;  %v1333_v41 = vld [vmem:[%s1751_s1 + $0x178] sm:$0xff] }
   0xc   :  { %749 = vmatpush.bf16.msra.mxu2 %v1307_v10  ;;  %v1311_v27 = vld [vmem:[%s1751_s1 + $0xc8] sm:$0xff]  ;;  %v1310_v31 = vld [vmem:[%s1751_s1 + $0xc0] sm:$0xff]  ;;  %v1341_v46 = vld [vmem:[%s1751_s1 + $0x1b8] sm:$0xff] }
   0xd   :  { %768 = vmatpush.bf16.msra.mxu3 %v1315_v11  ;;  %v910_v32 = vld [vmem:[%s1752_s0] sm:$0xf]  ;;  %v1272_v33 = vld [vmem:[%s1752_s0 + $0x20] sm:$0xf0]  ;;  %v912_v35 = vld [vmem:[%s1752_s0 + $0x24] sm:$0xf0] }
   0xe   :  { %712 = vmatpush.bf16.msra.mxu0 %v1290_v12  ;;  %v1268_v34 = vld [vmem:[%s1752_s0 + $0x4] sm:$0xf]  ;;  %v918_v36 = vld [vmem:[%s1752_s0 + $0x8] sm:$0xf]  ;;  %v1273_v37 = vld [vmem:[%s1752_s0 + $0x28] sm:$0xf0]  ;;  %v911_v42 = vor.u32 %v1272_v33, %v910_v32 }
   0xf   :  { %731 = vmatpush.bf16.msra.mxu1 %v1298_v13  ;;  %v1269_v38 = vld [vmem:[%s1752_s0 + $0xc] sm:$0xf]  ;;  %v915_v43 = vor.u32 %v1268_v34, %v912_v35  ;;  %v919_v44 = vor.u32 %v1273_v37, %v918_v36  ;;  %v1349_v47 = vld [vmem:[%s1751_s1 + $0x1f8] sm:$0xff]  ;;  %v1324_v48 = vld [vmem:[%s1751_s1 + $0x130] sm:$0xff] }
  0x10   :  { %750 = vmatpush.bf16.msra.mxu2 %v1306_v14  ;;  %v923_v45 = vor.u32 %v1269_v38, %v920_v39  ;;  %v1332_v49 = vld [vmem:[%s1751_s1 + $0x170] sm:$0xff]  ;;  %v1323_v52 = vld [vmem:[%s1751_s1 + $0x128] sm:$0xff]  ;;  %v1322_v56 = vld [vmem:[%s1751_s1 + $0x120] sm:$0xff] }
  0x11   :  { %769 = vmatpush.bf16.msra.mxu3 %v1314_v15  ;;  %v1340_v50 = vld [vmem:[%s1751_s1 + $0x1b0] sm:$0xff]  ;;  %v1331_v53 = vld [vmem:[%s1751_s1 + $0x168] sm:$0xff]  ;;  %v1330_v57 = vld [vmem:[%s1751_s1 + $0x160] sm:$0xff] }
  0x12   :  { %713 = vmatpush.bf16.msra.mxu0 %v1289_v16  ;;  %v1348_v51 = vld [vmem:[%s1751_s1 + $0x1f0] sm:$0xff]  ;;  %v1339_v54 = vld [vmem:[%s1751_s1 + $0x1a8] sm:$0xff]  ;;  %v1338_v58 = vld [vmem:[%s1751_s1 + $0x1a0] sm:$0xff] }
  0x13   :  { %732 = vmatpush.bf16.msra.mxu1 %v1297_v17  ;;  %v1347_v55 = vld [vmem:[%s1751_s1 + $0x1e8] sm:$0xff]  ;;  %v1346_v59 = vld [vmem:[%s1751_s1 + $0x1e0] sm:$0xff]  ;;  %v948_v63 = vld [vmem:[%s1752_s0 + $0x6c] sm:$0xf0] }
  0x14   :  { %751 = vmatpush.bf16.msra.mxu2 %v1305_v18  ;;  %v946_v60 = vld [vmem:[%s1752_s0 + $0x48] sm:$0xf]  ;;  %v1281_v61 = vld [vmem:[%s1752_s0 + $0x68] sm:$0xf0]  ;;  %v954_v0 = vld [vmem:[%s1752_s0 + $0x50] sm:$0xf] }
  0x15   :  { %770 = vmatpush.bf16.msra.mxu3 %v1313_v19  ;;  %v1277_v62 = vld [vmem:[%s1752_s0 + $0x4c] sm:$0xf]  ;;  %v1282_v1 = vld [vmem:[%s1752_s0 + $0x70] sm:$0xf0]  ;;  %v956_v3 = vld [vmem:[%s1752_s0 + $0x74] sm:$0xf0]  ;;  %v947_v6 = vor.u32 %v1281_v61, %v946_v60 }
  0x16   :  { %714 = vmatpush.bf16.msra.mxu0 %v1288_v20  ;;  %v1278_v2 = vld [vmem:[%s1752_s0 + $0x54] sm:$0xf]  ;;  %v1321_v4 = vld [vmem:[%s1751_s1 + $0x118] sm:$0xff]  ;;  %v951_v7 = vor.u32 %v1277_v62, %v948_v63  ;;  %v955_v8 = vor.u32 %v1282_v1, %v954_v0  ;;  %v1319_v16 = vld [vmem:[%s1751_s1 + $0x108] sm:$0xff] }
  0x17   :  { %733 = vmatpush.bf16.msra.mxu1 %v1296_v21  ;;  %v1329_v5 = vld [vmem:[%s1751_s1 + $0x158] sm:$0xff]  ;;  %v959_v9 = vor.u32 %v1278_v2, %v956_v3  ;;  %v1320_v12 = vld [vmem:[%s1751_s1 + $0x110] sm:$0xff]  ;;  %v1327_v17 = vld [vmem:[%s1751_s1 + $0x148] sm:$0xff] }
  0x18   :  { %752 = vmatpush.bf16.msra.mxu2 %v1304_v22  ;;  %v1337_v10 = vld [vmem:[%s1751_s1 + $0x198] sm:$0xff]  ;;  %v1328_v13 = vld [vmem:[%s1751_s1 + $0x150] sm:$0xff]  ;;  %v1335_v18 = vld [vmem:[%s1751_s1 + $0x188] sm:$0xff] }
  0x19   :  { %771 = vmatpush.bf16.msra.mxu3 %v1312_v23  ;;  %v1345_v11 = vld [vmem:[%s1751_s1 + $0x1d8] sm:$0xff]  ;;  %v1336_v14 = vld [vmem:[%s1751_s1 + $0x190] sm:$0xff]  ;;  %v1343_v19 = vld [vmem:[%s1751_s1 + $0x1c8] sm:$0xff] }
  0x1a   :  { %715 = vmatpush.bf16.msra.mxu0 %v1287_v24  ;;  %v1344_v15 = vld [vmem:[%s1751_s1 + $0x1d0] sm:$0xff]  ;;  %v1318_v20 = vld [vmem:[%s1751_s1 + $0x100] sm:$0xff]  ;;  %v1355_v38 = vld [vmem:[%s1751_s1 + $0x228] sm:$0xff] }
  0x1b   :  { %734 = vmatpush.bf16.msra.mxu1 %v1295_v25  ;;  %v1326_v21 = vld [vmem:[%s1751_s1 + $0x140] sm:$0xff]  ;;  %v926_v24 = vld [vmem:[%s1752_s0 + $0x10] sm:$0xf]  ;;  %v1274_v25 = vld [vmem:[%s1752_s0 + $0x30] sm:$0xf0] }
  0x1c   :  { %753 = vmatpush.bf16.msra.mxu2 %v1303_v26  ;;  %v1334_v22 = vld [vmem:[%s1751_s1 + $0x180] sm:$0xff]  ;;  %v1357_v26 = vld [vmem:[%s1751_s1 + $0x238] sm:$0xff]  ;;  %v927_v33 = vor.u32 %v1274_v25, %v926_v24  ;;  %v1356_v37 = vld [vmem:[%s1751_s1 + $0x230] sm:$0xff] }
  0x1d   :  { %772 = vmatpush.bf16.msra.mxu3 %v1311_v27  ;;  %v1342_v23 = vld [vmem:[%s1751_s1 + $0x1c0] sm:$0xff]  ;;  %v1270_v27 = vld [vmem:[%s1752_s0 + $0x14] sm:$0xf] }
  0x1e   :  { %716 = vmatpush.bf16.msra.mxu0 %v1286_v28  ;;  %v928_v28 = vld [vmem:[%s1752_s0 + $0x34] sm:$0xf0]  ;;  %v936_v32 = vld [vmem:[%s1752_s0 + $0x3c] sm:$0xf0] }
  0x1f   :  { %735 = vmatpush.bf16.msra.mxu1 %v1294_v29  ;;  %v934_v29 = vld [vmem:[%s1752_s0 + $0x18] sm:$0xf]  ;;  %v931_v34 = vor.u32 %v1270_v27, %v928_v28  ;;  %v1354_v39 = vld [vmem:[%s1751_s1 + $0x220] sm:$0xff] }
  0x20   :  { %754 = vmatpush.bf16.msra.mxu2 %v1302_v30  ;;  %v1275_v30 = vld [vmem:[%s1752_s0 + $0x38] sm:$0xf0] }
  0x21   :  { %773 = vmatpush.bf16.msra.mxu3 %v1310_v31  ;;  %717 = vmatmul.bf16.vlgmr.msra.gmra.mxu0 %v911_v42  ;;  %v1271_v31 = vld [vmem:[%s1752_s0 + $0x1c] sm:$0xf]  ;;  %v935_v35 = vor.u32 %v1275_v30, %v934_v29 }
  0x22   :  { %785 = vmatpush.bf16.msrb.mxu0 %v1325_v40  ;;  %736 = vmatmul.bf16.vlgmr.msra.gmra.mxu1 %v915_v43  ;;  %v939_v36 = vor.u32 %v1271_v31, %v936_v32  ;;  %v962_v40 = vld [vmem:[%s1752_s0 + $0x58] sm:$0xf]  ;;  %v1279_v42 = vld [vmem:[%s1752_s0 + $0x5c] sm:$0xf]  ;;  %v964_v43 = vld [vmem:[%s1752_s0 + $0x7c] sm:$0xf0] }
  0x23   :  { %804 = vmatpush.bf16.msrb.mxu1 %v1333_v41  ;;  %755 = vmatmul.bf16.vlgmr.msra.gmra.mxu2 %v919_v44  ;;  %v1283_v41 = vld [vmem:[%s1752_s0 + $0x78] sm:$0xf0]  ;;  %v970_v44 = vld [vmem:[%s1752_s0 + $0x60] sm:$0xf] }
  0x24   :  { %774 = vmatmul.bf16.vlgmr.msra.gmra.mxu3 %v923_v45  ;;  %823 = vmatpush.bf16.msrb.mxu2 %v1341_v46  ;;  %v1284_v45 = vld [vmem:[%s1752_s0 + $0x80] sm:$0xf0] }
  0x25   :  { %842 = vmatpush.bf16.msrb.mxu3 %v1349_v47  ;;  %v1280_v46 = vld [vmem:[%s1752_s0 + $0x64] sm:$0xf]  ;;  %v972_v47 = vld [vmem:[%s1752_s0 + $0x84] sm:$0xf0] }
  0x26   :  { %786 = vmatpush.bf16.msrb.mxu0 %v1324_v48  ;;  %v1353_v48 = vld [vmem:[%s1751_s1 + $0x218] sm:$0xff] }
  0x27   :  { %805 = vmatpush.bf16.msrb.mxu1 %v1332_v49  ;;  %v963_v49 = vor.u32 %v1283_v41, %v962_v40 }
  0x28   :  { %824 = vmatpush.bf16.msrb.mxu2 %v1340_v50  ;;  %v967_v50 = vor.u32 %v1279_v42, %v964_v43 }
  0x29   :  { %843 = vmatpush.bf16.msrb.mxu3 %v1348_v51  ;;  %v971_v51 = vor.u32 %v1284_v45, %v970_v44 }
  0x2a   :  { %787 = vmatpush.bf16.msrb.mxu0 %v1323_v52  ;;  %v975_v52 = vor.u32 %v1280_v46, %v972_v47 }
  0x2b   :  { %806 = vmatpush.bf16.msrb.mxu1 %v1331_v53  ;;  %v1352_v53 = vld [vmem:[%s1751_s1 + $0x210] sm:$0xff] }
  0x2c   :  { %825 = vmatpush.bf16.msrb.mxu2 %v1339_v54  ;;  %v1351_v54 = vld [vmem:[%s1751_s1 + $0x208] sm:$0xff] }
  0x2d   :  { %844 = vmatpush.bf16.msrb.mxu3 %v1347_v55  ;;  %v1350_v55 = vld [vmem:[%s1751_s1 + $0x200] sm:$0xff] }
  0x2e   :  { %788 = vmatpush.bf16.msrb.mxu0 %v1322_v56  ;;  %v942_v56 = vld [vmem:[%s1752_s0 + $0x20] sm:$0xf] }
  0x2f   :  { %807 = vmatpush.bf16.msrb.mxu1 %v1330_v57  ;;  %v1276_v57 = vld [vmem:[%s1752_s0 + $0x40] sm:$0xf0] }
  0x30   :  { %826 = vmatpush.bf16.msrb.mxu2 %v1338_v58  ;;  %v978_v58 = vld [vmem:[%s1752_s0 + $0x68] sm:$0xf]  ;;  %v943_v60 = vor.u32 %v1276_v57, %v942_v56 }
  0x31   :  { %845 = vmatpush.bf16.msrb.mxu3 %v1346_v59  ;;  %722 = vmatmul.bf16.gmra.mxu0 %v947_v6  ;;  %v1285_v59 = vld [vmem:[%s1752_s0 + $0x88] sm:$0xf0] }
  0x32   :  { %789 = vmatpush.bf16.msrb.mxu0 %v1321_v4  ;;  %741 = vmatmul.bf16.gmra.mxu1 %v951_v7  ;;  %v979_v61 = vor.u32 %v1285_v59, %v978_v58 }
  0x33   :  { %808 = vmatpush.bf16.msrb.mxu1 %v1329_v5  ;;  %760 = vmatmul.bf16.gmra.mxu2 %v955_v8 }
  0x34   :  { %779 = vmatmul.bf16.gmra.mxu3 %v959_v9  ;;  %827 = vmatpush.bf16.msrb.mxu2 %v1337_v10 }
  0x35   :  { %846 = vmatpush.bf16.msrb.mxu3 %v1345_v11 }
  0x36   :  { %790 = vmatpush.bf16.msrb.mxu0 %v1320_v12 }
  0x37   :  { %809 = vmatpush.bf16.msrb.mxu1 %v1328_v13 }
  0x38   :  { %828 = vmatpush.bf16.msrb.mxu2 %v1336_v14 }
  0x39   :  { %847 = vmatpush.bf16.msrb.mxu3 %v1344_v15 }
  0x3a   :  { %791 = vmatpush.bf16.msrb.mxu0 %v1319_v16 }
  0x3b   :  { %810 = vmatpush.bf16.msrb.mxu1 %v1327_v17 }
  0x3c   :  { %829 = vmatpush.bf16.msrb.mxu2 %v1335_v18 }
  0x3d   :  { %848 = vmatpush.bf16.msrb.mxu3 %v1343_v19 }
  0x3e   :  { %792 = vmatpush.bf16.msrb.mxu0 %v1318_v20  ;;  %v1386_v20 = vld [vmem:[%s1753_s2] ss:$0 sm:$0xff] }
  0x3f   :  { %811 = vmatpush.bf16.msrb.mxu1 %v1326_v21 }
  0x40   :  { %830 = vmatpush.bf16.msrb.mxu2 %v1334_v22 }
  0x41   :  { %849 = vmatpush.bf16.msrb.mxu3 %v1342_v23  ;;  %793 = vmatmul.bf16.vlgmr.msrb.gmra.mxu0 %v927_v33 }
  0x42   :  { %861 = vmatpush.bf16.msra.mxu0 %v1357_v26  ;;  %812 = vmatmul.bf16.vlgmr.msrb.gmra.mxu1 %v931_v34 }
  0x43   :  { %1378 = vmatpush.bf16.msra.mxu1 %v1357_v26  ;;  %831 = vmatmul.bf16.vlgmr.msrb.gmra.mxu2 %v935_v35 }
  0x44   :  { %850 = vmatmul.bf16.vlgmr.msrb.gmra.mxu3 %v939_v36 }
  0x46   :  { %862 = vmatpush.bf16.msra.mxu0 %v1356_v37 }
  0x47   :  { %1379 = vmatpush.bf16.msra.mxu1 %v1356_v37 }
  0x4a   :  { %863 = vmatpush.bf16.msra.mxu0 %v1355_v38 }
  0x4b   :  { %1380 = vmatpush.bf16.msra.mxu1 %v1355_v38 }
  0x4e   :  { %864 = vmatpush.bf16.msra.mxu0 %v1354_v39 }
  0x4f   :  { %1381 = vmatpush.bf16.msra.mxu1 %v1354_v39 }
  0x51   :  { %798 = vmatmul.bf16.gmra.mxu0 %v963_v49 }
  0x52   :  { %865 = vmatpush.bf16.msra.mxu0 %v1353_v48  ;;  %817 = vmatmul.bf16.gmra.mxu1 %v967_v50 }
  0x53   :  { %1382 = vmatpush.bf16.msra.mxu1 %v1353_v48  ;;  %836 = vmatmul.bf16.gmra.mxu2 %v971_v51 }
  0x54   :  { %855 = vmatmul.bf16.gmra.mxu3 %v975_v52 }
  0x56   :  { %866 = vmatpush.bf16.msra.mxu0 %v1352_v53 }
  0x57   :  { %1383 = vmatpush.bf16.msra.mxu1 %v1352_v53 }
  0x5a   :  { %867 = vmatpush.bf16.msra.mxu0 %v1351_v54 }
  0x5b   :  { %1384 = vmatpush.bf16.msra.mxu1 %v1351_v54 }
  0x5e   :  { %868 = vmatpush.bf16.msra.mxu0 %v1350_v55 }
  0x5f   :  { %1385 = vmatpush.bf16.msra.mxu1 %v1350_v55 }
  0x61   :  { %869 = vmatmul.bf16.vlgmr.msra.gmra.mxu0 %v943_v60 }
  0x62   :  { %874 = vmatmul.bf16.vlgmr.msra.gmra.mxu1 %v979_v61 }
  0x9e   :  { %v718_v62 = vpop.f32.mrf.mxu0 }
  0x9f   :  { %v737_v63 = vpop.f32.mrf.mxu1  ;;  %v719_v21 = vadd.f32 %v1386_v20, %v718_v62 }
  0xa1   :  { %v738_v26 = vadd.f32 %v737_v63, %v719_v21  ;;  %v1359_v63 = vld [vmem:[%s1754_s3] sm:$0xff]  }
  0xa6   :  { %v756_v0 = vpop.f32.mrf.mxu2  ;;  %v720_v2 = vpop.f32.mrf.mxu0 }
  0xa7   :  { %v775_v1 = vpop.f32.mrf.mxu3  ;;  %v739_v3 = vpop.f32.mrf.mxu1  ;;  %v721_v27 = vadd.f32 %v1386_v20, %v720_v2  ;;  %v757_v31 = vadd.f32 %v756_v0, %v738_v26 }
  0xa9   :  { %v740_v33 = vadd.f32 %v739_v3, %v721_v27  ;;  %v776_v35 = vadd.f32 %v775_v1, %v757_v31  ;;  %v1376_v1 = vld [vmem:[%s1754_s3 + $0x8] sm:$0xff]  }
  0xae   :  { %v758_v4 = vpop.f32.mrf.mxu2  ;;  %v723_v6 = vpop.f32.mrf.mxu0 }
  0xaf   :  { %v777_v5 = vpop.f32.mrf.mxu3  ;;  %v742_v7 = vpop.f32.mrf.mxu1  ;;  %v724_v22 = vadd.f32 %v1386_v20, %v723_v6  ;;  %v759_v36 = vadd.f32 %v758_v4, %v740_v33  ;;  %v1364_v6 = vunpack.c.l.bf16 %v1376_v1 }
  0xb1   :  { %v743_v28 = vadd.f32 %v742_v7, %v724_v22  ;;  %v778_v44 = vadd.f32 %v777_v5, %v759_v36  ;;  %v1360_v5 = vunpack.c.l.bf16 %v1359_v63 }
  0xb6   :  { %v761_v8 = vpop.f32.mrf.mxu2  ;;  %v725_v10 = vpop.f32.mrf.mxu0 }
  0xb7   :  { %v780_v9 = vpop.f32.mrf.mxu3  ;;  %v744_v11 = vpop.f32.mrf.mxu1  ;;  %v726_v29 = vadd.f32 %v1386_v20, %v725_v10  ;;  %v762_v32 = vadd.f32 %v761_v8, %v743_v28  ;;  %v1361_v8 = vunpack.c.h.bf16 %v1359_v63  ;;  %v1365_v10 = vunpack.c.h.bf16 %v1376_v1 }
  0xb9   :  { %v745_v34 = vadd.f32 %v744_v11, %v726_v29  ;;  %v781_v37 = vadd.f32 %v780_v9, %v762_v32 }
  0xbe   :  { %v763_v12 = vpop.f32.mrf.mxu2  ;;  %v794_v14 = vpop.f32.mrf.mxu0 }
  0xbf   :  { %v782_v13 = vpop.f32.mrf.mxu3  ;;  %v813_v15 = vpop.f32.mrf.mxu1  ;;  %v764_v38 = vadd.f32 %v763_v12, %v745_v34  ;;  %v795_v42 = vadd.f32 %v794_v14, %v776_v35 }
  0xc1   :  { %v783_v45 = vadd.f32 %v782_v13, %v764_v38  ;;  %v814_v47 = vadd.f32 %v813_v15, %v795_v42 }
  0xc6   :  { %v832_v16 = vpop.f32.mrf.mxu2  ;;  %v796_v18 = vpop.f32.mrf.mxu0 }
  0xc7   :  { %v851_v17 = vpop.f32.mrf.mxu3  ;;  %v815_v19 = vpop.f32.mrf.mxu1  ;;  %v797_v48 = vadd.f32 %v796_v18, %v778_v44  ;;  %v833_v51 = vadd.f32 %v832_v16, %v814_v47 }
  0xc9   :  { %v816_v56 = vadd.f32 %v815_v19, %v797_v48  ;;  %v852_v58 = vadd.f32 %v851_v17, %v833_v51 }
  0xce   :  { %v834_v23 = vpop.f32.mrf.mxu2  ;;  %v799_v24 = vpop.f32.mrf.mxu0 }
  0xcf   :  { %v818_v25 = vpop.f32.mrf.mxu1  ;;  %v853_v30 = vpop.f32.mrf.mxu3  ;;  %v800_v43 = vadd.f32 %v799_v24, %v781_v37  ;;  %v835_v59 = vadd.f32 %v834_v23, %v816_v56 }
  0xd1   :  { %v819_v49 = vadd.f32 %v818_v25, %v800_v43  ;;  %v854_v3 = vadd.f32 %v853_v30, %v835_v59 }
  0xd6   :  { %v837_v39 = vpop.f32.mrf.mxu2  ;;  %v801_v40 = vpop.f32.mrf.mxu0 }
  0xd7   :  { %v820_v41 = vpop.f32.mrf.mxu1  ;;  %v856_v46 = vpop.f32.mrf.mxu3  ;;  %v802_v50 = vadd.f32 %v801_v40, %v783_v45  ;;  %v838_v52 = vadd.f32 %v837_v39, %v819_v49 }
  0xd9   :  { %v821_v57 = vadd.f32 %v820_v41, %v802_v50  ;;  %v857_v60 = vadd.f32 %v856_v46, %v838_v52 }
  0xde   :  { %v839_v53 = vpop.f32.mrf.mxu2  ;;  %v870_v54 = vpop.f32.mrf.mxu0 }
  0xdf   :  { %v875_v55 = vpop.f32.mrf.mxu1  ;;  %v840_v61 = vadd.f32 %v839_v53, %v821_v57  ;;  %v871_v62 = vadd.f32 %v870_v54, %v852_v58  ;;  %v858_v2 = vpop.f32.mrf.mxu3 }
  0xe0   :  { %v876_v0 = vadd.f32 %v875_v55, %v857_v60 }
  0xe1   :  { %v859_v4 = vadd.f32 %v858_v2, %v840_v61  ;;  %v880_v11 = vmax.f32 %v871_v62, 0.0 }
  0xe2   :  { %v882_v12 = vmax.f32 %v876_v0, 0.0 }
  0xe3   :  { %v892_v17 = vadd.f32 %v1360_v5, %v880_v11 }
  0xe4   :  { %v894_v18 = vadd.f32 %v1364_v6, %v882_v12 }
  0xe6   :  { %v872_v7 = vpop.f32.mrf.mxu0 }
  0xe7   :  { %v877_v9 = vpop.f32.mrf.mxu1  ;;  %v873_v13 = vadd.f32 %v872_v7, %v854_v3 }
  0xe8   :  { %v878_v14 = vadd.f32 %v877_v9, %v859_v4 }
  0xe9   :  { %v881_v15 = vmax.f32 %v873_v13, 0.0 }
  0xea   :  { %v883_v16 = vmax.f32 %v878_v14, 0.0 }
  0xeb   :  { %v893_v19 = vadd.f32 %v1361_v8, %v881_v15 }
  0xec   :  { %v895_v20 = vadd.f32 %v1365_v10, %v883_v16 }
  0xed   :  { %v1369_v21 = vpack.c.bf16 %v893_v19, %v892_v17 }
  0xee   :  { %v1374_v22 = vpack.c.bf16 %v895_v20, %v894_v18 }
  0xef   :  { %1370 = vst [vmem:[%s1755_s4] sm:$0xff] %v1369_v21  }
  0xf0   :  { %1377 = vst [vmem:[%s1755_s4 + $0x8] sm:$0xff] %v1374_v22  }

// kernel: l1block_forward.25
= control target key start
LH: loop header
LB: loop body
LE: loop exit
PB: predicated region body
PF: predicated region fallthrough
CT: control target
= control target key end

     0   :  { %s1373_s1 = inlined_call_operand.vmem [shape: bf16[1152,128], index: 1, kind: input, shape index: {}]   ;;  %s1374_s2 = inlined_call_operand.vmem [shape: f32[1,128], index: 2, kind: input, shape index: {}]   ;;  %s1375_s0 = inlined_call_operand.vmem [shape: bf16[8,1152], index: 0, kind: input, shape index: {}]   ;;  %s1376_s3 = inlined_call_operand.vmem [shape: bf16[8,128], index: 3, kind: output, shape index: {}]  }
   0x1   :  { %v1050_v0 = vld [vmem:[%s1373_s1 + $0x38] sm:$0xff]  ;;  %v1049_v4 = vld [vmem:[%s1373_s1 + $0x30] sm:$0xff]  ;;  %v1048_v8 = vld [vmem:[%s1373_s1 + $0x28] sm:$0xff] }
   0x2   :  { %v1066_v1 = vld [vmem:[%s1373_s1 + $0xb8] sm:$0xff]  ;;  %631 = vmatpush.bf16.msra.mxu0 %v1050_v0  ;;  %v1065_v5 = vld [vmem:[%s1373_s1 + $0xb0] sm:$0xff]  ;;  %v1064_v9 = vld [vmem:[%s1373_s1 + $0xa8] sm:$0xff] }
   0x3   :  { %v1074_v2 = vld [vmem:[%s1373_s1 + $0xf8] sm:$0xff]  ;;  %657 = vmatpush.bf16.msra.mxu2 %v1066_v1  ;;  %v1073_v6 = vld [vmem:[%s1373_s1 + $0xf0] sm:$0xff]  ;;  %v1072_v10 = vld [vmem:[%s1373_s1 + $0xe8] sm:$0xff] }
   0x4   :  { %v1058_v3 = vld [vmem:[%s1373_s1 + $0x78] sm:$0xff]  ;;  %670 = vmatpush.bf16.msra.mxu3 %v1074_v2  ;;  %v1057_v7 = vld [vmem:[%s1373_s1 + $0x70] sm:$0xff]  ;;  %v1056_v11 = vld [vmem:[%s1373_s1 + $0x68] sm:$0xff] }
   0x5   :  { %644 = vmatpush.bf16.msra.mxu1 %v1058_v3  ;;  %v1047_v12 = vld [vmem:[%s1373_s1 + $0x20] sm:$0xff]  ;;  %v1046_v16 = vld [vmem:[%s1373_s1 + $0x18] sm:$0xff]  ;;  %v1045_v20 = vld [vmem:[%s1373_s1 + $0x10] sm:$0xff] }
   0x6   :  { %632 = vmatpush.bf16.msra.mxu0 %v1049_v4  ;;  %v1063_v13 = vld [vmem:[%s1373_s1 + $0xa0] sm:$0xff]  ;;  %v1062_v17 = vld [vmem:[%s1373_s1 + $0x98] sm:$0xff]  ;;  %v1061_v21 = vld [vmem:[%s1373_s1 + $0x90] sm:$0xff] }
   0x7   :  { %658 = vmatpush.bf16.msra.mxu2 %v1065_v5  ;;  %v1071_v14 = vld [vmem:[%s1373_s1 + $0xe0] sm:$0xff]  ;;  %v1070_v18 = vld [vmem:[%s1373_s1 + $0xd8] sm:$0xff]  ;;  %v1069_v22 = vld [vmem:[%s1373_s1 + $0xd0] sm:$0xff] }
   0x8   :  { %671 = vmatpush.bf16.msra.mxu3 %v1073_v6  ;;  %v1055_v15 = vld [vmem:[%s1373_s1 + $0x60] sm:$0xff]  ;;  %v1054_v19 = vld [vmem:[%s1373_s1 + $0x58] sm:$0xff]  ;;  %v1053_v23 = vld [vmem:[%s1373_s1 + $0x50] sm:$0xff] }
   0x9   :  { %645 = vmatpush.bf16.msra.mxu1 %v1057_v7  ;;  %v1044_v24 = vld [vmem:[%s1373_s1 + $0x8] sm:$0xff]  ;;  %v14_v29 = vld [vmem:[%s1375_s0] sm:$0xff]  ;;  %v1082_v34 = vld [vmem:[%s1373_s1 + $0x138] sm:$0xff] }
   0xa   :  { %633 = vmatpush.bf16.msra.mxu0 %v1048_v8  ;;  %v1060_v25 = vld [vmem:[%s1373_s1 + $0x88] sm:$0xff]  ;;  %v1043_v30 = vld [vmem:[%s1373_s1] sm:$0xff]  ;;  %v172_v33 = vunpack.c.l.b16 %v14_v29  ;;  %v1098_v35 = vld [vmem:[%s1373_s1 + $0x1b8] sm:$0xff]  ;;  %v173_v39 = vunpack.c.h.b16 %v14_v29 }
   0xb   :  { %659 = vmatpush.bf16.msra.mxu2 %v1064_v9  ;;  %v1068_v26 = vld [vmem:[%s1373_s1 + $0xc8] sm:$0xff]  ;;  %v1059_v31 = vld [vmem:[%s1373_s1 + $0x80] sm:$0xff]  ;;  %v1106_v40 = vld [vmem:[%s1373_s1 + $0x1f8] sm:$0xff] }
   0xc   :  { %672 = vmatpush.bf16.msra.mxu3 %v1072_v10  ;;  %v1052_v27 = vld [vmem:[%s1373_s1 + $0x48] sm:$0xff]  ;;  %v1067_v36 = vld [vmem:[%s1373_s1 + $0xc0] sm:$0xff]  ;;  %v1090_v41 = vld [vmem:[%s1373_s1 + $0x178] sm:$0xff]  ;;  %v181_v43 = vpack.c.b16 %v172_v33, %v172_v33  ;;  %v182_v47 = vpack.c.b16 %v173_v39, %v173_v39 }
   0xd   :  { %646 = vmatpush.bf16.msra.mxu1 %v1056_v11  ;;  %v15_v28 = vld [vmem:[%s1375_s0 + $0x8] sm:$0xff]  ;;  %v1051_v37 = vld [vmem:[%s1373_s1 + $0x40] sm:$0xff]  ;;  %v1081_v44 = vld [vmem:[%s1373_s1 + $0x130] sm:$0xff] }
   0xe   :  { %634 = vmatpush.bf16.msra.mxu0 %v1047_v12  ;;  %v174_v32 = vunpack.c.l.b16 %v15_v28  ;;  %v175_v38 = vunpack.c.h.b16 %v15_v28  ;;  %v1097_v45 = vld [vmem:[%s1373_s1 + $0x1b0] sm:$0xff]  ;;  %v1080_v50 = vld [vmem:[%s1373_s1 + $0x128] sm:$0xff]  ;;  %v1079_v54 = vld [vmem:[%s1373_s1 + $0x120] sm:$0xff] }
   0xf   :  { %660 = vmatpush.bf16.msra.mxu2 %v1063_v13  ;;  %v1105_v48 = vld [vmem:[%s1373_s1 + $0x1f0] sm:$0xff]  ;;  %v1096_v51 = vld [vmem:[%s1373_s1 + $0x1a8] sm:$0xff]  ;;  %v1095_v55 = vld [vmem:[%s1373_s1 + $0x1a0] sm:$0xff] }
  0x10   :  { %673 = vmatpush.bf16.msra.mxu3 %v1071_v14  ;;  %v183_v42 = vpack.c.b16 %v174_v32, %v174_v32  ;;  %v184_v46 = vpack.c.b16 %v175_v38, %v175_v38  ;;  %v1089_v49 = vld [vmem:[%s1373_s1 + $0x170] sm:$0xff]  ;;  %v1104_v52 = vld [vmem:[%s1373_s1 + $0x1e8] sm:$0xff]  ;;  %v1103_v56 = vld [vmem:[%s1373_s1 + $0x1e0] sm:$0xff] }
  0x11   :  { %647 = vmatpush.bf16.msra.mxu1 %v1055_v15  ;;  %v1088_v53 = vld [vmem:[%s1373_s1 + $0x168] sm:$0xff]  ;;  %v1087_v57 = vld [vmem:[%s1373_s1 + $0x160] sm:$0xff]  ;;  %v1078_v58 = vld [vmem:[%s1373_s1 + $0x118] sm:$0xff] }
  0x12   :  { %635 = vmatpush.bf16.msra.mxu0 %v1046_v16  ;;  %v1094_v59 = vld [vmem:[%s1373_s1 + $0x198] sm:$0xff]  ;;  %v1077_v62 = vld [vmem:[%s1373_s1 + $0x110] sm:$0xff]  ;;  %v1076_v2 = vld [vmem:[%s1373_s1 + $0x108] sm:$0xff] }
  0x13   :  { %661 = vmatpush.bf16.msra.mxu2 %v1062_v17  ;;  %v1102_v60 = vld [vmem:[%s1373_s1 + $0x1d8] sm:$0xff]  ;;  %v1093_v63 = vld [vmem:[%s1373_s1 + $0x190] sm:$0xff]  ;;  %v1092_v3 = vld [vmem:[%s1373_s1 + $0x188] sm:$0xff] }
  0x14   :  { %674 = vmatpush.bf16.msra.mxu3 %v1070_v18  ;;  %v1086_v61 = vld [vmem:[%s1373_s1 + $0x158] sm:$0xff]  ;;  %v1101_v0 = vld [vmem:[%s1373_s1 + $0x1d0] sm:$0xff]  ;;  %v1100_v6 = vld [vmem:[%s1373_s1 + $0x1c8] sm:$0xff] }
  0x15   :  { %648 = vmatpush.bf16.msra.mxu1 %v1054_v19  ;;  %v1085_v1 = vld [vmem:[%s1373_s1 + $0x150] sm:$0xff]  ;;  %v17_v4 = vld [vmem:[%s1375_s0 + $0x18] sm:$0xff]  ;;  %v1084_v7 = vld [vmem:[%s1373_s1 + $0x148] sm:$0xff] }
  0x16   :  { %636 = vmatpush.bf16.msra.mxu0 %v1045_v20  ;;  %v16_v5 = vld [vmem:[%s1375_s0 + $0x10] sm:$0xff]  ;;  %v178_v8 = vunpack.c.l.b16 %v17_v4  ;;  %v1075_v10 = vld [vmem:[%s1373_s1 + $0x100] sm:$0xff]  ;;  %v1114_v12 = vld [vmem:[%s1373_s1 + $0x238] sm:$0xff]  ;;  %v179_v13 = vunpack.c.h.b16 %v17_v4 }
  0x17   :  { %662 = vmatpush.bf16.msra.mxu2 %v1061_v21  ;;  %v176_v9 = vunpack.c.l.b16 %v16_v5  ;;  %v1091_v11 = vld [vmem:[%s1373_s1 + $0x180] sm:$0xff]  ;;  %v177_v16 = vunpack.c.h.b16 %v16_v5  ;;  %v1113_v19 = vld [vmem:[%s1373_s1 + $0x230] sm:$0xff] }
  0x18   :  { %675 = vmatpush.bf16.msra.mxu3 %v1069_v22  ;;  %v1099_v14 = vld [vmem:[%s1373_s1 + $0x1c0] sm:$0xff]  ;;  %v187_v17 = vpack.c.b16 %v178_v8, %v178_v8  ;;  %v188_v20 = vpack.c.b16 %v179_v13, %v179_v13  ;;  %v1112_v22 = vld [vmem:[%s1373_s1 + $0x228] sm:$0xff] }
  0x19   :  { %649 = vmatpush.bf16.msra.mxu1 %v1053_v23  ;;  %v1083_v15 = vld [vmem:[%s1373_s1 + $0x140] sm:$0xff]  ;;  %v185_v18 = vpack.c.b16 %v176_v9, %v176_v9  ;;  %v186_v21 = vpack.c.b16 %v177_v16, %v177_v16 }
  0x1a   :  { %637 = vmatpush.bf16.msra.mxu0 %v1044_v24  ;;  %v1111_v23 = vld [vmem:[%s1373_s1 + $0x220] sm:$0xff]  ;;  %v1110_v24 = vld [vmem:[%s1373_s1 + $0x218] sm:$0xff] }
  0x1b   :  { %663 = vmatpush.bf16.msra.mxu2 %v1060_v25  ;;  %v1109_v25 = vld [vmem:[%s1373_s1 + $0x210] sm:$0xff]  ;;  %v1107_v29 = vld [vmem:[%s1373_s1 + $0x200] sm:$0xff] }
  0x1c   :  { %676 = vmatpush.bf16.msra.mxu3 %v1068_v26  ;;  %v1108_v26 = vld [vmem:[%s1373_s1 + $0x208] sm:$0xff]  ;;  %v1115_v39 = vld [vmem:[%s1374_s2] ss:$0 sm:$0xff] }
  0x1d   :  { %650 = vmatpush.bf16.msra.mxu1 %v1052_v27  ;;  %v18_v27 = vld [vmem:[%s1375_s0 + $0x20] sm:$0xf] }
  0x1e   :  { %638 = vmatpush.bf16.msra.mxu0 %v1043_v30  ;;  %v180_v28 = vunpack.c.l.b16 %v18_v27 }
  0x1f   :  { %664 = vmatpush.bf16.msra.mxu2 %v1059_v31 }
  0x20   :  { %677 = vmatpush.bf16.msra.mxu3 %v1067_v36  ;;  %v189_v30 = vpack.c.b16 %v180_v28, %v180_v28 }
  0x21   :  { %651 = vmatpush.bf16.msra.mxu1 %v1051_v37  ;;  %639 = vmatmul.bf16.vlgmr.msra.gmra.mxu0 %v181_v43 }
  0x22   :  { %683 = vmatpush.bf16.msrb.mxu0 %v1082_v34  ;;  %665 = vmatmul.bf16.vlgmr.msra.gmra.mxu2 %v183_v42 }
  0x23   :  { %709 = vmatpush.bf16.msrb.mxu2 %v1098_v35  ;;  %678 = vmatmul.bf16.vlgmr.msra.gmra.mxu3 %v184_v46 }
  0x24   :  { %722 = vmatpush.bf16.msrb.mxu3 %v1106_v40  ;;  %652 = vmatmul.bf16.vlgmr.msra.gmra.mxu1 %v182_v47 }
  0x25   :  { %696 = vmatpush.bf16.msrb.mxu1 %v1090_v41 }
  0x26   :  { %684 = vmatpush.bf16.msrb.mxu0 %v1081_v44 }
  0x27   :  { %710 = vmatpush.bf16.msrb.mxu2 %v1097_v45 }
  0x28   :  { %723 = vmatpush.bf16.msrb.mxu3 %v1105_v48 }
  0x29   :  { %697 = vmatpush.bf16.msrb.mxu1 %v1089_v49 }
  0x2a   :  { %685 = vmatpush.bf16.msrb.mxu0 %v1080_v50 }
  0x2b   :  { %711 = vmatpush.bf16.msrb.mxu2 %v1096_v51 }
  0x2c   :  { %724 = vmatpush.bf16.msrb.mxu3 %v1104_v52 }
  0x2d   :  { %698 = vmatpush.bf16.msrb.mxu1 %v1088_v53 }
  0x2e   :  { %686 = vmatpush.bf16.msrb.mxu0 %v1079_v54 }
  0x2f   :  { %712 = vmatpush.bf16.msrb.mxu2 %v1095_v55 }
  0x30   :  { %725 = vmatpush.bf16.msrb.mxu3 %v1103_v56 }
  0x31   :  { %699 = vmatpush.bf16.msrb.mxu1 %v1087_v57 }
  0x32   :  { %687 = vmatpush.bf16.msrb.mxu0 %v1078_v58 }
  0x33   :  { %713 = vmatpush.bf16.msrb.mxu2 %v1094_v59 }
  0x34   :  { %726 = vmatpush.bf16.msrb.mxu3 %v1102_v60 }
  0x35   :  { %700 = vmatpush.bf16.msrb.mxu1 %v1086_v61 }
  0x36   :  { %688 = vmatpush.bf16.msrb.mxu0 %v1077_v62 }
  0x37   :  { %714 = vmatpush.bf16.msrb.mxu2 %v1093_v63 }
  0x38   :  { %727 = vmatpush.bf16.msrb.mxu3 %v1101_v0 }
  0x39   :  { %701 = vmatpush.bf16.msrb.mxu1 %v1085_v1 }
  0x3a   :  { %689 = vmatpush.bf16.msrb.mxu0 %v1076_v2 }
  0x3b   :  { %715 = vmatpush.bf16.msrb.mxu2 %v1092_v3 }
  0x3c   :  { %728 = vmatpush.bf16.msrb.mxu3 %v1100_v6 }
  0x3d   :  { %702 = vmatpush.bf16.msrb.mxu1 %v1084_v7 }
  0x3e   :  { %690 = vmatpush.bf16.msrb.mxu0 %v1075_v10 }
  0x3f   :  { %716 = vmatpush.bf16.msrb.mxu2 %v1091_v11 }
  0x40   :  { %729 = vmatpush.bf16.msrb.mxu3 %v1099_v14 }
  0x41   :  { %703 = vmatpush.bf16.msrb.mxu1 %v1083_v15  ;;  %691 = vmatmul.bf16.vlgmr.msrb.gmra.mxu0 %v185_v18 }
  0x42   :  { %735 = vmatpush.bf16.msra.mxu0 %v1114_v12  ;;  %717 = vmatmul.bf16.vlgmr.msrb.gmra.mxu2 %v187_v17 }
  0x43   :  { %730 = vmatmul.bf16.vlgmr.msrb.gmra.mxu3 %v188_v20 }
  0x44   :  { %704 = vmatmul.bf16.vlgmr.msrb.gmra.mxu1 %v186_v21 }
  0x46   :  { %736 = vmatpush.bf16.msra.mxu0 %v1113_v19 }
  0x4a   :  { %737 = vmatpush.bf16.msra.mxu0 %v1112_v22 }
  0x4e   :  { %738 = vmatpush.bf16.msra.mxu0 %v1111_v23 }
  0x52   :  { %739 = vmatpush.bf16.msra.mxu0 %v1110_v24 }
  0x56   :  { %740 = vmatpush.bf16.msra.mxu0 %v1109_v25 }
  0x5a   :  { %741 = vmatpush.bf16.msra.mxu0 %v1108_v26 }
  0x5e   :  { %742 = vmatpush.bf16.msra.mxu0 %v1107_v29 }
  0x61   :  { %743 = vmatmul.bf16.vlgmr.msra.gmra.mxu0 %v189_v30 }
  0x9e   :  { %v640_v31 = vpop.f32.mrf.mxu0 }
  0x9f   :  { %v641_v40 = vadd.f32 %v1115_v39, %v640_v31 }
  0xa1   :  { %v653_v32 = vpop.f32.mrf.mxu1 }
  0xa2   :  { %v654_v43 = vadd.f32 %v653_v32, %v641_v40 }
  0xa5   :  { %v666_v33 = vpop.f32.mrf.mxu2 }
  0xa6   :  { %v679_v34 = vpop.f32.mrf.mxu3  ;;  %v642_v35 = vpop.f32.mrf.mxu0  ;;  %v667_v45 = vadd.f32 %v666_v33, %v654_v43 }
  0xa8   :  { %v680_v49 = vadd.f32 %v679_v34, %v667_v45 }
  0xa9   :  { %v655_v36 = vpop.f32.mrf.mxu1 }
  0xad   :  { %v668_v37 = vpop.f32.mrf.mxu2 }
  0xae   :  { %v681_v38 = vpop.f32.mrf.mxu3 }
  0xbe   :  { %v692_v41 = vpop.f32.mrf.mxu0 }
  0xbf   :  { %v693_v51 = vadd.f32 %v692_v41, %v680_v49 }
  0xc1   :  { %v705_v42 = vpop.f32.mrf.mxu1 }
  0xc2   :  { %v706_v53 = vadd.f32 %v705_v42, %v693_v51 }
  0xc5   :  { %v718_v44 = vpop.f32.mrf.mxu2 }
  0xc6   :  { %v731_v46 = vpop.f32.mrf.mxu3  ;;  %v694_v47 = vpop.f32.mrf.mxu0  ;;  %v719_v54 = vadd.f32 %v718_v44, %v706_v53 }
  0xc8   :  { %v732_v55 = vadd.f32 %v731_v46, %v719_v54 }
  0xc9   :  { %v707_v48 = vpop.f32.mrf.mxu1 }
  0xcd   :  { %v720_v50 = vpop.f32.mrf.mxu2 }
  0xce   :  { %v733_v52 = vpop.f32.mrf.mxu3 }
  0xde   :  { %v744_v56 = vpop.f32.mrf.mxu0 }
  0xdf   :  { %v745_v57 = vadd.f32 %v744_v56, %v732_v55 }
  0xe1   :  { %v748_v58 = vmax.f32 %v745_v57, 0.0 }
  0xe3   :  { %v749_v59 = vpack.c.bf16 %v748_v58, %v748_v58 }
  0xe5   :  { %750 = vst [vmem:[%s1376_s3] sm:$0xf] %v749_v59 }
  0xe6   :  { %v746_v60 = vpop.f32.mrf.mxu0 }

// kernel: l1block_forward.28
= control target key start
LH: loop header
LB: loop body
LE: loop exit
PB: predicated region body
PF: predicated region fallthrough
CT: control target
= control target key end

     0   :  { %s1387_s1 = inlined_call_operand.vmem [shape: bf16[1152,128], index: 1, kind: input, shape index: {}]   ;;  %s1388_s2 = inlined_call_operand.vmem [shape: f32[1,128], index: 2, kind: input, shape index: {}]   ;;  %s1389_s0 = inlined_call_operand.vmem [shape: bf16[8,1152], index: 0, kind: input, shape index: {}]   ;;  %s1390_s3 = inlined_call_operand.vmem [shape: bf16[8,128], index: 3, kind: input, shape index: {}]   ;;  %s1391_s4 = inlined_call_operand.vmem [shape: bf16[8,128], index: 4, kind: output, shape index: {}]  }
   0x1   :  { %v1056_v0 = vld [vmem:[%s1387_s1 + $0x38] sm:$0xff]  ;;  %v1055_v4 = vld [vmem:[%s1387_s1 + $0x30] sm:$0xff]  ;;  %v1054_v8 = vld [vmem:[%s1387_s1 + $0x28] sm:$0xff] }
   0x2   :  { %v1072_v1 = vld [vmem:[%s1387_s1 + $0xb8] sm:$0xff]  ;;  %634 = vmatpush.bf16.msra.mxu0 %v1056_v0  ;;  %v1071_v5 = vld [vmem:[%s1387_s1 + $0xb0] sm:$0xff]  ;;  %v1070_v9 = vld [vmem:[%s1387_s1 + $0xa8] sm:$0xff] }
   0x3   :  { %v1080_v2 = vld [vmem:[%s1387_s1 + $0xf8] sm:$0xff]  ;;  %660 = vmatpush.bf16.msra.mxu2 %v1072_v1  ;;  %v1079_v6 = vld [vmem:[%s1387_s1 + $0xf0] sm:$0xff]  ;;  %v1078_v10 = vld [vmem:[%s1387_s1 + $0xe8] sm:$0xff] }
   0x4   :  { %v1064_v3 = vld [vmem:[%s1387_s1 + $0x78] sm:$0xff]  ;;  %673 = vmatpush.bf16.msra.mxu3 %v1080_v2  ;;  %v1063_v7 = vld [vmem:[%s1387_s1 + $0x70] sm:$0xff]  ;;  %v1062_v11 = vld [vmem:[%s1387_s1 + $0x68] sm:$0xff] }
   0x5   :  { %647 = vmatpush.bf16.msra.mxu1 %v1064_v3  ;;  %v1053_v12 = vld [vmem:[%s1387_s1 + $0x20] sm:$0xff]  ;;  %v1052_v16 = vld [vmem:[%s1387_s1 + $0x18] sm:$0xff]  ;;  %v1051_v20 = vld [vmem:[%s1387_s1 + $0x10] sm:$0xff] }
   0x6   :  { %635 = vmatpush.bf16.msra.mxu0 %v1055_v4  ;;  %v1069_v13 = vld [vmem:[%s1387_s1 + $0xa0] sm:$0xff]  ;;  %v1068_v17 = vld [vmem:[%s1387_s1 + $0x98] sm:$0xff]  ;;  %v1067_v21 = vld [vmem:[%s1387_s1 + $0x90] sm:$0xff] }
   0x7   :  { %661 = vmatpush.bf16.msra.mxu2 %v1071_v5  ;;  %v1077_v14 = vld [vmem:[%s1387_s1 + $0xe0] sm:$0xff]  ;;  %v1076_v18 = vld [vmem:[%s1387_s1 + $0xd8] sm:$0xff]  ;;  %v1075_v22 = vld [vmem:[%s1387_s1 + $0xd0] sm:$0xff] }
   0x8   :  { %674 = vmatpush.bf16.msra.mxu3 %v1079_v6  ;;  %v1061_v15 = vld [vmem:[%s1387_s1 + $0x60] sm:$0xff]  ;;  %v1060_v19 = vld [vmem:[%s1387_s1 + $0x58] sm:$0xff]  ;;  %v1059_v23 = vld [vmem:[%s1387_s1 + $0x50] sm:$0xff] }
   0x9   :  { %648 = vmatpush.bf16.msra.mxu1 %v1063_v7  ;;  %v1050_v24 = vld [vmem:[%s1387_s1 + $0x8] sm:$0xff]  ;;  %v17_v29 = vld [vmem:[%s1389_s0] sm:$0xff]  ;;  %v1088_v34 = vld [vmem:[%s1387_s1 + $0x138] sm:$0xff] }
   0xa   :  { %636 = vmatpush.bf16.msra.mxu0 %v1054_v8  ;;  %v1066_v25 = vld [vmem:[%s1387_s1 + $0x88] sm:$0xff]  ;;  %v1049_v30 = vld [vmem:[%s1387_s1] sm:$0xff]  ;;  %v175_v33 = vunpack.c.l.b16 %v17_v29  ;;  %v1104_v35 = vld [vmem:[%s1387_s1 + $0x1b8] sm:$0xff]  ;;  %v176_v39 = vunpack.c.h.b16 %v17_v29 }
   0xb   :  { %662 = vmatpush.bf16.msra.mxu2 %v1070_v9  ;;  %v1074_v26 = vld [vmem:[%s1387_s1 + $0xc8] sm:$0xff]  ;;  %v1065_v31 = vld [vmem:[%s1387_s1 + $0x80] sm:$0xff]  ;;  %v1112_v40 = vld [vmem:[%s1387_s1 + $0x1f8] sm:$0xff] }
   0xc   :  { %675 = vmatpush.bf16.msra.mxu3 %v1078_v10  ;;  %v1058_v27 = vld [vmem:[%s1387_s1 + $0x48] sm:$0xff]  ;;  %v1073_v36 = vld [vmem:[%s1387_s1 + $0xc0] sm:$0xff]  ;;  %v1096_v41 = vld [vmem:[%s1387_s1 + $0x178] sm:$0xff]  ;;  %v184_v43 = vpack.c.b16 %v175_v33, %v175_v33  ;;  %v185_v47 = vpack.c.b16 %v176_v39, %v176_v39 }
   0xd   :  { %649 = vmatpush.bf16.msra.mxu1 %v1062_v11  ;;  %v18_v28 = vld [vmem:[%s1389_s0 + $0x8] sm:$0xff]  ;;  %v1057_v37 = vld [vmem:[%s1387_s1 + $0x40] sm:$0xff]  ;;  %v1087_v44 = vld [vmem:[%s1387_s1 + $0x130] sm:$0xff] }
   0xe   :  { %637 = vmatpush.bf16.msra.mxu0 %v1053_v12  ;;  %v177_v32 = vunpack.c.l.b16 %v18_v28  ;;  %v178_v38 = vunpack.c.h.b16 %v18_v28  ;;  %v1103_v45 = vld [vmem:[%s1387_s1 + $0x1b0] sm:$0xff]  ;;  %v1086_v50 = vld [vmem:[%s1387_s1 + $0x128] sm:$0xff]  ;;  %v1085_v54 = vld [vmem:[%s1387_s1 + $0x120] sm:$0xff] }
   0xf   :  { %663 = vmatpush.bf16.msra.mxu2 %v1069_v13  ;;  %v1111_v48 = vld [vmem:[%s1387_s1 + $0x1f0] sm:$0xff]  ;;  %v1102_v51 = vld [vmem:[%s1387_s1 + $0x1a8] sm:$0xff]  ;;  %v1101_v55 = vld [vmem:[%s1387_s1 + $0x1a0] sm:$0xff] }
  0x10   :  { %676 = vmatpush.bf16.msra.mxu3 %v1077_v14  ;;  %v186_v42 = vpack.c.b16 %v177_v32, %v177_v32  ;;  %v187_v46 = vpack.c.b16 %v178_v38, %v178_v38  ;;  %v1095_v49 = vld [vmem:[%s1387_s1 + $0x170] sm:$0xff]  ;;  %v1110_v52 = vld [vmem:[%s1387_s1 + $0x1e8] sm:$0xff]  ;;  %v1109_v56 = vld [vmem:[%s1387_s1 + $0x1e0] sm:$0xff] }
  0x11   :  { %650 = vmatpush.bf16.msra.mxu1 %v1061_v15  ;;  %v1094_v53 = vld [vmem:[%s1387_s1 + $0x168] sm:$0xff]  ;;  %v1093_v57 = vld [vmem:[%s1387_s1 + $0x160] sm:$0xff]  ;;  %v1084_v58 = vld [vmem:[%s1387_s1 + $0x118] sm:$0xff] }
  0x12   :  { %638 = vmatpush.bf16.msra.mxu0 %v1052_v16  ;;  %v1100_v59 = vld [vmem:[%s1387_s1 + $0x198] sm:$0xff]  ;;  %v1083_v62 = vld [vmem:[%s1387_s1 + $0x110] sm:$0xff]  ;;  %v1082_v2 = vld [vmem:[%s1387_s1 + $0x108] sm:$0xff] }
  0x13   :  { %664 = vmatpush.bf16.msra.mxu2 %v1068_v17  ;;  %v1108_v60 = vld [vmem:[%s1387_s1 + $0x1d8] sm:$0xff]  ;;  %v1099_v63 = vld [vmem:[%s1387_s1 + $0x190] sm:$0xff]  ;;  %v1098_v3 = vld [vmem:[%s1387_s1 + $0x188] sm:$0xff] }
  0x14   :  { %677 = vmatpush.bf16.msra.mxu3 %v1076_v18  ;;  %v1092_v61 = vld [vmem:[%s1387_s1 + $0x158] sm:$0xff]  ;;  %v1107_v0 = vld [vmem:[%s1387_s1 + $0x1d0] sm:$0xff]  ;;  %v1106_v6 = vld [vmem:[%s1387_s1 + $0x1c8] sm:$0xff] }
  0x15   :  { %651 = vmatpush.bf16.msra.mxu1 %v1060_v19  ;;  %v1091_v1 = vld [vmem:[%s1387_s1 + $0x150] sm:$0xff]  ;;  %v20_v4 = vld [vmem:[%s1389_s0 + $0x18] sm:$0xff]  ;;  %v1090_v7 = vld [vmem:[%s1387_s1 + $0x148] sm:$0xff] }
  0x16   :  { %639 = vmatpush.bf16.msra.mxu0 %v1051_v20  ;;  %v19_v5 = vld [vmem:[%s1389_s0 + $0x10] sm:$0xff]  ;;  %v181_v8 = vunpack.c.l.b16 %v20_v4  ;;  %v1081_v10 = vld [vmem:[%s1387_s1 + $0x100] sm:$0xff]  ;;  %v1120_v12 = vld [vmem:[%s1387_s1 + $0x238] sm:$0xff]  ;;  %v182_v13 = vunpack.c.h.b16 %v20_v4 }
  0x17   :  { %665 = vmatpush.bf16.msra.mxu2 %v1067_v21  ;;  %v179_v9 = vunpack.c.l.b16 %v19_v5  ;;  %v1097_v11 = vld [vmem:[%s1387_s1 + $0x180] sm:$0xff]  ;;  %v180_v16 = vunpack.c.h.b16 %v19_v5  ;;  %v1119_v19 = vld [vmem:[%s1387_s1 + $0x230] sm:$0xff] }
  0x18   :  { %678 = vmatpush.bf16.msra.mxu3 %v1075_v22  ;;  %v1105_v14 = vld [vmem:[%s1387_s1 + $0x1c0] sm:$0xff]  ;;  %v190_v17 = vpack.c.b16 %v181_v8, %v181_v8  ;;  %v191_v20 = vpack.c.b16 %v182_v13, %v182_v13  ;;  %v1118_v22 = vld [vmem:[%s1387_s1 + $0x228] sm:$0xff] }
  0x19   :  { %652 = vmatpush.bf16.msra.mxu1 %v1059_v23  ;;  %v1089_v15 = vld [vmem:[%s1387_s1 + $0x140] sm:$0xff]  ;;  %v188_v18 = vpack.c.b16 %v179_v9, %v179_v9  ;;  %v189_v21 = vpack.c.b16 %v180_v16, %v180_v16 }
  0x1a   :  { %640 = vmatpush.bf16.msra.mxu0 %v1050_v24  ;;  %v1117_v23 = vld [vmem:[%s1387_s1 + $0x220] sm:$0xff]  ;;  %v1116_v24 = vld [vmem:[%s1387_s1 + $0x218] sm:$0xff] }
  0x1b   :  { %666 = vmatpush.bf16.msra.mxu2 %v1066_v25  ;;  %v1115_v25 = vld [vmem:[%s1387_s1 + $0x210] sm:$0xff]  ;;  %v1113_v29 = vld [vmem:[%s1387_s1 + $0x200] sm:$0xff] }
  0x1c   :  { %679 = vmatpush.bf16.msra.mxu3 %v1074_v26  ;;  %v1114_v26 = vld [vmem:[%s1387_s1 + $0x208] sm:$0xff]  ;;  %v1121_v39 = vld [vmem:[%s1388_s2] ss:$0 sm:$0xff] }
  0x1d   :  { %653 = vmatpush.bf16.msra.mxu1 %v1058_v27  ;;  %v21_v27 = vld [vmem:[%s1389_s0 + $0x20] sm:$0xf] }
  0x1e   :  { %641 = vmatpush.bf16.msra.mxu0 %v1049_v30  ;;  %v183_v28 = vunpack.c.l.b16 %v21_v27 }
  0x1f   :  { %667 = vmatpush.bf16.msra.mxu2 %v1065_v31 }
  0x20   :  { %680 = vmatpush.bf16.msra.mxu3 %v1073_v36  ;;  %v192_v30 = vpack.c.b16 %v183_v28, %v183_v28 }
  0x21   :  { %654 = vmatpush.bf16.msra.mxu1 %v1057_v37  ;;  %642 = vmatmul.bf16.vlgmr.msra.gmra.mxu0 %v184_v43 }
  0x22   :  { %686 = vmatpush.bf16.msrb.mxu0 %v1088_v34  ;;  %668 = vmatmul.bf16.vlgmr.msra.gmra.mxu2 %v186_v42 }
  0x23   :  { %712 = vmatpush.bf16.msrb.mxu2 %v1104_v35  ;;  %681 = vmatmul.bf16.vlgmr.msra.gmra.mxu3 %v187_v46 }
  0x24   :  { %725 = vmatpush.bf16.msrb.mxu3 %v1112_v40  ;;  %655 = vmatmul.bf16.vlgmr.msra.gmra.mxu1 %v185_v47 }
  0x25   :  { %699 = vmatpush.bf16.msrb.mxu1 %v1096_v41 }
  0x26   :  { %687 = vmatpush.bf16.msrb.mxu0 %v1087_v44 }
  0x27   :  { %713 = vmatpush.bf16.msrb.mxu2 %v1103_v45 }
  0x28   :  { %726 = vmatpush.bf16.msrb.mxu3 %v1111_v48 }
  0x29   :  { %700 = vmatpush.bf16.msrb.mxu1 %v1095_v49 }
  0x2a   :  { %688 = vmatpush.bf16.msrb.mxu0 %v1086_v50 }
  0x2b   :  { %714 = vmatpush.bf16.msrb.mxu2 %v1102_v51 }
  0x2c   :  { %727 = vmatpush.bf16.msrb.mxu3 %v1110_v52 }
  0x2d   :  { %701 = vmatpush.bf16.msrb.mxu1 %v1094_v53 }
  0x2e   :  { %689 = vmatpush.bf16.msrb.mxu0 %v1085_v54 }
  0x2f   :  { %715 = vmatpush.bf16.msrb.mxu2 %v1101_v55  ;;  %v752_v55 = vld [vmem:[%s1390_s3] sm:$0xf] }
  0x30   :  { %728 = vmatpush.bf16.msrb.mxu3 %v1109_v56 }
  0x31   :  { %702 = vmatpush.bf16.msrb.mxu1 %v1093_v57 }
  0x32   :  { %690 = vmatpush.bf16.msrb.mxu0 %v1084_v58 }
  0x33   :  { %716 = vmatpush.bf16.msrb.mxu2 %v1100_v59  ;;  %v753_v59 = vunpack.c.l.bf16 %v752_v55 }
  0x34   :  { %729 = vmatpush.bf16.msrb.mxu3 %v1108_v60 }
  0x35   :  { %703 = vmatpush.bf16.msrb.mxu1 %v1092_v61 }
  0x36   :  { %691 = vmatpush.bf16.msrb.mxu0 %v1083_v62 }
  0x37   :  { %717 = vmatpush.bf16.msrb.mxu2 %v1099_v63 }
  0x38   :  { %730 = vmatpush.bf16.msrb.mxu3 %v1107_v0 }
  0x39   :  { %704 = vmatpush.bf16.msrb.mxu1 %v1091_v1 }
  0x3a   :  { %692 = vmatpush.bf16.msrb.mxu0 %v1082_v2 }
  0x3b   :  { %718 = vmatpush.bf16.msrb.mxu2 %v1098_v3 }
  0x3c   :  { %731 = vmatpush.bf16.msrb.mxu3 %v1106_v6 }
  0x3d   :  { %705 = vmatpush.bf16.msrb.mxu1 %v1090_v7 }
  0x3e   :  { %693 = vmatpush.bf16.msrb.mxu0 %v1081_v10 }
  0x3f   :  { %719 = vmatpush.bf16.msrb.mxu2 %v1097_v11 }
  0x40   :  { %732 = vmatpush.bf16.msrb.mxu3 %v1105_v14 }
  0x41   :  { %706 = vmatpush.bf16.msrb.mxu1 %v1089_v15  ;;  %694 = vmatmul.bf16.vlgmr.msrb.gmra.mxu0 %v188_v18 }
  0x42   :  { %738 = vmatpush.bf16.msra.mxu0 %v1120_v12  ;;  %720 = vmatmul.bf16.vlgmr.msrb.gmra.mxu2 %v190_v17 }
  0x43   :  { %733 = vmatmul.bf16.vlgmr.msrb.gmra.mxu3 %v191_v20 }
  0x44   :  { %707 = vmatmul.bf16.vlgmr.msrb.gmra.mxu1 %v189_v21 }
  0x46   :  { %739 = vmatpush.bf16.msra.mxu0 %v1119_v19 }
  0x4a   :  { %740 = vmatpush.bf16.msra.mxu0 %v1118_v22 }
  0x4e   :  { %741 = vmatpush.bf16.msra.mxu0 %v1117_v23 }
  0x52   :  { %742 = vmatpush.bf16.msra.mxu0 %v1116_v24 }
  0x56   :  { %743 = vmatpush.bf16.msra.mxu0 %v1115_v25 }
  0x5a   :  { %744 = vmatpush.bf16.msra.mxu0 %v1114_v26 }
  0x5e   :  { %745 = vmatpush.bf16.msra.mxu0 %v1113_v29 }
  0x61   :  { %746 = vmatmul.bf16.vlgmr.msra.gmra.mxu0 %v192_v30 }
  0x9e   :  { %v643_v31 = vpop.f32.mrf.mxu0 }
  0x9f   :  { %v644_v40 = vadd.f32 %v1121_v39, %v643_v31 }
  0xa1   :  { %v656_v32 = vpop.f32.mrf.mxu1 }
  0xa2   :  { %v657_v43 = vadd.f32 %v656_v32, %v644_v40 }
  0xa5   :  { %v669_v33 = vpop.f32.mrf.mxu2 }
  0xa6   :  { %v682_v34 = vpop.f32.mrf.mxu3  ;;  %v645_v35 = vpop.f32.mrf.mxu0  ;;  %v670_v45 = vadd.f32 %v669_v33, %v657_v43 }
  0xa8   :  { %v683_v49 = vadd.f32 %v682_v34, %v670_v45 }
  0xa9   :  { %v658_v36 = vpop.f32.mrf.mxu1 }
  0xad   :  { %v671_v37 = vpop.f32.mrf.mxu2 }
  0xae   :  { %v684_v38 = vpop.f32.mrf.mxu3 }
  0xbe   :  { %v695_v41 = vpop.f32.mrf.mxu0 }
  0xbf   :  { %v696_v51 = vadd.f32 %v695_v41, %v683_v49 }
  0xc1   :  { %v708_v42 = vpop.f32.mrf.mxu1 }
  0xc2   :  { %v709_v53 = vadd.f32 %v708_v42, %v696_v51 }
  0xc5   :  { %v721_v44 = vpop.f32.mrf.mxu2 }
  0xc6   :  { %v734_v46 = vpop.f32.mrf.mxu3  ;;  %v697_v47 = vpop.f32.mrf.mxu0  ;;  %v722_v54 = vadd.f32 %v721_v44, %v709_v53 }
  0xc8   :  { %v735_v56 = vadd.f32 %v734_v46, %v722_v54 }
  0xc9   :  { %v710_v48 = vpop.f32.mrf.mxu1 }
  0xcd   :  { %v723_v50 = vpop.f32.mrf.mxu2 }
  0xce   :  { %v736_v52 = vpop.f32.mrf.mxu3 }
  0xde   :  { %v747_v57 = vpop.f32.mrf.mxu0 }
  0xdf   :  { %v748_v58 = vadd.f32 %v747_v57, %v735_v56 }
  0xe1   :  { %v751_v60 = vmax.f32 %v748_v58, 0.0 }
  0xe3   :  { %v754_v61 = vadd.f32 %v753_v59, %v751_v60 }
  0xe5   :  { %v755_v62 = vpack.c.bf16 %v754_v61, %v754_v61 }
  0xe6   :  { %v749_v63 = vpop.f32.mrf.mxu0 }
  0xe7   :  { %756 = vst [vmem:[%s1391_s4] sm:$0xf] %v755_v62 }

// kernel: l1block_forward.32
= control target key start
LH: loop header
LB: loop body
LE: loop exit
PB: predicated region body
PF: predicated region fallthrough
CT: control target
= control target key end

     0   :  { %s2519_s1 = inlined_call_operand.vmem [shape: bf16[512,512], index: 1, kind: input, shape index: {}]   ;;  %s2520_s0 = inlined_call_operand.vmem [shape: bf16[8,512], index: 0, kind: input, shape index: {}]   ;;  %s2521_s2 = inlined_call_operand.vmem [shape: f32[1,512], index: 2, kind: input, shape index: {}]   ;;  %s2522_s3 = inlined_call_operand.vmem [shape: bf16[8,512], index: 3, kind: input, shape index: {}]   ;;  %s2523_s4 = inlined_call_operand.vmem [shape: bf16[8,512], index: 4, kind: output, shape index: {}]  }
   0x1   :  { %v1155_v0 = vld [vmem:[%s2519_s1 + $0xe0] sm:$0xf]  ;;  %v1583_v1 = vld [vmem:[%s2519_s1 + $0xec] sm:$0xf0] }
   0x2   :  { %v1283_v2 = vld [vmem:[%s2519_s1 + $0x1e0] sm:$0xf]  ;;  %v1156_v3 = vor.u32 %v1583_v1, %v1155_v0  ;;  %v1615_v4 = vld [vmem:[%s2519_s1 + $0x1ec] sm:$0xf0] }
   0x3   :  { %v1411_v5 = vld [vmem:[%s2519_s1 + $0x2e0] sm:$0xf]  ;;  %v1647_v6 = vld [vmem:[%s2519_s1 + $0x2ec] sm:$0xf0]  ;;  %v1284_v7 = vor.u32 %v1615_v4, %v1283_v2 }
   0x4   :  { %v1412_v8 = vor.u32 %v1647_v6, %v1411_v5  ;;  %v1539_v9 = vld [vmem:[%s2519_s1 + $0x3e0] sm:$0xf]  ;;  %v1679_v10 = vld [vmem:[%s2519_s1 + $0x3ec] sm:$0xf0]  ;;  %811 = vmatpush.bf16.msra.mxu0 %v1156_v3 }
   0x5   :  { %v1139_v11 = vld [vmem:[%s2519_s1 + $0xc0] sm:$0xf]  ;;  %v1540_v12 = vor.u32 %v1679_v10, %v1539_v9  ;;  %v1579_v13 = vld [vmem:[%s2519_s1 + $0xcc] sm:$0xf0]  ;;  %824 = vmatpush.bf16.msra.mxu1 %v1284_v7 }
   0x6   :  { %v1267_v14 = vld [vmem:[%s2519_s1 + $0x1c0] sm:$0xf]  ;;  %v1611_v15 = vld [vmem:[%s2519_s1 + $0x1cc] sm:$0xf0]  ;;  %837 = vmatpush.bf16.msra.mxu2 %v1412_v8  ;;  %v1140_v16 = vor.u32 %v1579_v13, %v1139_v11 }
   0x7   :  { %v1268_v17 = vor.u32 %v1611_v15, %v1267_v14  ;;  %v1395_v18 = vld [vmem:[%s2519_s1 + $0x2c0] sm:$0xf]  ;;  %v1643_v19 = vld [vmem:[%s2519_s1 + $0x2cc] sm:$0xf0]  ;;  %850 = vmatpush.bf16.msra.mxu3 %v1540_v12 }
   0x8   :  { %v1523_v20 = vld [vmem:[%s2519_s1 + $0x3c0] sm:$0xf]  ;;  %v1396_v21 = vor.u32 %v1643_v19, %v1395_v18  ;;  %v1675_v22 = vld [vmem:[%s2519_s1 + $0x3cc] sm:$0xf0]  ;;  %812 = vmatpush.bf16.msra.mxu0 %v1140_v16 }
   0x9   :  { %v1123_v23 = vld [vmem:[%s2519_s1 + $0xa0] sm:$0xf]  ;;  %v1575_v24 = vld [vmem:[%s2519_s1 + $0xac] sm:$0xf0]  ;;  %v1524_v25 = vor.u32 %v1675_v22, %v1523_v20  ;;  %825 = vmatpush.bf16.msra.mxu1 %v1268_v17 }
   0xa   :  { %v1251_v26 = vld [vmem:[%s2519_s1 + $0x1a0] sm:$0xf]  ;;  %v1607_v27 = vld [vmem:[%s2519_s1 + $0x1ac] sm:$0xf0]  ;;  %v1124_v29 = vor.u32 %v1575_v24, %v1123_v23  ;;  %838 = vmatpush.bf16.msra.mxu2 %v1396_v21 }
   0xb   :  { %v1379_v28 = vld [vmem:[%s2519_s1 + $0x2a0] sm:$0xf]  ;;  %v1639_v30 = vld [vmem:[%s2519_s1 + $0x2ac] sm:$0xf0]  ;;  %v1252_v33 = vor.u32 %v1607_v27, %v1251_v26  ;;  %851 = vmatpush.bf16.msra.mxu3 %v1524_v25 }
   0xc   :  { %v1507_v31 = vld [vmem:[%s2519_s1 + $0x3a0] sm:$0xf]  ;;  %v1671_v32 = vld [vmem:[%s2519_s1 + $0x3ac] sm:$0xf0]  ;;  %v1380_v34 = vor.u32 %v1639_v30, %v1379_v28  ;;  %813 = vmatpush.bf16.msra.mxu0 %v1124_v29  ;;  %v1581_v28 = vld [vmem:[%s2519_s1 + $0xe4] sm:$0xf] }
   0xd   :  { %v1107_v35 = vld [vmem:[%s2519_s1 + $0x80] sm:$0xf]  ;;  %v1571_v36 = vld [vmem:[%s2519_s1 + $0x8c] sm:$0xf0]  ;;  %v1508_v38 = vor.u32 %v1671_v32, %v1507_v31  ;;  %826 = vmatpush.bf16.msra.mxu1 %v1252_v33  ;;  %v1157_v29 = vld [vmem:[%s2519_s1 + $0xf0] sm:$0xf0] }
   0xe   :  { %v1235_v37 = vld [vmem:[%s2519_s1 + $0x180] sm:$0xf]  ;;  %v1603_v39 = vld [vmem:[%s2519_s1 + $0x18c] sm:$0xf0]  ;;  %v1108_v44 = vor.u32 %v1571_v36, %v1107_v35  ;;  %839 = vmatpush.bf16.msra.mxu2 %v1380_v34  ;;  %v1613_v30 = vld [vmem:[%s2519_s1 + $0x1e4] sm:$0xf] }
   0xf   :  { %v1363_v40 = vld [vmem:[%s2519_s1 + $0x280] sm:$0xf]  ;;  %v1635_v41 = vld [vmem:[%s2519_s1 + $0x28c] sm:$0xf0]  ;;  %v1236_v45 = vor.u32 %v1603_v39, %v1235_v37  ;;  %852 = vmatpush.bf16.msra.mxu3 %v1508_v38  ;;  %v1285_v32 = vld [vmem:[%s2519_s1 + $0x1f0] sm:$0xf0] }
  0x10   :  { %v1491_v42 = vld [vmem:[%s2519_s1 + $0x380] sm:$0xf]  ;;  %v1667_v43 = vld [vmem:[%s2519_s1 + $0x38c] sm:$0xf0]  ;;  %v1364_v46 = vor.u32 %v1635_v41, %v1363_v40  ;;  %814 = vmatpush.bf16.msra.mxu0 %v1108_v44  ;;  %v1645_v33 = vld [vmem:[%s2519_s1 + $0x2e4] sm:$0xf]  ;;  %v1160_v40 = vor.u32 %v1581_v28, %v1157_v29  ;;  %v1288_v41 = vor.u32 %v1613_v30, %v1285_v32 }
  0x11   :  { %v1091_v47 = vld [vmem:[%s2519_s1 + $0x60] sm:$0xf]  ;;  %v1567_v48 = vld [vmem:[%s2519_s1 + $0x6c] sm:$0xf0]  ;;  %v1492_v50 = vor.u32 %v1667_v43, %v1491_v42  ;;  %827 = vmatpush.bf16.msra.mxu1 %v1236_v45  ;;  %v1413_v34 = vld [vmem:[%s2519_s1 + $0x2f0] sm:$0xf0] }
  0x12   :  { %v1219_v49 = vld [vmem:[%s2519_s1 + $0x160] sm:$0xf]  ;;  %v1599_v51 = vld [vmem:[%s2519_s1 + $0x16c] sm:$0xf0]  ;;  %v1092_v56 = vor.u32 %v1567_v48, %v1091_v47  ;;  %840 = vmatpush.bf16.msra.mxu2 %v1364_v46  ;;  %v1677_v37 = vld [vmem:[%s2519_s1 + $0x3e4] sm:$0xf]  ;;  %v1416_v42 = vor.u32 %v1645_v33, %v1413_v34 }
  0x13   :  { %v1347_v52 = vld [vmem:[%s2519_s1 + $0x260] sm:$0xf]  ;;  %v1631_v53 = vld [vmem:[%s2519_s1 + $0x26c] sm:$0xf0]  ;;  %v1220_v57 = vor.u32 %v1599_v51, %v1219_v49  ;;  %853 = vmatpush.bf16.msra.mxu3 %v1492_v50  ;;  %v1541_v38 = vld [vmem:[%s2519_s1 + $0x3f0] sm:$0xf0] }
  0x14   :  { %v1475_v54 = vld [vmem:[%s2519_s1 + $0x360] sm:$0xf]  ;;  %v1663_v55 = vld [vmem:[%s2519_s1 + $0x36c] sm:$0xf0]  ;;  %v1348_v58 = vor.u32 %v1631_v53, %v1347_v52  ;;  %815 = vmatpush.bf16.msra.mxu0 %v1092_v56  ;;  %v1577_v43 = vld [vmem:[%s2519_s1 + $0xc4] sm:$0xf]  ;;  %v1544_v46 = vor.u32 %v1677_v37, %v1541_v38 }
  0x15   :  { %v1075_v59 = vld [vmem:[%s2519_s1 + $0x40] sm:$0xf]  ;;  %v1563_v60 = vld [vmem:[%s2519_s1 + $0x4c] sm:$0xf0]  ;;  %v1476_v62 = vor.u32 %v1663_v55, %v1475_v54  ;;  %828 = vmatpush.bf16.msra.mxu1 %v1220_v57  ;;  %v1141_v44 = vld [vmem:[%s2519_s1 + $0xd0] sm:$0xf0] }
  0x16   :  { %v1203_v61 = vld [vmem:[%s2519_s1 + $0x140] sm:$0xf]  ;;  %v1595_v63 = vld [vmem:[%s2519_s1 + $0x14c] sm:$0xf0]  ;;  %v1076_v4 = vor.u32 %v1563_v60, %v1075_v59  ;;  %841 = vmatpush.bf16.msra.mxu2 %v1348_v58  ;;  %v1609_v45 = vld [vmem:[%s2519_s1 + $0x1c4] sm:$0xf]  ;;  %v1144_v53 = vor.u32 %v1577_v43, %v1141_v44 }
  0x17   :  { %v1331_v0 = vld [vmem:[%s2519_s1 + $0x240] sm:$0xf]  ;;  %v1627_v1 = vld [vmem:[%s2519_s1 + $0x24c] sm:$0xf0]  ;;  %v1204_v5 = vor.u32 %v1595_v63, %v1203_v61  ;;  %854 = vmatpush.bf16.msra.mxu3 %v1476_v62  ;;  %v1269_v47 = vld [vmem:[%s2519_s1 + $0x1d0] sm:$0xf0] }
  0x18   :  { %v1459_v2 = vld [vmem:[%s2519_s1 + $0x340] sm:$0xf]  ;;  %v1659_v3 = vld [vmem:[%s2519_s1 + $0x34c] sm:$0xf0]  ;;  %v1332_v6 = vor.u32 %v1627_v1, %v1331_v0  ;;  %816 = vmatpush.bf16.msra.mxu0 %v1076_v4  ;;  %v1641_v48 = vld [vmem:[%s2519_s1 + $0x2c4] sm:$0xf]  ;;  %v1272_v57 = vor.u32 %v1609_v45, %v1269_v47 }
  0x19   :  { %v1059_v7 = vld [vmem:[%s2519_s1 + $0x20] sm:$0xf]  ;;  %v1559_v8 = vld [vmem:[%s2519_s1 + $0x2c] sm:$0xf0]  ;;  %v1460_v10 = vor.u32 %v1659_v3, %v1459_v2  ;;  %829 = vmatpush.bf16.msra.mxu1 %v1204_v5  ;;  %v1397_v49 = vld [vmem:[%s2519_s1 + $0x2d0] sm:$0xf0] }
  0x1a   :  { %v1187_v9 = vld [vmem:[%s2519_s1 + $0x120] sm:$0xf]  ;;  %v1591_v11 = vld [vmem:[%s2519_s1 + $0x12c] sm:$0xf0]  ;;  %v1060_v16 = vor.u32 %v1559_v8, %v1059_v7  ;;  %842 = vmatpush.bf16.msra.mxu2 %v1332_v6  ;;  %v1673_v50 = vld [vmem:[%s2519_s1 + $0x3c4] sm:$0xf]  ;;  %v1400_v58 = vor.u32 %v1641_v48, %v1397_v49 }
  0x1b   :  { %v1315_v12 = vld [vmem:[%s2519_s1 + $0x220] sm:$0xf]  ;;  %v1623_v13 = vld [vmem:[%s2519_s1 + $0x22c] sm:$0xf0]  ;;  %v1188_v19 = vor.u32 %v1591_v11, %v1187_v9  ;;  %855 = vmatpush.bf16.msra.mxu3 %v1460_v10  ;;  %v1525_v51 = vld [vmem:[%s2519_s1 + $0x3d0] sm:$0xf0] }
  0x1c   :  { %v1443_v14 = vld [vmem:[%s2519_s1 + $0x320] sm:$0xf]  ;;  %v1655_v15 = vld [vmem:[%s2519_s1 + $0x32c] sm:$0xf0]  ;;  %v1316_v20 = vor.u32 %v1623_v13, %v1315_v12  ;;  %817 = vmatpush.bf16.msra.mxu0 %v1060_v16  ;;  %v18_v52 = vld [vmem:[%s2520_s0 + $0x8] sm:$0xff]  ;;  %v1528_v62 = vor.u32 %v1673_v50, %v1525_v51 }
  0x1d   :  { %v1043_v17 = vld [vmem:[%s2519_s1] sm:$0xf]  ;;  %v1555_v18 = vld [vmem:[%s2519_s1 + $0xc] sm:$0xf0]  ;;  %v1444_v24 = vor.u32 %v1655_v15, %v1443_v14  ;;  %830 = vmatpush.bf16.msra.mxu1 %v1188_v19  ;;  %v1573_v54 = vld [vmem:[%s2519_s1 + $0xa4] sm:$0xf]  ;;  %v161_v55 = vunpack.c.l.b16 %v18_v52  ;;  %v162_v56 = vunpack.c.h.b16 %v18_v52 }
  0x1e   :  { %v1171_v21 = vld [vmem:[%s2519_s1 + $0x100] sm:$0xf]  ;;  %v1587_v22 = vld [vmem:[%s2519_s1 + $0x10c] sm:$0xf0]  ;;  %v1044_v31 = vor.u32 %v1555_v18, %v1043_v17  ;;  %843 = vmatpush.bf16.msra.mxu2 %v1316_v20  ;;  %v1125_v59 = vld [vmem:[%s2519_s1 + $0xb0] sm:$0xf0] }
  0x1f   :  { %v1299_v23 = vld [vmem:[%s2519_s1 + $0x200] sm:$0xf]  ;;  %v1619_v25 = vld [vmem:[%s2519_s1 + $0x20c] sm:$0xf0]  ;;  %v1172_v35 = vor.u32 %v1587_v22, %v1171_v21  ;;  %856 = vmatpush.bf16.msra.mxu3 %v1444_v24  ;;  %v1605_v60 = vld [vmem:[%s2519_s1 + $0x1a4] sm:$0xf]  ;;  %v1967_v1 = vpack.c.b16 %v161_v55, %v161_v55  ;;  %v1978_v6 = vpack.c.b16 %v162_v56, %v162_v56  ;;  %v1128_v8 = vor.u32 %v1573_v54, %v1125_v59 }
  0x20   :  { %v1427_v26 = vld [vmem:[%s2519_s1 + $0x300] sm:$0xf]  ;;  %v1651_v27 = vld [vmem:[%s2519_s1 + $0x30c] sm:$0xf0]  ;;  %v1300_v36 = vor.u32 %v1619_v25, %v1299_v23  ;;  %818 = vmatpush.bf16.msra.mxu0 %v1044_v31  ;;  %v1253_v61 = vld [vmem:[%s2519_s1 + $0x1b0] sm:$0xf0] }
  0x21   :  { %v1428_v39 = vor.u32 %v1651_v27, %v1427_v26  ;;  %831 = vmatpush.bf16.msra.mxu1 %v1172_v35  ;;  %v1637_v63 = vld [vmem:[%s2519_s1 + $0x2a4] sm:$0xf]  ;;  %v1381_v0 = vld [vmem:[%s2519_s1 + $0x2b0] sm:$0xf0]  ;;  %v1256_v9 = vor.u32 %v1605_v60, %v1253_v61 }
  0x22   :  { %844 = vmatpush.bf16.msra.mxu2 %v1300_v36  ;;  %v17_v2 = vld [vmem:[%s2520_s0] sm:$0xff]  ;;  %v1509_v4 = vld [vmem:[%s2519_s1 + $0x3b0] sm:$0xf0]  ;;  %v1384_v10 = vor.u32 %v1637_v63, %v1381_v0 }
  0x23   :  { %857 = vmatpush.bf16.msra.mxu3 %v1428_v39  ;;  %v1669_v3 = vld [vmem:[%s2519_s1 + $0x3a4] sm:$0xf]  ;;  %v159_v5 = vunpack.c.l.b16 %v17_v2  ;;  %v160_v7 = vunpack.c.h.b16 %v17_v2  ;;  %v1109_v12 = vld [vmem:[%s2519_s1 + $0x90] sm:$0xf0] }
  0x24   :  { %863 = vmatpush.bf16.msrb.mxu0 %v1160_v40  ;;  %v1569_v11 = vld [vmem:[%s2519_s1 + $0x84] sm:$0xf]  ;;  %v1512_v16 = vor.u32 %v1669_v3, %v1509_v4  ;;  %v1237_v17 = vld [vmem:[%s2519_s1 + $0x190] sm:$0xf0] }
  0x25   :  { %876 = vmatpush.bf16.msrb.mxu1 %v1288_v41  ;;  %845 = vmatmul.bf16.vlgmr.msra.gmra.mxu2 %v1967_v1  ;;  %v1601_v13 = vld [vmem:[%s2519_s1 + $0x184] sm:$0xf]  ;;  %v1990_v14 = vpack.c.b16 %v159_v5, %v159_v5  ;;  %v1992_v15 = vpack.c.b16 %v160_v7, %v160_v7  ;;  %v1365_v19 = vld [vmem:[%s2519_s1 + $0x290] sm:$0xf0]  ;;  %v1112_v22 = vor.u32 %v1569_v11, %v1109_v12  ;;  %v1616_v12 = vld [vmem:[%s2519_s1 + $0x1f4] sm:$0xf0] }
  0x26   :  { %889 = vmatpush.bf16.msrb.mxu2 %v1416_v42  ;;  %v1633_v18 = vld [vmem:[%s2519_s1 + $0x284] sm:$0xf]  ;;  %v1493_v21 = vld [vmem:[%s2519_s1 + $0x390] sm:$0xf0]  ;;  %858 = vmatmul.bf16.vlgmr.msra.gmra.mxu3 %v1978_v6  ;;  %v1240_v23 = vor.u32 %v1601_v13, %v1237_v17  ;;  %v1419_v13 = vld [vmem:[%s2519_s1 + $0x2e8] sm:$0xf] }
  0x27   :  { %902 = vmatpush.bf16.msrb.mxu3 %v1544_v46  ;;  %v1665_v20 = vld [vmem:[%s2519_s1 + $0x384] sm:$0xf]  ;;  %819 = vmatmul.bf16.vlgmr.msra.gmra.mxu0 %v1990_v14  ;;  %v1368_v24 = vor.u32 %v1633_v18, %v1365_v19  ;;  %v1093_v26 = vld [vmem:[%s2519_s1 + $0x70] sm:$0xf0]  ;;  %v1547_v19 = vld [vmem:[%s2519_s1 + $0x3e8] sm:$0xf] }
  0x28   :  { %864 = vmatpush.bf16.msrb.mxu0 %v1144_v53  ;;  %832 = vmatmul.bf16.vlgmr.msra.gmra.mxu1 %v1992_v15  ;;  %v1565_v25 = vld [vmem:[%s2519_s1 + $0x64] sm:$0xf]  ;;  %v1496_v28 = vor.u32 %v1665_v20, %v1493_v21  ;;  %v1221_v29 = vld [vmem:[%s2519_s1 + $0x170] sm:$0xf0]  ;;  %v1680_v20 = vld [vmem:[%s2519_s1 + $0x3f4] sm:$0xf0] }
  0x29   :  { %877 = vmatpush.bf16.msrb.mxu1 %v1272_v57  ;;  %v1597_v27 = vld [vmem:[%s2519_s1 + $0x164] sm:$0xf]  ;;  %v1349_v31 = vld [vmem:[%s2519_s1 + $0x270] sm:$0xf0]  ;;  %v1096_v34 = vor.u32 %v1565_v25, %v1093_v26  ;;  %v1147_v25 = vld [vmem:[%s2519_s1 + $0xc8] sm:$0xf] }
  0x2a   :  { %890 = vmatpush.bf16.msrb.mxu2 %v1400_v58  ;;  %v1629_v30 = vld [vmem:[%s2519_s1 + $0x264] sm:$0xf]  ;;  %v1477_v33 = vld [vmem:[%s2519_s1 + $0x370] sm:$0xf0]  ;;  %v1224_v35 = vor.u32 %v1597_v27, %v1221_v29  ;;  %v1580_v26 = vld [vmem:[%s2519_s1 + $0xd4] sm:$0xf0] }
  0x2b   :  { %903 = vmatpush.bf16.msrb.mxu3 %v1528_v62  ;;  %v1661_v32 = vld [vmem:[%s2519_s1 + $0x364] sm:$0xf]  ;;  %v1352_v36 = vor.u32 %v1629_v30, %v1349_v31  ;;  %v1077_v38 = vld [vmem:[%s2519_s1 + $0x50] sm:$0xf0]  ;;  %v1275_v27 = vld [vmem:[%s2519_s1 + $0x1c8] sm:$0xf] }
  0x2c   :  { %865 = vmatpush.bf16.msrb.mxu0 %v1128_v8  ;;  %v1561_v37 = vld [vmem:[%s2519_s1 + $0x44] sm:$0xf]  ;;  %v1480_v40 = vor.u32 %v1661_v32, %v1477_v33  ;;  %v1205_v41 = vld [vmem:[%s2519_s1 + $0x150] sm:$0xf0]  ;;  %v1163_v8 = vld [vmem:[%s2519_s1 + $0xe8] sm:$0xf] }
  0x2d   :  { %878 = vmatpush.bf16.msrb.mxu1 %v1256_v9  ;;  %v1593_v39 = vld [vmem:[%s2519_s1 + $0x144] sm:$0xf]  ;;  %v1333_v43 = vld [vmem:[%s2519_s1 + $0x250] sm:$0xf0]  ;;  %v1080_v46 = vor.u32 %v1561_v37, %v1077_v38  ;;  %v1584_v9 = vld [vmem:[%s2519_s1 + $0xf4] sm:$0xf0] }
  0x2e   :  { %891 = vmatpush.bf16.msrb.mxu2 %v1384_v10  ;;  %v1625_v42 = vld [vmem:[%s2519_s1 + $0x244] sm:$0xf]  ;;  %v1461_v45 = vld [vmem:[%s2519_s1 + $0x350] sm:$0xf0]  ;;  %v1208_v47 = vor.u32 %v1593_v39, %v1205_v41  ;;  %v1291_v10 = vld [vmem:[%s2519_s1 + $0x1e8] sm:$0xf] }
  0x2f   :  { %904 = vmatpush.bf16.msrb.mxu3 %v1512_v16  ;;  %v1657_v44 = vld [vmem:[%s2519_s1 + $0x344] sm:$0xf]  ;;  %v1336_v48 = vor.u32 %v1625_v42, %v1333_v43  ;;  %v1061_v50 = vld [vmem:[%s2519_s1 + $0x30] sm:$0xf0]  ;;  %v1648_v16 = vld [vmem:[%s2519_s1 + $0x2f4] sm:$0xf0] }
  0x30   :  { %866 = vmatpush.bf16.msrb.mxu0 %v1112_v22  ;;  %v1557_v49 = vld [vmem:[%s2519_s1 + $0x24] sm:$0xf]  ;;  %v1464_v52 = vor.u32 %v1657_v44, %v1461_v45  ;;  %v1189_v53 = vld [vmem:[%s2519_s1 + $0x130] sm:$0xf0]  ;;  %v1164_v22 = vor.u32 %v1584_v9, %v1163_v8  ;;  %v1612_v29 = vld [vmem:[%s2519_s1 + $0x1d4] sm:$0xf0] }
  0x31   :  { %879 = vmatpush.bf16.msrb.mxu1 %v1240_v23  ;;  %v1589_v51 = vld [vmem:[%s2519_s1 + $0x124] sm:$0xf]  ;;  %v1317_v55 = vld [vmem:[%s2519_s1 + $0x230] sm:$0xf0]  ;;  %v1064_v58 = vor.u32 %v1557_v49, %v1061_v50  ;;  %v1292_v23 = vor.u32 %v1616_v12, %v1291_v10  ;;  %v1403_v30 = vld [vmem:[%s2519_s1 + $0x2c8] sm:$0xf] }
  0x32   :  { %892 = vmatpush.bf16.msrb.mxu2 %v1368_v24  ;;  %v1621_v54 = vld [vmem:[%s2519_s1 + $0x224] sm:$0xf]  ;;  %v1445_v57 = vld [vmem:[%s2519_s1 + $0x330] sm:$0xf0]  ;;  %v1192_v61 = vor.u32 %v1589_v51, %v1189_v53  ;;  %v1420_v24 = vor.u32 %v1648_v16, %v1419_v13  ;;  %v1644_v31 = vld [vmem:[%s2519_s1 + $0x2d4] sm:$0xf0] }
  0x33   :  { %905 = vmatpush.bf16.msrb.mxu3 %v1496_v28  ;;  %v1653_v56 = vld [vmem:[%s2519_s1 + $0x324] sm:$0xf]  ;;  %v1045_v60 = vld [vmem:[%s2519_s1 + $0x10] sm:$0xf0]  ;;  %v1320_v62 = vor.u32 %v1621_v54, %v1317_v55  ;;  %v1548_v28 = vor.u32 %v1680_v20, %v1547_v19  ;;  %v1531_v32 = vld [vmem:[%s2519_s1 + $0x3c8] sm:$0xf] }
  0x34   :  { %867 = vmatpush.bf16.msrb.mxu0 %v1096_v34  ;;  %v1553_v59 = vld [vmem:[%s2519_s1 + $0x4] sm:$0xf]  ;;  %v1173_v0 = vld [vmem:[%s2519_s1 + $0x110] sm:$0xf0]  ;;  %v1448_v3 = vor.u32 %v1653_v56, %v1445_v57  ;;  %v1676_v33 = vld [vmem:[%s2519_s1 + $0x3d4] sm:$0xf0]  ;;  %v1148_v34 = vor.u32 %v1580_v26, %v1147_v25 }
  0x35   :  { %880 = vmatpush.bf16.msrb.mxu1 %v1224_v35  ;;  %v1585_v63 = vld [vmem:[%s2519_s1 + $0x104] sm:$0xf]  ;;  %v1301_v4 = vld [vmem:[%s2519_s1 + $0x210] sm:$0xf0]  ;;  %v1048_v11 = vor.u32 %v1553_v59, %v1045_v60  ;;  %v1276_v35 = vor.u32 %v1612_v29, %v1275_v27  ;;  %v1131_v37 = vld [vmem:[%s2519_s1 + $0xa8] sm:$0xf] }
  0x36   :  { %893 = vmatpush.bf16.msrb.mxu2 %v1352_v36  ;;  %v1617_v2 = vld [vmem:[%s2519_s1 + $0x204] sm:$0xf]  ;;  %v1429_v7 = vld [vmem:[%s2519_s1 + $0x310] sm:$0xf0]  ;;  %v1176_v17 = vor.u32 %v1585_v63, %v1173_v0  ;;  %v1404_v36 = vor.u32 %v1644_v31, %v1403_v30  ;;  %v1576_v38 = vld [vmem:[%s2519_s1 + $0xb4] sm:$0xf0] }
  0x37   :  { %906 = vmatpush.bf16.msrb.mxu3 %v1480_v40  ;;  %v1649_v5 = vld [vmem:[%s2519_s1 + $0x304] sm:$0xf]  ;;  %v1304_v18 = vor.u32 %v1617_v2, %v1301_v4  ;;  %v1259_v39 = vld [vmem:[%s2519_s1 + $0x1a8] sm:$0xf]  ;;  %v1532_v40 = vor.u32 %v1676_v33, %v1531_v32  ;;  %v1608_v41 = vld [vmem:[%s2519_s1 + $0x1b4] sm:$0xf0] }
  0x38   :  { %868 = vmatpush.bf16.msrb.mxu0 %v1080_v46  ;;  %v1432_v21 = vor.u32 %v1649_v5, %v1429_v7  ;;  %v1387_v42 = vld [vmem:[%s2519_s1 + $0x2a8] sm:$0xf]  ;;  %v1640_v43 = vld [vmem:[%s2519_s1 + $0x2b4] sm:$0xf0]  ;;  %v1132_v46 = vor.u32 %v1576_v38, %v1131_v37 }
  0x39   :  { %881 = vmatpush.bf16.msrb.mxu1 %v1208_v47  ;;  %v1515_v44 = vld [vmem:[%s2519_s1 + $0x3a8] sm:$0xf]  ;;  %v1672_v45 = vld [vmem:[%s2519_s1 + $0x3b4] sm:$0xf0]  ;;  %v1260_v47 = vor.u32 %v1608_v41, %v1259_v39 }
  0x3a   :  { %894 = vmatpush.bf16.msrb.mxu2 %v1336_v48  ;;  %v1388_v48 = vor.u32 %v1640_v43, %v1387_v42  ;;  %v1115_v49 = vld [vmem:[%s2519_s1 + $0x88] sm:$0xf]  ;;  %v1572_v50 = vld [vmem:[%s2519_s1 + $0x94] sm:$0xf0] }
  0x3b   :  { %907 = vmatpush.bf16.msrb.mxu3 %v1464_v52  ;;  %v1243_v51 = vld [vmem:[%s2519_s1 + $0x188] sm:$0xf]  ;;  %v1516_v52 = vor.u32 %v1672_v45, %v1515_v44  ;;  %v1604_v53 = vld [vmem:[%s2519_s1 + $0x194] sm:$0xf0] }
  0x3c   :  { %869 = vmatpush.bf16.msrb.mxu0 %v1064_v58  ;;  %v1371_v54 = vld [vmem:[%s2519_s1 + $0x288] sm:$0xf]  ;;  %v1636_v55 = vld [vmem:[%s2519_s1 + $0x294] sm:$0xf0]  ;;  %v1116_v58 = vor.u32 %v1572_v50, %v1115_v49  ;;  %v1244_v59 = vor.u32 %v1604_v53, %v1243_v51  ;;  %v1293_v50 = vld [vmem:[%s2519_s1 + $0x1f8] sm:$0xf0] }
  0x3d   :  { %882 = vmatpush.bf16.msrb.mxu1 %v1192_v61  ;;  %v1499_v56 = vld [vmem:[%s2519_s1 + $0x388] sm:$0xf]  ;;  %v1668_v57 = vld [vmem:[%s2519_s1 + $0x394] sm:$0xf0]  ;;  %v1372_v60 = vor.u32 %v1636_v55, %v1371_v54  ;;  %v1646_v51 = vld [vmem:[%s2519_s1 + $0x2ec] sm:$0xf] }
  0x3e   :  { %895 = vmatpush.bf16.msrb.mxu2 %v1320_v62  ;;  %v1099_v61 = vld [vmem:[%s2519_s1 + $0x68] sm:$0xf]  ;;  %v1568_v62 = vld [vmem:[%s2519_s1 + $0x74] sm:$0xf0]  ;;  %v1500_v0 = vor.u32 %v1668_v57, %v1499_v56  ;;  %v1678_v55 = vld [vmem:[%s2519_s1 + $0x3ec] sm:$0xf] }
  0x3f   :  { %908 = vmatpush.bf16.msrb.mxu3 %v1448_v3  ;;  %v1227_v63 = vld [vmem:[%s2519_s1 + $0x168] sm:$0xf]  ;;  %v1600_v2 = vld [vmem:[%s2519_s1 + $0x174] sm:$0xf0]  ;;  %v1100_v8 = vor.u32 %v1568_v62, %v1099_v61  ;;  %v1549_v56 = vld [vmem:[%s2519_s1 + $0x3f8] sm:$0xf0] }
  0x40   :  { %870 = vmatpush.bf16.msrb.mxu0 %v1048_v11  ;;  %v1355_v3 = vld [vmem:[%s2519_s1 + $0x268] sm:$0xf]  ;;  %v1632_v4 = vld [vmem:[%s2519_s1 + $0x274] sm:$0xf0]  ;;  %v1228_v9 = vor.u32 %v1600_v2, %v1227_v63  ;;  %v1578_v61 = vld [vmem:[%s2519_s1 + $0xcc] sm:$0xf] }
  0x41   :  { %883 = vmatpush.bf16.msrb.mxu1 %v1176_v17  ;;  %v1483_v5 = vld [vmem:[%s2519_s1 + $0x368] sm:$0xf]  ;;  %v1664_v7 = vld [vmem:[%s2519_s1 + $0x374] sm:$0xf0]  ;;  %v1356_v10 = vor.u32 %v1632_v4, %v1355_v3  ;;  %v1149_v62 = vld [vmem:[%s2519_s1 + $0xd8] sm:$0xf0] }
  0x42   :  { %896 = vmatpush.bf16.msrb.mxu2 %v1304_v18  ;;  %v1083_v11 = vld [vmem:[%s2519_s1 + $0x48] sm:$0xf]  ;;  %v1564_v12 = vld [vmem:[%s2519_s1 + $0x54] sm:$0xf0]  ;;  %v1484_v16 = vor.u32 %v1664_v7, %v1483_v5  ;;  %v1610_v63 = vld [vmem:[%s2519_s1 + $0x1cc] sm:$0xf] }
  0x43   :  { %909 = vmatpush.bf16.msrb.mxu3 %v1432_v21  ;;  %871 = vmatmul.bf16.vlgmr.msrb.gmra.mxu0 %v1990_v14  ;;  %v1211_v13 = vld [vmem:[%s2519_s1 + $0x148] sm:$0xf]  ;;  %v1596_v17 = vld [vmem:[%s2519_s1 + $0x154] sm:$0xf0]  ;;  %v1277_v2 = vld [vmem:[%s2519_s1 + $0x1d8] sm:$0xf0] }
  0x44   :  { %915 = vmatpush.bf16.msra.mxu0 %v1164_v22  ;;  %884 = vmatmul.bf16.vlgmr.msrb.gmra.mxu1 %v1992_v15  ;;  %v1339_v18 = vld [vmem:[%s2519_s1 + $0x248] sm:$0xf]  ;;  %v1628_v19 = vld [vmem:[%s2519_s1 + $0x254] sm:$0xf0]  ;;  %v1084_v22 = vor.u32 %v1564_v12, %v1083_v11  ;;  %v1642_v3 = vld [vmem:[%s2519_s1 + $0x2cc] sm:$0xf] }
  0x45   :  { %928 = vmatpush.bf16.msra.mxu1 %v1292_v23  ;;  %897 = vmatmul.bf16.vlgmr.msrb.gmra.mxu2 %v1967_v1  ;;  %v1467_v20 = vld [vmem:[%s2519_s1 + $0x348] sm:$0xf]  ;;  %v1660_v21 = vld [vmem:[%s2519_s1 + $0x354] sm:$0xf0]  ;;  %v1212_v23 = vor.u32 %v1596_v17, %v1211_v13  ;;  %v1405_v4 = vld [vmem:[%s2519_s1 + $0x2d8] sm:$0xf0] }
  0x46   :  { %941 = vmatpush.bf16.msra.mxu2 %v1420_v24  ;;  %910 = vmatmul.bf16.vlgmr.msrb.gmra.mxu3 %v1978_v6  ;;  %v1340_v24 = vor.u32 %v1628_v19, %v1339_v18  ;;  %v1067_v25 = vld [vmem:[%s2519_s1 + $0x28] sm:$0xf]  ;;  %v1560_v26 = vld [vmem:[%s2519_s1 + $0x34] sm:$0xf0]  ;;  %v1674_v5 = vld [vmem:[%s2519_s1 + $0x3cc] sm:$0xf] }
  0x47   :  { %954 = vmatpush.bf16.msra.mxu3 %v1548_v28  ;;  %v1195_v27 = vld [vmem:[%s2519_s1 + $0x128] sm:$0xf]  ;;  %v1468_v28 = vor.u32 %v1660_v21, %v1467_v20  ;;  %v1592_v29 = vld [vmem:[%s2519_s1 + $0x134] sm:$0xf0]  ;;  %v1533_v7 = vld [vmem:[%s2519_s1 + $0x3d8] sm:$0xf0] }
  0x48   :  { %916 = vmatpush.bf16.msra.mxu0 %v1148_v34  ;;  %v1323_v30 = vld [vmem:[%s2519_s1 + $0x228] sm:$0xf]  ;;  %v1624_v31 = vld [vmem:[%s2519_s1 + $0x234] sm:$0xf0]  ;;  %v1068_v34 = vor.u32 %v1560_v26, %v1067_v25  ;;  %v1196_v37 = vor.u32 %v1592_v29, %v1195_v27  ;;  %v1574_v11 = vld [vmem:[%s2519_s1 + $0xac] sm:$0xf] }
  0x49   :  { %929 = vmatpush.bf16.msra.mxu1 %v1276_v35  ;;  %v1451_v32 = vld [vmem:[%s2519_s1 + $0x328] sm:$0xf]  ;;  %v1656_v33 = vld [vmem:[%s2519_s1 + $0x334] sm:$0xf0]  ;;  %v1324_v38 = vor.u32 %v1624_v31, %v1323_v30  ;;  %v1133_v12 = vld [vmem:[%s2519_s1 + $0xb8] sm:$0xf0] }
  0x4a   :  { %942 = vmatpush.bf16.msra.mxu2 %v1404_v36  ;;  %v1051_v35 = vld [vmem:[%s2519_s1 + $0x8] sm:$0xf]  ;;  %v1556_v36 = vld [vmem:[%s2519_s1 + $0x14] sm:$0xf0]  ;;  %v1452_v42 = vor.u32 %v1656_v33, %v1451_v32  ;;  %v1606_v13 = vld [vmem:[%s2519_s1 + $0x1ac] sm:$0xf] }
  0x4b   :  { %955 = vmatpush.bf16.msra.mxu3 %v1532_v40  ;;  %v1179_v39 = vld [vmem:[%s2519_s1 + $0x108] sm:$0xf]  ;;  %v1588_v40 = vld [vmem:[%s2519_s1 + $0x114] sm:$0xf0]  ;;  %v1052_v49 = vor.u32 %v1556_v36, %v1051_v35  ;;  %v1261_v17 = vld [vmem:[%s2519_s1 + $0x1b8] sm:$0xf0] }
  0x4c   :  { %917 = vmatpush.bf16.msra.mxu0 %v1132_v46  ;;  %v1307_v41 = vld [vmem:[%s2519_s1 + $0x208] sm:$0xf]  ;;  %v1620_v43 = vld [vmem:[%s2519_s1 + $0x214] sm:$0xf0]  ;;  %v1582_v46 = vld [vmem:[%s2519_s1 + $0xec] sm:$0xf]  ;;  %v1180_v53 = vor.u32 %v1588_v40, %v1179_v39 }
  0x4d   :  { %930 = vmatpush.bf16.msra.mxu1 %v1260_v47  ;;  %v1435_v44 = vld [vmem:[%s2519_s1 + $0x308] sm:$0xf]  ;;  %v1652_v45 = vld [vmem:[%s2519_s1 + $0x314] sm:$0xf0]  ;;  %v1165_v47 = vld [vmem:[%s2519_s1 + $0xf8] sm:$0xf0]  ;;  %v1308_v54 = vor.u32 %v1620_v43, %v1307_v41 }
  0x4e   :  { %943 = vmatpush.bf16.msra.mxu2 %v1388_v48  ;;  %v1614_v48 = vld [vmem:[%s2519_s1 + $0x1ec] sm:$0xf]  ;;  %v1436_v57 = vor.u32 %v1652_v45, %v1435_v44  ;;  %v1389_v19 = vld [vmem:[%s2519_s1 + $0x2b8] sm:$0xf0] }
  0x4f   :  { %956 = vmatpush.bf16.msra.mxu3 %v1516_v52  ;;  %v1421_v52 = vld [vmem:[%s2519_s1 + $0x2f8] sm:$0xf0]  ;;  %v1638_v18 = vld [vmem:[%s2519_s1 + $0x2ac] sm:$0xf] }
  0x50   :  { %918 = vmatpush.bf16.msra.mxu0 %v1116_v58  ;;  %v1168_v58 = vor.u32 %v1582_v46, %v1165_v47  ;;  %v1670_v20 = vld [vmem:[%s2519_s1 + $0x3ac] sm:$0xf]  ;;  %v1517_v21 = vld [vmem:[%s2519_s1 + $0x3b8] sm:$0xf0] }
  0x51   :  { %931 = vmatpush.bf16.msra.mxu1 %v1244_v59  ;;  %v1296_v59 = vor.u32 %v1614_v48, %v1293_v50  ;;  %v1570_v25 = vld [vmem:[%s2519_s1 + $0x8c] sm:$0xf]  ;;  %v1117_v26 = vld [vmem:[%s2519_s1 + $0x98] sm:$0xf0] }
  0x52   :  { %944 = vmatpush.bf16.msra.mxu2 %v1372_v60  ;;  %v1424_v60 = vor.u32 %v1646_v51, %v1421_v52  ;;  %v1602_v27 = vld [vmem:[%s2519_s1 + $0x18c] sm:$0xf]  ;;  %v1245_v29 = vld [vmem:[%s2519_s1 + $0x198] sm:$0xf0] }
  0x53   :  { %957 = vmatpush.bf16.msra.mxu3 %v1500_v0  ;;  %v1552_v0 = vor.u32 %v1678_v55, %v1549_v56  ;;  %v1634_v30 = vld [vmem:[%s2519_s1 + $0x28c] sm:$0xf]  ;;  %v1373_v31 = vld [vmem:[%s2519_s1 + $0x298] sm:$0xf0]  ;;  %v1248_v35 = vor.u32 %v1602_v27, %v1245_v29 }
  0x54   :  { %919 = vmatpush.bf16.msra.mxu0 %v1100_v8  ;;  %v1152_v8 = vor.u32 %v1578_v61, %v1149_v62  ;;  %v1666_v32 = vld [vmem:[%s2519_s1 + $0x38c] sm:$0xf]  ;;  %v1501_v33 = vld [vmem:[%s2519_s1 + $0x398] sm:$0xf0]  ;;  %v1376_v36 = vor.u32 %v1634_v30, %v1373_v31 }
  0x55   :  { %932 = vmatpush.bf16.msra.mxu1 %v1228_v9  ;;  %v1280_v9 = vor.u32 %v1610_v63, %v1277_v2  ;;  %v1598_v39 = vld [vmem:[%s2519_s1 + $0x16c] sm:$0xf]  ;;  %v1504_v40 = vor.u32 %v1666_v32, %v1501_v33  ;;  %v1229_v41 = vld [vmem:[%s2519_s1 + $0x178] sm:$0xf0]  ;;  %v147_v32 = vld [vmem:[%s2521_s2] sm:$0xf] }
  0x56   :  { %945 = vmatpush.bf16.msra.mxu2 %v1356_v10  ;;  %v1408_v10 = vor.u32 %v1642_v3, %v1405_v4  ;;  %v1357_v43 = vld [vmem:[%s2519_s1 + $0x278] sm:$0xf0]  ;;  %v1662_v44 = vld [vmem:[%s2519_s1 + $0x36c] sm:$0xf]  ;;  %v1232_v47 = vor.u32 %v1598_v39, %v1229_v41 }
  0x57   :  { %958 = vmatpush.bf16.msra.mxu3 %v1484_v16  ;;  %v1536_v16 = vor.u32 %v1674_v5, %v1533_v7  ;;  %v1485_v45 = vld [vmem:[%s2519_s1 + $0x378] sm:$0xf0]  ;;  %v1594_v51 = vld [vmem:[%s2519_s1 + $0x14c] sm:$0xf] }
  0x58   :  { %920 = vmatpush.bf16.msra.mxu0 %v1084_v22  ;;  %v1136_v22 = vor.u32 %v1574_v11, %v1133_v12  ;;  %v1085_v50 = vld [vmem:[%s2519_s1 + $0x58] sm:$0xf0]  ;;  %v1488_v52 = vor.u32 %v1662_v44, %v1485_v45  ;;  %v1658_v56 = vld [vmem:[%s2519_s1 + $0x34c] sm:$0xf] }
  0x59   :  { %933 = vmatpush.bf16.msra.mxu1 %v1212_v23  ;;  %v1264_v23 = vor.u32 %v1606_v13, %v1261_v17  ;;  %v1341_v55 = vld [vmem:[%s2519_s1 + $0x258] sm:$0xf0]  ;;  %v1558_v61 = vld [vmem:[%s2519_s1 + $0x2c] sm:$0xf] }
  0x5a   :  { %946 = vmatpush.bf16.msra.mxu2 %v1340_v24  ;;  %v1392_v24 = vor.u32 %v1638_v18, %v1389_v19  ;;  %v1069_v62 = vld [vmem:[%s2519_s1 + $0x38] sm:$0xf0]  ;;  %v1590_v63 = vld [vmem:[%s2519_s1 + $0x12c] sm:$0xf] }
  0x5b   :  { %959 = vmatpush.bf16.msra.mxu3 %v1468_v28  ;;  %v1520_v28 = vor.u32 %v1670_v20, %v1517_v21  ;;  %v1197_v2 = vld [vmem:[%s2519_s1 + $0x138] sm:$0xf0]  ;;  %v1622_v3 = vld [vmem:[%s2519_s1 + $0x22c] sm:$0xf] }
  0x5c   :  { %921 = vmatpush.bf16.msra.mxu0 %v1068_v34  ;;  %v1120_v34 = vor.u32 %v1570_v25, %v1117_v26  ;;  %v1325_v4 = vld [vmem:[%s2519_s1 + $0x238] sm:$0xf0]  ;;  %v1654_v5 = vld [vmem:[%s2519_s1 + $0x32c] sm:$0xf] }
  0x5d   :  { %934 = vmatpush.bf16.msra.mxu1 %v1196_v37  ;;  %v1566_v37 = vld [vmem:[%s2519_s1 + $0x6c] sm:$0xf]  ;;  %v1453_v7 = vld [vmem:[%s2519_s1 + $0x338] sm:$0xf0] }
  0x5e   :  { %947 = vmatpush.bf16.msra.mxu2 %v1324_v38  ;;  %v1101_v38 = vld [vmem:[%s2519_s1 + $0x78] sm:$0xf0]  ;;  %v1554_v11 = vld [vmem:[%s2519_s1 + $0xc] sm:$0xf] }
  0x5f   :  { %960 = vmatpush.bf16.msra.mxu3 %v1452_v42  ;;  %v1630_v42 = vld [vmem:[%s2519_s1 + $0x26c] sm:$0xf]  ;;  %v1104_v46 = vor.u32 %v1566_v37, %v1101_v38  ;;  %v1053_v12 = vld [vmem:[%s2519_s1 + $0x18] sm:$0xf0] }
  0x60   :  { %922 = vmatpush.bf16.msra.mxu0 %v1052_v49  ;;  %v1360_v48 = vor.u32 %v1630_v42, %v1357_v43  ;;  %v1562_v49 = vld [vmem:[%s2519_s1 + $0x4c] sm:$0xf]  ;;  %v1181_v17 = vld [vmem:[%s2519_s1 + $0x118] sm:$0xf0] }
  0x61   :  { %935 = vmatpush.bf16.msra.mxu1 %v1180_v53  ;;  %v1213_v53 = vld [vmem:[%s2519_s1 + $0x158] sm:$0xf0]  ;;  %v1586_v13 = vld [vmem:[%s2519_s1 + $0x10c] sm:$0xf] }
  0x62   :  { %948 = vmatpush.bf16.msra.mxu2 %v1308_v54  ;;  %v1626_v54 = vld [vmem:[%s2519_s1 + $0x24c] sm:$0xf]  ;;  %v1309_v19 = vld [vmem:[%s2519_s1 + $0x218] sm:$0xf0] }
  0x63   :  { %961 = vmatpush.bf16.msra.mxu3 %v1436_v57  ;;  %923 = vmatmul.bf16.vlgmr.msra.gmra.mxu0 %v1990_v14  ;;  %v1469_v57 = vld [vmem:[%s2519_s1 + $0x358] sm:$0xf0]  ;;  %v1618_v18 = vld [vmem:[%s2519_s1 + $0x20c] sm:$0xf] }
  0x64   :  { %967 = vmatpush.bf16.msrb.mxu0 %v1168_v58  ;;  %936 = vmatmul.bf16.vlgmr.msra.gmra.mxu1 %v1992_v15  ;;  %v1088_v58 = vor.u32 %v1562_v49, %v1085_v50  ;;  %v1650_v20 = vld [vmem:[%s2519_s1 + $0x30c] sm:$0xf]  ;;  %v1437_v21 = vld [vmem:[%s2519_s1 + $0x318] sm:$0xf0] }
  0x65   :  { %980 = vmatpush.bf16.msrb.mxu1 %v1296_v59  ;;  %949 = vmatmul.bf16.vlgmr.msra.gmra.mxu2 %v1967_v1  ;;  %v1216_v59 = vor.u32 %v1594_v51, %v1213_v53  ;;  %v1440_v25 = vor.u32 %v1650_v20, %v1437_v21 }
  0x66   :  { %993 = vmatpush.bf16.msrb.mxu2 %v1424_v60  ;;  %962 = vmatmul.bf16.vlgmr.msra.gmra.mxu3 %v1978_v6  ;;  %v1344_v60 = vor.u32 %v1626_v54, %v1341_v55 }
  0x67   :  { %1006 = vmatpush.bf16.msrb.mxu3 %v1552_v0  ;;  %v1472_v0 = vor.u32 %v1658_v56, %v1469_v57 }
  0x68   :  { %968 = vmatpush.bf16.msrb.mxu0 %v1152_v8  ;;  %v1072_v8 = vor.u32 %v1558_v61, %v1069_v62 }
  0x69   :  { %981 = vmatpush.bf16.msrb.mxu1 %v1280_v9  ;;  %v1200_v9 = vor.u32 %v1590_v63, %v1197_v2  ;;  %v151_v2 = vperm.slane %v147_v32, 2 }
  0x6a   :  { %994 = vmatpush.bf16.msrb.mxu2 %v1408_v10  ;;  %v1328_v10 = vor.u32 %v1622_v3, %v1325_v4  ;;  %v152_v4 = vperm.slane %v147_v32, 3 }
  0x6b   :  { %1007 = vmatpush.bf16.msrb.mxu3 %v1536_v16  ;;  %v1456_v16 = vor.u32 %v1654_v5, %v1453_v7 }
  0x6c   :  { %969 = vmatpush.bf16.msrb.mxu0 %v1136_v22  ;;  %v1056_v22 = vor.u32 %v1554_v11, %v1053_v12  ;;  %v1020_v11 = vld [vmem:[%s2522_s3 + $0x8] sm:$0xff] }
  0x6d   :  { %982 = vmatpush.bf16.msrb.mxu1 %v1264_v23  ;;  %v1184_v23 = vor.u32 %v1586_v13, %v1181_v17  ;;  %v1024_v20 = vunpack.c.h.bf16 %v1020_v11 }
  0x6e   :  { %995 = vmatpush.bf16.msrb.mxu2 %v1392_v24  ;;  %v1312_v24 = vor.u32 %v1618_v18, %v1309_v19 }
  0x6f   :  { %1008 = vmatpush.bf16.msrb.mxu3 %v1520_v28 }
  0x70   :  { %970 = vmatpush.bf16.msrb.mxu0 %v1120_v34  ;;  %v149_v34 = vperm.slane %v147_v32, 0 }
  0x71   :  { %983 = vmatpush.bf16.msrb.mxu1 %v1248_v35 }
  0x72   :  { %996 = vmatpush.bf16.msrb.mxu2 %v1376_v36 }
  0x73   :  { %1009 = vmatpush.bf16.msrb.mxu3 %v1504_v40 }
  0x74   :  { %971 = vmatpush.bf16.msrb.mxu0 %v1104_v46 }
  0x75   :  { %984 = vmatpush.bf16.msrb.mxu1 %v1232_v47 }
  0x76   :  { %997 = vmatpush.bf16.msrb.mxu2 %v1360_v48 }
  0x77   :  { %1010 = vmatpush.bf16.msrb.mxu3 %v1488_v52 }
  0x78   :  { %972 = vmatpush.bf16.msrb.mxu0 %v1088_v58 }
  0x79   :  { %985 = vmatpush.bf16.msrb.mxu1 %v1216_v59 }
  0x7a   :  { %998 = vmatpush.bf16.msrb.mxu2 %v1344_v60 }
  0x7b   :  { %1011 = vmatpush.bf16.msrb.mxu3 %v1472_v0 }
  0x7c   :  { %973 = vmatpush.bf16.msrb.mxu0 %v1072_v8 }
  0x7d   :  { %986 = vmatpush.bf16.msrb.mxu1 %v1200_v9 }
  0x7e   :  { %999 = vmatpush.bf16.msrb.mxu2 %v1328_v10 }
  0x7f   :  { %1012 = vmatpush.bf16.msrb.mxu3 %v1456_v16  ;;  %v1023_v16 = vunpack.c.l.bf16 %v1020_v11 }
  0x80   :  { %974 = vmatpush.bf16.msrb.mxu0 %v1056_v22 }
  0x81   :  { %987 = vmatpush.bf16.msrb.mxu1 %v1184_v23 }
  0x82   :  { %1000 = vmatpush.bf16.msrb.mxu2 %v1312_v24 }
  0x83   :  { %1013 = vmatpush.bf16.msrb.mxu3 %v1440_v25  ;;  %975 = vmatmul.bf16.vlgmr.msrb.gmra.mxu0 %v1990_v14 }
  0x84   :  { %988 = vmatmul.bf16.vlgmr.msrb.gmra.mxu1 %v1992_v15  ;;  %v150_v15 = vperm.slane %v147_v32, 1 }
  0x85   :  { %1001 = vmatmul.bf16.vlgmr.msrb.gmra.mxu2 %v1967_v1 }
  0x86   :  { %1014 = vmatmul.bf16.vlgmr.msrb.gmra.mxu3 %v1978_v6  ;;  %v1019_v6 = vld [vmem:[%s2522_s3] sm:$0xff] }
  0x87   :  { %v1021_v42 = vunpack.c.l.bf16 %v1019_v6  ;;  %v1022_v46 = vunpack.c.h.bf16 %v1019_v6 }
  0xa4   :  { %v820_v26 = vpop.f32.mrf.mxu0 }
  0xa5   :  { %v833_v27 = vpop.f32.mrf.mxu1  ;;  %v821_v14 = vadd.f32 %v820_v26, %v149_v34 }
  0xa7   :  { %v834_v36 = vadd.f32 %v833_v27, %v821_v14 }
  0xa8   :  { %v846_v28 = vpop.f32.mrf.mxu2 }
  0xa9   :  { %v859_v29 = vpop.f32.mrf.mxu3  ;;  %v847_v37 = vadd.f32 %v846_v28, %v834_v36 }
  0xab   :  { %v860_v41 = vadd.f32 %v859_v29, %v847_v37 }
  0xac   :  { %v822_v30 = vpop.f32.mrf.mxu0 }
  0xad   :  { %v835_v31 = vpop.f32.mrf.mxu1  ;;  %v1025_v47 = vadd.f32 %v1021_v42, %v860_v41 }
  0xaf   :  { %v1029_v52 = vmax.f32 %v1025_v47, 0.0 }
  0xb0   :  { %v848_v33 = vpop.f32.mrf.mxu2 }
  0xb1   :  { %v861_v35 = vpop.f32.mrf.mxu3 }
  0xc0   :  { %v872_v1 = vpop.f32.mrf.mxu0 }
  0xc1   :  { %v873_v38 = vadd.f32 %v872_v1, %v150_v15  ;;  %v885_v39 = vpop.f32.mrf.mxu1 }
  0xc3   :  { %v886_v40 = vadd.f32 %v885_v39, %v873_v38 }
  0xc8   :  { %v898_v43 = vpop.f32.mrf.mxu2  ;;  %v874_v49 = vpop.f32.mrf.mxu0 }
  0xc9   :  { %v899_v44 = vadd.f32 %v898_v43, %v886_v40  ;;  %v911_v45 = vpop.f32.mrf.mxu3  ;;  %v887_v50 = vpop.f32.mrf.mxu1 }
  0xcb   :  { %v912_v48 = vadd.f32 %v911_v45, %v899_v44 }
  0xcd   :  { %v1026_v51 = vadd.f32 %v1022_v46, %v912_v48 }
  0xcf   :  { %v1030_v53 = vmax.f32 %v1026_v51, 0.0 }
  0xd0   :  { %v900_v54 = vpop.f32.mrf.mxu2 }
  0xd1   :  { %v1033_v55 = vpack.c.bf16 %v1030_v53, %v1029_v52  ;;  %v913_v56 = vpop.f32.mrf.mxu3 }
  0xd3   :  { %1035 = vst [vmem:[%s2523_s4] sm:$0xff] %v1033_v55 }
  0xe0   :  { %v924_v57 = vpop.f32.mrf.mxu0 }
  0xe1   :  { %v937_v58 = vpop.f32.mrf.mxu1  ;;  %v925_v3 = vadd.f32 %v924_v57, %v151_v2 }
  0xe3   :  { %v938_v5 = vadd.f32 %v937_v58, %v925_v3 }
  0xe8   :  { %v950_v59 = vpop.f32.mrf.mxu2  ;;  %v926_v61 = vpop.f32.mrf.mxu0 }
  0xe9   :  { %v963_v60 = vpop.f32.mrf.mxu3  ;;  %v939_v62 = vpop.f32.mrf.mxu1  ;;  %v951_v10 = vadd.f32 %v950_v59, %v938_v5 }
  0xeb   :  { %v964_v13 = vadd.f32 %v963_v60, %v951_v10 }
  0xed   :  { %v1027_v23 = vadd.f32 %v1023_v16, %v964_v13 }
  0xef   :  { %v1031_v26 = vmax.f32 %v1027_v23, 0.0 }
  0xf0   :  { %v952_v63 = vpop.f32.mrf.mxu2 }
  0xf1   :  { %v965_v0 = vpop.f32.mrf.mxu3 }
 0x100   :  { %v976_v7 = vpop.f32.mrf.mxu0 }
 0x101   :  { %v977_v8 = vadd.f32 %v976_v7, %v152_v4  ;;  %v989_v9 = vpop.f32.mrf.mxu1 }
 0x103   :  { %v990_v12 = vadd.f32 %v989_v9, %v977_v8 }
 0x108   :  { %v1002_v17 = vpop.f32.mrf.mxu2  ;;  %v978_v21 = vpop.f32.mrf.mxu0 }
 0x109   :  { %v1003_v18 = vadd.f32 %v1002_v17, %v990_v12  ;;  %v1015_v19 = vpop.f32.mrf.mxu3  ;;  %v991_v22 = vpop.f32.mrf.mxu1 }
 0x10b   :  { %v1016_v24 = vadd.f32 %v1015_v19, %v1003_v18 }
 0x10d   :  { %v1028_v25 = vadd.f32 %v1024_v20, %v1016_v24 }
 0x10f   :  { %v1032_v27 = vmax.f32 %v1028_v25, 0.0 }
 0x110   :  { %v1004_v28 = vpop.f32.mrf.mxu2 }
 0x111   :  { %v1034_v29 = vpack.c.bf16 %v1032_v27, %v1031_v26  ;;  %v1017_v30 = vpop.f32.mrf.mxu3 }
 0x113   :  { %1036 = vst [vmem:[%s2523_s4 + $0x8] sm:$0xff] %v1034_v29 }

// kernel: l1block_forward.34
= control target key start
LH: loop header
LB: loop body
LE: loop exit
PB: predicated region body
PF: predicated region fallthrough
CT: control target
= control target key end

     0   :  { %s2867_s1 = inlined_call_operand.vmem [shape: bf16[512,512], index: 1, kind: input, shape index: {}]   ;;  %s2868_s0 = inlined_call_operand.vmem [shape: bf16[32,512], index: 0, kind: input, shape index: {}]   ;;  %s2869_s2 = inlined_call_operand.vmem [shape: f32[1,512], index: 2, kind: input, shape index: {}]   ;;  %s2870_s3 = inlined_call_operand.vmem [shape: bf16[32,512], index: 3, kind: input, shape index: {}]   ;;  %s2871_s4 = inlined_call_operand.vmem [shape: bf16[32,512], index: 4, kind: output, shape index: {}]  }
   0x1   :  { %v1369_v0 = vld [vmem:[%s2867_s1 + $0xe0] sm:$0xf]  ;;  %v1805_v1 = vld [vmem:[%s2867_s1 + $0xec] sm:$0xf0] }
   0x2   :  { %v1497_v2 = vld [vmem:[%s2867_s1 + $0x1e0] sm:$0xf]  ;;  %v1370_v3 = vor.u32 %v1805_v1, %v1369_v0  ;;  %v1837_v4 = vld [vmem:[%s2867_s1 + $0x1ec] sm:$0xf0] }
   0x3   :  { %v1625_v5 = vld [vmem:[%s2867_s1 + $0x2e0] sm:$0xf]  ;;  %v1869_v6 = vld [vmem:[%s2867_s1 + $0x2ec] sm:$0xf0]  ;;  %v1498_v7 = vor.u32 %v1837_v4, %v1497_v2 }
   0x4   :  { %v1626_v8 = vor.u32 %v1869_v6, %v1625_v5  ;;  %v1753_v9 = vld [vmem:[%s2867_s1 + $0x3e0] sm:$0xf]  ;;  %v1901_v10 = vld [vmem:[%s2867_s1 + $0x3ec] sm:$0xf0]  ;;  %843 = vmatpush.bf16.msra.mxu0 %v1370_v3 }
   0x5   :  { %v1353_v11 = vld [vmem:[%s2867_s1 + $0xc0] sm:$0xf]  ;;  %v1754_v12 = vor.u32 %v1901_v10, %v1753_v9  ;;  %v1801_v13 = vld [vmem:[%s2867_s1 + $0xcc] sm:$0xf0]  ;;  %862 = vmatpush.bf16.msra.mxu1 %v1498_v7 }
   0x6   :  { %v1481_v14 = vld [vmem:[%s2867_s1 + $0x1c0] sm:$0xf]  ;;  %v1833_v15 = vld [vmem:[%s2867_s1 + $0x1cc] sm:$0xf0]  ;;  %881 = vmatpush.bf16.msra.mxu2 %v1626_v8  ;;  %v1354_v16 = vor.u32 %v1801_v13, %v1353_v11 }
   0x7   :  { %v1482_v17 = vor.u32 %v1833_v15, %v1481_v14  ;;  %v1609_v18 = vld [vmem:[%s2867_s1 + $0x2c0] sm:$0xf]  ;;  %v1865_v19 = vld [vmem:[%s2867_s1 + $0x2cc] sm:$0xf0]  ;;  %900 = vmatpush.bf16.msra.mxu3 %v1754_v12 }
   0x8   :  { %v1737_v20 = vld [vmem:[%s2867_s1 + $0x3c0] sm:$0xf]  ;;  %v1610_v21 = vor.u32 %v1865_v19, %v1609_v18  ;;  %v1897_v22 = vld [vmem:[%s2867_s1 + $0x3cc] sm:$0xf0]  ;;  %844 = vmatpush.bf16.msra.mxu0 %v1354_v16 }
   0x9   :  { %v1337_v23 = vld [vmem:[%s2867_s1 + $0xa0] sm:$0xf]  ;;  %v1797_v24 = vld [vmem:[%s2867_s1 + $0xac] sm:$0xf0]  ;;  %v1738_v25 = vor.u32 %v1897_v22, %v1737_v20  ;;  %863 = vmatpush.bf16.msra.mxu1 %v1482_v17 }
   0xa   :  { %v1465_v26 = vld [vmem:[%s2867_s1 + $0x1a0] sm:$0xf]  ;;  %v1829_v27 = vld [vmem:[%s2867_s1 + $0x1ac] sm:$0xf0]  ;;  %v1338_v29 = vor.u32 %v1797_v24, %v1337_v23  ;;  %882 = vmatpush.bf16.msra.mxu2 %v1610_v21 }
   0xb   :  { %v1593_v28 = vld [vmem:[%s2867_s1 + $0x2a0] sm:$0xf]  ;;  %v1861_v30 = vld [vmem:[%s2867_s1 + $0x2ac] sm:$0xf0]  ;;  %v1466_v33 = vor.u32 %v1829_v27, %v1465_v26  ;;  %901 = vmatpush.bf16.msra.mxu3 %v1738_v25 }
   0xc   :  { %v1721_v31 = vld [vmem:[%s2867_s1 + $0x3a0] sm:$0xf]  ;;  %v1893_v32 = vld [vmem:[%s2867_s1 + $0x3ac] sm:$0xf0]  ;;  %v1594_v34 = vor.u32 %v1861_v30, %v1593_v28  ;;  %845 = vmatpush.bf16.msra.mxu0 %v1338_v29  ;;  %v1767_v30 = vld [vmem:[%s2868_s0 + $0x4] sm:$0xf] }
   0xd   :  { %v1321_v35 = vld [vmem:[%s2867_s1 + $0x80] sm:$0xf]  ;;  %v1793_v36 = vld [vmem:[%s2867_s1 + $0x8c] sm:$0xf0]  ;;  %v1722_v38 = vor.u32 %v1893_v32, %v1721_v31  ;;  %864 = vmatpush.bf16.msra.mxu1 %v1466_v33  ;;  %v1227_v31 = vld [vmem:[%s2868_s0 + $0x10] sm:$0xf0] }
   0xe   :  { %v1449_v37 = vld [vmem:[%s2867_s1 + $0x180] sm:$0xf]  ;;  %v1825_v39 = vld [vmem:[%s2867_s1 + $0x18c] sm:$0xf0]  ;;  %v1322_v44 = vor.u32 %v1793_v36, %v1321_v35  ;;  %883 = vmatpush.bf16.msra.mxu2 %v1594_v34  ;;  %v1867_v32 = vld [vmem:[%s2867_s1 + $0x2e4] sm:$0xf] }
   0xf   :  { %v1577_v40 = vld [vmem:[%s2867_s1 + $0x280] sm:$0xf]  ;;  %v1857_v41 = vld [vmem:[%s2867_s1 + $0x28c] sm:$0xf0]  ;;  %v1450_v45 = vor.u32 %v1825_v39, %v1449_v37  ;;  %902 = vmatpush.bf16.msra.mxu3 %v1722_v38  ;;  %v1627_v33 = vld [vmem:[%s2867_s1 + $0x2f0] sm:$0xf0] }
  0x10   :  { %v1705_v42 = vld [vmem:[%s2867_s1 + $0x380] sm:$0xf]  ;;  %v1889_v43 = vld [vmem:[%s2867_s1 + $0x38c] sm:$0xf0]  ;;  %v1578_v46 = vor.u32 %v1857_v41, %v1577_v40  ;;  %846 = vmatpush.bf16.msra.mxu0 %v1322_v44  ;;  %v1233_v35 = vld [vmem:[%s2868_s0 + $0x8] sm:$0xf]  ;;  %v1630_v44 = vor.u32 %v1867_v32, %v1627_v33 }
  0x11   :  { %v1305_v47 = vld [vmem:[%s2867_s1 + $0x60] sm:$0xf]  ;;  %v1789_v48 = vld [vmem:[%s2867_s1 + $0x6c] sm:$0xf0]  ;;  %v1706_v50 = vor.u32 %v1889_v43, %v1705_v42  ;;  %865 = vmatpush.bf16.msra.mxu1 %v1450_v45  ;;  %v1835_v36 = vld [vmem:[%s2867_s1 + $0x1e4] sm:$0xf] }
  0x12   :  { %v1433_v49 = vld [vmem:[%s2867_s1 + $0x160] sm:$0xf]  ;;  %v1821_v51 = vld [vmem:[%s2867_s1 + $0x16c] sm:$0xf0]  ;;  %v1306_v56 = vor.u32 %v1789_v48, %v1305_v47  ;;  %884 = vmatpush.bf16.msra.mxu2 %v1578_v46  ;;  %v1499_v37 = vld [vmem:[%s2867_s1 + $0x1f0] sm:$0xf0] }
  0x13   :  { %v1561_v52 = vld [vmem:[%s2867_s1 + $0x260] sm:$0xf]  ;;  %v1853_v53 = vld [vmem:[%s2867_s1 + $0x26c] sm:$0xf0]  ;;  %v1434_v57 = vor.u32 %v1821_v51, %v1433_v49  ;;  %903 = vmatpush.bf16.msra.mxu3 %v1706_v50  ;;  %v1770_v40 = vld [vmem:[%s2868_s0 + $0x14] sm:$0xf0]  ;;  %v1502_v49 = vor.u32 %v1835_v36, %v1499_v37 }
  0x14   :  { %v1689_v54 = vld [vmem:[%s2867_s1 + $0x360] sm:$0xf]  ;;  %v1885_v55 = vld [vmem:[%s2867_s1 + $0x36c] sm:$0xf0]  ;;  %v1562_v58 = vor.u32 %v1853_v53, %v1561_v52  ;;  %847 = vmatpush.bf16.msra.mxu0 %v1306_v56  ;;  %v1768_v41 = vld [vmem:[%s2868_s0 + $0xc] sm:$0xf]  ;;  %v2176_v53 = vor.u32 %v1767_v30, %v1227_v31 }
  0x15   :  { %v1289_v59 = vld [vmem:[%s2867_s1 + $0x40] sm:$0xf]  ;;  %v1785_v60 = vld [vmem:[%s2867_s1 + $0x4c] sm:$0xf0]  ;;  %v1690_v62 = vor.u32 %v1885_v55, %v1689_v54  ;;  %866 = vmatpush.bf16.msra.mxu1 %v1434_v57  ;;  %v1235_v42 = vld [vmem:[%s2868_s0 + $0x18] sm:$0xf0]  ;;  %v2178_v54 = vor.u32 %v1770_v40, %v1233_v35 }
  0x16   :  { %v1417_v61 = vld [vmem:[%s2867_s1 + $0x140] sm:$0xf]  ;;  %v1817_v63 = vld [vmem:[%s2867_s1 + $0x14c] sm:$0xf0]  ;;  %v1290_v4 = vor.u32 %v1785_v60, %v1289_v59  ;;  %885 = vmatpush.bf16.msra.mxu2 %v1562_v58  ;;  %v1803_v45 = vld [vmem:[%s2867_s1 + $0xe4] sm:$0xf]  ;;  %v2186_v57 = vor.u32 %v1768_v41, %v1235_v42 }
  0x17   :  { %v1545_v0 = vld [vmem:[%s2867_s1 + $0x240] sm:$0xf]  ;;  %v1849_v1 = vld [vmem:[%s2867_s1 + $0x24c] sm:$0xf0]  ;;  %v1418_v5 = vor.u32 %v1817_v63, %v1417_v61  ;;  %904 = vmatpush.bf16.msra.mxu3 %v1690_v62  ;;  %v1371_v46 = vld [vmem:[%s2867_s1 + $0xf0] sm:$0xf0] }
  0x18   :  { %v1673_v2 = vld [vmem:[%s2867_s1 + $0x340] sm:$0xf]  ;;  %v1881_v3 = vld [vmem:[%s2867_s1 + $0x34c] sm:$0xf0]  ;;  %v1546_v6 = vor.u32 %v1849_v1, %v1545_v0  ;;  %848 = vmatpush.bf16.msra.mxu0 %v1290_v4  ;;  %v1899_v47 = vld [vmem:[%s2867_s1 + $0x3e4] sm:$0xf]  ;;  %v1374_v58 = vor.u32 %v1803_v45, %v1371_v46 }
  0x19   :  { %v1273_v7 = vld [vmem:[%s2867_s1 + $0x20] sm:$0xf]  ;;  %v1781_v8 = vld [vmem:[%s2867_s1 + $0x2c] sm:$0xf0]  ;;  %v1674_v10 = vor.u32 %v1881_v3, %v1673_v2  ;;  %867 = vmatpush.bf16.msra.mxu1 %v1418_v5  ;;  %v1755_v50 = vld [vmem:[%s2867_s1 + $0x3f0] sm:$0xf0] }
  0x1a   :  { %v1401_v9 = vld [vmem:[%s2867_s1 + $0x120] sm:$0xf]  ;;  %v1813_v11 = vld [vmem:[%s2867_s1 + $0x12c] sm:$0xf0]  ;;  %v1274_v17 = vor.u32 %v1781_v8, %v1273_v7  ;;  %886 = vmatpush.bf16.msra.mxu2 %v1546_v6  ;;  %v1863_v51 = vld [vmem:[%s2867_s1 + $0x2c4] sm:$0xf]  ;;  %v1758_v59 = vor.u32 %v1899_v47, %v1755_v50 }
  0x1b   :  { %v1529_v12 = vld [vmem:[%s2867_s1 + $0x220] sm:$0xf]  ;;  %v1845_v13 = vld [vmem:[%s2867_s1 + $0x22c] sm:$0xf0]  ;;  %v1402_v21 = vor.u32 %v1813_v11, %v1401_v9  ;;  %905 = vmatpush.bf16.msra.mxu3 %v1674_v10  ;;  %v1611_v52 = vld [vmem:[%s2867_s1 + $0x2d0] sm:$0xf0] }
  0x1c   :  { %v1657_v14 = vld [vmem:[%s2867_s1 + $0x320] sm:$0xf]  ;;  %v1877_v15 = vld [vmem:[%s2867_s1 + $0x32c] sm:$0xf0]  ;;  %v1530_v22 = vor.u32 %v1845_v13, %v1529_v12  ;;  %849 = vmatpush.bf16.msra.mxu0 %v1274_v17  ;;  %v1831_v55 = vld [vmem:[%s2867_s1 + $0x1c4] sm:$0xf]  ;;  %v1614_v60 = vor.u32 %v1863_v51, %v1611_v52 }
  0x1d   :  { %v1257_v16 = vld [vmem:[%s2867_s1] sm:$0xf]  ;;  %v1777_v18 = vld [vmem:[%s2867_s1 + $0xc] sm:$0xf0]  ;;  %v1658_v26 = vor.u32 %v1877_v15, %v1657_v14  ;;  %868 = vmatpush.bf16.msra.mxu1 %v1402_v21  ;;  %v1483_v56 = vld [vmem:[%s2867_s1 + $0x1d0] sm:$0xf0] }
  0x1e   :  { %v1385_v19 = vld [vmem:[%s2867_s1 + $0x100] sm:$0xf]  ;;  %v1809_v20 = vld [vmem:[%s2867_s1 + $0x10c] sm:$0xf0]  ;;  %v1258_v34 = vor.u32 %v1777_v18, %v1257_v16  ;;  %887 = vmatpush.bf16.msra.mxu2 %v1530_v22  ;;  %v1799_v61 = vld [vmem:[%s2867_s1 + $0xc4] sm:$0xf]  ;;  %v1486_v0 = vor.u32 %v1831_v55, %v1483_v56 }
  0x1f   :  { %v1513_v23 = vld [vmem:[%s2867_s1 + $0x200] sm:$0xf]  ;;  %v1841_v24 = vld [vmem:[%s2867_s1 + $0x20c] sm:$0xf0]  ;;  %v1386_v38 = vor.u32 %v1809_v20, %v1385_v19  ;;  %906 = vmatpush.bf16.msra.mxu3 %v1658_v26  ;;  %v1355_v62 = vld [vmem:[%s2867_s1 + $0xd0] sm:$0xf0] }
  0x20   :  { %v1641_v25 = vld [vmem:[%s2867_s1 + $0x300] sm:$0xf]  ;;  %v1873_v27 = vld [vmem:[%s2867_s1 + $0x30c] sm:$0xf0]  ;;  %v1514_v39 = vor.u32 %v1841_v24, %v1513_v23  ;;  %850 = vmatpush.bf16.msra.mxu0 %v1258_v34  ;;  %v1895_v63 = vld [vmem:[%s2867_s1 + $0x3c4] sm:$0xf]  ;;  %v1358_v6 = vor.u32 %v1799_v61, %v1355_v62 }
  0x21   :  { %v1225_v28 = vld [vmem:[%s2868_s0] sm:$0xf]  ;;  %v1769_v29 = vld [vmem:[%s2868_s0 + $0xc] sm:$0xf0]  ;;  %v1642_v43 = vor.u32 %v1873_v27, %v1641_v25  ;;  %869 = vmatpush.bf16.msra.mxu1 %v1386_v38  ;;  %v1739_v1 = vld [vmem:[%s2867_s1 + $0x3d0] sm:$0xf0] }
  0x22   :  { %v2165_v48 = vor.u32 %v1769_v29, %v1225_v28  ;;  %888 = vmatpush.bf16.msra.mxu2 %v1514_v39  ;;  %v1859_v2 = vld [vmem:[%s2867_s1 + $0x2a4] sm:$0xf]  ;;  %v1595_v3 = vld [vmem:[%s2867_s1 + $0x2b0] sm:$0xf0]  ;;  %v1742_v7 = vor.u32 %v1895_v63, %v1739_v1  ;;  %v1241_v25 = vld [vmem:[%s2868_s0 + $0x20] sm:$0xf] }
  0x23   :  { %907 = vmatpush.bf16.msra.mxu3 %v1642_v43  ;;  %v1827_v4 = vld [vmem:[%s2867_s1 + $0x1a4] sm:$0xf]  ;;  %v1467_v5 = vld [vmem:[%s2867_s1 + $0x1b0] sm:$0xf0]  ;;  %v1598_v8 = vor.u32 %v1859_v2, %v1595_v3  ;;  %v1773_v26 = vld [vmem:[%s2868_s0 + $0x2c] sm:$0xf0] }
  0x24   :  { %851 = vmatmul.bf16.vlgmr.msra.gmra.mxu0 %v2165_v48  ;;  %870 = vmatmul.bf16.vlgmr.msra.gmra.mxu1 %v2176_v53  ;;  %v1795_v9 = vld [vmem:[%s2867_s1 + $0xa4] sm:$0xf]  ;;  %v1339_v10 = vld [vmem:[%s2867_s1 + $0xb0] sm:$0xf0]  ;;  %v1470_v12 = vor.u32 %v1827_v4, %v1467_v5  ;;  %v1249_v32 = vld [vmem:[%s2868_s0 + $0x28] sm:$0xf] }
  0x25   :  { %938 = vmatpush.bf16.msrb.mxu1 %v1502_v49  ;;  %889 = vmatmul.bf16.vlgmr.msra.gmra.mxu2 %v2178_v54  ;;  %v1891_v11 = vld [vmem:[%s2867_s1 + $0x3a4] sm:$0xf]  ;;  %v1723_v13 = vld [vmem:[%s2867_s1 + $0x3b0] sm:$0xf0]  ;;  %v1342_v18 = vor.u32 %v1795_v9, %v1339_v10  ;;  %v1774_v36 = vld [vmem:[%s2868_s0 + $0x34] sm:$0xf0] }
  0x26   :  { %957 = vmatpush.bf16.msrb.mxu2 %v1630_v44  ;;  %908 = vmatmul.bf16.vlgmr.msra.gmra.mxu3 %v2186_v57  ;;  %v1855_v14 = vld [vmem:[%s2867_s1 + $0x284] sm:$0xf]  ;;  %v1579_v15 = vld [vmem:[%s2867_s1 + $0x290] sm:$0xf0]  ;;  %v1726_v22 = vor.u32 %v1891_v11, %v1723_v13  ;;  %v1772_v37 = vld [vmem:[%s2868_s0 + $0x2c] sm:$0xf]  ;;  %v2297_v44 = vor.u32 %v1773_v26, %v1241_v25  ;;  %v2310_v51 = vor.u32 %v1774_v36, %v1249_v32 }
  0x27   :  { %919 = vmatpush.bf16.msrb.mxu0 %v1374_v58  ;;  %976 = vmatpush.bf16.msrb.mxu3 %v1758_v59  ;;  %v1823_v16 = vld [vmem:[%s2867_s1 + $0x184] sm:$0xf]  ;;  %v1451_v17 = vld [vmem:[%s2867_s1 + $0x190] sm:$0xf0]  ;;  %v1582_v23 = vor.u32 %v1855_v14, %v1579_v15  ;;  %v1251_v38 = vld [vmem:[%s2868_s0 + $0x38] sm:$0xf0] }
  0x28   :  { %v1791_v19 = vld [vmem:[%s2867_s1 + $0x84] sm:$0xf]  ;;  %v1323_v20 = vld [vmem:[%s2867_s1 + $0x90] sm:$0xf0]  ;;  %v1454_v27 = vor.u32 %v1823_v16, %v1451_v17  ;;  %v2318_v56 = vor.u32 %v1772_v37, %v1251_v38  ;;  %v1806_v32 = vld [vmem:[%s2867_s1 + $0xf4] sm:$0xf0] }
  0x29   :  { %939 = vmatpush.bf16.msrb.mxu1 %v1486_v0  ;;  %v1887_v21 = vld [vmem:[%s2867_s1 + $0x384] sm:$0xf]  ;;  %v1707_v24 = vld [vmem:[%s2867_s1 + $0x390] sm:$0xf0]  ;;  %v1326_v35 = vor.u32 %v1791_v19, %v1323_v20  ;;  %v1870_v19 = vld [vmem:[%s2867_s1 + $0x2f4] sm:$0xf0] }
  0x2a   :  { %958 = vmatpush.bf16.msrb.mxu2 %v1614_v60  ;;  %v1771_v28 = vld [vmem:[%s2868_s0 + $0x24] sm:$0xf]  ;;  %v1243_v29 = vld [vmem:[%s2868_s0 + $0x30] sm:$0xf0]  ;;  %v1710_v39 = vor.u32 %v1887_v21, %v1707_v24  ;;  %v1617_v36 = vld [vmem:[%s2867_s1 + $0x2c8] sm:$0xf] }
  0x2b   :  { %920 = vmatpush.bf16.msrb.mxu0 %v1358_v6  ;;  %977 = vmatpush.bf16.msrb.mxu3 %v1742_v7  ;;  %v1851_v30 = vld [vmem:[%s2867_s1 + $0x264] sm:$0xf]  ;;  %v1563_v31 = vld [vmem:[%s2867_s1 + $0x270] sm:$0xf0]  ;;  %v2308_v50 = vor.u32 %v1771_v28, %v1243_v29  ;;  %v1866_v37 = vld [vmem:[%s2867_s1 + $0x2d4] sm:$0xf0] }
  0x2c   :  { %v1819_v33 = vld [vmem:[%s2867_s1 + $0x164] sm:$0xf]  ;;  %v1435_v34 = vld [vmem:[%s2867_s1 + $0x170] sm:$0xf0]  ;;  %v1566_v40 = vor.u32 %v1851_v30, %v1563_v31  ;;  %v1377_v31 = vld [vmem:[%s2867_s1 + $0xe8] sm:$0xf] }
  0x2d   :  { %940 = vmatpush.bf16.msrb.mxu1 %v1470_v12  ;;  %v1787_v41 = vld [vmem:[%s2867_s1 + $0x64] sm:$0xf]  ;;  %v1307_v42 = vld [vmem:[%s2867_s1 + $0x70] sm:$0xf0]  ;;  %v1438_v45 = vor.u32 %v1819_v33, %v1435_v34  ;;  %v1761_v33 = vld [vmem:[%s2867_s1 + $0x3e8] sm:$0xf] }
  0x2e   :  { %959 = vmatpush.bf16.msrb.mxu2 %v1598_v8  ;;  %v1883_v43 = vld [vmem:[%s2867_s1 + $0x364] sm:$0xf]  ;;  %v1691_v46 = vld [vmem:[%s2867_s1 + $0x370] sm:$0xf0]  ;;  %v1310_v58 = vor.u32 %v1787_v41, %v1307_v42  ;;  %v1361_v41 = vld [vmem:[%s2867_s1 + $0xc8] sm:$0xf] }
  0x2f   :  { %921 = vmatpush.bf16.msrb.mxu0 %v1342_v18  ;;  %978 = vmatpush.bf16.msrb.mxu3 %v1726_v22  ;;  %v1847_v47 = vld [vmem:[%s2867_s1 + $0x244] sm:$0xf]  ;;  %v1547_v49 = vld [vmem:[%s2867_s1 + $0x250] sm:$0xf0]  ;;  %v1694_v59 = vor.u32 %v1883_v43, %v1691_v46  ;;  %v1633_v18 = vld [vmem:[%s2867_s1 + $0x2e8] sm:$0xf] }
  0x30   :  { %v1815_v52 = vld [vmem:[%s2867_s1 + $0x144] sm:$0xf]  ;;  %v1419_v55 = vld [vmem:[%s2867_s1 + $0x150] sm:$0xf0]  ;;  %v1550_v60 = vor.u32 %v1847_v47, %v1547_v49  ;;  %v1505_v22 = vld [vmem:[%s2867_s1 + $0x1e8] sm:$0xf]  ;;  %v1634_v30 = vor.u32 %v1870_v19, %v1633_v18 }
  0x31   :  { %941 = vmatpush.bf16.msrb.mxu1 %v1454_v27  ;;  %v1783_v61 = vld [vmem:[%s2867_s1 + $0x44] sm:$0xf]  ;;  %v1291_v62 = vld [vmem:[%s2867_s1 + $0x50] sm:$0xf0]  ;;  %v1422_v0 = vor.u32 %v1815_v52, %v1419_v55  ;;  %v1802_v42 = vld [vmem:[%s2867_s1 + $0xd4] sm:$0xf0] }
  0x32   :  { %960 = vmatpush.bf16.msrb.mxu2 %v1582_v23  ;;  %v1879_v63 = vld [vmem:[%s2867_s1 + $0x344] sm:$0xf]  ;;  %v1675_v1 = vld [vmem:[%s2867_s1 + $0x350] sm:$0xf0]  ;;  %v1294_v6 = vor.u32 %v1783_v61, %v1291_v62  ;;  %v1838_v23 = vld [vmem:[%s2867_s1 + $0x1f4] sm:$0xf0] }
  0x33   :  { %922 = vmatpush.bf16.msrb.mxu0 %v1326_v35  ;;  %979 = vmatpush.bf16.msrb.mxu3 %v1710_v39  ;;  %v1843_v2 = vld [vmem:[%s2867_s1 + $0x224] sm:$0xf]  ;;  %v1531_v3 = vld [vmem:[%s2867_s1 + $0x230] sm:$0xf0]  ;;  %v1678_v8 = vor.u32 %v1879_v63, %v1675_v1  ;;  %v1506_v34 = vor.u32 %v1838_v23, %v1505_v22  ;;  %v1902_v35 = vld [vmem:[%s2867_s1 + $0x3f4] sm:$0xf0] }
  0x34   :  { %856 = vmatmul.bf16.gmra.mxu0 %v2297_v44  ;;  %875 = vmatmul.bf16.gmra.mxu1 %v2308_v50  ;;  %v1811_v4 = vld [vmem:[%s2867_s1 + $0x124] sm:$0xf]  ;;  %v1403_v5 = vld [vmem:[%s2867_s1 + $0x130] sm:$0xf0]  ;;  %v1534_v9 = vor.u32 %v1843_v2, %v1531_v3  ;;  %v1762_v43 = vor.u32 %v1902_v35, %v1761_v33  ;;  %v1489_v46 = vld [vmem:[%s2867_s1 + $0x1c8] sm:$0xf] }
  0x35   :  { %942 = vmatpush.bf16.msrb.mxu1 %v1438_v45  ;;  %894 = vmatmul.bf16.gmra.mxu2 %v2310_v51  ;;  %v1779_v7 = vld [vmem:[%s2867_s1 + $0x24] sm:$0xf]  ;;  %v1275_v10 = vld [vmem:[%s2867_s1 + $0x30] sm:$0xf0]  ;;  %v1406_v13 = vor.u32 %v1811_v4, %v1403_v5  ;;  %v1618_v45 = vor.u32 %v1866_v37, %v1617_v36  ;;  %v1834_v47 = vld [vmem:[%s2867_s1 + $0x1d4] sm:$0xf0] }
  0x36   :  { %961 = vmatpush.bf16.msrb.mxu2 %v1566_v40  ;;  %913 = vmatmul.bf16.gmra.mxu3 %v2318_v56  ;;  %v1875_v11 = vld [vmem:[%s2867_s1 + $0x324] sm:$0xf]  ;;  %v1659_v12 = vld [vmem:[%s2867_s1 + $0x330] sm:$0xf0]  ;;  %v1278_v20 = vor.u32 %v1779_v7, %v1275_v10  ;;  %v1378_v40 = vor.u32 %v1806_v32, %v1377_v31  ;;  %v1745_v49 = vld [vmem:[%s2867_s1 + $0x3c8] sm:$0xf] }
  0x37   :  { %923 = vmatpush.bf16.msrb.mxu0 %v1310_v58  ;;  %980 = vmatpush.bf16.msrb.mxu3 %v1694_v59  ;;  %v1839_v14 = vld [vmem:[%s2867_s1 + $0x204] sm:$0xf]  ;;  %v1515_v15 = vld [vmem:[%s2867_s1 + $0x210] sm:$0xf0]  ;;  %v1662_v24 = vor.u32 %v1875_v11, %v1659_v12  ;;  %v1898_v52 = vld [vmem:[%s2867_s1 + $0x3d4] sm:$0xf0]  ;;  %v1362_v59 = vor.u32 %v1802_v42, %v1361_v41 }
  0x38   :  { %v1807_v16 = vld [vmem:[%s2867_s1 + $0x104] sm:$0xf]  ;;  %v1387_v17 = vld [vmem:[%s2867_s1 + $0x110] sm:$0xf0]  ;;  %v1518_v25 = vor.u32 %v1839_v14, %v1515_v15  ;;  %v1601_v55 = vld [vmem:[%s2867_s1 + $0x2a8] sm:$0xf]  ;;  %v1746_v63 = vor.u32 %v1898_v52, %v1745_v49 }
  0x39   :  { %943 = vmatpush.bf16.msrb.mxu1 %v1422_v0  ;;  %v1775_v21 = vld [vmem:[%s2867_s1 + $0x4] sm:$0xf]  ;;  %v1259_v26 = vld [vmem:[%s2867_s1 + $0x10] sm:$0xf0]  ;;  %v1390_v29 = vor.u32 %v1807_v16, %v1387_v17  ;;  %v1862_v58 = vld [vmem:[%s2867_s1 + $0x2b4] sm:$0xf0] }
  0x3a   :  { %962 = vmatpush.bf16.msrb.mxu2 %v1550_v60  ;;  %v1871_v27 = vld [vmem:[%s2867_s1 + $0x304] sm:$0xf]  ;;  %v1643_v28 = vld [vmem:[%s2867_s1 + $0x310] sm:$0xf0]  ;;  %v1262_v38 = vor.u32 %v1775_v21, %v1259_v26  ;;  %v1490_v60 = vor.u32 %v1834_v47, %v1489_v46  ;;  %v1345_v61 = vld [vmem:[%s2867_s1 + $0xa8] sm:$0xf]  ;;  %v1602_v0 = vor.u32 %v1862_v58, %v1601_v55 }
  0x3b   :  { %924 = vmatpush.bf16.msrb.mxu0 %v1294_v6  ;;  %981 = vmatpush.bf16.msrb.mxu3 %v1678_v8  ;;  %v1646_v39 = vor.u32 %v1871_v27, %v1643_v28  ;;  %v1798_v62 = vld [vmem:[%s2867_s1 + $0xb4] sm:$0xf0]  ;;  %v1473_v1 = vld [vmem:[%s2867_s1 + $0x1a8] sm:$0xf] }
  0x3c   :  { %v1830_v2 = vld [vmem:[%s2867_s1 + $0x1b4] sm:$0xf0]  ;;  %v1729_v3 = vld [vmem:[%s2867_s1 + $0x3a8] sm:$0xf]  ;;  %v1346_v7 = vor.u32 %v1798_v62, %v1345_v61 }
  0x3d   :  { %944 = vmatpush.bf16.msrb.mxu1 %v1406_v13  ;;  %v1894_v4 = vld [vmem:[%s2867_s1 + $0x3b4] sm:$0xf0]  ;;  %v1585_v5 = vld [vmem:[%s2867_s1 + $0x288] sm:$0xf]  ;;  %v1474_v8 = vor.u32 %v1830_v2, %v1473_v1 }
  0x3e   :  { %963 = vmatpush.bf16.msrb.mxu2 %v1534_v9  ;;  %v1858_v6 = vld [vmem:[%s2867_s1 + $0x294] sm:$0xf0]  ;;  %v1329_v9 = vld [vmem:[%s2867_s1 + $0x88] sm:$0xf]  ;;  %v1730_v11 = vor.u32 %v1894_v4, %v1729_v3 }
  0x3f   :  { %925 = vmatpush.bf16.msrb.mxu0 %v1278_v20  ;;  %982 = vmatpush.bf16.msrb.mxu3 %v1662_v24  ;;  %v1794_v10 = vld [vmem:[%s2867_s1 + $0x94] sm:$0xf0]  ;;  %v1586_v12 = vor.u32 %v1858_v6, %v1585_v5  ;;  %v1457_v13 = vld [vmem:[%s2867_s1 + $0x188] sm:$0xf] }
  0x40   :  { %v1826_v14 = vld [vmem:[%s2867_s1 + $0x194] sm:$0xf0]  ;;  %v1713_v15 = vld [vmem:[%s2867_s1 + $0x388] sm:$0xf]  ;;  %v1330_v19 = vor.u32 %v1794_v10, %v1329_v9 }
  0x41   :  { %945 = vmatpush.bf16.msrb.mxu1 %v1390_v29  ;;  %v1890_v16 = vld [vmem:[%s2867_s1 + $0x394] sm:$0xf0]  ;;  %v1569_v17 = vld [vmem:[%s2867_s1 + $0x268] sm:$0xf]  ;;  %v1458_v20 = vor.u32 %v1826_v14, %v1457_v13  ;;  %v1379_v13 = vld [vmem:[%s2867_s1 + $0xf8] sm:$0xf0] }
  0x42   :  { %964 = vmatpush.bf16.msrb.mxu2 %v1518_v25  ;;  %v1854_v18 = vld [vmem:[%s2867_s1 + $0x274] sm:$0xf0]  ;;  %v1313_v21 = vld [vmem:[%s2867_s1 + $0x68] sm:$0xf]  ;;  %v1714_v23 = vor.u32 %v1890_v16, %v1713_v15  ;;  %v1836_v14 = vld [vmem:[%s2867_s1 + $0x1ec] sm:$0xf] }
  0x43   :  { %926 = vmatpush.bf16.msrb.mxu0 %v1262_v38  ;;  %983 = vmatpush.bf16.msrb.mxu3 %v1646_v39  ;;  %v1790_v22 = vld [vmem:[%s2867_s1 + $0x74] sm:$0xf0]  ;;  %v1570_v24 = vor.u32 %v1854_v18, %v1569_v17  ;;  %v1441_v25 = vld [vmem:[%s2867_s1 + $0x168] sm:$0xf]  ;;  %v1507_v15 = vld [vmem:[%s2867_s1 + $0x1f8] sm:$0xf0] }
  0x44   :  { %946 = vmatmul.bf16.vlgmr.msrb.gmra.mxu1 %v2176_v53  ;;  %v1822_v26 = vld [vmem:[%s2867_s1 + $0x174] sm:$0xf0]  ;;  %v1697_v27 = vld [vmem:[%s2867_s1 + $0x368] sm:$0xf]  ;;  %v1314_v31 = vor.u32 %v1790_v22, %v1313_v21  ;;  %v1900_v16 = vld [vmem:[%s2867_s1 + $0x3ec] sm:$0xf] }
  0x45   :  { %1014 = vmatpush.bf16.msra.mxu1 %v1506_v34  ;;  %965 = vmatmul.bf16.vlgmr.msrb.gmra.mxu2 %v2178_v54  ;;  %v1886_v28 = vld [vmem:[%s2867_s1 + $0x374] sm:$0xf0]  ;;  %v1553_v29 = vld [vmem:[%s2867_s1 + $0x248] sm:$0xf]  ;;  %v1442_v32 = vor.u32 %v1822_v26, %v1441_v25  ;;  %v1763_v17 = vld [vmem:[%s2867_s1 + $0x3f8] sm:$0xf0] }
  0x46   :  { %1033 = vmatpush.bf16.msra.mxu2 %v1634_v30  ;;  %927 = vmatmul.bf16.vlgmr.msrb.gmra.mxu0 %v2165_v48  ;;  %v1850_v30 = vld [vmem:[%s2867_s1 + $0x254] sm:$0xf0]  ;;  %v1297_v33 = vld [vmem:[%s2867_s1 + $0x48] sm:$0xf]  ;;  %v1698_v35 = vor.u32 %v1886_v28, %v1697_v27  ;;  %v1619_v21 = vld [vmem:[%s2867_s1 + $0x2d8] sm:$0xf0]  ;;  %v1766_v25 = vor.u32 %v1900_v16, %v1763_v17 }
  0x47   :  { %995 = vmatpush.bf16.msra.mxu0 %v1378_v40  ;;  %1052 = vmatpush.bf16.msra.mxu3 %v1762_v43  ;;  %v1786_v34 = vld [vmem:[%s2867_s1 + $0x54] sm:$0xf0]  ;;  %v1554_v36 = vor.u32 %v1850_v30, %v1553_v29  ;;  %v1425_v37 = vld [vmem:[%s2867_s1 + $0x148] sm:$0xf]  ;;  %v1800_v26 = vld [vmem:[%s2867_s1 + $0xcc] sm:$0xf] }
  0x48   :  { %984 = vmatmul.bf16.vlgmr.msrb.gmra.mxu3 %v2186_v57  ;;  %v1818_v38 = vld [vmem:[%s2867_s1 + $0x154] sm:$0xf0]  ;;  %v1681_v39 = vld [vmem:[%s2867_s1 + $0x348] sm:$0xf]  ;;  %v1298_v43 = vor.u32 %v1786_v34, %v1297_v33  ;;  %v1363_v27 = vld [vmem:[%s2867_s1 + $0xd8] sm:$0xf0] }
  0x49   :  { %1015 = vmatpush.bf16.msra.mxu1 %v1490_v60  ;;  %v1882_v40 = vld [vmem:[%s2867_s1 + $0x354] sm:$0xf0]  ;;  %v1537_v41 = vld [vmem:[%s2867_s1 + $0x228] sm:$0xf]  ;;  %v1832_v29 = vld [vmem:[%s2867_s1 + $0x1cc] sm:$0xf] }
  0x4a   :  { %1034 = vmatpush.bf16.msra.mxu2 %v1618_v45  ;;  %v1846_v42 = vld [vmem:[%s2867_s1 + $0x234] sm:$0xf0]  ;;  %v1426_v45 = vor.u32 %v1818_v38, %v1425_v37  ;;  %v1281_v46 = vld [vmem:[%s2867_s1 + $0x28] sm:$0xf]  ;;  %v1682_v49 = vor.u32 %v1882_v40, %v1681_v39  ;;  %v1491_v30 = vld [vmem:[%s2867_s1 + $0x1d8] sm:$0xf0] }
  0x4b   :  { %996 = vmatpush.bf16.msra.mxu0 %v1362_v59  ;;  %1053 = vmatpush.bf16.msra.mxu3 %v1746_v63  ;;  %v1782_v47 = vld [vmem:[%s2867_s1 + $0x34] sm:$0xf0]  ;;  %v1538_v52 = vor.u32 %v1846_v42, %v1537_v41  ;;  %v1409_v55 = vld [vmem:[%s2867_s1 + $0x128] sm:$0xf]  ;;  %v1868_v63 = vld [vmem:[%s2867_s1 + $0x2ec] sm:$0xf]  ;;  %v1494_v38 = vor.u32 %v1832_v29, %v1491_v30 }
  0x4c   :  { %v1814_v58 = vld [vmem:[%s2867_s1 + $0x134] sm:$0xf0]  ;;  %v1665_v59 = vld [vmem:[%s2867_s1 + $0x328] sm:$0xf]  ;;  %v1282_v1 = vor.u32 %v1782_v47, %v1281_v46  ;;  %v1747_v33 = vld [vmem:[%s2867_s1 + $0x3d8] sm:$0xf0] }
  0x4d   :  { %1016 = vmatpush.bf16.msra.mxu1 %v1474_v8  ;;  %v1878_v60 = vld [vmem:[%s2867_s1 + $0x334] sm:$0xf0]  ;;  %v1521_v61 = vld [vmem:[%s2867_s1 + $0x208] sm:$0xf]  ;;  %v1410_v2 = vor.u32 %v1814_v58, %v1409_v55  ;;  %v1860_v34 = vld [vmem:[%s2867_s1 + $0x2ac] sm:$0xf] }
  0x4e   :  { %1035 = vmatpush.bf16.msra.mxu2 %v1602_v0  ;;  %v1842_v62 = vld [vmem:[%s2867_s1 + $0x214] sm:$0xf0]  ;;  %v1635_v0 = vld [vmem:[%s2867_s1 + $0x2f8] sm:$0xf0]  ;;  %v1265_v3 = vld [vmem:[%s2867_s1 + $0x8] sm:$0xf]  ;;  %v1666_v6 = vor.u32 %v1878_v60, %v1665_v59 }
  0x4f   :  { %997 = vmatpush.bf16.msra.mxu0 %v1346_v7  ;;  %1054 = vmatpush.bf16.msra.mxu3 %v1730_v11  ;;  %v1778_v4 = vld [vmem:[%s2867_s1 + $0x14] sm:$0xf0]  ;;  %v1393_v5 = vld [vmem:[%s2867_s1 + $0x108] sm:$0xf]  ;;  %v1522_v7 = vor.u32 %v1842_v62, %v1521_v61  ;;  %v1638_v11 = vor.u32 %v1868_v63, %v1635_v0  ;;  %v1347_v37 = vld [vmem:[%s2867_s1 + $0xb8] sm:$0xf0] }
  0x50   :  { %v1810_v8 = vld [vmem:[%s2867_s1 + $0x114] sm:$0xf0]  ;;  %v1649_v9 = vld [vmem:[%s2867_s1 + $0x308] sm:$0xf]  ;;  %v1266_v18 = vor.u32 %v1778_v4, %v1265_v3  ;;  %v1828_v40 = vld [vmem:[%s2867_s1 + $0x1ac] sm:$0xf] }
  0x51   :  { %1017 = vmatpush.bf16.msra.mxu1 %v1458_v20  ;;  %v1874_v10 = vld [vmem:[%s2867_s1 + $0x314] sm:$0xf0]  ;;  %v1864_v20 = vld [vmem:[%s2867_s1 + $0x2cc] sm:$0xf]  ;;  %v1475_v41 = vld [vmem:[%s2867_s1 + $0x1b8] sm:$0xf0] }
  0x52   :  { %1036 = vmatpush.bf16.msra.mxu2 %v1586_v12  ;;  %v1804_v12 = vld [vmem:[%s2867_s1 + $0xec] sm:$0xf]  ;;  %v1650_v22 = vor.u32 %v1874_v10, %v1649_v9  ;;  %v1622_v28 = vor.u32 %v1864_v20, %v1619_v21  ;;  %v1731_v46 = vld [vmem:[%s2867_s1 + $0x3b8] sm:$0xf0]  ;;  %v1478_v58 = vor.u32 %v1828_v40, %v1475_v41 }
  0x53   :  { %998 = vmatpush.bf16.msra.mxu0 %v1330_v19  ;;  %1055 = vmatpush.bf16.msra.mxu3 %v1714_v23  ;;  %v1394_v19 = vor.u32 %v1810_v8, %v1393_v5  ;;  %v1382_v23 = vor.u32 %v1804_v12, %v1379_v13  ;;  %v1856_v47 = vld [vmem:[%s2867_s1 + $0x28c] sm:$0xf]  ;;  %v1331_v55 = vld [vmem:[%s2867_s1 + $0x98] sm:$0xf0] }
  0x54   :  { %951 = vmatmul.bf16.gmra.mxu1 %v2308_v50  ;;  %v1824_v60 = vld [vmem:[%s2867_s1 + $0x18c] sm:$0xf]  ;;  %v1459_v61 = vld [vmem:[%s2867_s1 + $0x198] sm:$0xf0] }
  0x55   :  { %1018 = vmatpush.bf16.msra.mxu1 %v1442_v32  ;;  %970 = vmatmul.bf16.gmra.mxu2 %v2310_v51  ;;  %v1896_v32 = vld [vmem:[%s2867_s1 + $0x3cc] sm:$0xf]  ;;  %v1571_v3 = vld [vmem:[%s2867_s1 + $0x278] sm:$0xf0] }
  0x56   :  { %1037 = vmatpush.bf16.msra.mxu2 %v1570_v24  ;;  %932 = vmatmul.bf16.gmra.mxu0 %v2297_v44  ;;  %v1510_v24 = vor.u32 %v1836_v14, %v1507_v15  ;;  %v1750_v39 = vor.u32 %v1896_v32, %v1747_v33  ;;  %v1888_v0 = vld [vmem:[%s2867_s1 + $0x38c] sm:$0xf]  ;;  %v1315_v5 = vld [vmem:[%s2867_s1 + $0x78] sm:$0xf0] }
  0x57   :  { %999 = vmatpush.bf16.msra.mxu0 %v1314_v31  ;;  %1056 = vmatpush.bf16.msra.mxu3 %v1698_v35  ;;  %v1366_v31 = vor.u32 %v1800_v26, %v1363_v27  ;;  %v1603_v35 = vld [vmem:[%s2867_s1 + $0x2b8] sm:$0xf0]  ;;  %v1788_v4 = vld [vmem:[%s2867_s1 + $0x6c] sm:$0xf] }
  0x58   :  { %989 = vmatmul.bf16.gmra.mxu3 %v2318_v56  ;;  %v1606_v42 = vor.u32 %v1860_v34, %v1603_v35  ;;  %v1820_v8 = vld [vmem:[%s2867_s1 + $0x16c] sm:$0xf]  ;;  %v1443_v9 = vld [vmem:[%s2867_s1 + $0x178] sm:$0xf0] }
  0x59   :  { %1019 = vmatpush.bf16.msra.mxu1 %v1426_v45  ;;  %v1892_v45 = vld [vmem:[%s2867_s1 + $0x3ac] sm:$0xf]  ;;  %v1699_v13 = vld [vmem:[%s2867_s1 + $0x378] sm:$0xf0] }
  0x5a   :  { %1038 = vmatpush.bf16.msra.mxu2 %v1554_v36  ;;  %v1796_v36 = vld [vmem:[%s2867_s1 + $0xac] sm:$0xf]  ;;  %v1734_v59 = vor.u32 %v1892_v45, %v1731_v46  ;;  %v1555_v15 = vld [vmem:[%s2867_s1 + $0x258] sm:$0xf0] }
  0x5b   :  { %1000 = vmatpush.bf16.msra.mxu0 %v1298_v43  ;;  %1057 = vmatpush.bf16.msra.mxu3 %v1682_v49  ;;  %v1350_v43 = vor.u32 %v1796_v36, %v1347_v37  ;;  %v1587_v49 = vld [vmem:[%s2867_s1 + $0x298] sm:$0xf0]  ;;  %v1884_v12 = vld [vmem:[%s2867_s1 + $0x36c] sm:$0xf] }
  0x5c   :  { %v1590_v62 = vor.u32 %v1856_v47, %v1587_v49  ;;  %v1848_v14 = vld [vmem:[%s2867_s1 + $0x24c] sm:$0xf]  ;;  %v1299_v17 = vld [vmem:[%s2867_s1 + $0x58] sm:$0xf0] }
  0x5d   :  { %1020 = vmatpush.bf16.msra.mxu1 %v1410_v2  ;;  %v1852_v2 = vld [vmem:[%s2867_s1 + $0x26c] sm:$0xf]  ;;  %v1427_v21 = vld [vmem:[%s2867_s1 + $0x158] sm:$0xf0] }
  0x5e   :  { %1039 = vmatpush.bf16.msra.mxu2 %v1538_v52  ;;  %v1792_v52 = vld [vmem:[%s2867_s1 + $0x8c] sm:$0xf]  ;;  %v1574_v10 = vor.u32 %v1852_v2, %v1571_v3  ;;  %v1539_v27 = vld [vmem:[%s2867_s1 + $0x238] sm:$0xf0] }
  0x5f   :  { %1001 = vmatpush.bf16.msra.mxu0 %v1282_v1  ;;  %1058 = vmatpush.bf16.msra.mxu3 %v1666_v6  ;;  %v1334_v63 = vor.u32 %v1792_v52, %v1331_v55  ;;  %v1715_v1 = vld [vmem:[%s2867_s1 + $0x398] sm:$0xf0]  ;;  %v1462_v6 = vor.u32 %v1824_v60, %v1459_v61  ;;  %v1784_v16 = vld [vmem:[%s2867_s1 + $0x4c] sm:$0xf] }
  0x60   :  { %v1816_v20 = vld [vmem:[%s2867_s1 + $0x14c] sm:$0xf]  ;;  %v1283_v29 = vld [vmem:[%s2867_s1 + $0x38] sm:$0xf0] }
  0x61   :  { %1021 = vmatpush.bf16.msra.mxu1 %v1394_v19  ;;  %v1702_v19 = vor.u32 %v1884_v12, %v1699_v13  ;;  %v1844_v26 = vld [vmem:[%s2867_s1 + $0x22c] sm:$0xf]  ;;  %v1430_v30 = vor.u32 %v1816_v20, %v1427_v21  ;;  %v1411_v33 = vld [vmem:[%s2867_s1 + $0x138] sm:$0xf0]  ;;  %v1147_v13 = vld [vmem:[%s2870_s3] sm:$0xff] }
  0x62   :  { %1040 = vmatpush.bf16.msra.mxu2 %v1522_v7  ;;  %v1718_v7 = vor.u32 %v1888_v0, %v1715_v1  ;;  %v1812_v32 = vld [vmem:[%s2867_s1 + $0x12c] sm:$0xf]  ;;  %v1542_v34 = vor.u32 %v1844_v26, %v1539_v27  ;;  %v1667_v37 = vld [vmem:[%s2867_s1 + $0x338] sm:$0xf0]  ;;  %v1149_v27 = vld [vmem:[%s2870_s3 + $0x10] sm:$0xff] }
  0x63   :  { %1002 = vmatpush.bf16.msra.mxu0 %v1266_v18  ;;  %1059 = vmatpush.bf16.msra.mxu3 %v1650_v22  ;;  %v1446_v18 = vor.u32 %v1820_v8, %v1443_v9  ;;  %v1558_v22 = vor.u32 %v1848_v14, %v1555_v15  ;;  %v1876_v36 = vld [vmem:[%s2867_s1 + $0x32c] sm:$0xf]  ;;  %v1267_v41 = vld [vmem:[%s2867_s1 + $0x18] sm:$0xf0] }
  0x64   :  { %1022 = vmatmul.bf16.vlgmr.msra.gmra.mxu1 %v2176_v53  ;;  %v1776_v40 = vld [vmem:[%s2867_s1 + $0xc] sm:$0xf]  ;;  %v1395_v49 = vld [vmem:[%s2867_s1 + $0x118] sm:$0xf0] }
  0x65   :  { %1090 = vmatpush.bf16.msrb.mxu1 %v1510_v24  ;;  %1041 = vmatmul.bf16.vlgmr.msra.gmra.mxu2 %v2178_v54  ;;  %v1880_v24 = vld [vmem:[%s2867_s1 + $0x34c] sm:$0xf]  ;;  %v1270_v47 = vor.u32 %v1776_v40, %v1267_v41  ;;  %v1651_v55 = vld [vmem:[%s2867_s1 + $0x318] sm:$0xf0] }
  0x66   :  { %1109 = vmatpush.bf16.msrb.mxu2 %v1638_v11  ;;  %1003 = vmatmul.bf16.vlgmr.msra.gmra.mxu0 %v2165_v48  ;;  %v1318_v11 = vor.u32 %v1788_v4, %v1315_v5  ;;  %v1808_v45 = vld [vmem:[%s2867_s1 + $0x10c] sm:$0xf] }
  0x67   :  { %1071 = vmatpush.bf16.msrb.mxu0 %v1382_v23  ;;  %1128 = vmatpush.bf16.msrb.mxu3 %v1766_v25  ;;  %v1302_v23 = vor.u32 %v1784_v16, %v1299_v17  ;;  %v1683_v25 = vld [vmem:[%s2867_s1 + $0x358] sm:$0xf0]  ;;  %v1872_v52 = vld [vmem:[%s2867_s1 + $0x30c] sm:$0xf]  ;;  %v1155_v17 = vunpack.c.l.bf16 %v1147_v13 }
  0x68   :  { %1060 = vmatmul.bf16.vlgmr.msra.gmra.mxu3 %v2186_v57 }
  0x69   :  { %1091 = vmatpush.bf16.msrb.mxu1 %v1494_v38  ;;  %v1840_v38 = vld [vmem:[%s2867_s1 + $0x20c] sm:$0xf] }
  0x6a   :  { %1110 = vmatpush.bf16.msrb.mxu2 %v1622_v28  ;;  %v1780_v28 = vld [vmem:[%s2867_s1 + $0x2c] sm:$0xf] }
  0x6b   :  { %1072 = vmatpush.bf16.msrb.mxu0 %v1366_v31  ;;  %1129 = vmatpush.bf16.msrb.mxu3 %v1750_v39  ;;  %v1686_v31 = vor.u32 %v1880_v24, %v1683_v25  ;;  %v1286_v35 = vor.u32 %v1780_v28, %v1283_v29  ;;  %v1523_v39 = vld [vmem:[%s2867_s1 + $0x218] sm:$0xf0] }
  0x6c   :  { %v1526_v46 = vor.u32 %v1840_v38, %v1523_v39 }
  0x6d   :  { %1092 = vmatpush.bf16.msrb.mxu1 %v1478_v58  ;;  %v1398_v58 = vor.u32 %v1808_v45, %v1395_v49 }
  0x6e   :  { %1111 = vmatpush.bf16.msrb.mxu2 %v1606_v42  ;;  %v1414_v42 = vor.u32 %v1812_v32, %v1411_v33  ;;  %v1159_v33 = vunpack.c.l.bf16 %v1149_v27 }
  0x6f   :  { %1073 = vmatpush.bf16.msrb.mxu0 %v1350_v43  ;;  %1130 = vmatpush.bf16.msrb.mxu3 %v1734_v59  ;;  %v1670_v43 = vor.u32 %v1876_v36, %v1667_v37  ;;  %v1654_v59 = vor.u32 %v1872_v52, %v1651_v55  ;;  %v1151_v55 = vld [vmem:[%s2870_s3 + $0x20] sm:$0xff] }
  0x71   :  { %1093 = vmatpush.bf16.msrb.mxu1 %v1462_v6 }
  0x72   :  { %1112 = vmatpush.bf16.msrb.mxu2 %v1590_v62 }
  0x73   :  { %1074 = vmatpush.bf16.msrb.mxu0 %v1334_v63  ;;  %1131 = vmatpush.bf16.msrb.mxu3 %v1718_v7 }
  0x74   :  { %1027 = vmatmul.bf16.gmra.mxu1 %v2308_v50 }
  0x75   :  { %1094 = vmatpush.bf16.msrb.mxu1 %v1446_v18  ;;  %1046 = vmatmul.bf16.gmra.mxu2 %v2310_v51 }
  0x76   :  { %1113 = vmatpush.bf16.msrb.mxu2 %v1574_v10  ;;  %1008 = vmatmul.bf16.gmra.mxu0 %v2297_v44 }
  0x77   :  { %1075 = vmatpush.bf16.msrb.mxu0 %v1318_v11  ;;  %1132 = vmatpush.bf16.msrb.mxu3 %v1702_v19 }
  0x78   :  { %1065 = vmatmul.bf16.gmra.mxu3 %v2318_v56 }
  0x79   :  { %1095 = vmatpush.bf16.msrb.mxu1 %v1430_v30 }
  0x7a   :  { %1114 = vmatpush.bf16.msrb.mxu2 %v1558_v22  ;;  %v1156_v22 = vunpack.c.h.bf16 %v1147_v13 }
  0x7b   :  { %1076 = vmatpush.bf16.msrb.mxu0 %v1302_v23  ;;  %1133 = vmatpush.bf16.msrb.mxu3 %v1686_v31 }
  0x7d   :  { %1096 = vmatpush.bf16.msrb.mxu1 %v1414_v42  ;;  %v1160_v42 = vunpack.c.h.bf16 %v1149_v27 }
  0x7e   :  { %1115 = vmatpush.bf16.msrb.mxu2 %v1542_v34 }
  0x7f   :  { %1077 = vmatpush.bf16.msrb.mxu0 %v1286_v35  ;;  %1134 = vmatpush.bf16.msrb.mxu3 %v1670_v43 }
  0x81   :  { %1097 = vmatpush.bf16.msrb.mxu1 %v1398_v58 }
  0x82   :  { %1116 = vmatpush.bf16.msrb.mxu2 %v1526_v46 }
  0x83   :  { %1078 = vmatpush.bf16.msrb.mxu0 %v1270_v47  ;;  %1135 = vmatpush.bf16.msrb.mxu3 %v1654_v59 }
  0x84   :  { %1098 = vmatmul.bf16.vlgmr.msrb.gmra.mxu1 %v2176_v53 }
  0x85   :  { %1117 = vmatmul.bf16.vlgmr.msrb.gmra.mxu2 %v2178_v54 }
  0x86   :  { %1079 = vmatmul.bf16.vlgmr.msrb.gmra.mxu0 %v2165_v48 }
  0x88   :  { %1136 = vmatmul.bf16.vlgmr.msrb.gmra.mxu3 %v2186_v57  ;;  %v2795_v57 = vld [vmem:[%s2869_s2] sm:$0xf] }
  0x89   :  { %v2799_v6 = vperm.slane %v2795_v57, 1 }
  0x94   :  { %1103 = vmatmul.bf16.gmra.mxu1 %v2308_v50 }
  0x95   :  { %1122 = vmatmul.bf16.gmra.mxu2 %v2310_v51 }
  0x96   :  { %1084 = vmatmul.bf16.gmra.mxu0 %v2297_v44  ;;  %v155_v44 = vperm.slane %v2795_v57, 0 }
  0x98   :  { %1141 = vmatmul.bf16.gmra.mxu3 %v2318_v56 }
  0xa1   :  { %v852_v60 = vpop.f32.mrf.mxu0  ;;  %v871_v61 = vpop.f32.mrf.mxu1 }
  0xa2   :  { %v853_v4 = vadd.f32 %v852_v60, %v155_v44 }
  0xa4   :  { %v872_v5 = vadd.f32 %v871_v61, %v853_v4 }
  0xa8   :  { %v890_v62 = vpop.f32.mrf.mxu2 }
  0xa9   :  { %v909_v63 = vpop.f32.mrf.mxu3  ;;  %v854_v0 = vpop.f32.mrf.mxu0  ;;  %v891_v11 = vadd.f32 %v890_v62, %v872_v5 }
  0xaa   :  { %v873_v48 = vpop.f32.mrf.mxu1  ;;  %v855_v14 = vadd.f32 %v854_v0, %v155_v44 }
  0xab   :  { %v910_v16 = vadd.f32 %v909_v63, %v891_v11  ;;  %v1163_v63 = vunpack.c.l.bf16 %v1151_v55 }
  0xac   :  { %v874_v20 = vadd.f32 %v873_v48, %v855_v14 }
  0xad   :  { %v1171_v25 = vadd.f32 %v1155_v17, %v910_v16 }
  0xaf   :  { %v1187_v32 = vmax.f32 %v1171_v25, 0.0 }
  0xb0   :  { %v892_v1 = vpop.f32.mrf.mxu2 }
  0xb1   :  { %v911_v53 = vpop.f32.mrf.mxu3  ;;  %v857_v2 = vpop.f32.mrf.mxu0  ;;  %v893_v26 = vadd.f32 %v892_v1, %v874_v20 }
  0xb2   :  { %v876_v54 = vpop.f32.mrf.mxu1  ;;  %v858_v28 = vadd.f32 %v857_v2, %v155_v44 }
  0xb3   :  { %v912_v34 = vadd.f32 %v911_v53, %v893_v26 }
  0xb4   :  { %v877_v35 = vadd.f32 %v876_v54, %v858_v28 }
  0xb5   :  { %v1175_v47 = vadd.f32 %v1159_v33, %v912_v34  ;;  %v157_v34 = vperm.slane %v2795_v57, 2 }
  0xb7   :  { %v1191_v61 = vmax.f32 %v1175_v47, 0.0 }
  0xb8   :  { %v895_v50 = vpop.f32.mrf.mxu2 }
  0xb9   :  { %v914_v51 = vpop.f32.mrf.mxu3  ;;  %v859_v56 = vpop.f32.mrf.mxu0  ;;  %v896_v49 = vadd.f32 %v895_v50, %v877_v35  ;;  %v1164_v50 = vunpack.c.h.bf16 %v1151_v55 }
  0xba   :  { %v878_v3 = vpop.f32.mrf.mxu1  ;;  %v860_v58 = vadd.f32 %v859_v56, %v155_v44  ;;  %v1153_v44 = vld [vmem:[%s2870_s3 + $0x30] sm:$0xff] }
  0xbb   :  { %v915_v62 = vadd.f32 %v914_v51, %v896_v49 }
  0xbc   :  { %v879_v53 = vadd.f32 %v878_v3, %v860_v58  ;;  %v1167_v3 = vunpack.c.l.bf16 %v1153_v44 }
  0xc0   :  { %v897_v7 = vpop.f32.mrf.mxu2 }
  0xc1   :  { %v2801_v8 = vpop.f32.mrf.mxu3 }
  0xc2   :  { %v947_v10 = vpop.f32.mrf.mxu1 }
  0xc3   :  { %v928_v9 = vpop.f32.mrf.mxu0 }
  0xc4   :  { %v929_v12 = vadd.f32 %v928_v9, %v2799_v6  ;;  %v1179_v9 = vadd.f32 %v1163_v63, %v915_v62 }
  0xc6   :  { %v948_v15 = vadd.f32 %v947_v10, %v929_v12  ;;  %v898_v10 = vadd.f32 %v897_v7, %v879_v53  ;;  %v1195_v12 = vmax.f32 %v1179_v9, 0.0 }
  0xc8   :  { %v966_v18 = vpop.f32.mrf.mxu2  ;;  %v917_v13 = vadd.f32 %v2801_v8, %v898_v10 }
  0xc9   :  { %v967_v21 = vadd.f32 %v966_v18, %v948_v15 }
  0xca   :  { %v949_v24 = vpop.f32.mrf.mxu1 }
  0xcb   :  { %v985_v19 = vpop.f32.mrf.mxu3  ;;  %v930_v23 = vpop.f32.mrf.mxu0 }
  0xcc   :  { %v986_v29 = vadd.f32 %v985_v19, %v967_v21  ;;  %v931_v30 = vadd.f32 %v930_v23, %v2799_v6  ;;  %v1168_v19 = vunpack.c.h.bf16 %v1153_v44 }
  0xce   :  { %v1172_v31 = vadd.f32 %v1156_v22, %v986_v29  ;;  %v950_v37 = vadd.f32 %v949_v24, %v931_v30  ;;  %v1183_v22 = vadd.f32 %v1167_v3, %v917_v13 }
  0xd0   :  { %v1188_v36 = vmax.f32 %v1172_v31, 0.0  ;;  %v968_v38 = vpop.f32.mrf.mxu2  ;;  %v1199_v24 = vmax.f32 %v1183_v22, 0.0 }
  0xd1   :  { %v969_v41 = vadd.f32 %v968_v38, %v950_v37 }
  0xd2   :  { %v1203_v40 = vpack.c.bf16 %v1188_v36, %v1187_v32  ;;  %v952_v45 = vpop.f32.mrf.mxu1 }
  0xd3   :  { %v987_v39 = vpop.f32.mrf.mxu3  ;;  %v933_v43 = vpop.f32.mrf.mxu0 }
  0xd4   :  { %v934_v46 = vadd.f32 %v933_v43, %v2799_v6  ;;  %1211 = vst [vmem:[%s2871_s4] sm:$0xff] %v1203_v40  ;;  %v988_v52 = vadd.f32 %v987_v39, %v969_v41  ;;  %v2834_v41 = vperm.slane %v2795_v57, 3 }
  0xd6   :  { %v1176_v59 = vadd.f32 %v1160_v42, %v988_v52  ;;  %v953_v60 = vadd.f32 %v952_v45, %v934_v46  ;;  %v1148_v52 = vld [vmem:[%s2870_s3 + $0x8] sm:$0xff] }
  0xd8   :  { %v1192_v0 = vmax.f32 %v1176_v59, 0.0  ;;  %v971_v48 = vpop.f32.mrf.mxu2 }
  0xd9   :  { %v972_v54 = vadd.f32 %v971_v48, %v953_v60  ;;  %v1157_v60 = vunpack.c.l.bf16 %v1148_v52 }
  0xda   :  { %v1205_v2 = vpack.c.bf16 %v1192_v0, %v1191_v61  ;;  %v954_v5 = vpop.f32.mrf.mxu1  ;;  %v1158_v0 = vunpack.c.h.bf16 %v1148_v52 }
  0xdb   :  { %v990_v1 = vpop.f32.mrf.mxu3  ;;  %v935_v4 = vpop.f32.mrf.mxu0 }
  0xdc   :  { %1213 = vst [vmem:[%s2871_s4 + $0x10] sm:$0xff] %v1205_v2  ;;  %v991_v51 = vadd.f32 %v990_v1, %v972_v54  ;;  %v936_v56 = vadd.f32 %v935_v4, %v2799_v6  ;;  %v1150_v54 = vld [vmem:[%s2870_s3 + $0x18] sm:$0xff] }
  0xdd   :  { %v1161_v44 = vunpack.c.l.bf16 %v1150_v54 }
  0xde   :  { %v1180_v11 = vadd.f32 %v1164_v50, %v991_v51  ;;  %v955_v15 = vadd.f32 %v954_v5, %v936_v56 }
  0xe0   :  { %v1196_v14 = vmax.f32 %v1180_v11, 0.0  ;;  %v973_v16 = vpop.f32.mrf.mxu2 }
  0xe1   :  { %v974_v18 = vadd.f32 %v973_v16, %v955_v15  ;;  %v1162_v16 = vunpack.c.h.bf16 %v1150_v54 }
  0xe2   :  { %v1207_v17 = vpack.c.bf16 %v1196_v14, %v1195_v12  ;;  %v1023_v21 = vpop.f32.mrf.mxu1 }
  0xe3   :  { %v992_v7 = vpop.f32.mrf.mxu3  ;;  %v1004_v20 = vpop.f32.mrf.mxu0 }
  0xe4   :  { %1215 = vst [vmem:[%s2871_s4 + $0x20] sm:$0xff] %v1207_v17  ;;  %v993_v6 = vadd.f32 %v992_v7, %v974_v18  ;;  %v1005_v39 = vadd.f32 %v1004_v20, %v157_v34 }
  0xe6   :  { %v1184_v23 = vadd.f32 %v1168_v19, %v993_v6  ;;  %v1024_v40 = vadd.f32 %v1023_v21, %v1005_v39  ;;  %v1152_v21 = vld [vmem:[%s2870_s3 + $0x28] sm:$0xff] }
  0xe8   :  { %v1200_v25 = vmax.f32 %v1184_v23, 0.0  ;;  %v1042_v26 = vpop.f32.mrf.mxu2 }
  0xe9   :  { %v1043_v47 = vadd.f32 %v1042_v26, %v1024_v40 }
  0xea   :  { %v1209_v27 = vpack.c.bf16 %v1200_v25, %v1199_v24  ;;  %v1025_v29 = vpop.f32.mrf.mxu1 }
  0xeb   :  { %v1061_v8 = vpop.f32.mrf.mxu3  ;;  %v1006_v28 = vpop.f32.mrf.mxu0 }
  0xec   :  { %1217 = vst [vmem:[%s2871_s4 + $0x30] sm:$0xff] %v1209_v27  ;;  %v1007_v55 = vadd.f32 %v1006_v28, %v157_v34  ;;  %v1062_v59 = vadd.f32 %v1061_v8, %v1043_v47  ;;  %v1165_v8 = vunpack.c.l.bf16 %v1152_v21 }
  0xee   :  { %v1026_v57 = vadd.f32 %v1025_v29, %v1007_v55  ;;  %v1173_v1 = vadd.f32 %v1157_v60, %v1062_v59 }
  0xf0   :  { %v1044_v30 = vpop.f32.mrf.mxu2  ;;  %v1189_v10 = vmax.f32 %v1173_v1, 0.0 }
  0xf1   :  { %v1045_v2 = vadd.f32 %v1044_v30, %v1026_v57 }
  0xf2   :  { %v1028_v33 = vpop.f32.mrf.mxu1 }
  0xf3   :  { %v1063_v31 = vpop.f32.mrf.mxu3  ;;  %v1009_v32 = vpop.f32.mrf.mxu0 }
  0xf4   :  { %v1010_v50 = vadd.f32 %v1009_v32, %v157_v34  ;;  %v1064_v51 = vadd.f32 %v1063_v31, %v1045_v2 }
  0xf6   :  { %v1029_v56 = vadd.f32 %v1028_v33, %v1010_v50  ;;  %v1177_v18 = vadd.f32 %v1161_v44, %v1064_v51  ;;  %v1166_v33 = vunpack.c.h.bf16 %v1152_v21 }
  0xf8   :  { %v1047_v35 = vpop.f32.mrf.mxu2  ;;  %v1193_v25 = vmax.f32 %v1177_v18, 0.0 }
  0xf9   :  { %v1048_v19 = vadd.f32 %v1047_v35, %v1029_v56 }
  0xfa   :  { %v1030_v38 = vpop.f32.mrf.mxu1 }
  0xfb   :  { %v1066_v36 = vpop.f32.mrf.mxu3  ;;  %v1011_v37 = vpop.f32.mrf.mxu0 }
  0xfc   :  { %v1012_v6 = vadd.f32 %v1011_v37, %v157_v34  ;;  %v1067_v26 = vadd.f32 %v1066_v36, %v1048_v19 }
  0xfe   :  { %v1031_v30 = vadd.f32 %v1030_v38, %v1012_v6  ;;  %v1181_v39 = vadd.f32 %v1165_v8, %v1067_v26 }
 0x100   :  { %v1049_v42 = vpop.f32.mrf.mxu2  ;;  %v1197_v47 = vmax.f32 %v1181_v39, 0.0 }
 0x101   :  { %v1050_v40 = vadd.f32 %v1049_v42, %v1031_v30 }
 0x102   :  { %v1099_v46 = vpop.f32.mrf.mxu1 }
 0x103   :  { %v2836_v43 = vpop.f32.mrf.mxu3  ;;  %v1080_v45 = vpop.f32.mrf.mxu0 }
 0x104   :  { %v1081_v49 = vadd.f32 %v1080_v45, %v2834_v41  ;;  %v1154_v45 = vld [vmem:[%s2870_s3 + $0x38] sm:$0xff] }
 0x105   :  { %v1170_v60 = vunpack.c.h.bf16 %v1154_v45 }
 0x106   :  { %v1100_v58 = vadd.f32 %v1099_v46, %v1081_v49  ;;  %v1169_v46 = vunpack.c.l.bf16 %v1154_v45  ;;  %v1069_v49 = vadd.f32 %v2836_v43, %v1050_v40 }
 0x108   :  { %v1118_v61 = vpop.f32.mrf.mxu2 }
 0x109   :  { %v1119_v63 = vadd.f32 %v1118_v61, %v1100_v58 }
 0x10a   :  { %v1101_v53 = vpop.f32.mrf.mxu1 }
 0x10b   :  { %v1137_v62 = vpop.f32.mrf.mxu3  ;;  %v1082_v48 = vpop.f32.mrf.mxu0 }
 0x10c   :  { %v1138_v4 = vadd.f32 %v1137_v62, %v1119_v63  ;;  %v1083_v5 = vadd.f32 %v1082_v48, %v2834_v41  ;;  %v1185_v62 = vadd.f32 %v1169_v46, %v1069_v49 }
 0x10e   :  { %v1174_v9 = vadd.f32 %v1158_v0, %v1138_v4  ;;  %v1102_v3 = vadd.f32 %v1101_v53, %v1083_v5  ;;  %v1201_v63 = vmax.f32 %v1185_v62, 0.0 }
 0x110   :  { %v1190_v11 = vmax.f32 %v1174_v9, 0.0  ;;  %v1120_v12 = vpop.f32.mrf.mxu2 }
 0x111   :  { %v1121_v15 = vadd.f32 %v1120_v12, %v1102_v3 }
 0x112   :  { %v1204_v14 = vpack.c.bf16 %v1190_v11, %v1189_v10  ;;  %v1104_v22 = vpop.f32.mrf.mxu1 }
 0x113   :  { %v1139_v13 = vpop.f32.mrf.mxu3  ;;  %v1085_v7 = vpop.f32.mrf.mxu0 }
 0x114   :  { %v1086_v17 = vadd.f32 %v1085_v7, %v2834_v41  ;;  %1212 = vst [vmem:[%s2871_s4 + $0x8] sm:$0xff] %v1204_v14  ;;  %v1140_v20 = vadd.f32 %v1139_v13, %v1121_v15 }
 0x116   :  { %v1178_v23 = vadd.f32 %v1162_v16, %v1140_v20  ;;  %v1105_v24 = vadd.f32 %v1104_v22, %v1086_v17 }
 0x118   :  { %v1194_v27 = vmax.f32 %v1178_v23, 0.0  ;;  %v1123_v28 = vpop.f32.mrf.mxu2 }
 0x119   :  { %v1124_v32 = vadd.f32 %v1123_v28, %v1105_v24 }
 0x11a   :  { %v1206_v31 = vpack.c.bf16 %v1194_v27, %v1193_v25  ;;  %v1106_v38 = vpop.f32.mrf.mxu1 }
 0x11b   :  { %v1142_v29 = vpop.f32.mrf.mxu3  ;;  %v1087_v35 = vpop.f32.mrf.mxu0 }
 0x11c   :  { %1214 = vst [vmem:[%s2871_s4 + $0x18] sm:$0xff] %v1206_v31  ;;  %v1143_v34 = vadd.f32 %v1142_v29, %v1124_v32  ;;  %v1088_v36 = vadd.f32 %v1087_v35, %v2834_v41 }
 0x11e   :  { %v1182_v37 = vadd.f32 %v1166_v33, %v1143_v34  ;;  %v1107_v55 = vadd.f32 %v1106_v38, %v1088_v36 }
 0x120   :  { %v1198_v52 = vmax.f32 %v1182_v37, 0.0  ;;  %v1125_v42 = vpop.f32.mrf.mxu2 }
 0x121   :  { %v1126_v59 = vadd.f32 %v1125_v42, %v1107_v55 }
 0x122   :  { %v1208_v58 = vpack.c.bf16 %v1198_v52, %v1197_v47 }
 0x123   :  { %v1144_v61 = vpop.f32.mrf.mxu3 }
 0x124   :  { %1216 = vst [vmem:[%s2871_s4 + $0x28] sm:$0xff] %v1208_v58  ;;  %v1145_v57 = vadd.f32 %v1144_v61, %v1126_v59 }
 0x126   :  { %v1186_v41 = vadd.f32 %v1170_v60, %v1145_v57 }
 0x128   :  { %v1202_v0 = vmax.f32 %v1186_v41, 0.0 }
 0x12a   :  { %v1210_v48 = vpack.c.bf16 %v1202_v0, %v1201_v63 }
 0x12c   :  { %1218 = vst [vmem:[%s2871_s4 + $0x38] sm:$0xff] %v1210_v48 }

// kernel: l1block_forward.35
= control target key start
LH: loop header
LB: loop body
LE: loop exit
PB: predicated region body
PF: predicated region fallthrough
CT: control target
= control target key end

     0   :  { %s4151_s1 = inlined_call_operand.vmem [shape: bf16[512,512], index: 1, kind: input, shape index: {}]   ;;  %s4152_s0 = inlined_call_operand.vmem [shape: bf16[128,512], index: 0, kind: input, shape index: {}]   ;;  %s4153_s2 = inlined_call_operand.vmem [shape: f32[1,512], index: 2, kind: input, shape index: {}]   ;;  %s4154_s3 = inlined_call_operand.vmem [shape: bf16[128,512], index: 3, kind: output, shape index: {}]  }
   0x1   :  { %v2142_v0 = vld [vmem:[%s4151_s1 + $0xe0] sm:$0xf]  ;;  %v2602_v1 = vld [vmem:[%s4151_s1 + $0xec] sm:$0xf0] }
   0x2   :  { %v2270_v2 = vld [vmem:[%s4151_s1 + $0x1e0] sm:$0xf]  ;;  %v2143_v3 = vor.u32 %v2602_v1, %v2142_v0  ;;  %v2634_v4 = vld [vmem:[%s4151_s1 + $0x1ec] sm:$0xf0] }
   0x3   :  { %v2398_v5 = vld [vmem:[%s4151_s1 + $0x2e0] sm:$0xf]  ;;  %v2666_v6 = vld [vmem:[%s4151_s1 + $0x2ec] sm:$0xf0]  ;;  %v2271_v7 = vor.u32 %v2634_v4, %v2270_v2 }
   0x4   :  { %v2399_v8 = vor.u32 %v2666_v6, %v2398_v5  ;;  %v2526_v9 = vld [vmem:[%s4151_s1 + $0x3e0] sm:$0xf]  ;;  %v2698_v10 = vld [vmem:[%s4151_s1 + $0x3ec] sm:$0xf0]  ;;  %984 = vmatpush.bf16.msra.mxu0 %v2143_v3 }
   0x5   :  { %v2126_v11 = vld [vmem:[%s4151_s1 + $0xc0] sm:$0xf]  ;;  %v2527_v12 = vor.u32 %v2698_v10, %v2526_v9  ;;  %v2598_v13 = vld [vmem:[%s4151_s1 + $0xcc] sm:$0xf0]  ;;  %1033 = vmatpush.bf16.msra.mxu1 %v2271_v7 }
   0x6   :  { %v2254_v14 = vld [vmem:[%s4151_s1 + $0x1c0] sm:$0xf]  ;;  %v2630_v15 = vld [vmem:[%s4151_s1 + $0x1cc] sm:$0xf0]  ;;  %1082 = vmatpush.bf16.msra.mxu2 %v2399_v8  ;;  %v2127_v16 = vor.u32 %v2598_v13, %v2126_v11 }
   0x7   :  { %v2255_v17 = vor.u32 %v2630_v15, %v2254_v14  ;;  %v2382_v18 = vld [vmem:[%s4151_s1 + $0x2c0] sm:$0xf]  ;;  %v2662_v19 = vld [vmem:[%s4151_s1 + $0x2cc] sm:$0xf0]  ;;  %1131 = vmatpush.bf16.msra.mxu3 %v2527_v12 }
   0x8   :  { %v2510_v20 = vld [vmem:[%s4151_s1 + $0x3c0] sm:$0xf]  ;;  %v2383_v21 = vor.u32 %v2662_v19, %v2382_v18  ;;  %v2694_v22 = vld [vmem:[%s4151_s1 + $0x3cc] sm:$0xf0]  ;;  %985 = vmatpush.bf16.msra.mxu0 %v2127_v16 }
   0x9   :  { %v2110_v23 = vld [vmem:[%s4151_s1 + $0xa0] sm:$0xf]  ;;  %v2594_v24 = vld [vmem:[%s4151_s1 + $0xac] sm:$0xf0]  ;;  %v2511_v25 = vor.u32 %v2694_v22, %v2510_v20  ;;  %1034 = vmatpush.bf16.msra.mxu1 %v2255_v17 }
   0xa   :  { %v2238_v26 = vld [vmem:[%s4151_s1 + $0x1a0] sm:$0xf]  ;;  %v2626_v27 = vld [vmem:[%s4151_s1 + $0x1ac] sm:$0xf0]  ;;  %v2111_v29 = vor.u32 %v2594_v24, %v2110_v23  ;;  %1083 = vmatpush.bf16.msra.mxu2 %v2383_v21 }
   0xb   :  { %v2366_v28 = vld [vmem:[%s4151_s1 + $0x2a0] sm:$0xf]  ;;  %v2658_v30 = vld [vmem:[%s4151_s1 + $0x2ac] sm:$0xf0]  ;;  %v2239_v33 = vor.u32 %v2626_v27, %v2238_v26  ;;  %1132 = vmatpush.bf16.msra.mxu3 %v2511_v25 }
   0xc   :  { %v2494_v31 = vld [vmem:[%s4151_s1 + $0x3a0] sm:$0xf]  ;;  %v2690_v32 = vld [vmem:[%s4151_s1 + $0x3ac] sm:$0xf0]  ;;  %v2367_v34 = vor.u32 %v2658_v30, %v2366_v28  ;;  %986 = vmatpush.bf16.msra.mxu0 %v2111_v29  ;;  %v2540_v30 = vld [vmem:[%s4152_s0 + $0x4] sm:$0xf] }
   0xd   :  { %v2094_v35 = vld [vmem:[%s4151_s1 + $0x80] sm:$0xf]  ;;  %v2590_v36 = vld [vmem:[%s4151_s1 + $0x8c] sm:$0xf0]  ;;  %v2495_v38 = vor.u32 %v2690_v32, %v2494_v31  ;;  %1035 = vmatpush.bf16.msra.mxu1 %v2239_v33  ;;  %v1904_v31 = vld [vmem:[%s4152_s0 + $0x10] sm:$0xf0] }
   0xe   :  { %v2222_v37 = vld [vmem:[%s4151_s1 + $0x180] sm:$0xf]  ;;  %v2622_v39 = vld [vmem:[%s4151_s1 + $0x18c] sm:$0xf0]  ;;  %v2095_v44 = vor.u32 %v2590_v36, %v2094_v35  ;;  %1084 = vmatpush.bf16.msra.mxu2 %v2367_v34  ;;  %v2664_v32 = vld [vmem:[%s4151_s1 + $0x2e4] sm:$0xf] }
   0xf   :  { %v2350_v40 = vld [vmem:[%s4151_s1 + $0x280] sm:$0xf]  ;;  %v2654_v41 = vld [vmem:[%s4151_s1 + $0x28c] sm:$0xf0]  ;;  %v2223_v45 = vor.u32 %v2622_v39, %v2222_v37  ;;  %1133 = vmatpush.bf16.msra.mxu3 %v2495_v38  ;;  %v2400_v33 = vld [vmem:[%s4151_s1 + $0x2f0] sm:$0xf0] }
  0x10   :  { %v2478_v42 = vld [vmem:[%s4151_s1 + $0x380] sm:$0xf]  ;;  %v2686_v43 = vld [vmem:[%s4151_s1 + $0x38c] sm:$0xf0]  ;;  %v2351_v46 = vor.u32 %v2654_v41, %v2350_v40  ;;  %987 = vmatpush.bf16.msra.mxu0 %v2095_v44  ;;  %v1910_v35 = vld [vmem:[%s4152_s0 + $0x8] sm:$0xf]  ;;  %v2403_v44 = vor.u32 %v2664_v32, %v2400_v33 }
  0x11   :  { %v2078_v47 = vld [vmem:[%s4151_s1 + $0x60] sm:$0xf]  ;;  %v2586_v48 = vld [vmem:[%s4151_s1 + $0x6c] sm:$0xf0]  ;;  %v2479_v50 = vor.u32 %v2686_v43, %v2478_v42  ;;  %1036 = vmatpush.bf16.msra.mxu1 %v2223_v45  ;;  %v2696_v36 = vld [vmem:[%s4151_s1 + $0x3e4] sm:$0xf] }
  0x12   :  { %v2206_v49 = vld [vmem:[%s4151_s1 + $0x160] sm:$0xf]  ;;  %v2618_v51 = vld [vmem:[%s4151_s1 + $0x16c] sm:$0xf0]  ;;  %v2079_v56 = vor.u32 %v2586_v48, %v2078_v47  ;;  %1085 = vmatpush.bf16.msra.mxu2 %v2351_v46  ;;  %v2528_v37 = vld [vmem:[%s4151_s1 + $0x3f0] sm:$0xf0] }
  0x13   :  { %v2334_v52 = vld [vmem:[%s4151_s1 + $0x260] sm:$0xf]  ;;  %v2650_v53 = vld [vmem:[%s4151_s1 + $0x26c] sm:$0xf0]  ;;  %v2207_v57 = vor.u32 %v2618_v51, %v2206_v49  ;;  %1134 = vmatpush.bf16.msra.mxu3 %v2479_v50  ;;  %v2543_v40 = vld [vmem:[%s4152_s0 + $0x14] sm:$0xf0]  ;;  %v2531_v49 = vor.u32 %v2696_v36, %v2528_v37 }
  0x14   :  { %v2462_v54 = vld [vmem:[%s4151_s1 + $0x360] sm:$0xf]  ;;  %v2682_v55 = vld [vmem:[%s4151_s1 + $0x36c] sm:$0xf0]  ;;  %v2335_v58 = vor.u32 %v2650_v53, %v2334_v52  ;;  %988 = vmatpush.bf16.msra.mxu0 %v2079_v56  ;;  %v2541_v41 = vld [vmem:[%s4152_s0 + $0xc] sm:$0xf]  ;;  %v2969_v53 = vor.u32 %v2540_v30, %v1904_v31 }
  0x15   :  { %v2062_v59 = vld [vmem:[%s4151_s1 + $0x40] sm:$0xf]  ;;  %v2582_v60 = vld [vmem:[%s4151_s1 + $0x4c] sm:$0xf0]  ;;  %v2463_v62 = vor.u32 %v2682_v55, %v2462_v54  ;;  %1037 = vmatpush.bf16.msra.mxu1 %v2207_v57  ;;  %v1912_v42 = vld [vmem:[%s4152_s0 + $0x18] sm:$0xf0]  ;;  %v2971_v54 = vor.u32 %v2543_v40, %v1910_v35 }
  0x16   :  { %v2190_v61 = vld [vmem:[%s4151_s1 + $0x140] sm:$0xf]  ;;  %v2614_v63 = vld [vmem:[%s4151_s1 + $0x14c] sm:$0xf0]  ;;  %v2063_v4 = vor.u32 %v2582_v60, %v2062_v59  ;;  %1086 = vmatpush.bf16.msra.mxu2 %v2335_v58  ;;  %v2600_v45 = vld [vmem:[%s4151_s1 + $0xe4] sm:$0xf]  ;;  %v2979_v57 = vor.u32 %v2541_v41, %v1912_v42 }
  0x17   :  { %v2318_v0 = vld [vmem:[%s4151_s1 + $0x240] sm:$0xf]  ;;  %v2646_v1 = vld [vmem:[%s4151_s1 + $0x24c] sm:$0xf0]  ;;  %v2191_v5 = vor.u32 %v2614_v63, %v2190_v61  ;;  %1135 = vmatpush.bf16.msra.mxu3 %v2463_v62  ;;  %v2144_v46 = vld [vmem:[%s4151_s1 + $0xf0] sm:$0xf0] }
  0x18   :  { %v2446_v2 = vld [vmem:[%s4151_s1 + $0x340] sm:$0xf]  ;;  %v2678_v3 = vld [vmem:[%s4151_s1 + $0x34c] sm:$0xf0]  ;;  %v2319_v6 = vor.u32 %v2646_v1, %v2318_v0  ;;  %989 = vmatpush.bf16.msra.mxu0 %v2063_v4  ;;  %v2632_v47 = vld [vmem:[%s4151_s1 + $0x1e4] sm:$0xf]  ;;  %v2147_v58 = vor.u32 %v2600_v45, %v2144_v46 }
  0x19   :  { %v2046_v7 = vld [vmem:[%s4151_s1 + $0x20] sm:$0xf]  ;;  %v2578_v8 = vld [vmem:[%s4151_s1 + $0x2c] sm:$0xf0]  ;;  %v2447_v10 = vor.u32 %v2678_v3, %v2446_v2  ;;  %1038 = vmatpush.bf16.msra.mxu1 %v2191_v5  ;;  %v2272_v50 = vld [vmem:[%s4151_s1 + $0x1f0] sm:$0xf0] }
  0x1a   :  { %v2174_v9 = vld [vmem:[%s4151_s1 + $0x120] sm:$0xf]  ;;  %v2610_v11 = vld [vmem:[%s4151_s1 + $0x12c] sm:$0xf0]  ;;  %v2047_v17 = vor.u32 %v2578_v8, %v2046_v7  ;;  %1087 = vmatpush.bf16.msra.mxu2 %v2319_v6  ;;  %v2660_v51 = vld [vmem:[%s4151_s1 + $0x2c4] sm:$0xf]  ;;  %v2275_v59 = vor.u32 %v2632_v47, %v2272_v50 }
  0x1b   :  { %v2302_v12 = vld [vmem:[%s4151_s1 + $0x220] sm:$0xf]  ;;  %v2642_v13 = vld [vmem:[%s4151_s1 + $0x22c] sm:$0xf0]  ;;  %v2175_v21 = vor.u32 %v2610_v11, %v2174_v9  ;;  %1136 = vmatpush.bf16.msra.mxu3 %v2447_v10  ;;  %v2384_v52 = vld [vmem:[%s4151_s1 + $0x2d0] sm:$0xf0] }
  0x1c   :  { %v2430_v14 = vld [vmem:[%s4151_s1 + $0x320] sm:$0xf]  ;;  %v2674_v15 = vld [vmem:[%s4151_s1 + $0x32c] sm:$0xf0]  ;;  %v2303_v22 = vor.u32 %v2642_v13, %v2302_v12  ;;  %990 = vmatpush.bf16.msra.mxu0 %v2047_v17  ;;  %4162 = vst [vmem:[#allocation2_spill] sm:$0xff] %v2969_v53  ;;  %v2387_v60 = vor.u32 %v2660_v51, %v2384_v52 }
  0x1d   :  { %v2030_v16 = vld [vmem:[%s4151_s1] sm:$0xf]  ;;  %v2574_v18 = vld [vmem:[%s4151_s1 + $0xc] sm:$0xf0]  ;;  %v2431_v26 = vor.u32 %v2674_v15, %v2430_v14  ;;  %1039 = vmatpush.bf16.msra.mxu1 %v2175_v21  ;;  %4163 = vst [vmem:[#allocation3_spill] sm:$0xff] %v2971_v54 }
  0x1e   :  { %v2158_v19 = vld [vmem:[%s4151_s1 + $0x100] sm:$0xf]  ;;  %v2606_v20 = vld [vmem:[%s4151_s1 + $0x10c] sm:$0xf0]  ;;  %v2031_v34 = vor.u32 %v2574_v18, %v2030_v16  ;;  %1088 = vmatpush.bf16.msra.mxu2 %v2303_v22  ;;  %v2692_v55 = vld [vmem:[%s4151_s1 + $0x3c4] sm:$0xf] }
  0x1f   :  { %v2286_v23 = vld [vmem:[%s4151_s1 + $0x200] sm:$0xf]  ;;  %v2638_v24 = vld [vmem:[%s4151_s1 + $0x20c] sm:$0xf0]  ;;  %v2159_v38 = vor.u32 %v2606_v20, %v2158_v19  ;;  %1137 = vmatpush.bf16.msra.mxu3 %v2431_v26  ;;  %v2512_v56 = vld [vmem:[%s4151_s1 + $0x3d0] sm:$0xf0] }
  0x20   :  { %v2414_v25 = vld [vmem:[%s4151_s1 + $0x300] sm:$0xf]  ;;  %v2670_v27 = vld [vmem:[%s4151_s1 + $0x30c] sm:$0xf0]  ;;  %v2287_v39 = vor.u32 %v2638_v24, %v2286_v23  ;;  %991 = vmatpush.bf16.msra.mxu0 %v2031_v34  ;;  %4164 = vst [vmem:[#allocation4_spill] sm:$0xff] %v2979_v57  ;;  %v2515_v63 = vor.u32 %v2692_v55, %v2512_v56 }
  0x21   :  { %v1902_v28 = vld [vmem:[%s4152_s0] sm:$0xf]  ;;  %v2542_v29 = vld [vmem:[%s4152_s0 + $0xc] sm:$0xf0]  ;;  %v2415_v43 = vor.u32 %v2670_v27, %v2414_v25  ;;  %1040 = vmatpush.bf16.msra.mxu1 %v2159_v38  ;;  %v2596_v61 = vld [vmem:[%s4151_s1 + $0xc4] sm:$0xf] }
  0x22   :  { %v2958_v48 = vor.u32 %v2542_v29, %v1902_v28  ;;  %1089 = vmatpush.bf16.msra.mxu2 %v2287_v39  ;;  %v2128_v62 = vld [vmem:[%s4151_s1 + $0xd0] sm:$0xf0]  ;;  %v2628_v0 = vld [vmem:[%s4151_s1 + $0x1c4] sm:$0xf]  ;;  %v1918_v16 = vld [vmem:[%s4152_s0 + $0x20] sm:$0xf] }
  0x23   :  { %1138 = vmatpush.bf16.msra.mxu3 %v2415_v43  ;;  %v2256_v1 = vld [vmem:[%s4151_s1 + $0x1d0] sm:$0xf0]  ;;  %v2131_v2 = vor.u32 %v2596_v61, %v2128_v62  ;;  %v2656_v3 = vld [vmem:[%s4151_s1 + $0x2a4] sm:$0xf]  ;;  %v2546_v17 = vld [vmem:[%s4152_s0 + $0x2c] sm:$0xf0] }
  0x24   :  { %992 = vmatmul.bf16.vlgmr.msra.gmra.mxu0 %v2958_v48  ;;  %1041 = vmatmul.bf16.vlgmr.msra.gmra.mxu1 %v2969_v53  ;;  %v2368_v4 = vld [vmem:[%s4151_s1 + $0x2b0] sm:$0xf0]  ;;  %v2592_v5 = vld [vmem:[%s4151_s1 + $0xa4] sm:$0xf]  ;;  %v2259_v6 = vor.u32 %v2628_v0, %v2256_v1  ;;  %v1926_v20 = vld [vmem:[%s4152_s0 + $0x28] sm:$0xf]  ;;  %v3045_v24 = vor.u32 %v2546_v17, %v1918_v16 }
  0x25   :  { %1090 = vmatmul.bf16.vlgmr.msra.gmra.mxu2 %v2971_v54  ;;  %1180 = vmatpush.bf16.msrb.mxu0 %v2147_v58  ;;  %v2371_v7 = vor.u32 %v2656_v3, %v2368_v4  ;;  %v2112_v8 = vld [vmem:[%s4151_s1 + $0xb0] sm:$0xf0]  ;;  %v2688_v9 = vld [vmem:[%s4151_s1 + $0x3a4] sm:$0xf]  ;;  %v2547_v21 = vld [vmem:[%s4152_s0 + $0x34] sm:$0xf0] }
  0x26   :  { %1278 = vmatpush.bf16.msrb.mxu2 %v2403_v44  ;;  %1139 = vmatmul.bf16.vlgmr.msra.gmra.mxu3 %v2979_v57  ;;  %v2496_v10 = vld [vmem:[%s4151_s1 + $0x3b0] sm:$0xf0]  ;;  %v2624_v12 = vld [vmem:[%s4151_s1 + $0x1a4] sm:$0xf]  ;;  %v2115_v14 = vor.u32 %v2592_v5, %v2112_v8  ;;  %v2545_v22 = vld [vmem:[%s4152_s0 + $0x2c] sm:$0xf]  ;;  %v3049_v26 = vor.u32 %v2547_v21, %v1926_v20 }
  0x27   :  { %1327 = vmatpush.bf16.msrb.mxu3 %v2531_v49  ;;  %1229 = vmatpush.bf16.msrb.mxu1 %v2275_v59  ;;  %v2499_v11 = vor.u32 %v2688_v9, %v2496_v10  ;;  %v2240_v13 = vld [vmem:[%s4151_s1 + $0x1b0] sm:$0xf0]  ;;  %v2544_v18 = vld [vmem:[%s4152_s0 + $0x24] sm:$0xf]  ;;  %v1928_v23 = vld [vmem:[%s4152_s0 + $0x38] sm:$0xf0] }
  0x28   :  { %v2243_v15 = vor.u32 %v2624_v12, %v2240_v13  ;;  %v1920_v19 = vld [vmem:[%s4152_s0 + $0x30] sm:$0xf0]  ;;  %v3051_v27 = vor.u32 %v2545_v22, %v1928_v23  ;;  %v2652_v28 = vld [vmem:[%s4151_s1 + $0x284] sm:$0xf]  ;;  %v1934_v40 = vld [vmem:[%s4152_s0 + $0x40] sm:$0xf] }
  0x29   :  { %1181 = vmatpush.bf16.msrb.mxu0 %v2131_v2  ;;  %v3047_v25 = vor.u32 %v2544_v18, %v1920_v19  ;;  %v2352_v29 = vld [vmem:[%s4151_s1 + $0x290] sm:$0xf0]  ;;  %v2588_v30 = vld [vmem:[%s4151_s1 + $0x84] sm:$0xf]  ;;  %v2550_v41 = vld [vmem:[%s4152_s0 + $0x4c] sm:$0xf0] }
  0x2a   :  { %1279 = vmatpush.bf16.msrb.mxu2 %v2387_v60  ;;  %v2355_v31 = vor.u32 %v2652_v28, %v2352_v29  ;;  %v2096_v32 = vld [vmem:[%s4151_s1 + $0x90] sm:$0xf0]  ;;  %v2684_v33 = vld [vmem:[%s4151_s1 + $0x384] sm:$0xf]  ;;  %v1942_v44 = vld [vmem:[%s4152_s0 + $0x48] sm:$0xf]  ;;  %v3105_v49 = vor.u32 %v2550_v41, %v1934_v40 }
  0x2b   :  { %1328 = vmatpush.bf16.msrb.mxu3 %v2515_v63  ;;  %1230 = vmatpush.bf16.msrb.mxu1 %v2259_v6  ;;  %v2480_v34 = vld [vmem:[%s4151_s1 + $0x390] sm:$0xf0]  ;;  %v2099_v35 = vor.u32 %v2588_v30, %v2096_v32  ;;  %v2620_v37 = vld [vmem:[%s4151_s1 + $0x184] sm:$0xf]  ;;  %v2551_v45 = vld [vmem:[%s4152_s0 + $0x54] sm:$0xf0] }
  0x2c   :  { %v2483_v36 = vor.u32 %v2684_v33, %v2480_v34  ;;  %v2224_v38 = vld [vmem:[%s4151_s1 + $0x190] sm:$0xf0]  ;;  %v2548_v42 = vld [vmem:[%s4152_s0 + $0x44] sm:$0xf]  ;;  %v2549_v46 = vld [vmem:[%s4152_s0 + $0x4c] sm:$0xf]  ;;  %v3109_v51 = vor.u32 %v2551_v45, %v1942_v44 }
  0x2d   :  { %1182 = vmatpush.bf16.msrb.mxu0 %v2115_v14  ;;  %v2227_v39 = vor.u32 %v2620_v37, %v2224_v38  ;;  %v1936_v43 = vld [vmem:[%s4152_s0 + $0x50] sm:$0xf0]  ;;  %v1944_v47 = vld [vmem:[%s4152_s0 + $0x58] sm:$0xf0]  ;;  %v2648_v55 = vld [vmem:[%s4151_s1 + $0x264] sm:$0xf] }
  0x2e   :  { %1280 = vmatpush.bf16.msrb.mxu2 %v2371_v7  ;;  %v3107_v50 = vor.u32 %v2548_v42, %v1936_v43  ;;  %v3111_v52 = vor.u32 %v2549_v46, %v1944_v47  ;;  %v2336_v56 = vld [vmem:[%s4151_s1 + $0x270] sm:$0xf0]  ;;  %v2584_v58 = vld [vmem:[%s4151_s1 + $0x64] sm:$0xf]  ;;  %v1950_v4 = vld [vmem:[%s4152_s0 + $0x60] sm:$0xf] }
  0x2f   :  { %1329 = vmatpush.bf16.msrb.mxu3 %v2499_v11  ;;  %1231 = vmatpush.bf16.msrb.mxu1 %v2243_v15  ;;  %v2339_v59 = vor.u32 %v2648_v55, %v2336_v56  ;;  %v2080_v60 = vld [vmem:[%s4151_s1 + $0x70] sm:$0xf0]  ;;  %v2680_v61 = vld [vmem:[%s4151_s1 + $0x364] sm:$0xf]  ;;  %v2554_v5 = vld [vmem:[%s4152_s0 + $0x6c] sm:$0xf0] }
  0x30   :  { %v2464_v62 = vld [vmem:[%s4151_s1 + $0x370] sm:$0xf0]  ;;  %v2083_v63 = vor.u32 %v2584_v58, %v2080_v60  ;;  %v2616_v1 = vld [vmem:[%s4151_s1 + $0x164] sm:$0xf]  ;;  %v1958_v8 = vld [vmem:[%s4152_s0 + $0x68] sm:$0xf]  ;;  %v3165_v12 = vor.u32 %v2554_v5, %v1950_v4 }
  0x31   :  { %1183 = vmatpush.bf16.msrb.mxu0 %v2099_v35  ;;  %v2467_v0 = vor.u32 %v2680_v61, %v2464_v62  ;;  %v2208_v2 = vld [vmem:[%s4151_s1 + $0x170] sm:$0xf0]  ;;  %v2552_v6 = vld [vmem:[%s4152_s0 + $0x64] sm:$0xf]  ;;  %v2555_v9 = vld [vmem:[%s4152_s0 + $0x74] sm:$0xf0] }
  0x32   :  { %1281 = vmatpush.bf16.msrb.mxu2 %v2355_v31  ;;  %v2211_v3 = vor.u32 %v2616_v1, %v2208_v2  ;;  %v1952_v7 = vld [vmem:[%s4152_s0 + $0x70] sm:$0xf0]  ;;  %v2553_v10 = vld [vmem:[%s4152_s0 + $0x6c] sm:$0xf]  ;;  %v1960_v11 = vld [vmem:[%s4152_s0 + $0x78] sm:$0xf0]  ;;  %v3169_v14 = vor.u32 %v2555_v9, %v1958_v8 }
  0x33   :  { %1330 = vmatpush.bf16.msrb.mxu3 %v2483_v36  ;;  %1232 = vmatpush.bf16.msrb.mxu1 %v2227_v39  ;;  %v3167_v13 = vor.u32 %v2552_v6, %v1952_v7  ;;  %v3171_v15 = vor.u32 %v2553_v10, %v1960_v11  ;;  %v2644_v16 = vld [vmem:[%s4151_s1 + $0x244] sm:$0xf]  ;;  %v2320_v17 = vld [vmem:[%s4151_s1 + $0x250] sm:$0xf0]  ;;  %v1966_v32 = vld [vmem:[%s4152_s0 + $0x80] sm:$0xf] }
  0x34   :  { %997 = vmatmul.bf16.gmra.mxu0 %v3045_v24  ;;  %1046 = vmatmul.bf16.gmra.mxu1 %v3047_v25  ;;  %v2580_v18 = vld [vmem:[%s4151_s1 + $0x44] sm:$0xf]  ;;  %v2323_v19 = vor.u32 %v2644_v16, %v2320_v17  ;;  %v2064_v20 = vld [vmem:[%s4151_s1 + $0x50] sm:$0xf0]  ;;  %v2558_v33 = vld [vmem:[%s4152_s0 + $0x8c] sm:$0xf0] }
  0x35   :  { %1095 = vmatmul.bf16.gmra.mxu2 %v3049_v26  ;;  %1184 = vmatpush.bf16.msrb.mxu0 %v2083_v63  ;;  %v2676_v21 = vld [vmem:[%s4151_s1 + $0x344] sm:$0xf]  ;;  %v2448_v22 = vld [vmem:[%s4151_s1 + $0x350] sm:$0xf0]  ;;  %v2067_v23 = vor.u32 %v2580_v18, %v2064_v20  ;;  %v1974_v36 = vld [vmem:[%s4152_s0 + $0x88] sm:$0xf]  ;;  %v3225_v40 = vor.u32 %v2558_v33, %v1966_v32 }
  0x36   :  { %1144 = vmatmul.bf16.gmra.mxu3 %v3051_v27  ;;  %1282 = vmatpush.bf16.msrb.mxu2 %v2339_v59  ;;  %v2451_v28 = vor.u32 %v2676_v21, %v2448_v22  ;;  %v2612_v29 = vld [vmem:[%s4151_s1 + $0x144] sm:$0xf]  ;;  %v2192_v30 = vld [vmem:[%s4151_s1 + $0x150] sm:$0xf0]  ;;  %v2559_v37 = vld [vmem:[%s4152_s0 + $0x94] sm:$0xf0] }
  0x37   :  { %1331 = vmatpush.bf16.msrb.mxu3 %v2467_v0  ;;  %1233 = vmatpush.bf16.msrb.mxu1 %v2211_v3  ;;  %v2195_v31 = vor.u32 %v2612_v29, %v2192_v30  ;;  %v2556_v34 = vld [vmem:[%s4152_s0 + $0x84] sm:$0xf]  ;;  %v1968_v35 = vld [vmem:[%s4152_s0 + $0x90] sm:$0xf0]  ;;  %v2557_v38 = vld [vmem:[%s4152_s0 + $0x8c] sm:$0xf]  ;;  %v3229_v42 = vor.u32 %v2559_v37, %v1974_v36 }
  0x38   :  { %v1976_v39 = vld [vmem:[%s4152_s0 + $0x98] sm:$0xf0]  ;;  %v3227_v41 = vor.u32 %v2556_v34, %v1968_v35  ;;  %v2640_v44 = vld [vmem:[%s4151_s1 + $0x224] sm:$0xf]  ;;  %v2304_v45 = vld [vmem:[%s4151_s1 + $0x230] sm:$0xf0] }
  0x39   :  { %1185 = vmatpush.bf16.msrb.mxu0 %v2067_v23  ;;  %v3231_v43 = vor.u32 %v2557_v38, %v1976_v39  ;;  %v2576_v46 = vld [vmem:[%s4151_s1 + $0x24] sm:$0xf]  ;;  %v2307_v47 = vor.u32 %v2640_v44, %v2304_v45  ;;  %v2048_v55 = vld [vmem:[%s4151_s1 + $0x30] sm:$0xf0]  ;;  %v1982_v0 = vld [vmem:[%s4152_s0 + $0xa0] sm:$0xf] }
  0x3a   :  { %1283 = vmatpush.bf16.msrb.mxu2 %v2323_v19  ;;  %v2672_v56 = vld [vmem:[%s4151_s1 + $0x324] sm:$0xf]  ;;  %v2432_v58 = vld [vmem:[%s4151_s1 + $0x330] sm:$0xf0]  ;;  %v2051_v59 = vor.u32 %v2576_v46, %v2048_v55  ;;  %v2562_v1 = vld [vmem:[%s4152_s0 + $0xac] sm:$0xf0] }
  0x3b   :  { %1332 = vmatpush.bf16.msrb.mxu3 %v2451_v28  ;;  %1234 = vmatpush.bf16.msrb.mxu1 %v2195_v31  ;;  %v2435_v60 = vor.u32 %v2672_v56, %v2432_v58  ;;  %v2608_v61 = vld [vmem:[%s4151_s1 + $0x124] sm:$0xf]  ;;  %v2176_v62 = vld [vmem:[%s4151_s1 + $0x130] sm:$0xf0]  ;;  %v1990_v4 = vld [vmem:[%s4152_s0 + $0xa8] sm:$0xf]  ;;  %v3285_v8 = vor.u32 %v2562_v1, %v1982_v0 }
  0x3c   :  { %v2179_v63 = vor.u32 %v2608_v61, %v2176_v62  ;;  %v2560_v2 = vld [vmem:[%s4152_s0 + $0xa4] sm:$0xf]  ;;  %v1984_v3 = vld [vmem:[%s4152_s0 + $0xb0] sm:$0xf0]  ;;  %v2563_v5 = vld [vmem:[%s4152_s0 + $0xb4] sm:$0xf0] }
  0x3d   :  { %1186 = vmatpush.bf16.msrb.mxu0 %v2051_v59  ;;  %v2561_v6 = vld [vmem:[%s4152_s0 + $0xac] sm:$0xf]  ;;  %v1992_v7 = vld [vmem:[%s4152_s0 + $0xb8] sm:$0xf0]  ;;  %v3287_v9 = vor.u32 %v2560_v2, %v1984_v3  ;;  %v3289_v10 = vor.u32 %v2563_v5, %v1990_v4  ;;  %v2636_v16 = vld [vmem:[%s4151_s1 + $0x204] sm:$0xf] }
  0x3e   :  { %1284 = vmatpush.bf16.msrb.mxu2 %v2307_v47  ;;  %v3291_v11 = vor.u32 %v2561_v6, %v1992_v7  ;;  %v2288_v17 = vld [vmem:[%s4151_s1 + $0x210] sm:$0xf0]  ;;  %v2572_v18 = vld [vmem:[%s4151_s1 + $0x4] sm:$0xf]  ;;  %v1998_v32 = vld [vmem:[%s4152_s0 + $0xc0] sm:$0xf] }
  0x3f   :  { %1333 = vmatpush.bf16.msrb.mxu3 %v2435_v60  ;;  %1235 = vmatpush.bf16.msrb.mxu1 %v2179_v63  ;;  %v2291_v19 = vor.u32 %v2636_v16, %v2288_v17  ;;  %v2032_v20 = vld [vmem:[%s4151_s1 + $0x10] sm:$0xf0]  ;;  %v2668_v21 = vld [vmem:[%s4151_s1 + $0x304] sm:$0xf]  ;;  %v2566_v33 = vld [vmem:[%s4152_s0 + $0xcc] sm:$0xf0] }
  0x40   :  { %v2416_v22 = vld [vmem:[%s4151_s1 + $0x310] sm:$0xf0]  ;;  %v2035_v23 = vor.u32 %v2572_v18, %v2032_v20  ;;  %v2604_v29 = vld [vmem:[%s4151_s1 + $0x104] sm:$0xf]  ;;  %v2006_v36 = vld [vmem:[%s4152_s0 + $0xc8] sm:$0xf]  ;;  %v3345_v44 = vor.u32 %v2566_v33, %v1998_v32 }
  0x41   :  { %v2419_v28 = vor.u32 %v2668_v21, %v2416_v22  ;;  %v2160_v30 = vld [vmem:[%s4151_s1 + $0x110] sm:$0xf0]  ;;  %v2564_v34 = vld [vmem:[%s4152_s0 + $0xc4] sm:$0xf]  ;;  %v2567_v37 = vld [vmem:[%s4152_s0 + $0xd4] sm:$0xf0] }
  0x42   :  { %1285 = vmatpush.bf16.msrb.mxu2 %v2291_v19  ;;  %v2163_v31 = vor.u32 %v2604_v29, %v2160_v30  ;;  %1187 = vmatpush.bf16.msrb.mxu0 %v2035_v23  ;;  %v2000_v35 = vld [vmem:[%s4152_s0 + $0xd0] sm:$0xf0]  ;;  %v2565_v38 = vld [vmem:[%s4152_s0 + $0xcc] sm:$0xf]  ;;  %v2008_v39 = vld [vmem:[%s4152_s0 + $0xd8] sm:$0xf0]  ;;  %v3349_v46 = vor.u32 %v2567_v37, %v2006_v36 }
  0x43   :  { %1334 = vmatpush.bf16.msrb.mxu3 %v2419_v28  ;;  %v3347_v45 = vor.u32 %v2564_v34, %v2000_v35  ;;  %v3351_v47 = vor.u32 %v2565_v38, %v2008_v39  ;;  %v2406_v55 = vld [vmem:[%s4151_s1 + $0x2e8] sm:$0xf]  ;;  %v2667_v56 = vld [vmem:[%s4151_s1 + $0x2f4] sm:$0xf0]  ;;  %v2014_v1 = vld [vmem:[%s4152_s0 + $0xe0] sm:$0xf] }
  0x44   :  { %1002 = vmatmul.bf16.gmra.mxu0 %v3105_v49  ;;  %1051 = vmatmul.bf16.gmra.mxu1 %v3107_v50  ;;  %4165 = vst [vmem:[#allocation5_spill] sm:$0xff] %v3349_v46  ;;  %v2150_v58 = vld [vmem:[%s4151_s1 + $0xe8] sm:$0xf]  ;;  %v2407_v59 = vor.u32 %v2667_v56, %v2406_v55  ;;  %v2603_v60 = vld [vmem:[%s4151_s1 + $0xf4] sm:$0xf0] }
  0x45   :  { %1100 = vmatmul.bf16.gmra.mxu2 %v3109_v51  ;;  %1236 = vmatpush.bf16.msrb.mxu1 %v2163_v31  ;;  %4166 = vst [vmem:[#allocation6_spill] sm:$0xff] %v3351_v47  ;;  %v2534_v61 = vld [vmem:[%s4151_s1 + $0x3e8] sm:$0xf]  ;;  %v2699_v62 = vld [vmem:[%s4151_s1 + $0x3f4] sm:$0xf0]  ;;  %v2151_v63 = vor.u32 %v2603_v60, %v2150_v58 }
  0x46   :  { %1149 = vmatmul.bf16.gmra.mxu3 %v3111_v52  ;;  %v2535_v0 = vor.u32 %v2699_v62, %v2534_v61  ;;  %1474 = vmatpush.bf16.msra.mxu2 %v2407_v59  ;;  %v2570_v2 = vld [vmem:[%s4152_s0 + $0xec] sm:$0xf0]  ;;  %v2568_v3 = vld [vmem:[%s4152_s0 + $0xe4] sm:$0xf]  ;;  %v2278_v4 = vld [vmem:[%s4151_s1 + $0x1e8] sm:$0xf] }
  0x47   :  { %1376 = vmatpush.bf16.msra.mxu0 %v2151_v63  ;;  %v2635_v5 = vld [vmem:[%s4151_s1 + $0x1f4] sm:$0xf0]  ;;  %v2016_v6 = vld [vmem:[%s4152_s0 + $0xf0] sm:$0xf0]  ;;  %v2022_v7 = vld [vmem:[%s4152_s0 + $0xe8] sm:$0xf]  ;;  %v3405_v20 = vor.u32 %v2570_v2, %v2014_v1 }
  0x48   :  { %1523 = vmatpush.bf16.msra.mxu3 %v2535_v0  ;;  %v2571_v16 = vld [vmem:[%s4152_s0 + $0xf4] sm:$0xf0]  ;;  %v2279_v17 = vor.u32 %v2635_v5, %v2278_v4  ;;  %v2569_v18 = vld [vmem:[%s4152_s0 + $0xec] sm:$0xf]  ;;  %v2024_v19 = vld [vmem:[%s4152_s0 + $0xf8] sm:$0xf0]  ;;  %v3407_v21 = vor.u32 %v2568_v3, %v2016_v6 }
  0x49   :  { %v3409_v22 = vor.u32 %v2571_v16, %v2022_v7  ;;  %v3411_v23 = vor.u32 %v2569_v18, %v2024_v19  ;;  %v2390_v28 = vld [vmem:[%s4151_s1 + $0x2c8] sm:$0xf]  ;;  %v2663_v29 = vld [vmem:[%s4151_s1 + $0x2d4] sm:$0xf0]  ;;  %v3438_v37 = vld [vmem:[%s4153_s2] sm:$0xf] }
  0x4a   :  { %1425 = vmatpush.bf16.msra.mxu1 %v2279_v17  ;;  %v2134_v30 = vld [vmem:[%s4151_s1 + $0xc8] sm:$0xf]  ;;  %v2391_v31 = vor.u32 %v2663_v29, %v2390_v28  ;;  %v2599_v32 = vld [vmem:[%s4151_s1 + $0xd4] sm:$0xf0]  ;;  %v3447_v55 = vperm.slane %v3438_v37, 0 }
  0x4b   :  { %v2518_v33 = vld [vmem:[%s4151_s1 + $0x3c8] sm:$0xf]  ;;  %v2695_v34 = vld [vmem:[%s4151_s1 + $0x3d4] sm:$0xf0]  ;;  %v2135_v35 = vor.u32 %v2599_v32, %v2134_v30 }
  0x4c   :  { %v2519_v36 = vor.u32 %v2695_v34, %v2518_v33  ;;  %1475 = vmatpush.bf16.msra.mxu2 %v2391_v31  ;;  %v2262_v38 = vld [vmem:[%s4151_s1 + $0x1c8] sm:$0xf]  ;;  %v2631_v39 = vld [vmem:[%s4151_s1 + $0x1d4] sm:$0xf0] }
  0x4d   :  { %1377 = vmatpush.bf16.msra.mxu0 %v2135_v35  ;;  %v2263_v56 = vor.u32 %v2631_v39, %v2262_v38  ;;  %v2374_v62 = vld [vmem:[%s4151_s1 + $0x2a8] sm:$0xf]  ;;  %v2659_v63 = vld [vmem:[%s4151_s1 + $0x2b4] sm:$0xf0] }
  0x4e   :  { %1524 = vmatpush.bf16.msra.mxu3 %v2519_v36  ;;  %v2118_v0 = vld [vmem:[%s4151_s1 + $0xa8] sm:$0xf]  ;;  %v2375_v1 = vor.u32 %v2659_v63, %v2374_v62  ;;  %v2595_v2 = vld [vmem:[%s4151_s1 + $0xb4] sm:$0xf0] }
  0x4f   :  { %1426 = vmatpush.bf16.msra.mxu1 %v2263_v56  ;;  %v2502_v3 = vld [vmem:[%s4151_s1 + $0x3a8] sm:$0xf]  ;;  %v2691_v4 = vld [vmem:[%s4151_s1 + $0x3b4] sm:$0xf0]  ;;  %v2119_v6 = vor.u32 %v2595_v2, %v2118_v0 }
  0x50   :  { %v2503_v7 = vor.u32 %v2691_v4, %v2502_v3  ;;  %1476 = vmatpush.bf16.msra.mxu2 %v2375_v1  ;;  %v2246_v31 = vld [vmem:[%s4151_s1 + $0x1a8] sm:$0xf]  ;;  %v2627_v32 = vld [vmem:[%s4151_s1 + $0x1b4] sm:$0xf0] }
  0x51   :  { %1378 = vmatpush.bf16.msra.mxu0 %v2119_v6  ;;  %v2247_v33 = vor.u32 %v2627_v32, %v2246_v31  ;;  %v2102_v62 = vld [vmem:[%s4151_s1 + $0x88] sm:$0xf]  ;;  %v2591_v0 = vld [vmem:[%s4151_s1 + $0x94] sm:$0xf0] }
  0x52   :  { %1525 = vmatpush.bf16.msra.mxu3 %v2503_v7  ;;  %v2486_v1 = vld [vmem:[%s4151_s1 + $0x388] sm:$0xf]  ;;  %v2687_v2 = vld [vmem:[%s4151_s1 + $0x394] sm:$0xf0]  ;;  %v2103_v4 = vor.u32 %v2591_v0, %v2102_v62 }
  0x53   :  { %1427 = vmatpush.bf16.msra.mxu1 %v2247_v33  ;;  %v2623_v31 = vld [vmem:[%s4151_s1 + $0x194] sm:$0xf0]  ;;  %v2086_v62 = vld [vmem:[%s4151_s1 + $0x68] sm:$0xf] }
  0x54   :  { %1007 = vmatmul.bf16.gmra.mxu0 %v3165_v12  ;;  %1056 = vmatmul.bf16.gmra.mxu1 %v3167_v13  ;;  %v2587_v0 = vld [vmem:[%s4151_s1 + $0x74] sm:$0xf0] }
  0x55   :  { %1105 = vmatmul.bf16.gmra.mxu2 %v3169_v14  ;;  %1379 = vmatpush.bf16.msra.mxu0 %v2103_v4  ;;  %v2087_v4 = vor.u32 %v2587_v0, %v2086_v62  ;;  %v2326_v62 = vld [vmem:[%s4151_s1 + $0x248] sm:$0xf] }
  0x56   :  { %1154 = vmatmul.bf16.gmra.mxu3 %v3171_v15  ;;  %v2070_v0 = vld [vmem:[%s4151_s1 + $0x48] sm:$0xf] }
  0x59   :  { %1380 = vmatpush.bf16.msra.mxu0 %v2087_v4  ;;  %v2679_v4 = vld [vmem:[%s4151_s1 + $0x354] sm:$0xf0] }
  0x64   :  { %1012 = vmatmul.bf16.gmra.mxu0 %v3225_v40  ;;  %1061 = vmatmul.bf16.gmra.mxu1 %v3227_v41 }
  0x65   :  { %1110 = vmatmul.bf16.gmra.mxu2 %v3229_v42 }
  0x66   :  { %1159 = vmatmul.bf16.gmra.mxu3 %v3231_v43 }
  0x74   :  { %1017 = vmatmul.bf16.gmra.mxu0 %v3285_v8  ;;  %1066 = vmatmul.bf16.gmra.mxu1 %v3287_v9 }
  0x75   :  { %1115 = vmatmul.bf16.gmra.mxu2 %v3289_v10 }
  0x76   :  { %1164 = vmatmul.bf16.gmra.mxu3 %v3291_v11 }
  0x84   :  { %1022 = vmatmul.bf16.gmra.mxu0 %v3345_v44  ;;  %1071 = vmatmul.bf16.gmra.mxu1 %v3347_v45 }
  0x85   :  { %1120 = vmatmul.bf16.gmra.mxu2 %v3349_v46 }
  0x86   :  { %1169 = vmatmul.bf16.gmra.mxu3 %v3351_v47 }
  0x94   :  { %1027 = vmatmul.bf16.gmra.mxu0 %v3405_v20  ;;  %1076 = vmatmul.bf16.gmra.mxu1 %v3407_v21 }
  0x95   :  { %1125 = vmatmul.bf16.gmra.mxu2 %v3409_v22 }
  0x96   :  { %1174 = vmatmul.bf16.gmra.mxu3 %v3411_v23 }
  0xa1   :  { %v993_v58 = vpop.f32.mrf.mxu0  ;;  %v1042_v60 = vpop.f32.mrf.mxu1 }
  0xa2   :  { %v994_v59 = vadd.f32 %v993_v58, %v3447_v55 }
  0xa4   :  { %v1043_v61 = vadd.f32 %v1042_v60, %v994_v59  ;;  %1188 = vmatmul.bf16.vlgmr.msrb.gmra.mxu0 %v2958_v48  ;;  %1237 = vmatmul.bf16.vlgmr.msrb.gmra.mxu1 %v2969_v53  ;;  %v2358_v60 = vld [vmem:[%s4151_s1 + $0x288] sm:$0xf] }
  0xa5   :  { %1286 = vmatmul.bf16.vlgmr.msrb.gmra.mxu2 %v2971_v54 }
  0xa6   :  { %1335 = vmatmul.bf16.vlgmr.msrb.gmra.mxu3 %v2979_v57 }
  0xa8   :  { %v1091_v5 = vpop.f32.mrf.mxu2 }
  0xa9   :  { %v1092_v16 = vadd.f32 %v1091_v5, %v1043_v61  ;;  %v1140_v17 = vpop.f32.mrf.mxu3  ;;  %v995_v18 = vpop.f32.mrf.mxu0  ;;  %v2655_v61 = vld [vmem:[%s4151_s1 + $0x294] sm:$0xf0]  ;;  %v2487_v5 = vor.u32 %v2687_v2, %v2486_v1  ;;  %v2470_v1 = vld [vmem:[%s4151_s1 + $0x368] sm:$0xf] }
  0xaa   :  { %v996_v19 = vadd.f32 %v995_v18, %v3447_v55  ;;  %v1044_v28 = vpop.f32.mrf.mxu1  ;;  %v2359_v63 = vor.u32 %v2655_v61, %v2358_v60  ;;  %v2342_v60 = vld [vmem:[%s4151_s1 + $0x268] sm:$0xf]  ;;  %v2651_v61 = vld [vmem:[%s4151_s1 + $0x274] sm:$0xf0] }
  0xab   :  { %v3473_v29 = vadd.f32 %v1140_v17, %v1092_v16  ;;  %1526 = vmatpush.bf16.msra.mxu3 %v2487_v5  ;;  %v2683_v2 = vld [vmem:[%s4151_s1 + $0x374] sm:$0xf0] }
  0xac   :  { %v1045_v30 = vadd.f32 %v1044_v28, %v996_v19  ;;  %1477 = vmatpush.bf16.msra.mxu2 %v2359_v63  ;;  %v2343_v63 = vor.u32 %v2651_v61, %v2342_v60  ;;  %v2471_v5 = vor.u32 %v2683_v2, %v2470_v1  ;;  %v2583_v2 = vld [vmem:[%s4151_s1 + $0x54] sm:$0xf0] }
  0xaf   :  { %1527 = vmatpush.bf16.msra.mxu3 %v2471_v5 }
  0xb0   :  { %v1093_v34 = vpop.f32.mrf.mxu2  ;;  %1478 = vmatpush.bf16.msra.mxu2 %v2343_v63  ;;  %v2647_v63 = vld [vmem:[%s4151_s1 + $0x254] sm:$0xf0] }
  0xb1   :  { %v1094_v35 = vadd.f32 %v1093_v34, %v1045_v30  ;;  %v1142_v36 = vpop.f32.mrf.mxu3  ;;  %v998_v38 = vpop.f32.mrf.mxu0  ;;  %v2230_v30 = vld [vmem:[%s4151_s1 + $0x188] sm:$0xf]  ;;  %v2327_v1 = vor.u32 %v2647_v63, %v2326_v62 }
  0xb2   :  { %v999_v39 = vadd.f32 %v998_v38, %v3447_v55  ;;  %v1047_v56 = vpop.f32.mrf.mxu1  ;;  %v2231_v32 = vor.u32 %v2623_v31, %v2230_v30  ;;  %v2214_v31 = vld [vmem:[%s4151_s1 + $0x168] sm:$0xf] }
  0xb3   :  { %v3482_v58 = vadd.f32 %v1142_v36, %v1094_v35 }
  0xb4   :  { %v1048_v59 = vadd.f32 %v1047_v56, %v999_v39  ;;  %1193 = vmatmul.bf16.gmra.mxu0 %v3045_v24  ;;  %1242 = vmatmul.bf16.gmra.mxu1 %v3047_v25 }
  0xb5   :  { %1291 = vmatmul.bf16.gmra.mxu2 %v3049_v26  ;;  %1428 = vmatpush.bf16.msra.mxu1 %v2231_v32  ;;  %v2619_v32 = vld [vmem:[%s4151_s1 + $0x174] sm:$0xf0] }
  0xb6   :  { %1340 = vmatmul.bf16.gmra.mxu3 %v3051_v27  ;;  %1479 = vmatpush.bf16.msra.mxu2 %v2327_v1 }
  0xb8   :  { %v1096_v3 = vpop.f32.mrf.mxu2 }
  0xb9   :  { %v1097_v6 = vadd.f32 %v1096_v3, %v1048_v59  ;;  %v1145_v7 = vpop.f32.mrf.mxu3  ;;  %v1000_v16 = vpop.f32.mrf.mxu0 }
  0xba   :  { %v1001_v17 = vadd.f32 %v1000_v16, %v3447_v55  ;;  %v1049_v18 = vpop.f32.mrf.mxu1 }
  0xbb   :  { %v3507_v19 = vadd.f32 %v1145_v7, %v1097_v6 }
  0xbc   :  { %v1050_v28 = vadd.f32 %v1049_v18, %v1001_v17 }
  0xc0   :  { %v1098_v33 = vpop.f32.mrf.mxu2 }
  0xc1   :  { %v1099_v34 = vadd.f32 %v1098_v33, %v1050_v28  ;;  %v1147_v35 = vpop.f32.mrf.mxu3  ;;  %v1003_v36 = vpop.f32.mrf.mxu0  ;;  %v2215_v33 = vor.u32 %v2619_v32, %v2214_v31 }
  0xc2   :  { %v1004_v38 = vadd.f32 %v1003_v36, %v3447_v55  ;;  %v1052_v39 = vpop.f32.mrf.mxu1 }
  0xc3   :  { %v3516_v56 = vadd.f32 %v1147_v35, %v1099_v34  ;;  %1429 = vmatpush.bf16.msra.mxu1 %v2215_v33 }
  0xc4   :  { %v1053_v59 = vadd.f32 %v1052_v39, %v1004_v38  ;;  %1198 = vmatmul.bf16.gmra.mxu0 %v3105_v49  ;;  %1247 = vmatmul.bf16.gmra.mxu1 %v3107_v50 }
  0xc5   :  { %1296 = vmatmul.bf16.gmra.mxu2 %v3109_v51 }
  0xc6   :  { %1345 = vmatmul.bf16.gmra.mxu3 %v3111_v52 }
  0xc8   :  { %v1101_v3 = vpop.f32.mrf.mxu2 }
  0xc9   :  { %v1102_v6 = vadd.f32 %v1101_v3, %v1053_v59  ;;  %v1150_v7 = vpop.f32.mrf.mxu3  ;;  %v1005_v16 = vpop.f32.mrf.mxu0  ;;  %v2454_v3 = vld [vmem:[%s4151_s1 + $0x348] sm:$0xf] }
  0xca   :  { %v1006_v17 = vadd.f32 %v1005_v16, %v3447_v55  ;;  %v1054_v18 = vpop.f32.mrf.mxu1 }
  0xcb   :  { %v3541_v28 = vadd.f32 %v1150_v7, %v1102_v6  ;;  %v2071_v6 = vor.u32 %v2583_v2, %v2070_v0  ;;  %v2455_v7 = vor.u32 %v2679_v4, %v2454_v3  ;;  %v2310_v2 = vld [vmem:[%s4151_s1 + $0x228] sm:$0xf]  ;;  %v2643_v3 = vld [vmem:[%s4151_s1 + $0x234] sm:$0xf0] }
  0xcc   :  { %v1055_v30 = vadd.f32 %v1054_v18, %v1006_v17  ;;  %v2054_v4 = vld [vmem:[%s4151_s1 + $0x28] sm:$0xf] }
  0xcd   :  { %1381 = vmatpush.bf16.msra.mxu0 %v2071_v6  ;;  %1528 = vmatpush.bf16.msra.mxu3 %v2455_v7  ;;  %v2579_v6 = vld [vmem:[%s4151_s1 + $0x34] sm:$0xf0]  ;;  %v2438_v7 = vld [vmem:[%s4151_s1 + $0x328] sm:$0xf] }
  0xd0   :  { %v1103_v34 = vpop.f32.mrf.mxu2 }
  0xd1   :  { %v1104_v35 = vadd.f32 %v1103_v34, %v1055_v30  ;;  %v1152_v36 = vpop.f32.mrf.mxu3  ;;  %v1008_v38 = vpop.f32.mrf.mxu0  ;;  %v2198_v34 = vld [vmem:[%s4151_s1 + $0x148] sm:$0xf] }
  0xd2   :  { %v1009_v39 = vadd.f32 %v1008_v38, %v3447_v55  ;;  %v1057_v59 = vpop.f32.mrf.mxu1 }
  0xd3   :  { %v3550_v60 = vadd.f32 %v1152_v36, %v1104_v35  ;;  %v2615_v35 = vld [vmem:[%s4151_s1 + $0x154] sm:$0xf0] }
  0xd4   :  { %v1058_v61 = vadd.f32 %v1057_v59, %v1009_v39  ;;  %1203 = vmatmul.bf16.gmra.mxu0 %v3165_v12  ;;  %1252 = vmatmul.bf16.gmra.mxu1 %v3167_v13  ;;  %v2199_v36 = vor.u32 %v2615_v35, %v2198_v34 }
  0xd5   :  { %1301 = vmatmul.bf16.gmra.mxu2 %v3169_v14 }
  0xd6   :  { %1350 = vmatmul.bf16.gmra.mxu3 %v3171_v15  ;;  %1430 = vmatpush.bf16.msra.mxu1 %v2199_v36 }
  0xd8   :  { %v1106_v5 = vpop.f32.mrf.mxu2 }
  0xd9   :  { %v1107_v16 = vadd.f32 %v1106_v5, %v1058_v61  ;;  %v1155_v17 = vpop.f32.mrf.mxu3  ;;  %v1010_v18 = vpop.f32.mrf.mxu0  ;;  %v2311_v5 = vor.u32 %v2643_v3, %v2310_v2 }
  0xda   :  { %v1011_v30 = vadd.f32 %v1010_v18, %v3447_v55  ;;  %v1059_v31 = vpop.f32.mrf.mxu1  ;;  %v2055_v18 = vor.u32 %v2579_v6, %v2054_v4 }
  0xdb   :  { %v3575_v32 = vadd.f32 %v1155_v17, %v1107_v16  ;;  %v2675_v16 = vld [vmem:[%s4151_s1 + $0x334] sm:$0xf0]  ;;  %1480 = vmatpush.bf16.msra.mxu2 %v2311_v5 }
  0xdc   :  { %v1060_v33 = vadd.f32 %v1059_v31, %v1011_v30  ;;  %v2439_v30 = vor.u32 %v2675_v16, %v2438_v7  ;;  %1382 = vmatpush.bf16.msra.mxu0 %v2055_v18  ;;  %v2294_v16 = vld [vmem:[%s4151_s1 + $0x208] sm:$0xf] }
  0xdd   :  { %v2038_v18 = vld [vmem:[%s4151_s1 + $0x8] sm:$0xf] }
  0xde   :  { %1529 = vmatpush.bf16.msra.mxu3 %v2439_v30 }
  0xe0   :  { %v1108_v38 = vpop.f32.mrf.mxu2 }
  0xe1   :  { %v1109_v39 = vadd.f32 %v1108_v38, %v1060_v33  ;;  %v1157_v59 = vpop.f32.mrf.mxu3  ;;  %v1013_v61 = vpop.f32.mrf.mxu0 }
  0xe2   :  { %v1014_v62 = vadd.f32 %v1013_v61, %v3447_v55  ;;  %v1062_v63 = vpop.f32.mrf.mxu1  ;;  %v2611_v61 = vld [vmem:[%s4151_s1 + $0x134] sm:$0xf0] }
  0xe3   :  { %v3584_v0 = vadd.f32 %v1157_v59, %v1109_v39  ;;  %v2182_v59 = vld [vmem:[%s4151_s1 + $0x128] sm:$0xf] }
  0xe4   :  { %v1063_v1 = vadd.f32 %v1062_v63, %v1014_v62  ;;  %1208 = vmatmul.bf16.gmra.mxu0 %v3225_v40  ;;  %1257 = vmatmul.bf16.gmra.mxu1 %v3227_v41  ;;  %v2183_v62 = vor.u32 %v2611_v61, %v2182_v59 }
  0xe5   :  { %1306 = vmatmul.bf16.gmra.mxu2 %v3229_v42 }
  0xe6   :  { %1355 = vmatmul.bf16.gmra.mxu3 %v3231_v43  ;;  %1431 = vmatpush.bf16.msra.mxu1 %v2183_v62 }
  0xe8   :  { %v1111_v17 = vpop.f32.mrf.mxu2 }
  0xe9   :  { %v1112_v31 = vadd.f32 %v1111_v17, %v1063_v1  ;;  %v1160_v33 = vpop.f32.mrf.mxu3  ;;  %v1015_v34 = vpop.f32.mrf.mxu0  ;;  %v2639_v17 = vld [vmem:[%s4151_s1 + $0x214] sm:$0xf0] }
  0xea   :  { %v1016_v35 = vadd.f32 %v1015_v34, %v3447_v55  ;;  %v1064_v36 = vpop.f32.mrf.mxu1  ;;  %v2295_v30 = vor.u32 %v2639_v17, %v2294_v16  ;;  %v2671_v34 = vld [vmem:[%s4151_s1 + $0x314] sm:$0xf0] }
  0xeb   :  { %v3609_v38 = vadd.f32 %v1160_v33, %v1112_v31  ;;  %v2575_v31 = vld [vmem:[%s4151_s1 + $0x14] sm:$0xf0]  ;;  %v2422_v33 = vld [vmem:[%s4151_s1 + $0x308] sm:$0xf] }
  0xec   :  { %v1065_v39 = vadd.f32 %v1064_v36, %v1016_v35  ;;  %v2039_v36 = vor.u32 %v2575_v31, %v2038_v18  ;;  %1481 = vmatpush.bf16.msra.mxu2 %v2295_v30 }
  0xee   :  { %1383 = vmatpush.bf16.msra.mxu0 %v2039_v36  ;;  %v2665_v36 = vld [vmem:[%s4151_s1 + $0x2ec] sm:$0xf] }
  0xf0   :  { %v1113_v63 = vpop.f32.mrf.mxu2 }
  0xf1   :  { %v1114_v1 = vadd.f32 %v1113_v63, %v1065_v39  ;;  %v1162_v2 = vpop.f32.mrf.mxu3  ;;  %v1018_v3 = vpop.f32.mrf.mxu0  ;;  %v2423_v39 = vor.u32 %v2671_v34, %v2422_v33 }
  0xf2   :  { %v1019_v4 = vadd.f32 %v1018_v3, %v3447_v55  ;;  %v1067_v5 = vpop.f32.mrf.mxu1 }
  0xf3   :  { %v3618_v6 = vadd.f32 %v1162_v2, %v1114_v1  ;;  %1530 = vmatpush.bf16.msra.mxu3 %v2423_v39  ;;  %v2408_v39 = vld [vmem:[%s4151_s1 + $0x2f8] sm:$0xf0] }
  0xf4   :  { %v1068_v7 = vadd.f32 %v1067_v5, %v1019_v4  ;;  %1213 = vmatmul.bf16.gmra.mxu0 %v3285_v8  ;;  %1262 = vmatmul.bf16.gmra.mxu1 %v3287_v9  ;;  %v2166_v4 = vld [vmem:[%s4151_s1 + $0x108] sm:$0xf]  ;;  %v2607_v5 = vld [vmem:[%s4151_s1 + $0x114] sm:$0xf0] }
  0xf5   :  { %1311 = vmatmul.bf16.gmra.mxu2 %v3289_v10 }
  0xf6   :  { %1360 = vmatmul.bf16.gmra.mxu3 %v3291_v11 }
  0xf8   :  { %v1116_v35 = vpop.f32.mrf.mxu2 }
  0xf9   :  { %v1117_v59 = vadd.f32 %v1116_v35, %v1068_v7  ;;  %v1165_v61 = vpop.f32.mrf.mxu3  ;;  %v1020_v62 = vpop.f32.mrf.mxu0  ;;  %v2167_v7 = vor.u32 %v2607_v5, %v2166_v4 }
  0xfa   :  { %v1021_v63 = vadd.f32 %v1020_v62, %v3447_v55  ;;  %v1069_v1 = vpop.f32.mrf.mxu1  ;;  %v2152_v62 = vld [vmem:[%s4151_s1 + $0xf8] sm:$0xf0] }
  0xfb   :  { %v3643_v2 = vadd.f32 %v1165_v61, %v1117_v59  ;;  %1432 = vmatpush.bf16.msra.mxu1 %v2167_v7  ;;  %v2601_v59 = vld [vmem:[%s4151_s1 + $0xec] sm:$0xf]  ;;  %v2411_v61 = vor.u32 %v2665_v36, %v2408_v39 }
  0xfc   :  { %v1070_v3 = vadd.f32 %v1069_v1, %v1021_v63  ;;  %v2697_v63 = vld [vmem:[%s4151_s1 + $0x3ec] sm:$0xf]  ;;  %v2536_v1 = vld [vmem:[%s4151_s1 + $0x3f8] sm:$0xf0]  ;;  %v2155_v4 = vor.u32 %v2601_v59, %v2152_v62 }
  0xfd   :  { %v2539_v5 = vor.u32 %v2697_v63, %v2536_v1  ;;  %1670 = vmatpush.bf16.msrb.mxu2 %v2411_v61  ;;  %v2633_v59 = vld [vmem:[%s4151_s1 + $0x1ec] sm:$0xf] }
  0xfe   :  { %1572 = vmatpush.bf16.msrb.mxu0 %v2155_v4 }
  0xff   :  { %1719 = vmatpush.bf16.msrb.mxu3 %v2539_v5 }
 0x100   :  { %v1118_v16 = vpop.f32.mrf.mxu2 }
 0x101   :  { %v1119_v17 = vadd.f32 %v1118_v16, %v1070_v3  ;;  %v1167_v18 = vpop.f32.mrf.mxu3  ;;  %v1023_v30 = vpop.f32.mrf.mxu0 }
 0x102   :  { %v1024_v31 = vadd.f32 %v1023_v30, %v3447_v55  ;;  %v1072_v33 = vpop.f32.mrf.mxu1 }
 0x103   :  { %v3652_v34 = vadd.f32 %v1167_v18, %v1119_v17 }
 0x104   :  { %v1073_v35 = vadd.f32 %v1072_v33, %v1024_v31  ;;  %1218 = vmatmul.bf16.gmra.mxu0 %v3345_v44  ;;  %1267 = vmatmul.bf16.gmra.mxu1 %v3347_v45 }
 0x105   :  { %1316 = vmatmul.bf16.gmra.mxu2 %v3349_v46 }
 0x106   :  { %1365 = vmatmul.bf16.gmra.mxu3 %v3351_v47 }
 0x108   :  { %v1121_v3 = vpop.f32.mrf.mxu2 }
 0x109   :  { %v1122_v7 = vadd.f32 %v1121_v3, %v1073_v35  ;;  %v1170_v16 = vpop.f32.mrf.mxu3  ;;  %v1025_v17 = vpop.f32.mrf.mxu0  ;;  %v2280_v35 = vld [vmem:[%s4151_s1 + $0x1f8] sm:$0xf0] }
 0x10a   :  { %v1026_v18 = vadd.f32 %v1025_v17, %v3447_v55  ;;  %v1074_v30 = vpop.f32.mrf.mxu1  ;;  %v2283_v63 = vor.u32 %v2633_v59, %v2280_v35  ;;  %v2597_v17 = vld [vmem:[%s4151_s1 + $0xcc] sm:$0xf]  ;;  %v2520_v59 = vld [vmem:[%s4151_s1 + $0x3d8] sm:$0xf0] }
 0x10b   :  { %v3677_v31 = vadd.f32 %v1170_v16, %v1122_v7 }
 0x10c   :  { %v1075_v33 = vadd.f32 %v1074_v30, %v1026_v18  ;;  %1621 = vmatpush.bf16.msrb.mxu1 %v2283_v63 }
 0x110   :  { %v1123_v36 = vpop.f32.mrf.mxu2 }
 0x111   :  { %v1124_v39 = vadd.f32 %v1123_v36, %v1075_v33  ;;  %v1172_v47 = vpop.f32.mrf.mxu3  ;;  %v1028_v46 = vpop.f32.mrf.mxu0  ;;  %v2136_v36 = vld [vmem:[%s4151_s1 + $0xd8] sm:$0xf0] }
 0x112   :  { %v1029_v61 = vadd.f32 %v1028_v46, %v3447_v55  ;;  %v1077_v62 = vpop.f32.mrf.mxu1  ;;  %v2661_v46 = vld [vmem:[%s4151_s1 + $0x2cc] sm:$0xf] }
 0x113   :  { %v3686_v1 = vadd.f32 %v1172_v47, %v1124_v39  ;;  %v2392_v47 = vld [vmem:[%s4151_s1 + $0x2d8] sm:$0xf0]  ;;  %v2693_v39 = vld [vmem:[%s4151_s1 + $0x3cc] sm:$0xf] }
 0x114   :  { %v1078_v3 = vadd.f32 %v1077_v62, %v1029_v61  ;;  %1223 = vmatmul.bf16.gmra.mxu0 %v3405_v20  ;;  %1272 = vmatmul.bf16.gmra.mxu1 %v3407_v21  ;;  %v2395_v33 = vor.u32 %v2661_v46, %v2392_v47  ;;  %v2139_v61 = vor.u32 %v2597_v17, %v2136_v36  ;;  %v2629_v47 = vld [vmem:[%s4151_s1 + $0x1cc] sm:$0xf] }
 0x115   :  { %1321 = vmatmul.bf16.gmra.mxu2 %v3409_v22  ;;  %v2523_v62 = vor.u32 %v2693_v39, %v2520_v59 }
 0x116   :  { %1370 = vmatmul.bf16.gmra.mxu3 %v3411_v23  ;;  %1671 = vmatpush.bf16.msrb.mxu2 %v2395_v33 }
 0x117   :  { %1573 = vmatpush.bf16.msrb.mxu0 %v2139_v61  ;;  %1720 = vmatpush.bf16.msrb.mxu3 %v2523_v62  ;;  %v2657_v61 = vld [vmem:[%s4151_s1 + $0x2ac] sm:$0xf]  ;;  %v2376_v62 = vld [vmem:[%s4151_s1 + $0x2b8] sm:$0xf0] }
 0x118   :  { %v1126_v4 = vpop.f32.mrf.mxu2 }
 0x119   :  { %v1127_v5 = vadd.f32 %v1126_v4, %v1078_v3  ;;  %v1175_v7 = vpop.f32.mrf.mxu3  ;;  %v1030_v16 = vpop.f32.mrf.mxu0 }
 0x11a   :  { %v1031_v18 = vadd.f32 %v1030_v16, %v3447_v55  ;;  %v1079_v30 = vpop.f32.mrf.mxu1  ;;  %v3714_v55 = vperm.slane %v3438_v37, 1 }
 0x11b   :  { %v3711_v35 = vadd.f32 %v1175_v7, %v1127_v5  ;;  %v2264_v5 = vld [vmem:[%s4151_s1 + $0x1d8] sm:$0xf0] }
 0x11c   :  { %v1080_v63 = vadd.f32 %v1079_v30, %v1031_v18  ;;  %v2267_v18 = vor.u32 %v2629_v47, %v2264_v5  ;;  %v2504_v47 = vld [vmem:[%s4151_s1 + $0x3b8] sm:$0xf0] }
 0x11e   :  { %1622 = vmatpush.bf16.msrb.mxu1 %v2267_v18 }
 0x120   :  { %v1128_v3 = vpop.f32.mrf.mxu2 }
 0x121   :  { %v1129_v4 = vadd.f32 %v1128_v3, %v1080_v63  ;;  %v1177_v16 = vpop.f32.mrf.mxu3  ;;  %v1189_v46 = vpop.f32.mrf.mxu0  ;;  %v2593_v63 = vld [vmem:[%s4151_s1 + $0xac] sm:$0xf] }
 0x122   :  { %v1190_v7 = vadd.f32 %v1189_v46, %v3714_v55  ;;  %v1238_v17 = vpop.f32.mrf.mxu1  ;;  %v2689_v46 = vld [vmem:[%s4151_s1 + $0x3ac] sm:$0xf] }
 0x123   :  { %v3723_v30 = vadd.f32 %v1177_v16, %v1129_v4  ;;  %v2379_v4 = vor.u32 %v2657_v61, %v2376_v62  ;;  %v2120_v16 = vld [vmem:[%s4151_s1 + $0xb8] sm:$0xf0]  ;;  %v2507_v18 = vor.u32 %v2689_v46, %v2504_v47 }
 0x124   :  { %1384 = vmatmul.bf16.vlgmr.msra.gmra.mxu0 %v2958_v48  ;;  %v1239_v37 = vadd.f32 %v1238_v17, %v1190_v7  ;;  %1433 = vmatmul.bf16.vlgmr.msra.gmra.mxu1 %v2969_v53  ;;  %v2123_v17 = vor.u32 %v2593_v63, %v2120_v16 }
 0x125   :  { %1482 = vmatmul.bf16.vlgmr.msra.gmra.mxu2 %v2971_v54  ;;  %1721 = vmatpush.bf16.msrb.mxu3 %v2507_v18 }
 0x126   :  { %1531 = vmatmul.bf16.vlgmr.msra.gmra.mxu3 %v2979_v57  ;;  %1672 = vmatpush.bf16.msrb.mxu2 %v2379_v4 }
 0x127   :  { %1574 = vmatpush.bf16.msrb.mxu0 %v2123_v17  ;;  %v2360_v17 = vld [vmem:[%s4151_s1 + $0x298] sm:$0xf0] }
 0x128   :  { %v1287_v33 = vpop.f32.mrf.mxu2 }
 0x129   :  { %v1288_v36 = vadd.f32 %v1287_v33, %v1239_v37  ;;  %v1336_v39 = vpop.f32.mrf.mxu3  ;;  %v1191_v59 = vpop.f32.mrf.mxu0  ;;  %v1768_v37 = vmax.f32 %v3473_v29, 0.0  ;;  %v2248_v29 = vld [vmem:[%s4151_s1 + $0x1b8] sm:$0xf0] }
 0x12a   :  { %v1240_v3 = vpop.f32.mrf.mxu1  ;;  %v1192_v7 = vadd.f32 %v1191_v59, %v3714_v55 }
 0x12b   :  { %v1337_v5 = vadd.f32 %v1336_v39, %v1288_v36  ;;  %v2625_v39 = vld [vmem:[%s4151_s1 + $0x1ac] sm:$0xf] }
 0x12c   :  { %v1241_v62 = vadd.f32 %v1240_v3, %v1192_v7  ;;  %v2251_v3 = vor.u32 %v2625_v39, %v2248_v29 }
 0x12d   :  { %v1769_v33 = vmax.f32 %v1337_v5, 0.0 }
 0x12e   :  { %1623 = vmatpush.bf16.msrb.mxu1 %v2251_v3  ;;  %v1776_v3 = vmax.f32 %v3507_v19, 0.0  ;;  %v2232_v19 = vld [vmem:[%s4151_s1 + $0x198] sm:$0xf0] }
 0x12f   :  { %v1832_v61 = vpack.c.bf16 %v1769_v33, %v1768_v37  ;;  %v2589_v33 = vld [vmem:[%s4151_s1 + $0x8c] sm:$0xf] }
 0x130   :  { %v1289_v57 = vpop.f32.mrf.mxu2 }
 0x131   :  { %1864 = vst [vmem:[%s4154_s3] sm:$0xff] %v1832_v61  ;;  %v1290_v54 = vadd.f32 %v1289_v57, %v1241_v62  ;;  %v1338_v53 = vpop.f32.mrf.mxu3  ;;  %v1194_v36 = vpop.f32.mrf.mxu0  ;;  %v1772_v57 = vmax.f32 %v3482_v58, 0.0  ;;  %v2653_v58 = vld [vmem:[%s4151_s1 + $0x28c] sm:$0xf]  ;;  %v2104_v61 = vld [vmem:[%s4151_s1 + $0x98] sm:$0xf0] }
 0x132   :  { %v1195_v59 = vadd.f32 %v1194_v36, %v3714_v55  ;;  %v1243_v63 = vpop.f32.mrf.mxu1  ;;  %v2363_v37 = vor.u32 %v2653_v58, %v2360_v17  ;;  %v2685_v62 = vld [vmem:[%s4151_s1 + $0x38c] sm:$0xf]  ;;  %v2107_v29 = vor.u32 %v2589_v33, %v2104_v61 }
 0x133   :  { %v1339_v4 = vadd.f32 %v1338_v53, %v1290_v54 }
 0x134   :  { %1389 = vmatmul.bf16.gmra.mxu0 %v3045_v24  ;;  %v1244_v46 = vadd.f32 %v1243_v63, %v1195_v59  ;;  %1438 = vmatmul.bf16.gmra.mxu1 %v3047_v25  ;;  %v2488_v59 = vld [vmem:[%s4151_s1 + $0x398] sm:$0xf0] }
 0x135   :  { %v1773_v16 = vmax.f32 %v1339_v4, 0.0  ;;  %1487 = vmatmul.bf16.gmra.mxu2 %v3049_v26  ;;  %v2491_v63 = vor.u32 %v2685_v62, %v2488_v59  ;;  %1575 = vmatpush.bf16.msrb.mxu0 %v2107_v29 }
 0x136   :  { %1536 = vmatmul.bf16.gmra.mxu3 %v3051_v27  ;;  %1673 = vmatpush.bf16.msrb.mxu2 %v2363_v37  ;;  %v1780_v37 = vmax.f32 %v3516_v56, 0.0  ;;  %v2649_v56 = vld [vmem:[%s4151_s1 + $0x26c] sm:$0xf] }
 0x137   :  { %v1834_v47 = vpack.c.bf16 %v1773_v16, %v1772_v57  ;;  %1722 = vmatpush.bf16.msrb.mxu3 %v2491_v63  ;;  %v2344_v63 = vld [vmem:[%s4151_s1 + $0x278] sm:$0xf0] }
 0x138   :  { %v1292_v5 = vpop.f32.mrf.mxu2 }
 0x139   :  { %1866 = vst [vmem:[%s4154_s3 + $0x10] sm:$0xff] %v1834_v47  ;;  %v1293_v53 = vadd.f32 %v1292_v5, %v1244_v46  ;;  %v1341_v54 = vpop.f32.mrf.mxu3  ;;  %v1196_v7 = vpop.f32.mrf.mxu0 }
 0x13a   :  { %v1245_v18 = vpop.f32.mrf.mxu1  ;;  %v1197_v39 = vadd.f32 %v1196_v7, %v3714_v55 }
 0x13b   :  { %v1342_v36 = vadd.f32 %v1341_v54, %v1293_v53  ;;  %v2621_v54 = vld [vmem:[%s4151_s1 + $0x18c] sm:$0xf] }
 0x13c   :  { %v1246_v16 = vadd.f32 %v1245_v18, %v1197_v39  ;;  %v2235_v17 = vor.u32 %v2621_v54, %v2232_v19  ;;  %v2472_v54 = vld [vmem:[%s4151_s1 + $0x378] sm:$0xf0] }
 0x13d   :  { %v1777_v4 = vmax.f32 %v1342_v36, 0.0 }
 0x13e   :  { %1624 = vmatpush.bf16.msrb.mxu1 %v2235_v17 }
 0x13f   :  { %v1836_v57 = vpack.c.bf16 %v1777_v4, %v1776_v3  ;;  %v2347_v4 = vor.u32 %v2649_v56, %v2344_v63  ;;  %v1788_v63 = vmax.f32 %v3550_v60, 0.0  ;;  %v2645_v60 = vld [vmem:[%s4151_s1 + $0x24c] sm:$0xf] }
 0x140   :  { %v1294_v46 = vpop.f32.mrf.mxu2 }
 0x141   :  { %1868 = vst [vmem:[%s4154_s3 + $0x20] sm:$0xff] %v1836_v57  ;;  %v1295_v47 = vadd.f32 %v1294_v46, %v1246_v16  ;;  %v1343_v5 = vpop.f32.mrf.mxu3  ;;  %v1199_v53 = vpop.f32.mrf.mxu0  ;;  %v2585_v57 = vld [vmem:[%s4151_s1 + $0x6c] sm:$0xf]  ;;  %v2088_v16 = vld [vmem:[%s4151_s1 + $0x78] sm:$0xf0]  ;;  %1674 = vmatpush.bf16.msrb.mxu2 %v2347_v4 }
 0x142   :  { %v1200_v7 = vadd.f32 %v1199_v53, %v3714_v55  ;;  %v1248_v58 = vpop.f32.mrf.mxu1  ;;  %v2681_v46 = vld [vmem:[%s4151_s1 + $0x36c] sm:$0xf]  ;;  %v2091_v53 = vor.u32 %v2585_v57, %v2088_v16 }
 0x143   :  { %v1344_v18 = vadd.f32 %v1343_v5, %v1295_v47  ;;  %v2475_v19 = vor.u32 %v2681_v46, %v2472_v54 }
 0x144   :  { %1394 = vmatmul.bf16.gmra.mxu0 %v3105_v49  ;;  %v1249_v61 = vadd.f32 %v1248_v58, %v1200_v7  ;;  %1443 = vmatmul.bf16.gmra.mxu1 %v3107_v50  ;;  %v1784_v7 = vmax.f32 %v3541_v28, 0.0  ;;  %v2216_v28 = vld [vmem:[%s4151_s1 + $0x178] sm:$0xf0] }
 0x145   :  { %v1781_v33 = vmax.f32 %v1344_v18, 0.0  ;;  %1492 = vmatmul.bf16.gmra.mxu2 %v3109_v51  ;;  %1576 = vmatpush.bf16.msrb.mxu0 %v2091_v53  ;;  %v2328_v53 = vld [vmem:[%s4151_s1 + $0x258] sm:$0xf0] }
 0x146   :  { %1541 = vmatmul.bf16.gmra.mxu3 %v3111_v52 }
 0x147   :  { %v1838_v62 = vpack.c.bf16 %v1781_v33, %v1780_v37  ;;  %1723 = vmatpush.bf16.msrb.mxu3 %v2475_v19  ;;  %v2331_v19 = vor.u32 %v2645_v60, %v2328_v53 }
 0x148   :  { %v1297_v36 = vpop.f32.mrf.mxu2 }
 0x149   :  { %1870 = vst [vmem:[%s4154_s3 + $0x30] sm:$0xff] %v1838_v62  ;;  %v1298_v39 = vadd.f32 %v1297_v36, %v1249_v61  ;;  %v1346_v29 = vpop.f32.mrf.mxu3  ;;  %v1201_v59 = vpop.f32.mrf.mxu0  ;;  %v2617_v36 = vld [vmem:[%s4151_s1 + $0x16c] sm:$0xf]  ;;  %1675 = vmatpush.bf16.msrb.mxu2 %v2331_v19 }
 0x14a   :  { %v1250_v3 = vpop.f32.mrf.mxu1  ;;  %v1202_v5 = vadd.f32 %v1201_v59, %v3714_v55  ;;  %v2219_v59 = vor.u32 %v2617_v36, %v2216_v28  ;;  %v1792_v36 = vmax.f32 %v3575_v32, 0.0  ;;  %v2200_v32 = vld [vmem:[%s4151_s1 + $0x158] sm:$0xf0] }
 0x14b   :  { %v1347_v47 = vadd.f32 %v1346_v29, %v1298_v39 }
 0x14c   :  { %v1251_v18 = vadd.f32 %v1250_v3, %v1202_v5  ;;  %1625 = vmatpush.bf16.msrb.mxu1 %v2219_v59 }
 0x14d   :  { %v1785_v58 = vmax.f32 %v1347_v47, 0.0 }
 0x14f   :  { %v1840_v17 = vpack.c.bf16 %v1785_v58, %v1784_v7  ;;  %v2581_v7 = vld [vmem:[%s4151_s1 + $0x4c] sm:$0xf]  ;;  %v2072_v58 = vld [vmem:[%s4151_s1 + $0x58] sm:$0xf0] }
 0x150   :  { %v1299_v37 = vpop.f32.mrf.mxu2 }
 0x151   :  { %1872 = vst [vmem:[%s4154_s3 + $0x40] sm:$0xff] %v1840_v17  ;;  %v1300_v33 = vadd.f32 %v1299_v37, %v1251_v18  ;;  %v1348_v61 = vpop.f32.mrf.mxu3  ;;  %v1204_v62 = vpop.f32.mrf.mxu0  ;;  %v2677_v17 = vld [vmem:[%s4151_s1 + $0x34c] sm:$0xf] }
 0x152   :  { %v1205_v39 = vadd.f32 %v1204_v62, %v3714_v55  ;;  %v1253_v29 = vpop.f32.mrf.mxu1 }
 0x153   :  { %v1349_v56 = vadd.f32 %v1348_v61, %v1300_v33  ;;  %v2075_v33 = vor.u32 %v2581_v7, %v2072_v58  ;;  %v2456_v61 = vld [vmem:[%s4151_s1 + $0x358] sm:$0xf0] }
 0x154   :  { %1399 = vmatmul.bf16.gmra.mxu0 %v3165_v12  ;;  %v1254_v4 = vadd.f32 %v1253_v29, %v1205_v39  ;;  %1448 = vmatmul.bf16.gmra.mxu1 %v3167_v13  ;;  %v2459_v62 = vor.u32 %v2677_v17, %v2456_v61  ;;  %v2577_v61 = vld [vmem:[%s4151_s1 + $0x2c] sm:$0xf] }
 0x155   :  { %v1789_v3 = vmax.f32 %v1349_v56, 0.0  ;;  %1497 = vmatmul.bf16.gmra.mxu2 %v3169_v14  ;;  %1577 = vmatpush.bf16.msrb.mxu0 %v2075_v33 }
 0x156   :  { %1546 = vmatmul.bf16.gmra.mxu3 %v3171_v15 }
 0x157   :  { %v1842_v57 = vpack.c.bf16 %v1789_v3, %v1788_v63  ;;  %1724 = vmatpush.bf16.msrb.mxu3 %v2459_v62  ;;  %v2056_v62 = vld [vmem:[%s4151_s1 + $0x38] sm:$0xf0] }
 0x158   :  { %v1302_v16 = vpop.f32.mrf.mxu2 }
 0x159   :  { %1874 = vst [vmem:[%s4154_s3 + $0x50] sm:$0xff] %v1842_v57  ;;  %v1303_v46 = vadd.f32 %v1302_v16, %v1254_v4  ;;  %v1351_v47 = vpop.f32.mrf.mxu3  ;;  %v1206_v5 = vpop.f32.mrf.mxu0  ;;  %v2613_v4 = vld [vmem:[%s4151_s1 + $0x14c] sm:$0xf] }
 0x15a   :  { %v1255_v54 = vpop.f32.mrf.mxu1  ;;  %v1207_v37 = vadd.f32 %v1206_v5, %v3714_v55  ;;  %v1796_v5 = vmax.f32 %v3584_v0, 0.0  ;;  %v2641_v0 = vld [vmem:[%s4151_s1 + $0x22c] sm:$0xf] }
 0x15b   :  { %v1352_v18 = vadd.f32 %v1351_v47, %v1303_v46  ;;  %v2203_v46 = vor.u32 %v2613_v4, %v2200_v32 }
 0x15c   :  { %v1256_v29 = vadd.f32 %v1255_v54, %v1207_v37 }
 0x15d   :  { %v1793_v28 = vmax.f32 %v1352_v18, 0.0  ;;  %1626 = vmatpush.bf16.msrb.mxu1 %v2203_v46  ;;  %v2312_v18 = vld [vmem:[%s4151_s1 + $0x238] sm:$0xf0] }
 0x15e   :  { %v2315_v33 = vor.u32 %v2641_v0, %v2312_v18 }
 0x15f   :  { %v1844_v39 = vpack.c.bf16 %v1793_v28, %v1792_v36  ;;  %v2673_v36 = vld [vmem:[%s4151_s1 + $0x32c] sm:$0xf] }
 0x160   :  { %v1304_v59 = vpop.f32.mrf.mxu2  ;;  %1676 = vmatpush.bf16.msrb.mxu2 %v2315_v33 }
 0x161   :  { %1876 = vst [vmem:[%s4154_s3 + $0x60] sm:$0xff] %v1844_v39  ;;  %v1305_v56 = vadd.f32 %v1304_v59, %v1256_v29  ;;  %v1353_v63 = vpop.f32.mrf.mxu3  ;;  %v1209_v3 = vpop.f32.mrf.mxu0  ;;  %v2059_v29 = vor.u32 %v2577_v61, %v2056_v62  ;;  %v2440_v59 = vld [vmem:[%s4151_s1 + $0x338] sm:$0xf0] }
 0x162   :  { %v1210_v57 = vadd.f32 %v1209_v3, %v3714_v55  ;;  %v1258_v16 = vpop.f32.mrf.mxu1  ;;  %v2296_v62 = vld [vmem:[%s4151_s1 + $0x218] sm:$0xf0] }
 0x163   :  { %v1354_v47 = vadd.f32 %v1353_v63, %v1305_v56  ;;  %v2443_v56 = vor.u32 %v2673_v36, %v2440_v59  ;;  %v1800_v63 = vmax.f32 %v3609_v38, 0.0  ;;  %1578 = vmatpush.bf16.msrb.mxu0 %v2059_v29  ;;  %v2184_v38 = vld [vmem:[%s4151_s1 + $0x138] sm:$0xf0]  ;;  %v2669_v59 = vld [vmem:[%s4151_s1 + $0x30c] sm:$0xf] }
 0x164   :  { %1404 = vmatmul.bf16.gmra.mxu0 %v3225_v40  ;;  %v1259_v53 = vadd.f32 %v1258_v16, %v1210_v57  ;;  %1453 = vmatmul.bf16.gmra.mxu1 %v3227_v41  ;;  %v2040_v29 = vld [vmem:[%s4151_s1 + $0x18] sm:$0xf0] }
 0x165   :  { %v1797_v60 = vmax.f32 %v1354_v47, 0.0  ;;  %1502 = vmatmul.bf16.gmra.mxu2 %v3229_v42  ;;  %1725 = vmatpush.bf16.msrb.mxu3 %v2443_v56 }
 0x166   :  { %1551 = vmatmul.bf16.gmra.mxu3 %v3231_v43 }
 0x167   :  { %v1846_v54 = vpack.c.bf16 %v1797_v60, %v1796_v5  ;;  %v2609_v5 = vld [vmem:[%s4151_s1 + $0x12c] sm:$0xf] }
 0x168   :  { %v1307_v19 = vpop.f32.mrf.mxu2 }
 0x169   :  { %1878 = vst [vmem:[%s4154_s3 + $0x70] sm:$0xff] %v1846_v54  ;;  %v1308_v7 = vadd.f32 %v1307_v19, %v1259_v53  ;;  %v1356_v58 = vpop.f32.mrf.mxu3  ;;  %v1211_v17 = vpop.f32.mrf.mxu0  ;;  %v2187_v54 = vor.u32 %v2609_v5, %v2184_v38  ;;  %v2605_v38 = vld [vmem:[%s4151_s1 + $0x10c] sm:$0xf] }
 0x16a   :  { %v1260_v37 = vpop.f32.mrf.mxu1  ;;  %v1212_v39 = vadd.f32 %v1211_v17, %v3714_v55 }
 0x16b   :  { %v1357_v28 = vadd.f32 %v1356_v58, %v1308_v7  ;;  %1627 = vmatpush.bf16.msrb.mxu1 %v2187_v54  ;;  %v1804_v7 = vmax.f32 %v3618_v6, 0.0  ;;  %v2637_v6 = vld [vmem:[%s4151_s1 + $0x20c] sm:$0xf] }
 0x16c   :  { %v1261_v32 = vadd.f32 %v1260_v37, %v1212_v39  ;;  %v2573_v39 = vld [vmem:[%s4151_s1 + $0xc] sm:$0xf] }
 0x16d   :  { %v1801_v3 = vmax.f32 %v1357_v28, 0.0  ;;  %v2299_v28 = vor.u32 %v2637_v6, %v2296_v62 }
 0x16f   :  { %v1848_v4 = vpack.c.bf16 %v1801_v3, %v1800_v63  ;;  %v2043_v3 = vor.u32 %v2573_v39, %v2040_v29  ;;  %1677 = vmatpush.bf16.msrb.mxu2 %v2299_v28 }
 0x170   :  { %v1309_v57 = vpop.f32.mrf.mxu2 }
 0x171   :  { %1880 = vst [vmem:[%s4154_s3 + $0x80] sm:$0xff] %v1848_v4  ;;  %v1310_v16 = vadd.f32 %v1309_v57, %v1261_v32  ;;  %v1358_v46 = vpop.f32.mrf.mxu3  ;;  %v1214_v47 = vpop.f32.mrf.mxu0  ;;  %v2424_v4 = vld [vmem:[%s4151_s1 + $0x318] sm:$0xf0]  ;;  %v1808_v57 = vmax.f32 %v3643_v2, 0.0  ;;  %1579 = vmatpush.bf16.msrb.mxu0 %v2043_v3 }
 0x172   :  { %v1215_v60 = vadd.f32 %v1214_v47, %v3714_v55  ;;  %v1263_v53 = vpop.f32.mrf.mxu1  ;;  %v2427_v32 = vor.u32 %v2669_v59, %v2424_v4 }
 0x173   :  { %v1359_v19 = vadd.f32 %v1358_v46, %v1310_v16 }
 0x174   :  { %1409 = vmatmul.bf16.gmra.mxu0 %v3285_v8  ;;  %v1264_v17 = vadd.f32 %v1263_v53, %v1215_v60  ;;  %1458 = vmatmul.bf16.gmra.mxu1 %v3287_v9  ;;  %v2168_v60 = vld [vmem:[%s4151_s1 + $0x118] sm:$0xf0] }
 0x175   :  { %v1805_v58 = vmax.f32 %v1359_v19, 0.0  ;;  %1507 = vmatmul.bf16.gmra.mxu2 %v3289_v10  ;;  %1726 = vmatpush.bf16.msrb.mxu3 %v2427_v32  ;;  %v2171_v19 = vor.u32 %v2605_v38, %v2168_v60  ;;  %v1820_v60 = vmax.f32 %v3686_v1, 0.0 }
 0x176   :  { %1556 = vmatmul.bf16.gmra.mxu3 %v3291_v11 }
 0x177   :  { %v1850_v0 = vpack.c.bf16 %v1805_v58, %v1804_v7  ;;  %1628 = vmatpush.bf16.msrb.mxu1 %v2171_v19 }
 0x178   :  { %v1312_v18 = vpop.f32.mrf.mxu2 }
 0x179   :  { %1882 = vst [vmem:[%s4154_s3 + $0x90] sm:$0xff] %v1850_v0  ;;  %v1313_v37 = vadd.f32 %v1312_v18, %v1264_v17  ;;  %v1361_v33 = vpop.f32.mrf.mxu3  ;;  %v1216_v61 = vpop.f32.mrf.mxu0  ;;  %v1812_v0 = vmax.f32 %v3652_v34, 0.0 }
 0x17a   :  { %v1265_v36 = vpop.f32.mrf.mxu1  ;;  %v1217_v63 = vadd.f32 %v1216_v61, %v3714_v55  ;;  %v4168_v61 = vld [vmem:[#allocation6_spill] sm:$0xff] }
 0x17b   :  { %v1362_v56 = vadd.f32 %v1361_v33, %v1313_v37  ;;  %v4167_v33 = vld [vmem:[#allocation5_spill] sm:$0xff] }
 0x17c   :  { %v1266_v47 = vadd.f32 %v1265_v36, %v1217_v63 }
 0x17d   :  { %v1809_v16 = vmax.f32 %v1362_v56, 0.0  ;;  %v1816_v56 = vmax.f32 %v3677_v31, 0.0 }
 0x17f   :  { %v1852_v46 = vpack.c.bf16 %v1809_v16, %v1808_v57 }
 0x180   :  { %v1314_v5 = vpop.f32.mrf.mxu2 }
 0x181   :  { %1884 = vst [vmem:[%s4154_s3 + $0xa0] sm:$0xff] %v1852_v46  ;;  %v1315_v53 = vadd.f32 %v1314_v5, %v1266_v47  ;;  %v1363_v2 = vpop.f32.mrf.mxu3  ;;  %v1219_v54 = vpop.f32.mrf.mxu0 }
 0x182   :  { %v1220_v7 = vadd.f32 %v1219_v54, %v3714_v55  ;;  %v1268_v58 = vpop.f32.mrf.mxu1 }
 0x183   :  { %v1364_v17 = vadd.f32 %v1363_v2, %v1315_v53 }
 0x184   :  { %1414 = vmatmul.bf16.gmra.mxu0 %v3345_v44  ;;  %v1269_v37 = vadd.f32 %v1268_v58, %v1220_v7  ;;  %1463 = vmatmul.bf16.gmra.mxu1 %v3347_v45 }
 0x185   :  { %v1813_v18 = vmax.f32 %v1364_v17, 0.0  ;;  %1512 = vmatmul.bf16.gmra.mxu2 %v4167_v33 }
 0x186   :  { %1561 = vmatmul.bf16.gmra.mxu3 %v4168_v61 }
 0x187   :  { %v1854_v6 = vpack.c.bf16 %v1813_v18, %v1812_v0  ;;  %v1824_v18 = vmax.f32 %v3711_v35, 0.0 }
 0x188   :  { %v1317_v62 = vpop.f32.mrf.mxu2 }
 0x189   :  { %1886 = vst [vmem:[%s4154_s3 + $0xb0] sm:$0xff] %v1854_v6  ;;  %v1318_v36 = vadd.f32 %v1317_v62, %v1269_v37  ;;  %v1366_v28 = vpop.f32.mrf.mxu3  ;;  %v1221_v39 = vpop.f32.mrf.mxu0  ;;  %v3976_v6 = vld [vmem:[%s4153_s2] sm:$0xf] }
 0x18a   :  { %v1270_v29 = vpop.f32.mrf.mxu1  ;;  %v1222_v34 = vadd.f32 %v1221_v39, %v3714_v55  ;;  %v3979_v62 = vperm.slane %v3976_v6, 2 }
 0x18b   :  { %v1367_v59 = vadd.f32 %v1366_v28, %v1318_v36 }
 0x18c   :  { %v1271_v4 = vadd.f32 %v1270_v29, %v1222_v34 }
 0x18d   :  { %v1817_v63 = vmax.f32 %v1367_v59, 0.0 }
 0x18f   :  { %v1856_v3 = vpack.c.bf16 %v1817_v63, %v1816_v56 }
 0x190   :  { %v1319_v32 = vpop.f32.mrf.mxu2 }
 0x191   :  { %1888 = vst [vmem:[%s4154_s3 + $0xc0] sm:$0xff] %v1856_v3  ;;  %v1320_v57 = vadd.f32 %v1319_v32, %v1271_v4  ;;  %v1368_v16 = vpop.f32.mrf.mxu3  ;;  %v1224_v46 = vpop.f32.mrf.mxu0  ;;  %v1828_v3 = vmax.f32 %v3723_v30, 0.0  ;;  %v4169_v32 = vld [vmem:[#allocation2_spill] sm:$0xff] }
 0x192   :  { %v1225_v47 = vadd.f32 %v1224_v46, %v3714_v55  ;;  %v1273_v5 = vpop.f32.mrf.mxu1 }
 0x193   :  { %v1369_v38 = vadd.f32 %v1368_v16, %v1320_v57  ;;  %v4170_v57 = vld [vmem:[#allocation3_spill] sm:$0xff]  ;;  %v4171_v16 = vld [vmem:[#allocation4_spill] sm:$0xff] }
 0x194   :  { %1419 = vmatmul.bf16.gmra.mxu0 %v3405_v20  ;;  %v1274_v53 = vadd.f32 %v1273_v5, %v1225_v47  ;;  %1468 = vmatmul.bf16.gmra.mxu1 %v3407_v21 }
 0x195   :  { %v1821_v31 = vmax.f32 %v1369_v38, 0.0  ;;  %1517 = vmatmul.bf16.gmra.mxu2 %v3409_v22 }
 0x196   :  { %1566 = vmatmul.bf16.gmra.mxu3 %v3411_v23 }
 0x197   :  { %v1858_v2 = vpack.c.bf16 %v1821_v31, %v1820_v60 }
 0x198   :  { %v1322_v54 = vpop.f32.mrf.mxu2 }
 0x199   :  { %1890 = vst [vmem:[%s4154_s3 + $0xd0] sm:$0xff] %v1858_v2  ;;  %v1323_v19 = vadd.f32 %v1322_v54, %v1274_v53  ;;  %v1371_v7 = vpop.f32.mrf.mxu3  ;;  %v1226_v58 = vpop.f32.mrf.mxu0 }
 0x19a   :  { %v1275_v17 = vpop.f32.mrf.mxu1  ;;  %v1227_v1 = vadd.f32 %v1226_v58, %v3714_v55 }
 0x19b   :  { %v1372_v0 = vadd.f32 %v1371_v7, %v1323_v19 }
 0x19c   :  { %v1276_v28 = vadd.f32 %v1275_v17, %v1227_v1 }
 0x19d   :  { %v1825_v37 = vmax.f32 %v1372_v0, 0.0 }
 0x19f   :  { %v1860_v36 = vpack.c.bf16 %v1825_v37, %v1824_v18 }
 0x1a0   :  { %v1324_v39 = vpop.f32.mrf.mxu2 }
 0x1a1   :  { %1892 = vst [vmem:[%s4154_s3 + $0xe0] sm:$0xff] %v1860_v36  ;;  %v1325_v29 = vadd.f32 %v1324_v39, %v1276_v28  ;;  %v1373_v55 = vpop.f32.mrf.mxu3  ;;  %v1385_v59 = vpop.f32.mrf.mxu0 }
 0x1a2   :  { %v1386_v35 = vadd.f32 %v1385_v59, %v3979_v62  ;;  %v1434_v34 = vpop.f32.mrf.mxu1 }
 0x1a3   :  { %v1374_v56 = vadd.f32 %v1373_v55, %v1325_v29 }
 0x1a4   :  { %v1435_v63 = vadd.f32 %v1434_v34, %v1386_v35  ;;  %1580 = vmatmul.bf16.vlgmr.msrb.gmra.mxu0 %v2958_v48  ;;  %1629 = vmatmul.bf16.vlgmr.msrb.gmra.mxu1 %v4169_v32 }
 0x1a5   :  { %v1829_v4 = vmax.f32 %v1374_v56, 0.0  ;;  %1678 = vmatmul.bf16.vlgmr.msrb.gmra.mxu2 %v4170_v57 }
 0x1a6   :  { %1727 = vmatmul.bf16.vlgmr.msrb.gmra.mxu3 %v4171_v16 }
 0x1a7   :  { %v1862_v46 = vpack.c.bf16 %v1829_v4, %v1828_v3 }
 0x1a8   :  { %v1483_v47 = vpop.f32.mrf.mxu2 }
 0x1a9   :  { %1894 = vst [vmem:[%s4154_s3 + $0xf0] sm:$0xff] %v1862_v46  ;;  %v1484_v5 = vadd.f32 %v1483_v47, %v1435_v63  ;;  %v1532_v38 = vpop.f32.mrf.mxu3  ;;  %v1387_v60 = vpop.f32.mrf.mxu0 }
 0x1aa   :  { %v1388_v48 = vadd.f32 %v1387_v60, %v3979_v62  ;;  %v1436_v31 = vpop.f32.mrf.mxu1 }
 0x1ab   :  { %v3994_v30 = vadd.f32 %v1532_v38, %v1484_v5 }
 0x1ac   :  { %v1437_v53 = vadd.f32 %v1436_v31, %v1388_v48 }
 0x1b0   :  { %v1485_v2 = vpop.f32.mrf.mxu2 }
 0x1b1   :  { %v1486_v54 = vadd.f32 %v1485_v2, %v1437_v53  ;;  %v1534_v19 = vpop.f32.mrf.mxu3  ;;  %v1390_v7 = vpop.f32.mrf.mxu0 }
 0x1b2   :  { %v1391_v58 = vadd.f32 %v1390_v7, %v3979_v62  ;;  %v1439_v17 = vpop.f32.mrf.mxu1 }
 0x1b3   :  { %v3997_v0 = vadd.f32 %v1534_v19, %v1486_v54 }
 0x1b4   :  { %v1440_v1 = vadd.f32 %v1439_v17, %v1391_v58  ;;  %1585 = vmatmul.bf16.gmra.mxu0 %v3045_v24  ;;  %1634 = vmatmul.bf16.gmra.mxu1 %v3047_v25 }
 0x1b5   :  { %1683 = vmatmul.bf16.gmra.mxu2 %v3049_v26 }
 0x1b6   :  { %1732 = vmatmul.bf16.gmra.mxu3 %v3051_v27 }
 0x1b8   :  { %v1488_v18 = vpop.f32.mrf.mxu2 }
 0x1b9   :  { %v1489_v37 = vadd.f32 %v1488_v18, %v1440_v1  ;;  %v1537_v36 = vpop.f32.mrf.mxu3  ;;  %v1392_v28 = vpop.f32.mrf.mxu0 }
 0x1ba   :  { %v1393_v39 = vadd.f32 %v1392_v28, %v3979_v62  ;;  %v1441_v29 = vpop.f32.mrf.mxu1 }
 0x1bb   :  { %v4004_v55 = vadd.f32 %v1537_v36, %v1489_v37 }
 0x1bc   :  { %v1442_v59 = vadd.f32 %v1441_v29, %v1393_v39 }
 0x1c0   :  { %v1490_v35 = vpop.f32.mrf.mxu2 }
 0x1c1   :  { %v1491_v34 = vadd.f32 %v1490_v35, %v1442_v59  ;;  %v1539_v56 = vpop.f32.mrf.mxu3  ;;  %v1395_v24 = vpop.f32.mrf.mxu0 }
 0x1c2   :  { %v1396_v25 = vadd.f32 %v1395_v24, %v3979_v62  ;;  %v1444_v63 = vpop.f32.mrf.mxu1 }
 0x1c3   :  { %v4007_v26 = vadd.f32 %v1539_v56, %v1491_v34 }
 0x1c4   :  { %v1445_v27 = vadd.f32 %v1444_v63, %v1396_v25  ;;  %1590 = vmatmul.bf16.gmra.mxu0 %v3105_v49  ;;  %1639 = vmatmul.bf16.gmra.mxu1 %v3107_v50 }
 0x1c5   :  { %1688 = vmatmul.bf16.gmra.mxu2 %v3109_v51 }
 0x1c6   :  { %1737 = vmatmul.bf16.gmra.mxu3 %v3111_v52 }
 0x1c8   :  { %v1493_v3 = vpop.f32.mrf.mxu2 }
 0x1c9   :  { %v1494_v4 = vadd.f32 %v1493_v3, %v1445_v27  ;;  %v1542_v32 = vpop.f32.mrf.mxu3  ;;  %v1397_v57 = vpop.f32.mrf.mxu0 }
 0x1ca   :  { %v1398_v16 = vadd.f32 %v1397_v57, %v3979_v62  ;;  %v1446_v46 = vpop.f32.mrf.mxu1 }
 0x1cb   :  { %v4014_v47 = vadd.f32 %v1542_v32, %v1494_v4 }
 0x1cc   :  { %v1447_v5 = vadd.f32 %v1446_v46, %v1398_v16 }
 0x1d0   :  { %v1495_v38 = vpop.f32.mrf.mxu2 }
 0x1d1   :  { %v1496_v60 = vadd.f32 %v1495_v38, %v1447_v5  ;;  %v1544_v48 = vpop.f32.mrf.mxu3  ;;  %v1400_v49 = vpop.f32.mrf.mxu0 }
 0x1d2   :  { %v1401_v50 = vadd.f32 %v1400_v49, %v3979_v62  ;;  %v1449_v31 = vpop.f32.mrf.mxu1 }
 0x1d3   :  { %v4017_v51 = vadd.f32 %v1544_v48, %v1496_v60 }
 0x1d4   :  { %v1450_v52 = vadd.f32 %v1449_v31, %v1401_v50  ;;  %1595 = vmatmul.bf16.gmra.mxu0 %v3165_v12  ;;  %1644 = vmatmul.bf16.gmra.mxu1 %v3167_v13 }
 0x1d5   :  { %1693 = vmatmul.bf16.gmra.mxu2 %v3169_v14 }
 0x1d6   :  { %1742 = vmatmul.bf16.gmra.mxu3 %v3171_v15 }
 0x1d8   :  { %v1498_v53 = vpop.f32.mrf.mxu2 }
 0x1d9   :  { %v1499_v2 = vadd.f32 %v1498_v53, %v1450_v52  ;;  %v1547_v54 = vpop.f32.mrf.mxu3  ;;  %v1402_v19 = vpop.f32.mrf.mxu0 }
 0x1da   :  { %v1403_v7 = vadd.f32 %v1402_v19, %v3979_v62  ;;  %v1451_v58 = vpop.f32.mrf.mxu1 }
 0x1db   :  { %v4024_v17 = vadd.f32 %v1547_v54, %v1499_v2 }
 0x1dc   :  { %v1452_v1 = vadd.f32 %v1451_v58, %v1403_v7 }
 0x1e0   :  { %v1500_v18 = vpop.f32.mrf.mxu2 }
 0x1e1   :  { %v1501_v37 = vadd.f32 %v1500_v18, %v1452_v1  ;;  %v1549_v36 = vpop.f32.mrf.mxu3  ;;  %v1405_v12 = vpop.f32.mrf.mxu0 }
 0x1e2   :  { %v1406_v13 = vadd.f32 %v1405_v12, %v3979_v62  ;;  %v1454_v28 = vpop.f32.mrf.mxu1 }
 0x1e3   :  { %v4027_v14 = vadd.f32 %v1549_v36, %v1501_v37 }
 0x1e4   :  { %v1455_v15 = vadd.f32 %v1454_v28, %v1406_v13  ;;  %1600 = vmatmul.bf16.gmra.mxu0 %v3225_v40  ;;  %1649 = vmatmul.bf16.gmra.mxu1 %v3227_v41 }
 0x1e5   :  { %1698 = vmatmul.bf16.gmra.mxu2 %v3229_v42 }
 0x1e6   :  { %1747 = vmatmul.bf16.gmra.mxu3 %v3231_v43 }
 0x1e8   :  { %v1503_v39 = vpop.f32.mrf.mxu2 }
 0x1e9   :  { %v1504_v29 = vadd.f32 %v1503_v39, %v1455_v15  ;;  %v1552_v59 = vpop.f32.mrf.mxu3  ;;  %v1407_v35 = vpop.f32.mrf.mxu0 }
 0x1ea   :  { %v1408_v34 = vadd.f32 %v1407_v35, %v3979_v62  ;;  %v1456_v56 = vpop.f32.mrf.mxu1 }
 0x1eb   :  { %v4034_v24 = vadd.f32 %v1552_v59, %v1504_v29 }
 0x1ec   :  { %v1457_v25 = vadd.f32 %v1456_v56, %v1408_v34 }
 0x1f0   :  { %v1505_v63 = vpop.f32.mrf.mxu2 }
 0x1f1   :  { %v1506_v27 = vadd.f32 %v1505_v63, %v1457_v25  ;;  %v1554_v3 = vpop.f32.mrf.mxu3  ;;  %v1410_v40 = vpop.f32.mrf.mxu0  ;;  %v4067_v25 = vperm.slane %v3976_v6, 3  ;;  %v1770_v6 = vmax.f32 %v3994_v30, 0.0 }
 0x1f2   :  { %v1411_v41 = vadd.f32 %v1410_v40, %v3979_v62  ;;  %v1459_v4 = vpop.f32.mrf.mxu1 }
 0x1f3   :  { %v4037_v42 = vadd.f32 %v1554_v3, %v1506_v27 }
 0x1f4   :  { %v1460_v43 = vadd.f32 %v1459_v4, %v1411_v41  ;;  %1605 = vmatmul.bf16.gmra.mxu0 %v3285_v8  ;;  %1654 = vmatmul.bf16.gmra.mxu1 %v3287_v9 }
 0x1f5   :  { %1703 = vmatmul.bf16.gmra.mxu2 %v3289_v10 }
 0x1f6   :  { %1752 = vmatmul.bf16.gmra.mxu3 %v3291_v11 }
 0x1f8   :  { %v1508_v32 = vpop.f32.mrf.mxu2 }
 0x1f9   :  { %v1509_v57 = vadd.f32 %v1508_v32, %v1460_v43  ;;  %v1557_v16 = vpop.f32.mrf.mxu3  ;;  %v1412_v46 = vpop.f32.mrf.mxu0 }
 0x1fa   :  { %v1413_v5 = vadd.f32 %v1412_v46, %v3979_v62  ;;  %v1461_v38 = vpop.f32.mrf.mxu1 }
 0x1fb   :  { %v4044_v60 = vadd.f32 %v1557_v16, %v1509_v57 }
 0x1fc   :  { %v1462_v48 = vadd.f32 %v1461_v38, %v1413_v5 }
 0x200   :  { %v1510_v49 = vpop.f32.mrf.mxu2 }
 0x201   :  { %v1511_v50 = vadd.f32 %v1510_v49, %v1462_v48  ;;  %v1559_v31 = vpop.f32.mrf.mxu3  ;;  %v1415_v8 = vpop.f32.mrf.mxu0 }
 0x202   :  { %v1416_v9 = vadd.f32 %v1415_v8, %v3979_v62  ;;  %v1464_v52 = vpop.f32.mrf.mxu1 }
 0x203   :  { %v4047_v10 = vadd.f32 %v1559_v31, %v1511_v50 }
 0x204   :  { %v1465_v11 = vadd.f32 %v1464_v52, %v1416_v9  ;;  %1610 = vmatmul.bf16.gmra.mxu0 %v3345_v44  ;;  %1659 = vmatmul.bf16.gmra.mxu1 %v3347_v45 }
 0x205   :  { %1708 = vmatmul.bf16.gmra.mxu2 %v4167_v33 }
 0x206   :  { %1757 = vmatmul.bf16.gmra.mxu3 %v4168_v61 }
 0x208   :  { %v1513_v53 = vpop.f32.mrf.mxu2 }
 0x209   :  { %v1514_v2 = vadd.f32 %v1513_v53, %v1465_v11  ;;  %v1562_v54 = vpop.f32.mrf.mxu3  ;;  %v1417_v19 = vpop.f32.mrf.mxu0  ;;  %v1774_v11 = vmax.f32 %v3997_v0, 0.0 }
 0x20a   :  { %v1418_v7 = vadd.f32 %v1417_v19, %v3979_v62  ;;  %v1466_v58 = vpop.f32.mrf.mxu1 }
 0x20b   :  { %v4054_v1 = vadd.f32 %v1562_v54, %v1514_v2 }
 0x20c   :  { %v1467_v18 = vadd.f32 %v1466_v58, %v1418_v7 }
 0x210   :  { %v1515_v37 = vpop.f32.mrf.mxu2 }
 0x211   :  { %v1516_v36 = vadd.f32 %v1515_v37, %v1467_v18  ;;  %v1564_v12 = vpop.f32.mrf.mxu3  ;;  %v1420_v44 = vpop.f32.mrf.mxu0 }
 0x212   :  { %v1421_v45 = vadd.f32 %v1420_v44, %v3979_v62  ;;  %v1469_v13 = vpop.f32.mrf.mxu1 }
 0x213   :  { %v4057_v33 = vadd.f32 %v1564_v12, %v1516_v36  ;;  %v1778_v12 = vmax.f32 %v4004_v55, 0.0 }
 0x214   :  { %v1470_v61 = vadd.f32 %v1469_v13, %v1421_v45  ;;  %1615 = vmatmul.bf16.gmra.mxu0 %v3405_v20  ;;  %1664 = vmatmul.bf16.gmra.mxu1 %v3407_v21 }
 0x215   :  { %1713 = vmatmul.bf16.gmra.mxu2 %v3409_v22 }
 0x216   :  { %1762 = vmatmul.bf16.gmra.mxu3 %v3411_v23 }
 0x218   :  { %v1518_v28 = vpop.f32.mrf.mxu2 }
 0x219   :  { %v1519_v15 = vadd.f32 %v1518_v28, %v1470_v61  ;;  %v1567_v39 = vpop.f32.mrf.mxu3  ;;  %v1422_v29 = vpop.f32.mrf.mxu0 }
 0x21a   :  { %v1423_v59 = vadd.f32 %v1422_v29, %v3979_v62  ;;  %v1471_v35 = vpop.f32.mrf.mxu1 }
 0x21b   :  { %v4064_v34 = vadd.f32 %v1567_v39, %v1519_v15 }
 0x21c   :  { %v1472_v56 = vadd.f32 %v1471_v35, %v1423_v59  ;;  %v1782_v35 = vmax.f32 %v4007_v26, 0.0 }
 0x220   :  { %v1520_v20 = vpop.f32.mrf.mxu2 }
 0x221   :  { %v1521_v63 = vadd.f32 %v1520_v20, %v1472_v56  ;;  %v1569_v21 = vpop.f32.mrf.mxu3  ;;  %v1581_v27 = vpop.f32.mrf.mxu0 }
 0x222   :  { %v1582_v22 = vadd.f32 %v1581_v27, %v4067_v25  ;;  %v1630_v23 = vpop.f32.mrf.mxu1 }
 0x223   :  { %v4070_v3 = vadd.f32 %v1569_v21, %v1521_v63 }
 0x224   :  { %v1631_v40 = vadd.f32 %v1630_v23, %v1582_v22 }
 0x228   :  { %v1679_v41 = vpop.f32.mrf.mxu2 }
 0x229   :  { %v1680_v4 = vadd.f32 %v1679_v41, %v1631_v40  ;;  %v1728_v62 = vpop.f32.mrf.mxu3  ;;  %v1583_v43 = vpop.f32.mrf.mxu0 }
 0x22a   :  { %v1632_v32 = vpop.f32.mrf.mxu1  ;;  %v1584_v16 = vadd.f32 %v1583_v43, %v4067_v25 }
 0x22b   :  { %v1729_v57 = vadd.f32 %v1728_v62, %v1680_v4  ;;  %v1786_v4 = vmax.f32 %v4014_v47, 0.0 }
 0x22c   :  { %v1633_v38 = vadd.f32 %v1632_v32, %v1584_v16 }
 0x22d   :  { %v1771_v46 = vmax.f32 %v1729_v57, 0.0 }
 0x22f   :  { %v1833_v5 = vpack.c.bf16 %v1771_v46, %v1770_v6 }
 0x230   :  { %v1681_v48 = vpop.f32.mrf.mxu2 }
 0x231   :  { %1865 = vst [vmem:[%s4154_s3 + $0x8] sm:$0xff] %v1833_v5  ;;  %v1682_v49 = vadd.f32 %v1681_v48, %v1633_v38  ;;  %v1730_v50 = vpop.f32.mrf.mxu3  ;;  %v1586_v31 = vpop.f32.mrf.mxu0  ;;  %v1790_v48 = vmax.f32 %v4017_v51, 0.0 }
 0x232   :  { %v1587_v8 = vadd.f32 %v1586_v31, %v4067_v25  ;;  %v1635_v9 = vpop.f32.mrf.mxu1 }
 0x233   :  { %v1731_v52 = vadd.f32 %v1730_v50, %v1682_v49 }
 0x234   :  { %v1636_v2 = vadd.f32 %v1635_v9, %v1587_v8 }
 0x235   :  { %v1775_v53 = vmax.f32 %v1731_v52, 0.0 }
 0x237   :  { %v1835_v30 = vpack.c.bf16 %v1775_v53, %v1774_v11 }
 0x238   :  { %v1684_v54 = vpop.f32.mrf.mxu2 }
 0x239   :  { %1867 = vst [vmem:[%s4154_s3 + $0x18] sm:$0xff] %v1835_v30  ;;  %v1685_v19 = vadd.f32 %v1684_v54, %v1636_v2  ;;  %v1733_v7 = vpop.f32.mrf.mxu3  ;;  %v1588_v58 = vpop.f32.mrf.mxu0  ;;  %v1794_v30 = vmax.f32 %v4024_v17, 0.0 }
 0x23a   :  { %v1637_v18 = vpop.f32.mrf.mxu1  ;;  %v1589_v36 = vadd.f32 %v1588_v58, %v4067_v25 }
 0x23b   :  { %v1734_v37 = vadd.f32 %v1733_v7, %v1685_v19 }
 0x23c   :  { %v1638_v0 = vadd.f32 %v1637_v18, %v1589_v36 }
 0x23d   :  { %v1779_v44 = vmax.f32 %v1734_v37, 0.0 }
 0x23f   :  { %v1837_v45 = vpack.c.bf16 %v1779_v44, %v1778_v12 }
 0x240   :  { %v1686_v13 = vpop.f32.mrf.mxu2 }
 0x241   :  { %1869 = vst [vmem:[%s4154_s3 + $0x28] sm:$0xff] %v1837_v45  ;;  %v1687_v61 = vadd.f32 %v1686_v13, %v1638_v0  ;;  %v1735_v28 = vpop.f32.mrf.mxu3  ;;  %v1591_v15 = vpop.f32.mrf.mxu0  ;;  %v1798_v45 = vmax.f32 %v4027_v14, 0.0 }
 0x242   :  { %v1592_v39 = vadd.f32 %v1591_v15, %v4067_v25  ;;  %v1640_v29 = vpop.f32.mrf.mxu1 }
 0x243   :  { %v1736_v59 = vadd.f32 %v1735_v28, %v1687_v61 }
 0x244   :  { %v1641_v20 = vadd.f32 %v1640_v29, %v1592_v39 }
 0x245   :  { %v1783_v56 = vmax.f32 %v1736_v59, 0.0 }
 0x247   :  { %v1839_v55 = vpack.c.bf16 %v1783_v56, %v1782_v35  ;;  %v1802_v56 = vmax.f32 %v4034_v24, 0.0 }
 0x248   :  { %v1689_v63 = vpop.f32.mrf.mxu2 }
 0x249   :  { %1871 = vst [vmem:[%s4154_s3 + $0x38] sm:$0xff] %v1839_v55  ;;  %v1690_v21 = vadd.f32 %v1689_v63, %v1641_v20  ;;  %v1738_v27 = vpop.f32.mrf.mxu3  ;;  %v1593_v22 = vpop.f32.mrf.mxu0 }
 0x24a   :  { %v1642_v23 = vpop.f32.mrf.mxu1  ;;  %v1594_v41 = vadd.f32 %v1593_v22, %v4067_v25 }
 0x24b   :  { %v1739_v40 = vadd.f32 %v1738_v27, %v1690_v21 }
 0x24c   :  { %v1643_v26 = vadd.f32 %v1642_v23, %v1594_v41 }
 0x24d   :  { %v1787_v62 = vmax.f32 %v1739_v40, 0.0 }
 0x24f   :  { %v1841_v43 = vpack.c.bf16 %v1787_v62, %v1786_v4  ;;  %v1806_v4 = vmax.f32 %v4037_v42, 0.0 }
 0x250   :  { %v1691_v32 = vpop.f32.mrf.mxu2 }
 0x251   :  { %1873 = vst [vmem:[%s4154_s3 + $0x48] sm:$0xff] %v1841_v43  ;;  %v1692_v57 = vadd.f32 %v1691_v32, %v1643_v26  ;;  %v1740_v16 = vpop.f32.mrf.mxu3  ;;  %v1596_v6 = vpop.f32.mrf.mxu0 }
 0x252   :  { %v1597_v46 = vadd.f32 %v1596_v6, %v4067_v25  ;;  %v1645_v5 = vpop.f32.mrf.mxu1 }
 0x253   :  { %v1741_v38 = vadd.f32 %v1740_v16, %v1692_v57 }
 0x254   :  { %v1646_v50 = vadd.f32 %v1645_v5, %v1597_v46 }
 0x255   :  { %v1791_v49 = vmax.f32 %v1741_v38, 0.0  ;;  %v1810_v38 = vmax.f32 %v4044_v60, 0.0 }
 0x257   :  { %v1843_v47 = vpack.c.bf16 %v1791_v49, %v1790_v48 }
 0x258   :  { %v1694_v31 = vpop.f32.mrf.mxu2 }
 0x259   :  { %1875 = vst [vmem:[%s4154_s3 + $0x58] sm:$0xff] %v1843_v47  ;;  %v1695_v8 = vadd.f32 %v1694_v31, %v1646_v50  ;;  %v1743_v9 = vpop.f32.mrf.mxu3  ;;  %v1598_v52 = vpop.f32.mrf.mxu0 }
 0x25a   :  { %v1647_v11 = vpop.f32.mrf.mxu1  ;;  %v1599_v2 = vadd.f32 %v1598_v52, %v4067_v25 }
 0x25b   :  { %v1744_v53 = vadd.f32 %v1743_v9, %v1695_v8 }
 0x25c   :  { %v1648_v51 = vadd.f32 %v1647_v11, %v1599_v2 }
 0x25d   :  { %v1795_v54 = vmax.f32 %v1744_v53, 0.0  ;;  %v1814_v53 = vmax.f32 %v4047_v10, 0.0 }
 0x25f   :  { %v1845_v19 = vpack.c.bf16 %v1795_v54, %v1794_v30 }
 0x260   :  { %v1696_v7 = vpop.f32.mrf.mxu2 }
 0x261   :  { %1877 = vst [vmem:[%s4154_s3 + $0x68] sm:$0xff] %v1845_v19  ;;  %v1697_v58 = vadd.f32 %v1696_v7, %v1648_v51  ;;  %v1745_v18 = vpop.f32.mrf.mxu3  ;;  %v1601_v37 = vpop.f32.mrf.mxu0 }
 0x262   :  { %v1602_v36 = vadd.f32 %v1601_v37, %v4067_v25  ;;  %v1650_v12 = vpop.f32.mrf.mxu1 }
 0x263   :  { %v1746_v44 = vadd.f32 %v1745_v18, %v1697_v58 }
 0x264   :  { %v1651_v13 = vadd.f32 %v1650_v12, %v1602_v36  ;;  %v1818_v36 = vmax.f32 %v4054_v1, 0.0 }
 0x265   :  { %v1799_v0 = vmax.f32 %v1746_v44, 0.0 }
 0x267   :  { %v1847_v17 = vpack.c.bf16 %v1799_v0, %v1798_v45 }
 0x268   :  { %v1699_v61 = vpop.f32.mrf.mxu2 }
 0x269   :  { %1879 = vst [vmem:[%s4154_s3 + $0x78] sm:$0xff] %v1847_v17  ;;  %v1700_v28 = vadd.f32 %v1699_v61, %v1651_v13  ;;  %v1748_v15 = vpop.f32.mrf.mxu3  ;;  %v1603_v39 = vpop.f32.mrf.mxu0 }
 0x26a   :  { %v1652_v29 = vpop.f32.mrf.mxu1  ;;  %v1604_v35 = vadd.f32 %v1603_v39, %v4067_v25  ;;  %v1822_v39 = vmax.f32 %v4057_v33, 0.0 }
 0x26b   :  { %v1749_v59 = vadd.f32 %v1748_v15, %v1700_v28 }
 0x26c   :  { %v1653_v14 = vadd.f32 %v1652_v29, %v1604_v35 }
 0x26d   :  { %v1803_v20 = vmax.f32 %v1749_v59, 0.0 }
 0x26f   :  { %v1849_v55 = vpack.c.bf16 %v1803_v20, %v1802_v56 }
 0x270   :  { %v1701_v63 = vpop.f32.mrf.mxu2 }
 0x271   :  { %1881 = vst [vmem:[%s4154_s3 + $0x88] sm:$0xff] %v1849_v55  ;;  %v1702_v21 = vadd.f32 %v1701_v63, %v1653_v14  ;;  %v1750_v27 = vpop.f32.mrf.mxu3  ;;  %v1606_v22 = vpop.f32.mrf.mxu0 }
 0x272   :  { %v1607_v23 = vadd.f32 %v1606_v22, %v4067_v25  ;;  %v1655_v40 = vpop.f32.mrf.mxu1 }
 0x273   :  { %v1751_v41 = vadd.f32 %v1750_v27, %v1702_v21  ;;  %v1826_v21 = vmax.f32 %v4064_v34, 0.0 }
 0x274   :  { %v1656_v43 = vadd.f32 %v1655_v40, %v1607_v23 }
 0x275   :  { %v1807_v62 = vmax.f32 %v1751_v41, 0.0 }
 0x277   :  { %v1851_v24 = vpack.c.bf16 %v1807_v62, %v1806_v4 }
 0x278   :  { %v1704_v26 = vpop.f32.mrf.mxu2 }
 0x279   :  { %1883 = vst [vmem:[%s4154_s3 + $0x98] sm:$0xff] %v1851_v24  ;;  %v1705_v32 = vadd.f32 %v1704_v26, %v1656_v43  ;;  %v1753_v57 = vpop.f32.mrf.mxu3  ;;  %v1608_v16 = vpop.f32.mrf.mxu0  ;;  %v1830_v43 = vmax.f32 %v4070_v3, 0.0 }
 0x27a   :  { %v1657_v6 = vpop.f32.mrf.mxu1  ;;  %v1609_v5 = vadd.f32 %v1608_v16, %v4067_v25 }
 0x27b   :  { %v1754_v46 = vadd.f32 %v1753_v57, %v1705_v32 }
 0x27c   :  { %v1658_v42 = vadd.f32 %v1657_v6, %v1609_v5 }
 0x27d   :  { %v1811_v48 = vmax.f32 %v1754_v46, 0.0 }
 0x27f   :  { %v1853_v49 = vpack.c.bf16 %v1811_v48, %v1810_v38 }
 0x280   :  { %v1706_v50 = vpop.f32.mrf.mxu2 }
 0x281   :  { %1885 = vst [vmem:[%s4154_s3 + $0xa8] sm:$0xff] %v1853_v49  ;;  %v1707_v47 = vadd.f32 %v1706_v50, %v1658_v42  ;;  %v1755_v31 = vpop.f32.mrf.mxu3  ;;  %v1611_v8 = vpop.f32.mrf.mxu0 }
 0x282   :  { %v1612_v9 = vadd.f32 %v1611_v8, %v4067_v25  ;;  %v1660_v52 = vpop.f32.mrf.mxu1 }
 0x283   :  { %v1756_v11 = vadd.f32 %v1755_v31, %v1707_v47 }
 0x284   :  { %v1661_v30 = vadd.f32 %v1660_v52, %v1612_v9 }
 0x285   :  { %v1815_v2 = vmax.f32 %v1756_v11, 0.0 }
 0x287   :  { %v1855_v60 = vpack.c.bf16 %v1815_v2, %v1814_v53 }
 0x288   :  { %v1709_v54 = vpop.f32.mrf.mxu2 }
 0x289   :  { %1887 = vst [vmem:[%s4154_s3 + $0xb8] sm:$0xff] %v1855_v60  ;;  %v1710_v19 = vadd.f32 %v1709_v54, %v1661_v30  ;;  %v1758_v51 = vpop.f32.mrf.mxu3  ;;  %v1613_v7 = vpop.f32.mrf.mxu0 }
 0x28a   :  { %v1662_v58 = vpop.f32.mrf.mxu1  ;;  %v1614_v37 = vadd.f32 %v1613_v7, %v4067_v25 }
 0x28b   :  { %v1759_v18 = vadd.f32 %v1758_v51, %v1710_v19 }
 0x28c   :  { %v1663_v10 = vadd.f32 %v1662_v58, %v1614_v37 }
 0x28d   :  { %v1819_v12 = vmax.f32 %v1759_v18, 0.0 }
 0x28f   :  { %v1857_v44 = vpack.c.bf16 %v1819_v12, %v1818_v36 }
 0x290   :  { %v1711_v45 = vpop.f32.mrf.mxu2 }
 0x291   :  { %1889 = vst [vmem:[%s4154_s3 + $0xc8] sm:$0xff] %v1857_v44  ;;  %v1712_v0 = vadd.f32 %v1711_v45, %v1663_v10  ;;  %v1760_v13 = vpop.f32.mrf.mxu3  ;;  %v1616_v17 = vpop.f32.mrf.mxu0 }
 0x292   :  { %v1617_v61 = vadd.f32 %v1616_v17, %v4067_v25  ;;  %v1665_v15 = vpop.f32.mrf.mxu1 }
 0x293   :  { %v1761_v28 = vadd.f32 %v1760_v13, %v1712_v0 }
 0x294   :  { %v1666_v59 = vadd.f32 %v1665_v15, %v1617_v61 }
 0x295   :  { %v1823_v29 = vmax.f32 %v1761_v28, 0.0 }
 0x297   :  { %v1859_v1 = vpack.c.bf16 %v1823_v29, %v1822_v39 }
 0x298   :  { %v1714_v35 = vpop.f32.mrf.mxu2 }
 0x299   :  { %1891 = vst [vmem:[%s4154_s3 + $0xd8] sm:$0xff] %v1859_v1  ;;  %v1715_v56 = vadd.f32 %v1714_v35, %v1666_v59  ;;  %v1763_v20 = vpop.f32.mrf.mxu3  ;;  %v1618_v55 = vpop.f32.mrf.mxu0 }
 0x29a   :  { %v1619_v63 = vadd.f32 %v1618_v55, %v4067_v25  ;;  %v1667_v22 = vpop.f32.mrf.mxu1 }
 0x29b   :  { %v1764_v14 = vadd.f32 %v1763_v20, %v1715_v56 }
 0x29c   :  { %v1668_v33 = vadd.f32 %v1667_v22, %v1619_v63 }
 0x29d   :  { %v1827_v27 = vmax.f32 %v1764_v14, 0.0 }
 0x29f   :  { %v1861_v23 = vpack.c.bf16 %v1827_v27, %v1826_v21 }
 0x2a0   :  { %v1716_v40 = vpop.f32.mrf.mxu2 }
 0x2a1   :  { %1893 = vst [vmem:[%s4154_s3 + $0xe8] sm:$0xff] %v1861_v23  ;;  %v1717_v41 = vadd.f32 %v1716_v40, %v1668_v33  ;;  %v1765_v4 = vpop.f32.mrf.mxu3 }
 0x2a3   :  { %v1766_v62 = vadd.f32 %v1765_v4, %v1717_v41 }
 0x2a5   :  { %v1831_v24 = vmax.f32 %v1766_v62, 0.0 }
 0x2a7   :  { %v1863_v26 = vpack.c.bf16 %v1831_v24, %v1830_v43 }
 0x2a9   :  { %1895 = vst [vmem:[%s4154_s3 + $0xf8] sm:$0xff] %v1863_v26 }

</bundles_post_ra>
